<compile_context>
chip_gen: v7x
topology: tpu7x:2x2x1
jax: 0.10.0
libtpu: 0.0.40
codegen_flags: <defaults>
</compile_context>

<pallas_src>
import jax
import jax.numpy as jnp
from jax.experimental import pallas as pl
from jax.experimental.pallas import tpu as pltpu

PITCH_RANGE = 128
H_BARS = 16
Y_DIM = 13
Z_DIM = 100
GF_DIM = 64
EPS = 1e-5

_VMEM = pl.BlockSpec(memory_space=pltpu.MemorySpace.VMEM)
_ANY = pl.BlockSpec(memory_space=pl.ANY)

# 4-bit bit-reversal (involution): block j of the internal row order holds the
# NCHW h-position _BITREV4[j].
_BITREV4 = [((j & 1) << 3) | ((j & 2) << 1) | ((j & 4) >> 1) | ((j & 8) >> 3)
            for j in range(16)]

PARAM_ORDER = (
    "w_enc0", "b_enc0", "g_enc0", "bt_enc0",
    "w_enc1", "b_enc1", "g_enc1", "bt_enc1",
    "w_enc2", "b_enc2", "g_enc2", "bt_enc2",
    "w_enc3", "b_enc3", "g_enc3", "bt_enc3",
    "w1_z", "w1_y", "b1", "g1", "bt1",
    "w2_h", "w2_y", "b2", "g2", "bt2",
    "wd1_h", "wd1_y", "wd1_p", "bd1", "gd1", "btd1",
    "wd2_h", "wd2_y", "wd2_p", "bd2", "gd2", "btd2",
    "wd3_h", "wd3_y", "wd3_p", "bd3", "gd3", "btd3",
    "w4_h", "w4_y", "w4_p", "b4",
)
_ASYNC_WEIGHTS = ("w1_z", "w2_h")   # big slabs: DMA'd manually, overlapped


# ------------------------------ fused kernel --------------------------------
def _fused_kernel(*refs):
    P = PITCH_RANGE
    n_par = len(PARAM_ORDER)
    prev_ref, y_ref, z_ref = refs[:3]                      # (b,16,P), (b,13), (b,100)
    pr = dict(zip(PARAM_ORDER, refs[3:3 + n_par]))
    o_ref = refs[3 + n_par]                                # (b,16,P) f32, NCHW order
    (enc0, enc1, enc2, enc3, dec1, dec2, dec3, dec4,
     w1z_s, w2h_s, dma_sem) = refs[4 + n_par:]

    b = z_ref.shape[0]                                     # batch (static)

    # ---- overlap the two big weight DMAs with the prev-bar encoder ----
    cp_w1z = pltpu.make_async_copy(pr["w1_z"], w1z_s, dma_sem.at[0])
    cp_w2h = pltpu.make_async_copy(pr["w2_h"], w2h_s, dma_sem.at[1])
    cp_w1z.start()
    cp_w2h.start()

    def mm(a, w):
        # bf16 MXU operands, f32 accumulation (no-op cast if already bf16).
        return jnp.dot(a.astype(jnp.bfloat16), w,
                       preferred_element_type=jnp.float32)

    def bn_rows(x, g, bt):
        # training-mode BatchNorm, single-pass stats over rows (= N*H*W),
        # biased variance, eps=1e-5, affine gamma/beta.
        inv_n = 1.0 / x.shape[0]
        mean = jnp.sum(x, axis=0, keepdims=True) * inv_n
        ex2 = jnp.sum(x * x, axis=0, keepdims=True) * inv_n
        var = jnp.maximum(ex2 - mean * mean, 0.0)
        return (x - mean) * jax.lax.rsqrt(var + EPS) * g + bt

    def lrelu(x):
        return jnp.maximum(x, 0.2 * x)

    # -------- in-kernel input row permutation: NCHW -> bit-reversed --------
    prev_perm = jnp.concatenate(
        [prev_ref[:, _BITREV4[j], :] for j in range(16)], axis=0)      # (16b, P)

    # -------- prev-bar encoder: Conv2d + BN + lrelu(0.2), 4 stages --------
    h = mm(prev_perm, pr["w_enc0"][...]) + pr["b_enc0"][...]
    enc0[...] = lrelu(bn_rows(h, pr["g_enc0"][...],
                              pr["bt_enc0"][...])).astype(jnp.bfloat16)

    def enc_stage(src, dst, name, rows_in):
        half = rows_in // 2
        w = pr["w_" + name]                                # (2, ci, co) taps
        h = (mm(src[0:half, :], w[0]) + mm(src[half:rows_in, :], w[1])
             + pr["b_" + name][...])
        dst[...] = lrelu(bn_rows(h, pr["g_" + name][...],
                                 pr["bt_" + name][...])).astype(jnp.bfloat16)

    enc_stage(enc0, enc1, "enc1", 16 * b)                  # H 16 -> 8
    enc_stage(enc1, enc2, "enc2", 8 * b)                   # H  8 -> 4
    enc_stage(enc2, enc3, "enc3", 4 * b)                   # H  4 -> 2

    # y and its 16x (batch-innermost) replication, built in-kernel.
    yb = y_ref[...]                                        # (b, 13)
    y16 = jnp.concatenate([yb] * 16, axis=0)               # (16b, 13)

    # -------- latent / condition linear stack --------
    cp_w1z.wait()
    h0 = mm(z_ref[...], w1z_s[...]) + mm(yb, pr["w1_y"][...]) + pr["b1"][...]
    h0 = jnp.maximum(bn_rows(h0, pr["g1"][...], pr["bt1"][...]), 0.0)   # (b, 1024)
    cp_w2h.wait()
    h1 = mm(h0, w2h_s[...]) + mm(yb, pr["w2_y"][...]) + pr["b2"][...]
    h1 = jnp.maximum(bn_rows(h1, pr["g2"][...], pr["bt2"][...]), 0.0)   # (b, 256)
    # view(b,128,2,1) NCHW -> rows (h, batch): the column permutation was
    # absorbed into w2/b2 at init, so this is just two 128-lane slices.
    dec1[0:b, :] = h1[:, 0:P].astype(jnp.bfloat16)
    dec1[b:2 * b, :] = h1[:, P:2 * P].astype(jnp.bfloat16)

    # ---- decoder: ConvTranspose2d(157 -> 128, (2,1), stride 2) + BN + relu ----
    def dec_stage(src, prev_enc, dst, i, rows_in):
        xh = src[...]                                      # (rows_in, 128) bf16
        xp = prev_enc[...]                                 # (rows_in, 16) bf16
        yr = y16[0:rows_in, :]                             # (rows_in, 13)
        wide = (mm(xh, pr["wd%d_h" % i][...]) + mm(yr, pr["wd%d_y" % i][...])
                + mm(xp, pr["wd%d_p" % i][...]) + pr["bd%d" % i][...])  # (rows_in, 256)
        lo = wide[:, 0:P]                                  # kh = 0 output rows
        hi = wide[:, P:2 * P]                              # kh = 1 output rows
        inv_n = 1.0 / (2.0 * rows_in)                      # n = N * H_out * W_out
        mean = (jnp.sum(lo, axis=0, keepdims=True)
                + jnp.sum(hi, axis=0, keepdims=True)) * inv_n
        ex2 = (jnp.sum(lo * lo, axis=0, keepdims=True)
               + jnp.sum(hi * hi, axis=0, keepdims=True)) * inv_n
        var = jnp.maximum(ex2 - mean * mean, 0.0)
        scale = pr["gd%d" % i][...] * jax.lax.rsqrt(var + EPS)
        shift = pr["btd%d" % i][...] - mean * scale
        dst[0:rows_in, :] = jnp.maximum(lo * scale + shift,
                                        0.0).astype(jnp.bfloat16)
        dst[rows_in:2 * rows_in, :] = jnp.maximum(hi * scale + shift,
                                                  0.0).astype(jnp.bfloat16)

    dec_stage(dec1, enc3, dec2, 1, 2 * b)                  # H 2 -> 4   (bn2)
    dec_stage(dec2, enc2, dec3, 2, 4 * b)                  # H 4 -> 8   (bn3)
    dec_stage(dec3, enc1, dec4, 3, 8 * b)                  # H 8 -> 16  (bn4)

    # ---- final ConvTranspose2d(157 -> 1, (1, P), stride (1,2)) + sigmoid ----
    logits = (mm(dec4[...], pr["w4_h"][...]) + mm(y16, pr["w4_y"][...])
              + mm(enc0[...], pr["w4_p"][...]) + pr["b4"][...])         # (16b, 128)
    sig = 0.5 * jnp.tanh(0.5 * logits) + 0.5               # exact sigmoid, EUP tanh

    # -------- in-kernel output row un-permute: bit-reversed -> NCHW --------
    for j in range(16):
        o_ref[:, _BITREV4[j], :] = sig[j * b:(j + 1) * b, :]


# --------------------------- parameter creation -----------------------------
def _uniform(key, shape, fan_in):
    bound = 1.0 / float(fan_in) ** 0.5
    return jax.random.uniform(key, shape, jnp.float32, -bound, bound)


def init_params(key, pitch_range=PITCH_RANGE):
    assert pitch_range == PITCH_RANGE, "module structure forces pitch_range==128"
    P = pitch_range
    ks = iter(jax.random.split(key, 24))
    bf = lambda x: x.astype(jnp.bfloat16)
    p = {}

    # prev-bar encoder: Conv2d(1, 16, (1, P), stride (1, 2)) — kernel spans pitch
    w = _uniform(next(ks), (16, 1, 1, P), P)                       # (co, ci, kh, kw)
    p["w_enc0"] = bf(w.reshape(16, P).T)                           # (P, 16)
    p["b_enc0"] = _uniform(next(ks), (16,), P).reshape(1, 16)
    p["g_enc0"] = jnp.ones((1, 16), jnp.float32)
    p["bt_enc0"] = jnp.zeros((1, 16), jnp.float32)

    # Conv2d(16, 16, (2, 1), stride (2, 2)) x3 — stored as two (ci, co) taps
    for name in ("enc1", "enc2", "enc3"):
        w = _uniform(next(ks), (16, 16, 2, 1), 16 * 2)             # (co, ci, kh, 1)
        p["w_" + name] = bf(jnp.stack([w[:, :, 0, 0].T, w[:, :, 1, 0].T]))  # (2, ci, co)
        p["b_" + name] = _uniform(next(ks), (16,), 16 * 2).reshape(1, 16)
        p["g_" + name] = jnp.ones((1, 16), jnp.float32)
        p["bt_" + name] = jnp.zeros((1, 16), jnp.float32)

    # linear1 (113 -> 1024); input = [z(100) | y(13)]  -> split matmul
    w = _uniform(next(ks), (1024, 113), 113)
    p["w1_z"] = bf(w[:, :Z_DIM].T)                                 # (100, 1024)
    p["w1_y"] = bf(w[:, Z_DIM:].T)                                 # (13, 1024)
    p["b1"] = _uniform(next(ks), (1024,), 113).reshape(1, 1024)
    p["g1"] = jnp.ones((1, 1024), jnp.float32)
    p["bt1"] = jnp.zeros((1, 1024), jnp.float32)

    # linear2 (1037 -> 256); input = [h0(1024) | y(13)].  Output columns are
    # permuted so col h*128+c holds torch feature c*2+h: this absorbs the
    # view(b,128,2,1) rearrangement into the weights (BN1d_2 gamma/beta/bias
    # are permuted identically, which is exactly equivalent).
    w = _uniform(next(ks), (GF_DIM * 2 * 2, 1037), 1037)           # (256, 1037)
    b2 = _uniform(next(ks), (256,), 1037)
    perm = (jnp.arange(256) % 128) * 2 + jnp.arange(256) // 128
    p["w2_h"] = bf(w[:, :1024].T[:, perm])                         # (1024, 256)
    p["w2_y"] = bf(w[:, 1024:].T[:, perm])                         # (13, 256)
    p["b2"] = b2[perm].reshape(1, 256)
    p["g2"] = jnp.ones((1, 256), jnp.float32)
    p["bt2"] = jnp.zeros((1, 256), jnp.float32)

    # decoder: ConvTranspose2d(157, P, (2, 1), stride (2, 2)) x3
    #   weight (ci, co, kh, 1); stored with cols = (kh, co) and ci split into
    #   the concat blocks [h: 0..127 | y: 128..140 | prev: 141..156].
    for i in (1, 2, 3):
        w = _uniform(next(ks), (157, P, 2, 1), P * 2)
        wc = jnp.transpose(w[:, :, :, 0], (0, 2, 1)).reshape(157, 2 * P)
        p["wd%d_h" % i] = bf(wc[0:P])                              # (128, 256)
        p["wd%d_y" % i] = bf(wc[P:P + Y_DIM])                      # (13, 256)
        p["wd%d_p" % i] = bf(wc[P + Y_DIM:])                       # (16, 256)
        bias = _uniform(next(ks), (P,), P * 2)
        p["bd%d" % i] = jnp.tile(bias, 2).reshape(1, 2 * P)        # same bias both kh
        p["gd%d" % i] = jnp.ones((1, P), jnp.float32)
        p["btd%d" % i] = jnp.zeros((1, P), jnp.float32)

    # ConvTranspose2d(157, 1, (1, P), stride (1, 2)) — produces the pitch axis
    w = _uniform(next(ks), (157, 1, 1, P), P)
    wm = w[:, 0, 0, :]                                             # (157, P)
    p["w4_h"] = bf(wm[0:P])
    p["w4_y"] = bf(wm[P:P + Y_DIM])
    p["w4_p"] = bf(wm[P + Y_DIM:])
    b4 = _uniform(next(ks), (1,), P)
    p["b4"] = jnp.broadcast_to(b4, (1, P)).astype(jnp.float32)
    return p


# ------------------------------ forward pass --------------------------------
def _fused_call(params, prev3, y, z):
    b = z.shape[0]
    args = [prev3, y, z] + [params[k] for k in PARAM_ORDER]
    in_specs = [_VMEM, _VMEM, _VMEM] + [
        _ANY if k in _ASYNC_WEIGHTS else _VMEM for k in PARAM_ORDER]
    return pl.pallas_call(
        _fused_kernel,
        out_shape=jax.ShapeDtypeStruct((b, H_BARS, PITCH_RANGE), jnp.float32),
        in_specs=in_specs,
        out_specs=_VMEM,
        scratch_shapes=[
            pltpu.VMEM((16 * b, 16), jnp.bfloat16),            # enc0 (H=16)
            pltpu.VMEM((8 * b, 16), jnp.bfloat16),             # enc1 (H=8)
            pltpu.VMEM((4 * b, 16), jnp.bfloat16),             # enc2 (H=4)
            pltpu.VMEM((2 * b, 16), jnp.bfloat16),             # enc3 (H=2)
            pltpu.VMEM((2 * b, PITCH_RANGE), jnp.bfloat16),    # dec  H=2 input
            pltpu.VMEM((4 * b, PITCH_RANGE), jnp.bfloat16),    # dec  H=4
            pltpu.VMEM((8 * b, PITCH_RANGE), jnp.bfloat16),    # dec  H=8
            pltpu.VMEM((16 * b, PITCH_RANGE), jnp.bfloat16),   # dec  H=16
            pltpu.VMEM((Z_DIM, 1024), jnp.bfloat16),           # w1_z landing buffer
            pltpu.VMEM((1024, 256), jnp.bfloat16),             # w2_h landing buffer
            pltpu.SemaphoreType.DMA((2,)),                     # the two weight DMAs
        ],
    )(*args)


@jax.jit
def sample_generator_forward(params, z, prev_x, y):
    # Wrapper is reshape-only (metadata, no extra launches): the row
    # permutations and y replication now live inside the kernel.
    # Best performance when batch is a multiple of 8 (sublane alignment).
    b = z.shape[0]
    prev3 = prev_x.reshape(b, H_BARS, PITCH_RANGE)
    out = _fused_call(params, prev3, y, z)
    return out.reshape(b, 1, H_BARS, PITCH_RANGE)


# ---------------------------------- main ------------------------------------
if __name__ == "__main__":
    key = jax.random.PRNGKey(0)
    kp, kz, kx, ky = jax.random.split(key, 4)
    params = init_params(kp)

    batch = 8   # multiple of 8 keeps every static row slice sublane-aligned
    z = jax.random.normal(kz, (batch, Z_DIM), jnp.float32)
    prev_x = (jax.random.uniform(kx, (batch, 1, H_BARS, PITCH_RANGE)) > 0.8).astype(jnp.float32)
    y = jax.nn.one_hot(jax.random.randint(ky, (batch,), 0, Y_DIM), Y_DIM, dtype=jnp.float32)

    g_x = sample_generator_forward(params, z, prev_x, y)
    g_x = jax.block_until_ready(g_x)

    assert g_x.shape == (batch, 1, H_BARS, PITCH_RANGE), g_x.shape
    assert bool(jnp.all(jnp.isfinite(g_x)))
    assert bool(jnp.all((g_x >= 0.0) & (g_x <= 1.0)))
    print("KERNEL_OK")
</pallas_src>

<mosaic_0001>
module attributes {stable_mosaic.version = 11 : i64} {
  func.func @_fused_kernel(%arg0: memref<8x16x128xf32, #tpu.memory_space<vmem>>, %arg1: memref<8x13xf32, #tpu.memory_space<vmem>>, %arg2: memref<8x100xf32, #tpu.memory_space<vmem>>, %arg3: memref<128x16xbf16, #tpu.memory_space<vmem>>, %arg4: memref<1x16xf32, #tpu.memory_space<vmem>>, %arg5: memref<1x16xf32, #tpu.memory_space<vmem>>, %arg6: memref<1x16xf32, #tpu.memory_space<vmem>>, %arg7: memref<2x16x16xbf16, #tpu.memory_space<vmem>>, %arg8: memref<1x16xf32, #tpu.memory_space<vmem>>, %arg9: memref<1x16xf32, #tpu.memory_space<vmem>>, %arg10: memref<1x16xf32, #tpu.memory_space<vmem>>, %arg11: memref<2x16x16xbf16, #tpu.memory_space<vmem>>, %arg12: memref<1x16xf32, #tpu.memory_space<vmem>>, %arg13: memref<1x16xf32, #tpu.memory_space<vmem>>, %arg14: memref<1x16xf32, #tpu.memory_space<vmem>>, %arg15: memref<2x16x16xbf16, #tpu.memory_space<vmem>>, %arg16: memref<1x16xf32, #tpu.memory_space<vmem>>, %arg17: memref<1x16xf32, #tpu.memory_space<vmem>>, %arg18: memref<1x16xf32, #tpu.memory_space<vmem>>, %arg19: memref<100x1024xbf16, #tpu.memory_space<any>>, %arg20: memref<13x1024xbf16, #tpu.memory_space<vmem>>, %arg21: memref<1x1024xf32, #tpu.memory_space<vmem>>, %arg22: memref<1x1024xf32, #tpu.memory_space<vmem>>, %arg23: memref<1x1024xf32, #tpu.memory_space<vmem>>, %arg24: memref<1024x256xbf16, #tpu.memory_space<any>>, %arg25: memref<13x256xbf16, #tpu.memory_space<vmem>>, %arg26: memref<1x256xf32, #tpu.memory_space<vmem>>, %arg27: memref<1x256xf32, #tpu.memory_space<vmem>>, %arg28: memref<1x256xf32, #tpu.memory_space<vmem>>, %arg29: memref<128x256xbf16, #tpu.memory_space<vmem>>, %arg30: memref<13x256xbf16, #tpu.memory_space<vmem>>, %arg31: memref<16x256xbf16, #tpu.memory_space<vmem>>, %arg32: memref<1x256xf32, #tpu.memory_space<vmem>>, %arg33: memref<1x128xf32, #tpu.memory_space<vmem>>, %arg34: memref<1x128xf32, #tpu.memory_space<vmem>>, %arg35: memref<128x256xbf16, #tpu.memory_space<vmem>>, %arg36: memref<13x256xbf16, #tpu.memory_space<vmem>>, %arg37: memref<16x256xbf16, #tpu.memory_space<vmem>>, %arg38: memref<1x256xf32, #tpu.memory_space<vmem>>, %arg39: memref<1x128xf32, #tpu.memory_space<vmem>>, %arg40: memref<1x128xf32, #tpu.memory_space<vmem>>, %arg41: memref<128x256xbf16, #tpu.memory_space<vmem>>, %arg42: memref<13x256xbf16, #tpu.memory_space<vmem>>, %arg43: memref<16x256xbf16, #tpu.memory_space<vmem>>, %arg44: memref<1x256xf32, #tpu.memory_space<vmem>>, %arg45: memref<1x128xf32, #tpu.memory_space<vmem>>, %arg46: memref<1x128xf32, #tpu.memory_space<vmem>>, %arg47: memref<128x128xbf16, #tpu.memory_space<vmem>>, %arg48: memref<13x128xbf16, #tpu.memory_space<vmem>>, %arg49: memref<16x128xbf16, #tpu.memory_space<vmem>>, %arg50: memref<1x128xf32, #tpu.memory_space<vmem>>, %arg51: memref<8x16x128xf32, #tpu.memory_space<vmem>>, %arg52: memref<128x16xbf16, #tpu.memory_space<vmem>>, %arg53: memref<64x16xbf16, #tpu.memory_space<vmem>>, %arg54: memref<32x16xbf16, #tpu.memory_space<vmem>>, %arg55: memref<16x16xbf16, #tpu.memory_space<vmem>>, %arg56: memref<16x128xbf16, #tpu.memory_space<vmem>>, %arg57: memref<32x128xbf16, #tpu.memory_space<vmem>>, %arg58: memref<64x128xbf16, #tpu.memory_space<vmem>>, %arg59: memref<128x128xbf16, #tpu.memory_space<vmem>>, %arg60: memref<100x1024xbf16, #tpu.memory_space<vmem>>, %arg61: memref<1024x256xbf16, #tpu.memory_space<vmem>>, %arg62: memref<2x!tpu.dma_semaphore, #tpu.memory_space<semaphore_mem>>) attributes {dimension_semantics = [], scalar_prefetch = 0 : i64, scratch_operands = 11 : i64, tpu.core_type = #tpu.core_type<tc>} {
    %c0_i32 = arith.constant 0 : i32
    %0 = tpu.memref_slice %arg62[%c0_i32] : memref<2x!tpu.dma_semaphore, #tpu.memory_space<semaphore_mem>> -> memref<1x!tpu.dma_semaphore, #tpu.memory_space<semaphore_mem>>
    %1 = tpu.memref_squeeze %0 : memref<1x!tpu.dma_semaphore, #tpu.memory_space<semaphore_mem>> -> memref<!tpu.dma_semaphore, #tpu.memory_space<semaphore_mem>>
    tpu.enqueue_dma source(%arg19 : memref<100x1024xbf16, #tpu.memory_space<any>>) target(%arg60 : memref<100x1024xbf16, #tpu.memory_space<vmem>>) target_semaphore(%1 : memref<!tpu.dma_semaphore, #tpu.memory_space<semaphore_mem>>)
    %c1_i32 = arith.constant 1 : i32
    %2 = tpu.memref_slice %arg62[%c1_i32] : memref<2x!tpu.dma_semaphore, #tpu.memory_space<semaphore_mem>> -> memref<1x!tpu.dma_semaphore, #tpu.memory_space<semaphore_mem>>
    %3 = tpu.memref_squeeze %2 : memref<1x!tpu.dma_semaphore, #tpu.memory_space<semaphore_mem>> -> memref<!tpu.dma_semaphore, #tpu.memory_space<semaphore_mem>>
    tpu.enqueue_dma source(%arg24 : memref<1024x256xbf16, #tpu.memory_space<any>>) target(%arg61 : memref<1024x256xbf16, #tpu.memory_space<vmem>>) target_semaphore(%3 : memref<!tpu.dma_semaphore, #tpu.memory_space<semaphore_mem>>)
    %c0 = arith.constant 0 : index
    %c0_0 = arith.constant 0 : index
    %c0_1 = arith.constant 0 : index
    %4 = vector.load %arg0[%c0, %c0_0, %c0_1] : memref<8x16x128xf32, #tpu.memory_space<vmem>>, vector<8x1x128xf32>
    %5 = vector.shape_cast %4 : vector<8x1x128xf32> to vector<8x128xf32>
    %c0_2 = arith.constant 0 : index
    %c8 = arith.constant 8 : index
    %c0_3 = arith.constant 0 : index
    %6 = vector.load %arg0[%c0_2, %c8, %c0_3] : memref<8x16x128xf32, #tpu.memory_space<vmem>>, vector<8x1x128xf32>
    %7 = vector.shape_cast %6 : vector<8x1x128xf32> to vector<8x128xf32>
    %c0_4 = arith.constant 0 : index
    %c4 = arith.constant 4 : index
    %c0_5 = arith.constant 0 : index
    %8 = vector.load %arg0[%c0_4, %c4, %c0_5] : memref<8x16x128xf32, #tpu.memory_space<vmem>>, vector<8x1x128xf32>
    %9 = vector.shape_cast %8 : vector<8x1x128xf32> to vector<8x128xf32>
    %c0_6 = arith.constant 0 : index
    %c12 = arith.constant 12 : index
    %c0_7 = arith.constant 0 : index
    %10 = vector.load %arg0[%c0_6, %c12, %c0_7] : memref<8x16x128xf32, #tpu.memory_space<vmem>>, vector<8x1x128xf32>
    %11 = vector.shape_cast %10 : vector<8x1x128xf32> to vector<8x128xf32>
    %c0_8 = arith.constant 0 : index
    %c2 = arith.constant 2 : index
    %c0_9 = arith.constant 0 : index
    %12 = vector.load %arg0[%c0_8, %c2, %c0_9] : memref<8x16x128xf32, #tpu.memory_space<vmem>>, vector<8x1x128xf32>
    %13 = vector.shape_cast %12 : vector<8x1x128xf32> to vector<8x128xf32>
    %c0_10 = arith.constant 0 : index
    %c10 = arith.constant 10 : index
    %c0_11 = arith.constant 0 : index
    %14 = vector.load %arg0[%c0_10, %c10, %c0_11] : memref<8x16x128xf32, #tpu.memory_space<vmem>>, vector<8x1x128xf32>
    %15 = vector.shape_cast %14 : vector<8x1x128xf32> to vector<8x128xf32>
    %c0_12 = arith.constant 0 : index
    %c6 = arith.constant 6 : index
    %c0_13 = arith.constant 0 : index
    %16 = vector.load %arg0[%c0_12, %c6, %c0_13] : memref<8x16x128xf32, #tpu.memory_space<vmem>>, vector<8x1x128xf32>
    %17 = vector.shape_cast %16 : vector<8x1x128xf32> to vector<8x128xf32>
    %c0_14 = arith.constant 0 : index
    %c14 = arith.constant 14 : index
    %c0_15 = arith.constant 0 : index
    %18 = vector.load %arg0[%c0_14, %c14, %c0_15] : memref<8x16x128xf32, #tpu.memory_space<vmem>>, vector<8x1x128xf32>
    %19 = vector.shape_cast %18 : vector<8x1x128xf32> to vector<8x128xf32>
    %c0_16 = arith.constant 0 : index
    %c1 = arith.constant 1 : index
    %c0_17 = arith.constant 0 : index
    %20 = vector.load %arg0[%c0_16, %c1, %c0_17] : memref<8x16x128xf32, #tpu.memory_space<vmem>>, vector<8x1x128xf32>
    %21 = vector.shape_cast %20 : vector<8x1x128xf32> to vector<8x128xf32>
    %c0_18 = arith.constant 0 : index
    %c9 = arith.constant 9 : index
    %c0_19 = arith.constant 0 : index
    %22 = vector.load %arg0[%c0_18, %c9, %c0_19] : memref<8x16x128xf32, #tpu.memory_space<vmem>>, vector<8x1x128xf32>
    %23 = vector.shape_cast %22 : vector<8x1x128xf32> to vector<8x128xf32>
    %c0_20 = arith.constant 0 : index
    %c5 = arith.constant 5 : index
    %c0_21 = arith.constant 0 : index
    %24 = vector.load %arg0[%c0_20, %c5, %c0_21] : memref<8x16x128xf32, #tpu.memory_space<vmem>>, vector<8x1x128xf32>
    %25 = vector.shape_cast %24 : vector<8x1x128xf32> to vector<8x128xf32>
    %c0_22 = arith.constant 0 : index
    %c13 = arith.constant 13 : index
    %c0_23 = arith.constant 0 : index
    %26 = vector.load %arg0[%c0_22, %c13, %c0_23] : memref<8x16x128xf32, #tpu.memory_space<vmem>>, vector<8x1x128xf32>
    %27 = vector.shape_cast %26 : vector<8x1x128xf32> to vector<8x128xf32>
    %c0_24 = arith.constant 0 : index
    %c3 = arith.constant 3 : index
    %c0_25 = arith.constant 0 : index
    %28 = vector.load %arg0[%c0_24, %c3, %c0_25] : memref<8x16x128xf32, #tpu.memory_space<vmem>>, vector<8x1x128xf32>
    %29 = vector.shape_cast %28 : vector<8x1x128xf32> to vector<8x128xf32>
    %c0_26 = arith.constant 0 : index
    %c11 = arith.constant 11 : index
    %c0_27 = arith.constant 0 : index
    %30 = vector.load %arg0[%c0_26, %c11, %c0_27] : memref<8x16x128xf32, #tpu.memory_space<vmem>>, vector<8x1x128xf32>
    %31 = vector.shape_cast %30 : vector<8x1x128xf32> to vector<8x128xf32>
    %c0_28 = arith.constant 0 : index
    %c7 = arith.constant 7 : index
    %c0_29 = arith.constant 0 : index
    %32 = vector.load %arg0[%c0_28, %c7, %c0_29] : memref<8x16x128xf32, #tpu.memory_space<vmem>>, vector<8x1x128xf32>
    %33 = vector.shape_cast %32 : vector<8x1x128xf32> to vector<8x128xf32>
    %c0_30 = arith.constant 0 : index
    %c15 = arith.constant 15 : index
    %c0_31 = arith.constant 0 : index
    %34 = vector.load %arg0[%c0_30, %c15, %c0_31] : memref<8x16x128xf32, #tpu.memory_space<vmem>>, vector<8x1x128xf32>
    %35 = vector.shape_cast %34 : vector<8x1x128xf32> to vector<8x128xf32>
    %36 = tpu.concatenate %5, %7, %9, %11, %13, %15, %17, %19, %21, %23, %25, %27, %29, %31, %33, %35 in 0 : vector<8x128xf32>, vector<8x128xf32>, vector<8x128xf32>, vector<8x128xf32>, vector<8x128xf32>, vector<8x128xf32>, vector<8x128xf32>, vector<8x128xf32>, vector<8x128xf32>, vector<8x128xf32>, vector<8x128xf32>, vector<8x128xf32>, vector<8x128xf32>, vector<8x128xf32>, vector<8x128xf32>, vector<8x128xf32> -> vector<128x128xf32>
    %c0_32 = arith.constant 0 : index
    %c0_33 = arith.constant 0 : index
    %37 = vector.load %arg3[%c0_32, %c0_33] : memref<128x16xbf16, #tpu.memory_space<vmem>>, vector<128x16xbf16>
    %38 = arith.truncf %36 : vector<128x128xf32> to vector<128x128xbf16>
    %cst = arith.constant dense<0.000000e+00> : vector<128x16xf32>
    %39 = tpu.matmul %38, %37, %cst {dimension_numbers = #tpu.dot_dimension_numbers<[1], [0], [0], [1], [0, 0, 1, 1], [], []>} : vector<128x128xbf16>, vector<128x16xbf16>, vector<128x16xf32> -> vector<128x16xf32>
    %c0_34 = arith.constant 0 : index
    %c0_35 = arith.constant 0 : index
    %40 = vector.load %arg4[%c0_34, %c0_35] : memref<1x16xf32, #tpu.memory_space<vmem>>, vector<1x16xf32>
    %41 = vector.broadcast %40 : vector<1x16xf32> to vector<128x16xf32>
    %42 = arith.addf %39, %41 : vector<128x16xf32>
    %c0_36 = arith.constant 0 : index
    %c0_37 = arith.constant 0 : index
    %43 = vector.load %arg5[%c0_36, %c0_37] : memref<1x16xf32, #tpu.memory_space<vmem>>, vector<1x16xf32>
    %c0_38 = arith.constant 0 : index
    %c0_39 = arith.constant 0 : index
    %44 = vector.load %arg6[%c0_38, %c0_39] : memref<1x16xf32, #tpu.memory_space<vmem>>, vector<1x16xf32>
    %cst_40 = arith.constant dense<0.000000e+00> : vector<16xf32>
    %45 = vector.multi_reduction <add>, %42, %cst_40 [0] : vector<128x16xf32> to vector<16xf32>
    %46 = vector.shape_cast %45 : vector<16xf32> to vector<1x16xf32>
    %cst_41 = arith.constant 7.812500e-03 : f32
    %47 = vector.broadcast %cst_41 : f32 to vector<1x16xf32>
    %48 = arith.mulf %46, %47 : vector<1x16xf32>
    %49 = arith.mulf %42, %42 : vector<128x16xf32>
    %cst_42 = arith.constant dense<0.000000e+00> : vector<16xf32>
    %50 = vector.multi_reduction <add>, %49, %cst_42 [0] : vector<128x16xf32> to vector<16xf32>
    %51 = vector.shape_cast %50 : vector<16xf32> to vector<1x16xf32>
    %cst_43 = arith.constant 7.812500e-03 : f32
    %52 = vector.broadcast %cst_43 : f32 to vector<1x16xf32>
    %53 = arith.mulf %51, %52 : vector<1x16xf32>
    %54 = arith.mulf %48, %48 : vector<1x16xf32>
    %55 = arith.subf %53, %54 : vector<1x16xf32>
    %cst_44 = arith.constant 0.000000e+00 : f32
    %56 = vector.broadcast %cst_44 : f32 to vector<1x16xf32>
    %57 = arith.maximumf %55, %56 : vector<1x16xf32>
    %58 = vector.broadcast %48 : vector<1x16xf32> to vector<128x16xf32>
    %59 = arith.subf %42, %58 : vector<128x16xf32>
    %cst_45 = arith.constant 9.99999974E-6 : f32
    %60 = vector.broadcast %cst_45 : f32 to vector<1x16xf32>
    %61 = arith.addf %57, %60 : vector<1x16xf32>
    %62 = math.rsqrt %61 : vector<1x16xf32>
    %63 = vector.broadcast %62 : vector<1x16xf32> to vector<128x16xf32>
    %64 = arith.mulf %59, %63 : vector<128x16xf32>
    %65 = vector.broadcast %43 : vector<1x16xf32> to vector<128x16xf32>
    %66 = arith.mulf %64, %65 : vector<128x16xf32>
    %67 = vector.broadcast %44 : vector<1x16xf32> to vector<128x16xf32>
    %68 = arith.addf %66, %67 : vector<128x16xf32>
    %cst_46 = arith.constant 2.000000e-01 : f32
    %69 = vector.broadcast %cst_46 : f32 to vector<128x16xf32>
    %70 = arith.mulf %69, %68 : vector<128x16xf32>
    %71 = arith.maximumf %68, %70 : vector<128x16xf32>
    %72 = arith.truncf %71 : vector<128x16xf32> to vector<128x16xbf16>
    %c0_47 = arith.constant 0 : index
    %c0_48 = arith.constant 0 : index
    %73 = vector.load %arg52[%c0_47, %c0_48] : memref<128x16xbf16, #tpu.memory_space<vmem>>, vector<128x16xbf16>
    tpu.vector_store %arg52[%c0_47, %c0_48], %72 {strides = array<i32>} : memref<128x16xbf16, #tpu.memory_space<vmem>>, vector<128x16xbf16>,
    %c0_49 = arith.constant 0 : index
    %c0_50 = arith.constant 0 : index
    %74 = vector.load %arg52[%c0_49, %c0_50] : memref<128x16xbf16, #tpu.memory_space<vmem>>, vector<64x16xbf16>
    %c0_51 = arith.constant 0 : index
    %c0_52 = arith.constant 0 : index
    %c0_53 = arith.constant 0 : index
    %75 = vector.load %arg7[%c0_51, %c0_52, %c0_53] : memref<2x16x16xbf16, #tpu.memory_space<vmem>>, vector<1x16x16xbf16>
    %76 = vector.shape_cast %75 : vector<1x16x16xbf16> to vector<16x16xbf16>
    %cst_54 = arith.constant dense<0.000000e+00> : vector<64x16xf32>
    %77 = tpu.matmul %74, %76, %cst_54 {dimension_numbers = #tpu.dot_dimension_numbers<[1], [0], [0], [1], [0, 0, 1, 1], [], []>} : vector<64x16xbf16>, vector<16x16xbf16>, vector<64x16xf32> -> vector<64x16xf32>
    %c64 = arith.constant 64 : index
    %c0_55 = arith.constant 0 : index
    %78 = vector.load %arg52[%c64, %c0_55] : memref<128x16xbf16, #tpu.memory_space<vmem>>, vector<64x16xbf16>
    %c1_56 = arith.constant 1 : index
    %c0_57 = arith.constant 0 : index
    %c0_58 = arith.constant 0 : index
    %79 = vector.load %arg7[%c1_56, %c0_57, %c0_58] : memref<2x16x16xbf16, #tpu.memory_space<vmem>>, vector<1x16x16xbf16>
    %80 = vector.shape_cast %79 : vector<1x16x16xbf16> to vector<16x16xbf16>
    %cst_59 = arith.constant dense<0.000000e+00> : vector<64x16xf32>
    %81 = tpu.matmul %78, %80, %cst_59 {dimension_numbers = #tpu.dot_dimension_numbers<[1], [0], [0], [1], [0, 0, 1, 1], [], []>} : vector<64x16xbf16>, vector<16x16xbf16>, vector<64x16xf32> -> vector<64x16xf32>
    %82 = arith.addf %77, %81 : vector<64x16xf32>
    %c0_60 = arith.constant 0 : index
    %c0_61 = arith.constant 0 : index
    %83 = vector.load %arg8[%c0_60, %c0_61] : memref<1x16xf32, #tpu.memory_space<vmem>>, vector<1x16xf32>
    %84 = vector.broadcast %83 : vector<1x16xf32> to vector<64x16xf32>
    %85 = arith.addf %82, %84 : vector<64x16xf32>
    %c0_62 = arith.constant 0 : index
    %c0_63 = arith.constant 0 : index
    %86 = vector.load %arg9[%c0_62, %c0_63] : memref<1x16xf32, #tpu.memory_space<vmem>>, vector<1x16xf32>
    %c0_64 = arith.constant 0 : index
    %c0_65 = arith.constant 0 : index
    %87 = vector.load %arg10[%c0_64, %c0_65] : memref<1x16xf32, #tpu.memory_space<vmem>>, vector<1x16xf32>
    %cst_66 = arith.constant dense<0.000000e+00> : vector<16xf32>
    %88 = vector.multi_reduction <add>, %85, %cst_66 [0] : vector<64x16xf32> to vector<16xf32>
    %89 = vector.shape_cast %88 : vector<16xf32> to vector<1x16xf32>
    %cst_67 = arith.constant 1.562500e-02 : f32
    %90 = vector.broadcast %cst_67 : f32 to vector<1x16xf32>
    %91 = arith.mulf %89, %90 : vector<1x16xf32>
    %92 = arith.mulf %85, %85 : vector<64x16xf32>
    %cst_68 = arith.constant dense<0.000000e+00> : vector<16xf32>
    %93 = vector.multi_reduction <add>, %92, %cst_68 [0] : vector<64x16xf32> to vector<16xf32>
    %94 = vector.shape_cast %93 : vector<16xf32> to vector<1x16xf32>
    %cst_69 = arith.constant 1.562500e-02 : f32
    %95 = vector.broadcast %cst_69 : f32 to vector<1x16xf32>
    %96 = arith.mulf %94, %95 : vector<1x16xf32>
    %97 = arith.mulf %91, %91 : vector<1x16xf32>
    %98 = arith.subf %96, %97 : vector<1x16xf32>
    %cst_70 = arith.constant 0.000000e+00 : f32
    %99 = vector.broadcast %cst_70 : f32 to vector<1x16xf32>
    %100 = arith.maximumf %98, %99 : vector<1x16xf32>
    %101 = vector.broadcast %91 : vector<1x16xf32> to vector<64x16xf32>
    %102 = arith.subf %85, %101 : vector<64x16xf32>
    %cst_71 = arith.constant 9.99999974E-6 : f32
    %103 = vector.broadcast %cst_71 : f32 to vector<1x16xf32>
    %104 = arith.addf %100, %103 : vector<1x16xf32>
    %105 = math.rsqrt %104 : vector<1x16xf32>
    %106 = vector.broadcast %105 : vector<1x16xf32> to vector<64x16xf32>
    %107 = arith.mulf %102, %106 : vector<64x16xf32>
    %108 = vector.broadcast %86 : vector<1x16xf32> to vector<64x16xf32>
    %109 = arith.mulf %107, %108 : vector<64x16xf32>
    %110 = vector.broadcast %87 : vector<1x16xf32> to vector<64x16xf32>
    %111 = arith.addf %109, %110 : vector<64x16xf32>
    %cst_72 = arith.constant 2.000000e-01 : f32
    %112 = vector.broadcast %cst_72 : f32 to vector<64x16xf32>
    %113 = arith.mulf %112, %111 : vector<64x16xf32>
    %114 = arith.maximumf %111, %113 : vector<64x16xf32>
    %115 = arith.truncf %114 : vector<64x16xf32> to vector<64x16xbf16>
    %c0_73 = arith.constant 0 : index
    %c0_74 = arith.constant 0 : index
    %116 = vector.load %arg53[%c0_73, %c0_74] : memref<64x16xbf16, #tpu.memory_space<vmem>>, vector<64x16xbf16>
    tpu.vector_store %arg53[%c0_73, %c0_74], %115 {strides = array<i32>} : memref<64x16xbf16, #tpu.memory_space<vmem>>, vector<64x16xbf16>,
    %c0_75 = arith.constant 0 : index
    %c0_76 = arith.constant 0 : index
    %117 = vector.load %arg53[%c0_75, %c0_76] : memref<64x16xbf16, #tpu.memory_space<vmem>>, vector<32x16xbf16>
    %c0_77 = arith.constant 0 : index
    %c0_78 = arith.constant 0 : index
    %c0_79 = arith.constant 0 : index
    %118 = vector.load %arg11[%c0_77, %c0_78, %c0_79] : memref<2x16x16xbf16, #tpu.memory_space<vmem>>, vector<1x16x16xbf16>
    %119 = vector.shape_cast %118 : vector<1x16x16xbf16> to vector<16x16xbf16>
    %cst_80 = arith.constant dense<0.000000e+00> : vector<32x16xf32>
    %120 = tpu.matmul %117, %119, %cst_80 {dimension_numbers = #tpu.dot_dimension_numbers<[1], [0], [0], [1], [0, 0, 1, 1], [], []>} : vector<32x16xbf16>, vector<16x16xbf16>, vector<32x16xf32> -> vector<32x16xf32>
    %c32 = arith.constant 32 : index
    %c0_81 = arith.constant 0 : index
    %121 = vector.load %arg53[%c32, %c0_81] : memref<64x16xbf16, #tpu.memory_space<vmem>>, vector<32x16xbf16>
    %c1_82 = arith.constant 1 : index
    %c0_83 = arith.constant 0 : index
    %c0_84 = arith.constant 0 : index
    %122 = vector.load %arg11[%c1_82, %c0_83, %c0_84] : memref<2x16x16xbf16, #tpu.memory_space<vmem>>, vector<1x16x16xbf16>
    %123 = vector.shape_cast %122 : vector<1x16x16xbf16> to vector<16x16xbf16>
    %cst_85 = arith.constant dense<0.000000e+00> : vector<32x16xf32>
    %124 = tpu.matmul %121, %123, %cst_85 {dimension_numbers = #tpu.dot_dimension_numbers<[1], [0], [0], [1], [0, 0, 1, 1], [], []>} : vector<32x16xbf16>, vector<16x16xbf16>, vector<32x16xf32> -> vector<32x16xf32>
    %125 = arith.addf %120, %124 : vector<32x16xf32>
    %c0_86 = arith.constant 0 : index
    %c0_87 = arith.constant 0 : index
    %126 = vector.load %arg12[%c0_86, %c0_87] : memref<1x16xf32, #tpu.memory_space<vmem>>, vector<1x16xf32>
    %127 = vector.broadcast %126 : vector<1x16xf32> to vector<32x16xf32>
    %128 = arith.addf %125, %127 : vector<32x16xf32>
    %c0_88 = arith.constant 0 : index
    %c0_89 = arith.constant 0 : index
    %129 = vector.load %arg13[%c0_88, %c0_89] : memref<1x16xf32, #tpu.memory_space<vmem>>, vector<1x16xf32>
    %c0_90 = arith.constant 0 : index
    %c0_91 = arith.constant 0 : index
    %130 = vector.load %arg14[%c0_90, %c0_91] : memref<1x16xf32, #tpu.memory_space<vmem>>, vector<1x16xf32>
    %cst_92 = arith.constant dense<0.000000e+00> : vector<16xf32>
    %131 = vector.multi_reduction <add>, %128, %cst_92 [0] : vector<32x16xf32> to vector<16xf32>
    %132 = vector.shape_cast %131 : vector<16xf32> to vector<1x16xf32>
    %cst_93 = arith.constant 3.125000e-02 : f32
    %133 = vector.broadcast %cst_93 : f32 to vector<1x16xf32>
    %134 = arith.mulf %132, %133 : vector<1x16xf32>
    %135 = arith.mulf %128, %128 : vector<32x16xf32>
    %cst_94 = arith.constant dense<0.000000e+00> : vector<16xf32>
    %136 = vector.multi_reduction <add>, %135, %cst_94 [0] : vector<32x16xf32> to vector<16xf32>
    %137 = vector.shape_cast %136 : vector<16xf32> to vector<1x16xf32>
    %cst_95 = arith.constant 3.125000e-02 : f32
    %138 = vector.broadcast %cst_95 : f32 to vector<1x16xf32>
    %139 = arith.mulf %137, %138 : vector<1x16xf32>
    %140 = arith.mulf %134, %134 : vector<1x16xf32>
    %141 = arith.subf %139, %140 : vector<1x16xf32>
    %cst_96 = arith.constant 0.000000e+00 : f32
    %142 = vector.broadcast %cst_96 : f32 to vector<1x16xf32>
    %143 = arith.maximumf %141, %142 : vector<1x16xf32>
    %144 = vector.broadcast %134 : vector<1x16xf32> to vector<32x16xf32>
    %145 = arith.subf %128, %144 : vector<32x16xf32>
    %cst_97 = arith.constant 9.99999974E-6 : f32
    %146 = vector.broadcast %cst_97 : f32 to vector<1x16xf32>
    %147 = arith.addf %143, %146 : vector<1x16xf32>
    %148 = math.rsqrt %147 : vector<1x16xf32>
    %149 = vector.broadcast %148 : vector<1x16xf32> to vector<32x16xf32>
    %150 = arith.mulf %145, %149 : vector<32x16xf32>
    %151 = vector.broadcast %129 : vector<1x16xf32> to vector<32x16xf32>
    %152 = arith.mulf %150, %151 : vector<32x16xf32>
    %153 = vector.broadcast %130 : vector<1x16xf32> to vector<32x16xf32>
    %154 = arith.addf %152, %153 : vector<32x16xf32>
    %cst_98 = arith.constant 2.000000e-01 : f32
    %155 = vector.broadcast %cst_98 : f32 to vector<32x16xf32>
    %156 = arith.mulf %155, %154 : vector<32x16xf32>
    %157 = arith.maximumf %154, %156 : vector<32x16xf32>
    %158 = arith.truncf %157 : vector<32x16xf32> to vector<32x16xbf16>
    %c0_99 = arith.constant 0 : index
    %c0_100 = arith.constant 0 : index
    %159 = vector.load %arg54[%c0_99, %c0_100] : memref<32x16xbf16, #tpu.memory_space<vmem>>, vector<32x16xbf16>
    tpu.vector_store %arg54[%c0_99, %c0_100], %158 {strides = array<i32>} : memref<32x16xbf16, #tpu.memory_space<vmem>>, vector<32x16xbf16>,
    %c0_101 = arith.constant 0 : index
    %c0_102 = arith.constant 0 : index
    %160 = vector.load %arg54[%c0_101, %c0_102] : memref<32x16xbf16, #tpu.memory_space<vmem>>, vector<16x16xbf16>
    %c0_103 = arith.constant 0 : index
    %c0_104 = arith.constant 0 : index
    %c0_105 = arith.constant 0 : index
    %161 = vector.load %arg15[%c0_103, %c0_104, %c0_105] : memref<2x16x16xbf16, #tpu.memory_space<vmem>>, vector<1x16x16xbf16>
    %162 = vector.shape_cast %161 : vector<1x16x16xbf16> to vector<16x16xbf16>
    %cst_106 = arith.constant dense<0.000000e+00> : vector<16x16xf32>
    %163 = tpu.matmul %160, %162, %cst_106 {dimension_numbers = #tpu.dot_dimension_numbers<[1], [0], [0], [1], [0, 0, 1, 1], [], []>} : vector<16x16xbf16>, vector<16x16xbf16>, vector<16x16xf32> -> vector<16x16xf32>
    %c16 = arith.constant 16 : index
    %c0_107 = arith.constant 0 : index
    %164 = vector.load %arg54[%c16, %c0_107] : memref<32x16xbf16, #tpu.memory_space<vmem>>, vector<16x16xbf16>
    %c1_108 = arith.constant 1 : index
    %c0_109 = arith.constant 0 : index
    %c0_110 = arith.constant 0 : index
    %165 = vector.load %arg15[%c1_108, %c0_109, %c0_110] : memref<2x16x16xbf16, #tpu.memory_space<vmem>>, vector<1x16x16xbf16>
    %166 = vector.shape_cast %165 : vector<1x16x16xbf16> to vector<16x16xbf16>
    %cst_111 = arith.constant dense<0.000000e+00> : vector<16x16xf32>
    %167 = tpu.matmul %164, %166, %cst_111 {dimension_numbers = #tpu.dot_dimension_numbers<[1], [0], [0], [1], [0, 0, 1, 1], [], []>} : vector<16x16xbf16>, vector<16x16xbf16>, vector<16x16xf32> -> vector<16x16xf32>
    %168 = arith.addf %163, %167 : vector<16x16xf32>
    %c0_112 = arith.constant 0 : index
    %c0_113 = arith.constant 0 : index
    %169 = vector.load %arg16[%c0_112, %c0_113] : memref<1x16xf32, #tpu.memory_space<vmem>>, vector<1x16xf32>
    %170 = vector.broadcast %169 : vector<1x16xf32> to vector<16x16xf32>
    %171 = arith.addf %168, %170 : vector<16x16xf32>
    %c0_114 = arith.constant 0 : index
    %c0_115 = arith.constant 0 : index
    %172 = vector.load %arg17[%c0_114, %c0_115] : memref<1x16xf32, #tpu.memory_space<vmem>>, vector<1x16xf32>
    %c0_116 = arith.constant 0 : index
    %c0_117 = arith.constant 0 : index
    %173 = vector.load %arg18[%c0_116, %c0_117] : memref<1x16xf32, #tpu.memory_space<vmem>>, vector<1x16xf32>
    %cst_118 = arith.constant dense<0.000000e+00> : vector<16xf32>
    %174 = vector.multi_reduction <add>, %171, %cst_118 [0] : vector<16x16xf32> to vector<16xf32>
    %175 = vector.shape_cast %174 : vector<16xf32> to vector<1x16xf32>
    %cst_119 = arith.constant 6.250000e-02 : f32
    %176 = vector.broadcast %cst_119 : f32 to vector<1x16xf32>
    %177 = arith.mulf %175, %176 : vector<1x16xf32>
    %178 = arith.mulf %171, %171 : vector<16x16xf32>
    %cst_120 = arith.constant dense<0.000000e+00> : vector<16xf32>
    %179 = vector.multi_reduction <add>, %178, %cst_120 [0] : vector<16x16xf32> to vector<16xf32>
    %180 = vector.shape_cast %179 : vector<16xf32> to vector<1x16xf32>
    %cst_121 = arith.constant 6.250000e-02 : f32
    %181 = vector.broadcast %cst_121 : f32 to vector<1x16xf32>
    %182 = arith.mulf %180, %181 : vector<1x16xf32>
    %183 = arith.mulf %177, %177 : vector<1x16xf32>
    %184 = arith.subf %182, %183 : vector<1x16xf32>
    %cst_122 = arith.constant 0.000000e+00 : f32
    %185 = vector.broadcast %cst_122 : f32 to vector<1x16xf32>
    %186 = arith.maximumf %184, %185 : vector<1x16xf32>
    %187 = vector.broadcast %177 : vector<1x16xf32> to vector<16x16xf32>
    %188 = arith.subf %171, %187 : vector<16x16xf32>
    %cst_123 = arith.constant 9.99999974E-6 : f32
    %189 = vector.broadcast %cst_123 : f32 to vector<1x16xf32>
    %190 = arith.addf %186, %189 : vector<1x16xf32>
    %191 = math.rsqrt %190 : vector<1x16xf32>
    %192 = vector.broadcast %191 : vector<1x16xf32> to vector<16x16xf32>
    %193 = arith.mulf %188, %192 : vector<16x16xf32>
    %194 = vector.broadcast %172 : vector<1x16xf32> to vector<16x16xf32>
    %195 = arith.mulf %193, %194 : vector<16x16xf32>
    %196 = vector.broadcast %173 : vector<1x16xf32> to vector<16x16xf32>
    %197 = arith.addf %195, %196 : vector<16x16xf32>
    %cst_124 = arith.constant 2.000000e-01 : f32
    %198 = vector.broadcast %cst_124 : f32 to vector<16x16xf32>
    %199 = arith.mulf %198, %197 : vector<16x16xf32>
    %200 = arith.maximumf %197, %199 : vector<16x16xf32>
    %201 = arith.truncf %200 : vector<16x16xf32> to vector<16x16xbf16>
    %c0_125 = arith.constant 0 : index
    %c0_126 = arith.constant 0 : index
    %202 = vector.load %arg55[%c0_125, %c0_126] : memref<16x16xbf16, #tpu.memory_space<vmem>>, vector<16x16xbf16>
    tpu.vector_store %arg55[%c0_125, %c0_126], %201 {strides = array<i32>} : memref<16x16xbf16, #tpu.memory_space<vmem>>, vector<16x16xbf16>,
    %c0_127 = arith.constant 0 : index
    %c0_128 = arith.constant 0 : index
    %203 = vector.load %arg1[%c0_127, %c0_128] : memref<8x13xf32, #tpu.memory_space<vmem>>, vector<8x13xf32>
    %204 = tpu.concatenate %203, %203, %203, %203, %203, %203, %203, %203, %203, %203, %203, %203, %203, %203, %203, %203 in 0 : vector<8x13xf32>, vector<8x13xf32>, vector<8x13xf32>, vector<8x13xf32>, vector<8x13xf32>, vector<8x13xf32>, vector<8x13xf32>, vector<8x13xf32>, vector<8x13xf32>, vector<8x13xf32>, vector<8x13xf32>, vector<8x13xf32>, vector<8x13xf32>, vector<8x13xf32>, vector<8x13xf32>, vector<8x13xf32> -> vector<128x13xf32>
    %c0_i32_129 = arith.constant 0 : i32
    %205 = tpu.memref_slice %arg62[%c0_i32_129] : memref<2x!tpu.dma_semaphore, #tpu.memory_space<semaphore_mem>> -> memref<1x!tpu.dma_semaphore, #tpu.memory_space<semaphore_mem>>
    %206 = tpu.memref_squeeze %205 : memref<1x!tpu.dma_semaphore, #tpu.memory_space<semaphore_mem>> -> memref<!tpu.dma_semaphore, #tpu.memory_space<semaphore_mem>>
    tpu.wait_dma2 semaphore(%206 : memref<!tpu.dma_semaphore, #tpu.memory_space<semaphore_mem>>) src(%arg19 : memref<100x1024xbf16, #tpu.memory_space<any>>) dst(%arg60 : memref<100x1024xbf16, #tpu.memory_space<vmem>>)
    %c0_130 = arith.constant 0 : index
    %c0_131 = arith.constant 0 : index
    %207 = vector.load %arg2[%c0_130, %c0_131] : memref<8x100xf32, #tpu.memory_space<vmem>>, vector<8x100xf32>
    %c0_132 = arith.constant 0 : index
    %c0_133 = arith.constant 0 : index
    %208 = vector.load %arg60[%c0_132, %c0_133] : memref<100x1024xbf16, #tpu.memory_space<vmem>>, vector<100x1024xbf16>
    %209 = arith.truncf %207 : vector<8x100xf32> to vector<8x100xbf16>
    %cst_134 = arith.constant dense<0.000000e+00> : vector<8x1024xf32>
    %210 = tpu.matmul %209, %208, %cst_134 {dimension_numbers = #tpu.dot_dimension_numbers<[1], [0], [0], [1], [0, 0, 1, 1], [], []>} : vector<8x100xbf16>, vector<100x1024xbf16>, vector<8x1024xf32> -> vector<8x1024xf32>
    %c0_135 = arith.constant 0 : index
    %c0_136 = arith.constant 0 : index
    %211 = vector.load %arg20[%c0_135, %c0_136] : memref<13x1024xbf16, #tpu.memory_space<vmem>>, vector<13x1024xbf16>
    %212 = arith.truncf %203 : vector<8x13xf32> to vector<8x13xbf16>
    %cst_137 = arith.constant dense<0.000000e+00> : vector<8x1024xf32>
    %213 = tpu.matmul %212, %211, %cst_137 {dimension_numbers = #tpu.dot_dimension_numbers<[1], [0], [0], [1], [0, 0, 1, 1], [], []>} : vector<8x13xbf16>, vector<13x1024xbf16>, vector<8x1024xf32> -> vector<8x1024xf32>
    %214 = arith.addf %210, %213 : vector<8x1024xf32>
    %c0_138 = arith.constant 0 : index
    %c0_139 = arith.constant 0 : index
    %215 = vector.load %arg21[%c0_138, %c0_139] : memref<1x1024xf32, #tpu.memory_space<vmem>>, vector<1x1024xf32>
    %216 = vector.broadcast %215 : vector<1x1024xf32> to vector<8x1024xf32>
    %217 = arith.addf %214, %216 : vector<8x1024xf32>
    %c0_140 = arith.constant 0 : index
    %c0_141 = arith.constant 0 : index
    %218 = vector.load %arg22[%c0_140, %c0_141] : memref<1x1024xf32, #tpu.memory_space<vmem>>, vector<1x1024xf32>
    %c0_142 = arith.constant 0 : index
    %c0_143 = arith.constant 0 : index
    %219 = vector.load %arg23[%c0_142, %c0_143] : memref<1x1024xf32, #tpu.memory_space<vmem>>, vector<1x1024xf32>
    %cst_144 = arith.constant dense<0.000000e+00> : vector<1024xf32>
    %220 = vector.multi_reduction <add>, %217, %cst_144 [0] : vector<8x1024xf32> to vector<1024xf32>
    %221 = vector.shape_cast %220 : vector<1024xf32> to vector<1x1024xf32>
    %cst_145 = arith.constant 1.250000e-01 : f32
    %222 = vector.broadcast %cst_145 : f32 to vector<1x1024xf32>
    %223 = arith.mulf %221, %222 : vector<1x1024xf32>
    %224 = arith.mulf %217, %217 : vector<8x1024xf32>
    %cst_146 = arith.constant dense<0.000000e+00> : vector<1024xf32>
    %225 = vector.multi_reduction <add>, %224, %cst_146 [0] : vector<8x1024xf32> to vector<1024xf32>
    %226 = vector.shape_cast %225 : vector<1024xf32> to vector<1x1024xf32>
    %cst_147 = arith.constant 1.250000e-01 : f32
    %227 = vector.broadcast %cst_147 : f32 to vector<1x1024xf32>
    %228 = arith.mulf %226, %227 : vector<1x1024xf32>
    %229 = arith.mulf %223, %223 : vector<1x1024xf32>
    %230 = arith.subf %228, %229 : vector<1x1024xf32>
    %cst_148 = arith.constant 0.000000e+00 : f32
    %231 = vector.broadcast %cst_148 : f32 to vector<1x1024xf32>
    %232 = arith.maximumf %230, %231 : vector<1x1024xf32>
    %233 = vector.broadcast %223 : vector<1x1024xf32> to vector<8x1024xf32>
    %234 = arith.subf %217, %233 : vector<8x1024xf32>
    %cst_149 = arith.constant 9.99999974E-6 : f32
    %235 = vector.broadcast %cst_149 : f32 to vector<1x1024xf32>
    %236 = arith.addf %232, %235 : vector<1x1024xf32>
    %237 = math.rsqrt %236 : vector<1x1024xf32>
    %238 = vector.broadcast %237 : vector<1x1024xf32> to vector<8x1024xf32>
    %239 = arith.mulf %234, %238 : vector<8x1024xf32>
    %240 = vector.broadcast %218 : vector<1x1024xf32> to vector<8x1024xf32>
    %241 = arith.mulf %239, %240 : vector<8x1024xf32>
    %242 = vector.broadcast %219 : vector<1x1024xf32> to vector<8x1024xf32>
    %243 = arith.addf %241, %242 : vector<8x1024xf32>
    %cst_150 = arith.constant 0.000000e+00 : f32
    %244 = vector.broadcast %cst_150 : f32 to vector<8x1024xf32>
    %245 = arith.maximumf %243, %244 : vector<8x1024xf32>
    %c1_i32_151 = arith.constant 1 : i32
    %246 = tpu.memref_slice %arg62[%c1_i32_151] : memref<2x!tpu.dma_semaphore, #tpu.memory_space<semaphore_mem>> -> memref<1x!tpu.dma_semaphore, #tpu.memory_space<semaphore_mem>>
    %247 = tpu.memref_squeeze %246 : memref<1x!tpu.dma_semaphore, #tpu.memory_space<semaphore_mem>> -> memref<!tpu.dma_semaphore, #tpu.memory_space<semaphore_mem>>
    tpu.wait_dma2 semaphore(%247 : memref<!tpu.dma_semaphore, #tpu.memory_space<semaphore_mem>>) src(%arg24 : memref<1024x256xbf16, #tpu.memory_space<any>>) dst(%arg61 : memref<1024x256xbf16, #tpu.memory_space<vmem>>)
    %c0_152 = arith.constant 0 : index
    %c0_153 = arith.constant 0 : index
    %248 = vector.load %arg61[%c0_152, %c0_153] : memref<1024x256xbf16, #tpu.memory_space<vmem>>, vector<1024x256xbf16>
    %249 = arith.truncf %245 : vector<8x1024xf32> to vector<8x1024xbf16>
    %cst_154 = arith.constant dense<0.000000e+00> : vector<8x256xf32>
    %250 = tpu.matmul %249, %248, %cst_154 {dimension_numbers = #tpu.dot_dimension_numbers<[1], [0], [0], [1], [0, 0, 1, 1], [], []>} : vector<8x1024xbf16>, vector<1024x256xbf16>, vector<8x256xf32> -> vector<8x256xf32>
    %c0_155 = arith.constant 0 : index
    %c0_156 = arith.constant 0 : index
    %251 = vector.load %arg25[%c0_155, %c0_156] : memref<13x256xbf16, #tpu.memory_space<vmem>>, vector<13x256xbf16>
    %252 = arith.truncf %203 : vector<8x13xf32> to vector<8x13xbf16>
    %cst_157 = arith.constant dense<0.000000e+00> : vector<8x256xf32>
    %253 = tpu.matmul %252, %251, %cst_157 {dimension_numbers = #tpu.dot_dimension_numbers<[1], [0], [0], [1], [0, 0, 1, 1], [], []>} : vector<8x13xbf16>, vector<13x256xbf16>, vector<8x256xf32> -> vector<8x256xf32>
    %254 = arith.addf %250, %253 : vector<8x256xf32>
    %c0_158 = arith.constant 0 : index
    %c0_159 = arith.constant 0 : index
    %255 = vector.load %arg26[%c0_158, %c0_159] : memref<1x256xf32, #tpu.memory_space<vmem>>, vector<1x256xf32>
    %256 = vector.broadcast %255 : vector<1x256xf32> to vector<8x256xf32>
    %257 = arith.addf %254, %256 : vector<8x256xf32>
    %c0_160 = arith.constant 0 : index
    %c0_161 = arith.constant 0 : index
    %258 = vector.load %arg27[%c0_160, %c0_161] : memref<1x256xf32, #tpu.memory_space<vmem>>, vector<1x256xf32>
    %c0_162 = arith.constant 0 : index
    %c0_163 = arith.constant 0 : index
    %259 = vector.load %arg28[%c0_162, %c0_163] : memref<1x256xf32, #tpu.memory_space<vmem>>, vector<1x256xf32>
    %cst_164 = arith.constant dense<0.000000e+00> : vector<256xf32>
    %260 = vector.multi_reduction <add>, %257, %cst_164 [0] : vector<8x256xf32> to vector<256xf32>
    %261 = vector.shape_cast %260 : vector<256xf32> to vector<1x256xf32>
    %cst_165 = arith.constant 1.250000e-01 : f32
    %262 = vector.broadcast %cst_165 : f32 to vector<1x256xf32>
    %263 = arith.mulf %261, %262 : vector<1x256xf32>
    %264 = arith.mulf %257, %257 : vector<8x256xf32>
    %cst_166 = arith.constant dense<0.000000e+00> : vector<256xf32>
    %265 = vector.multi_reduction <add>, %264, %cst_166 [0] : vector<8x256xf32> to vector<256xf32>
    %266 = vector.shape_cast %265 : vector<256xf32> to vector<1x256xf32>
    %cst_167 = arith.constant 1.250000e-01 : f32
    %267 = vector.broadcast %cst_167 : f32 to vector<1x256xf32>
    %268 = arith.mulf %266, %267 : vector<1x256xf32>
    %269 = arith.mulf %263, %263 : vector<1x256xf32>
    %270 = arith.subf %268, %269 : vector<1x256xf32>
    %cst_168 = arith.constant 0.000000e+00 : f32
    %271 = vector.broadcast %cst_168 : f32 to vector<1x256xf32>
    %272 = arith.maximumf %270, %271 : vector<1x256xf32>
    %273 = vector.broadcast %263 : vector<1x256xf32> to vector<8x256xf32>
    %274 = arith.subf %257, %273 : vector<8x256xf32>
    %cst_169 = arith.constant 9.99999974E-6 : f32
    %275 = vector.broadcast %cst_169 : f32 to vector<1x256xf32>
    %276 = arith.addf %272, %275 : vector<1x256xf32>
    %277 = math.rsqrt %276 : vector<1x256xf32>
    %278 = vector.broadcast %277 : vector<1x256xf32> to vector<8x256xf32>
    %279 = arith.mulf %274, %278 : vector<8x256xf32>
    %280 = vector.broadcast %258 : vector<1x256xf32> to vector<8x256xf32>
    %281 = arith.mulf %279, %280 : vector<8x256xf32>
    %282 = vector.broadcast %259 : vector<1x256xf32> to vector<8x256xf32>
    %283 = arith.addf %281, %282 : vector<8x256xf32>
    %cst_170 = arith.constant 0.000000e+00 : f32
    %284 = vector.broadcast %cst_170 : f32 to vector<8x256xf32>
    %285 = arith.maximumf %283, %284 : vector<8x256xf32>
    %286 = vector.extract_strided_slice %285 {offsets = [0, 0], sizes = [8, 128], strides = [1, 1]} : vector<8x256xf32> to vector<8x128xf32>
    %287 = arith.truncf %286 : vector<8x128xf32> to vector<8x128xbf16>
    %c0_171 = arith.constant 0 : index
    %c0_172 = arith.constant 0 : index
    %288 = vector.load %arg56[%c0_171, %c0_172] : memref<16x128xbf16, #tpu.memory_space<vmem>>, vector<8x128xbf16>
    tpu.vector_store %arg56[%c0_171, %c0_172], %287 {strides = array<i32>} : memref<16x128xbf16, #tpu.memory_space<vmem>>, vector<8x128xbf16>,
    %289 = vector.extract_strided_slice %285 {offsets = [0, 128], sizes = [8, 128], strides = [1, 1]} : vector<8x256xf32> to vector<8x128xf32>
    %290 = arith.truncf %289 : vector<8x128xf32> to vector<8x128xbf16>
    %c8_173 = arith.constant 8 : index
    %c0_174 = arith.constant 0 : index
    %291 = vector.load %arg56[%c8_173, %c0_174] : memref<16x128xbf16, #tpu.memory_space<vmem>>, vector<8x128xbf16>
    tpu.vector_store %arg56[%c8_173, %c0_174], %290 {strides = array<i32>} : memref<16x128xbf16, #tpu.memory_space<vmem>>, vector<8x128xbf16>,
    %c0_175 = arith.constant 0 : index
    %c0_176 = arith.constant 0 : index
    %292 = vector.load %arg56[%c0_175, %c0_176] : memref<16x128xbf16, #tpu.memory_space<vmem>>, vector<16x128xbf16>
    %c0_177 = arith.constant 0 : index
    %c0_178 = arith.constant 0 : index
    %293 = vector.load %arg55[%c0_177, %c0_178] : memref<16x16xbf16, #tpu.memory_space<vmem>>, vector<16x16xbf16>
    %294 = vector.extract_strided_slice %204 {offsets = [0, 0], sizes = [16, 13], strides = [1, 1]} : vector<128x13xf32> to vector<16x13xf32>
    %c0_179 = arith.constant 0 : index
    %c0_180 = arith.constant 0 : index
    %295 = vector.load %arg29[%c0_179, %c0_180] : memref<128x256xbf16, #tpu.memory_space<vmem>>, vector<128x256xbf16>
    %cst_181 = arith.constant dense<0.000000e+00> : vector<16x256xf32>
    %296 = tpu.matmul %292, %295, %cst_181 {dimension_numbers = #tpu.dot_dimension_numbers<[1], [0], [0], [1], [0, 0, 1, 1], [], []>} : vector<16x128xbf16>, vector<128x256xbf16>, vector<16x256xf32> -> vector<16x256xf32>
    %c0_182 = arith.constant 0 : index
    %c0_183 = arith.constant 0 : index
    %297 = vector.load %arg30[%c0_182, %c0_183] : memref<13x256xbf16, #tpu.memory_space<vmem>>, vector<13x256xbf16>
    %298 = arith.truncf %294 : vector<16x13xf32> to vector<16x13xbf16>
    %cst_184 = arith.constant dense<0.000000e+00> : vector<16x256xf32>
    %299 = tpu.matmul %298, %297, %cst_184 {dimension_numbers = #tpu.dot_dimension_numbers<[1], [0], [0], [1], [0, 0, 1, 1], [], []>} : vector<16x13xbf16>, vector<13x256xbf16>, vector<16x256xf32> -> vector<16x256xf32>
    %300 = arith.addf %296, %299 : vector<16x256xf32>
    %c0_185 = arith.constant 0 : index
    %c0_186 = arith.constant 0 : index
    %301 = vector.load %arg31[%c0_185, %c0_186] : memref<16x256xbf16, #tpu.memory_space<vmem>>, vector<16x256xbf16>
    %cst_187 = arith.constant dense<0.000000e+00> : vector<16x256xf32>
    %302 = tpu.matmul %293, %301, %cst_187 {dimension_numbers = #tpu.dot_dimension_numbers<[1], [0], [0], [1], [0, 0, 1, 1], [], []>} : vector<16x16xbf16>, vector<16x256xbf16>, vector<16x256xf32> -> vector<16x256xf32>
    %303 = arith.addf %300, %302 : vector<16x256xf32>
    %c0_188 = arith.constant 0 : index
    %c0_189 = arith.constant 0 : index
    %304 = vector.load %arg32[%c0_188, %c0_189] : memref<1x256xf32, #tpu.memory_space<vmem>>, vector<1x256xf32>
    %305 = vector.broadcast %304 : vector<1x256xf32> to vector<16x256xf32>
    %306 = arith.addf %303, %305 : vector<16x256xf32>
    %307 = vector.extract_strided_slice %306 {offsets = [0, 0], sizes = [16, 128], strides = [1, 1]} : vector<16x256xf32> to vector<16x128xf32>
    %308 = vector.extract_strided_slice %306 {offsets = [0, 128], sizes = [16, 128], strides = [1, 1]} : vector<16x256xf32> to vector<16x128xf32>
    %cst_190 = arith.constant dense<0.000000e+00> : vector<128xf32>
    %309 = vector.multi_reduction <add>, %307, %cst_190 [0] : vector<16x128xf32> to vector<128xf32>
    %310 = vector.shape_cast %309 : vector<128xf32> to vector<1x128xf32>
    %cst_191 = arith.constant dense<0.000000e+00> : vector<128xf32>
    %311 = vector.multi_reduction <add>, %308, %cst_191 [0] : vector<16x128xf32> to vector<128xf32>
    %312 = vector.shape_cast %311 : vector<128xf32> to vector<1x128xf32>
    %313 = arith.addf %310, %312 : vector<1x128xf32>
    %cst_192 = arith.constant 3.125000e-02 : f32
    %314 = vector.broadcast %cst_192 : f32 to vector<1x128xf32>
    %315 = arith.mulf %313, %314 : vector<1x128xf32>
    %316 = arith.mulf %307, %307 : vector<16x128xf32>
    %cst_193 = arith.constant dense<0.000000e+00> : vector<128xf32>
    %317 = vector.multi_reduction <add>, %316, %cst_193 [0] : vector<16x128xf32> to vector<128xf32>
    %318 = vector.shape_cast %317 : vector<128xf32> to vector<1x128xf32>
    %319 = arith.mulf %308, %308 : vector<16x128xf32>
    %cst_194 = arith.constant dense<0.000000e+00> : vector<128xf32>
    %320 = vector.multi_reduction <add>, %319, %cst_194 [0] : vector<16x128xf32> to vector<128xf32>
    %321 = vector.shape_cast %320 : vector<128xf32> to vector<1x128xf32>
    %322 = arith.addf %318, %321 : vector<1x128xf32>
    %cst_195 = arith.constant 3.125000e-02 : f32
    %323 = vector.broadcast %cst_195 : f32 to vector<1x128xf32>
    %324 = arith.mulf %322, %323 : vector<1x128xf32>
    %325 = arith.mulf %315, %315 : vector<1x128xf32>
    %326 = arith.subf %324, %325 : vector<1x128xf32>
    %cst_196 = arith.constant 0.000000e+00 : f32
    %327 = vector.broadcast %cst_196 : f32 to vector<1x128xf32>
    %328 = arith.maximumf %326, %327 : vector<1x128xf32>
    %c0_197 = arith.constant 0 : index
    %c0_198 = arith.constant 0 : index
    %329 = vector.load %arg33[%c0_197, %c0_198] : memref<1x128xf32, #tpu.memory_space<vmem>>, vector<1x128xf32>
    %cst_199 = arith.constant 9.99999974E-6 : f32
    %330 = vector.broadcast %cst_199 : f32 to vector<1x128xf32>
    %331 = arith.addf %328, %330 : vector<1x128xf32>
    %332 = math.rsqrt %331 : vector<1x128xf32>
    %333 = arith.mulf %329, %332 : vector<1x128xf32>
    %c0_200 = arith.constant 0 : index
    %c0_201 = arith.constant 0 : index
    %334 = vector.load %arg34[%c0_200, %c0_201] : memref<1x128xf32, #tpu.memory_space<vmem>>, vector<1x128xf32>
    %335 = arith.mulf %315, %333 : vector<1x128xf32>
    %336 = arith.subf %334, %335 : vector<1x128xf32>
    %337 = vector.broadcast %333 : vector<1x128xf32> to vector<16x128xf32>
    %338 = arith.mulf %307, %337 : vector<16x128xf32>
    %339 = vector.broadcast %336 : vector<1x128xf32> to vector<16x128xf32>
    %340 = arith.addf %338, %339 : vector<16x128xf32>
    %cst_202 = arith.constant 0.000000e+00 : f32
    %341 = vector.broadcast %cst_202 : f32 to vector<16x128xf32>
    %342 = arith.maximumf %340, %341 : vector<16x128xf32>
    %343 = arith.truncf %342 : vector<16x128xf32> to vector<16x128xbf16>
    %c0_203 = arith.constant 0 : index
    %c0_204 = arith.constant 0 : index
    %344 = vector.load %arg57[%c0_203, %c0_204] : memref<32x128xbf16, #tpu.memory_space<vmem>>, vector<16x128xbf16>
    tpu.vector_store %arg57[%c0_203, %c0_204], %343 {strides = array<i32>} : memref<32x128xbf16, #tpu.memory_space<vmem>>, vector<16x128xbf16>,
    %345 = vector.broadcast %333 : vector<1x128xf32> to vector<16x128xf32>
    %346 = arith.mulf %308, %345 : vector<16x128xf32>
    %347 = vector.broadcast %336 : vector<1x128xf32> to vector<16x128xf32>
    %348 = arith.addf %346, %347 : vector<16x128xf32>
    %cst_205 = arith.constant 0.000000e+00 : f32
    %349 = vector.broadcast %cst_205 : f32 to vector<16x128xf32>
    %350 = arith.maximumf %348, %349 : vector<16x128xf32>
    %351 = arith.truncf %350 : vector<16x128xf32> to vector<16x128xbf16>
    %c16_206 = arith.constant 16 : index
    %c0_207 = arith.constant 0 : index
    %352 = vector.load %arg57[%c16_206, %c0_207] : memref<32x128xbf16, #tpu.memory_space<vmem>>, vector<16x128xbf16>
    tpu.vector_store %arg57[%c16_206, %c0_207], %351 {strides = array<i32>} : memref<32x128xbf16, #tpu.memory_space<vmem>>, vector<16x128xbf16>,
    %c0_208 = arith.constant 0 : index
    %c0_209 = arith.constant 0 : index
    %353 = vector.load %arg57[%c0_208, %c0_209] : memref<32x128xbf16, #tpu.memory_space<vmem>>, vector<32x128xbf16>
    %c0_210 = arith.constant 0 : index
    %c0_211 = arith.constant 0 : index
    %354 = vector.load %arg54[%c0_210, %c0_211] : memref<32x16xbf16, #tpu.memory_space<vmem>>, vector<32x16xbf16>
    %355 = vector.extract_strided_slice %204 {offsets = [0, 0], sizes = [32, 13], strides = [1, 1]} : vector<128x13xf32> to vector<32x13xf32>
    %c0_212 = arith.constant 0 : index
    %c0_213 = arith.constant 0 : index
    %356 = vector.load %arg35[%c0_212, %c0_213] : memref<128x256xbf16, #tpu.memory_space<vmem>>, vector<128x256xbf16>
    %cst_214 = arith.constant dense<0.000000e+00> : vector<32x256xf32>
    %357 = tpu.matmul %353, %356, %cst_214 {dimension_numbers = #tpu.dot_dimension_numbers<[1], [0], [0], [1], [0, 0, 1, 1], [], []>} : vector<32x128xbf16>, vector<128x256xbf16>, vector<32x256xf32> -> vector<32x256xf32>
    %c0_215 = arith.constant 0 : index
    %c0_216 = arith.constant 0 : index
    %358 = vector.load %arg36[%c0_215, %c0_216] : memref<13x256xbf16, #tpu.memory_space<vmem>>, vector<13x256xbf16>
    %359 = arith.truncf %355 : vector<32x13xf32> to vector<32x13xbf16>
    %cst_217 = arith.constant dense<0.000000e+00> : vector<32x256xf32>
    %360 = tpu.matmul %359, %358, %cst_217 {dimension_numbers = #tpu.dot_dimension_numbers<[1], [0], [0], [1], [0, 0, 1, 1], [], []>} : vector<32x13xbf16>, vector<13x256xbf16>, vector<32x256xf32> -> vector<32x256xf32>
    %361 = arith.addf %357, %360 : vector<32x256xf32>
    %c0_218 = arith.constant 0 : index
    %c0_219 = arith.constant 0 : index
    %362 = vector.load %arg37[%c0_218, %c0_219] : memref<16x256xbf16, #tpu.memory_space<vmem>>, vector<16x256xbf16>
    %cst_220 = arith.constant dense<0.000000e+00> : vector<32x256xf32>
    %363 = tpu.matmul %354, %362, %cst_220 {dimension_numbers = #tpu.dot_dimension_numbers<[1], [0], [0], [1], [0, 0, 1, 1], [], []>} : vector<32x16xbf16>, vector<16x256xbf16>, vector<32x256xf32> -> vector<32x256xf32>
    %364 = arith.addf %361, %363 : vector<32x256xf32>
    %c0_221 = arith.constant 0 : index
    %c0_222 = arith.constant 0 : index
    %365 = vector.load %arg38[%c0_221, %c0_222] : memref<1x256xf32, #tpu.memory_space<vmem>>, vector<1x256xf32>
    %366 = vector.broadcast %365 : vector<1x256xf32> to vector<32x256xf32>
    %367 = arith.addf %364, %366 : vector<32x256xf32>
    %368 = vector.extract_strided_slice %367 {offsets = [0, 0], sizes = [32, 128], strides = [1, 1]} : vector<32x256xf32> to vector<32x128xf32>
    %369 = vector.extract_strided_slice %367 {offsets = [0, 128], sizes = [32, 128], strides = [1, 1]} : vector<32x256xf32> to vector<32x128xf32>
    %cst_223 = arith.constant dense<0.000000e+00> : vector<128xf32>
    %370 = vector.multi_reduction <add>, %368, %cst_223 [0] : vector<32x128xf32> to vector<128xf32>
    %371 = vector.shape_cast %370 : vector<128xf32> to vector<1x128xf32>
    %cst_224 = arith.constant dense<0.000000e+00> : vector<128xf32>
    %372 = vector.multi_reduction <add>, %369, %cst_224 [0] : vector<32x128xf32> to vector<128xf32>
    %373 = vector.shape_cast %372 : vector<128xf32> to vector<1x128xf32>
    %374 = arith.addf %371, %373 : vector<1x128xf32>
    %cst_225 = arith.constant 1.562500e-02 : f32
    %375 = vector.broadcast %cst_225 : f32 to vector<1x128xf32>
    %376 = arith.mulf %374, %375 : vector<1x128xf32>
    %377 = arith.mulf %368, %368 : vector<32x128xf32>
    %cst_226 = arith.constant dense<0.000000e+00> : vector<128xf32>
    %378 = vector.multi_reduction <add>, %377, %cst_226 [0] : vector<32x128xf32> to vector<128xf32>
    %379 = vector.shape_cast %378 : vector<128xf32> to vector<1x128xf32>
    %380 = arith.mulf %369, %369 : vector<32x128xf32>
    %cst_227 = arith.constant dense<0.000000e+00> : vector<128xf32>
    %381 = vector.multi_reduction <add>, %380, %cst_227 [0] : vector<32x128xf32> to vector<128xf32>
    %382 = vector.shape_cast %381 : vector<128xf32> to vector<1x128xf32>
    %383 = arith.addf %379, %382 : vector<1x128xf32>
    %cst_228 = arith.constant 1.562500e-02 : f32
    %384 = vector.broadcast %cst_228 : f32 to vector<1x128xf32>
    %385 = arith.mulf %383, %384 : vector<1x128xf32>
    %386 = arith.mulf %376, %376 : vector<1x128xf32>
    %387 = arith.subf %385, %386 : vector<1x128xf32>
    %cst_229 = arith.constant 0.000000e+00 : f32
    %388 = vector.broadcast %cst_229 : f32 to vector<1x128xf32>
    %389 = arith.maximumf %387, %388 : vector<1x128xf32>
    %c0_230 = arith.constant 0 : index
    %c0_231 = arith.constant 0 : index
    %390 = vector.load %arg39[%c0_230, %c0_231] : memref<1x128xf32, #tpu.memory_space<vmem>>, vector<1x128xf32>
    %cst_232 = arith.constant 9.99999974E-6 : f32
    %391 = vector.broadcast %cst_232 : f32 to vector<1x128xf32>
    %392 = arith.addf %389, %391 : vector<1x128xf32>
    %393 = math.rsqrt %392 : vector<1x128xf32>
    %394 = arith.mulf %390, %393 : vector<1x128xf32>
    %c0_233 = arith.constant 0 : index
    %c0_234 = arith.constant 0 : index
    %395 = vector.load %arg40[%c0_233, %c0_234] : memref<1x128xf32, #tpu.memory_space<vmem>>, vector<1x128xf32>
    %396 = arith.mulf %376, %394 : vector<1x128xf32>
    %397 = arith.subf %395, %396 : vector<1x128xf32>
    %398 = vector.broadcast %394 : vector<1x128xf32> to vector<32x128xf32>
    %399 = arith.mulf %368, %398 : vector<32x128xf32>
    %400 = vector.broadcast %397 : vector<1x128xf32> to vector<32x128xf32>
    %401 = arith.addf %399, %400 : vector<32x128xf32>
    %cst_235 = arith.constant 0.000000e+00 : f32
    %402 = vector.broadcast %cst_235 : f32 to vector<32x128xf32>
    %403 = arith.maximumf %401, %402 : vector<32x128xf32>
    %404 = arith.truncf %403 : vector<32x128xf32> to vector<32x128xbf16>
    %c0_236 = arith.constant 0 : index
    %c0_237 = arith.constant 0 : index
    %405 = vector.load %arg58[%c0_236, %c0_237] : memref<64x128xbf16, #tpu.memory_space<vmem>>, vector<32x128xbf16>
    tpu.vector_store %arg58[%c0_236, %c0_237], %404 {strides = array<i32>} : memref<64x128xbf16, #tpu.memory_space<vmem>>, vector<32x128xbf16>,
    %406 = vector.broadcast %394 : vector<1x128xf32> to vector<32x128xf32>
    %407 = arith.mulf %369, %406 : vector<32x128xf32>
    %408 = vector.broadcast %397 : vector<1x128xf32> to vector<32x128xf32>
    %409 = arith.addf %407, %408 : vector<32x128xf32>
    %cst_238 = arith.constant 0.000000e+00 : f32
    %410 = vector.broadcast %cst_238 : f32 to vector<32x128xf32>
    %411 = arith.maximumf %409, %410 : vector<32x128xf32>
    %412 = arith.truncf %411 : vector<32x128xf32> to vector<32x128xbf16>
    %c32_239 = arith.constant 32 : index
    %c0_240 = arith.constant 0 : index
    %413 = vector.load %arg58[%c32_239, %c0_240] : memref<64x128xbf16, #tpu.memory_space<vmem>>, vector<32x128xbf16>
    tpu.vector_store %arg58[%c32_239, %c0_240], %412 {strides = array<i32>} : memref<64x128xbf16, #tpu.memory_space<vmem>>, vector<32x128xbf16>,
    %c0_241 = arith.constant 0 : index
    %c0_242 = arith.constant 0 : index
    %414 = vector.load %arg58[%c0_241, %c0_242] : memref<64x128xbf16, #tpu.memory_space<vmem>>, vector<64x128xbf16>
    %c0_243 = arith.constant 0 : index
    %c0_244 = arith.constant 0 : index
    %415 = vector.load %arg53[%c0_243, %c0_244] : memref<64x16xbf16, #tpu.memory_space<vmem>>, vector<64x16xbf16>
    %416 = vector.extract_strided_slice %204 {offsets = [0, 0], sizes = [64, 13], strides = [1, 1]} : vector<128x13xf32> to vector<64x13xf32>
    %c0_245 = arith.constant 0 : index
    %c0_246 = arith.constant 0 : index
    %417 = vector.load %arg41[%c0_245, %c0_246] : memref<128x256xbf16, #tpu.memory_space<vmem>>, vector<128x256xbf16>
    %cst_247 = arith.constant dense<0.000000e+00> : vector<64x256xf32>
    %418 = tpu.matmul %414, %417, %cst_247 {dimension_numbers = #tpu.dot_dimension_numbers<[1], [0], [0], [1], [0, 0, 1, 1], [], []>} : vector<64x128xbf16>, vector<128x256xbf16>, vector<64x256xf32> -> vector<64x256xf32>
    %c0_248 = arith.constant 0 : index
    %c0_249 = arith.constant 0 : index
    %419 = vector.load %arg42[%c0_248, %c0_249] : memref<13x256xbf16, #tpu.memory_space<vmem>>, vector<13x256xbf16>
    %420 = arith.truncf %416 : vector<64x13xf32> to vector<64x13xbf16>
    %cst_250 = arith.constant dense<0.000000e+00> : vector<64x256xf32>
    %421 = tpu.matmul %420, %419, %cst_250 {dimension_numbers = #tpu.dot_dimension_numbers<[1], [0], [0], [1], [0, 0, 1, 1], [], []>} : vector<64x13xbf16>, vector<13x256xbf16>, vector<64x256xf32> -> vector<64x256xf32>
    %422 = arith.addf %418, %421 : vector<64x256xf32>
    %c0_251 = arith.constant 0 : index
    %c0_252 = arith.constant 0 : index
    %423 = vector.load %arg43[%c0_251, %c0_252] : memref<16x256xbf16, #tpu.memory_space<vmem>>, vector<16x256xbf16>
    %cst_253 = arith.constant dense<0.000000e+00> : vector<64x256xf32>
    %424 = tpu.matmul %415, %423, %cst_253 {dimension_numbers = #tpu.dot_dimension_numbers<[1], [0], [0], [1], [0, 0, 1, 1], [], []>} : vector<64x16xbf16>, vector<16x256xbf16>, vector<64x256xf32> -> vector<64x256xf32>
    %425 = arith.addf %422, %424 : vector<64x256xf32>
    %c0_254 = arith.constant 0 : index
    %c0_255 = arith.constant 0 : index
    %426 = vector.load %arg44[%c0_254, %c0_255] : memref<1x256xf32, #tpu.memory_space<vmem>>, vector<1x256xf32>
    %427 = vector.broadcast %426 : vector<1x256xf32> to vector<64x256xf32>
    %428 = arith.addf %425, %427 : vector<64x256xf32>
    %429 = vector.extract_strided_slice %428 {offsets = [0, 0], sizes = [64, 128], strides = [1, 1]} : vector<64x256xf32> to vector<64x128xf32>
    %430 = vector.extract_strided_slice %428 {offsets = [0, 128], sizes = [64, 128], strides = [1, 1]} : vector<64x256xf32> to vector<64x128xf32>
    %cst_256 = arith.constant dense<0.000000e+00> : vector<128xf32>
    %431 = vector.multi_reduction <add>, %429, %cst_256 [0] : vector<64x128xf32> to vector<128xf32>
    %432 = vector.shape_cast %431 : vector<128xf32> to vector<1x128xf32>
    %cst_257 = arith.constant dense<0.000000e+00> : vector<128xf32>
    %433 = vector.multi_reduction <add>, %430, %cst_257 [0] : vector<64x128xf32> to vector<128xf32>
    %434 = vector.shape_cast %433 : vector<128xf32> to vector<1x128xf32>
    %435 = arith.addf %432, %434 : vector<1x128xf32>
    %cst_258 = arith.constant 7.812500e-03 : f32
    %436 = vector.broadcast %cst_258 : f32 to vector<1x128xf32>
    %437 = arith.mulf %435, %436 : vector<1x128xf32>
    %438 = arith.mulf %429, %429 : vector<64x128xf32>
    %cst_259 = arith.constant dense<0.000000e+00> : vector<128xf32>
    %439 = vector.multi_reduction <add>, %438, %cst_259 [0] : vector<64x128xf32> to vector<128xf32>
    %440 = vector.shape_cast %439 : vector<128xf32> to vector<1x128xf32>
    %441 = arith.mulf %430, %430 : vector<64x128xf32>
    %cst_260 = arith.constant dense<0.000000e+00> : vector<128xf32>
    %442 = vector.multi_reduction <add>, %441, %cst_260 [0] : vector<64x128xf32> to vector<128xf32>
    %443 = vector.shape_cast %442 : vector<128xf32> to vector<1x128xf32>
    %444 = arith.addf %440, %443 : vector<1x128xf32>
    %cst_261 = arith.constant 7.812500e-03 : f32
    %445 = vector.broadcast %cst_261 : f32 to vector<1x128xf32>
    %446 = arith.mulf %444, %445 : vector<1x128xf32>
    %447 = arith.mulf %437, %437 : vector<1x128xf32>
    %448 = arith.subf %446, %447 : vector<1x128xf32>
    %cst_262 = arith.constant 0.000000e+00 : f32
    %449 = vector.broadcast %cst_262 : f32 to vector<1x128xf32>
    %450 = arith.maximumf %448, %449 : vector<1x128xf32>
    %c0_263 = arith.constant 0 : index
    %c0_264 = arith.constant 0 : index
    %451 = vector.load %arg45[%c0_263, %c0_264] : memref<1x128xf32, #tpu.memory_space<vmem>>, vector<1x128xf32>
    %cst_265 = arith.constant 9.99999974E-6 : f32
    %452 = vector.broadcast %cst_265 : f32 to vector<1x128xf32>
    %453 = arith.addf %450, %452 : vector<1x128xf32>
    %454 = math.rsqrt %453 : vector<1x128xf32>
    %455 = arith.mulf %451, %454 : vector<1x128xf32>
    %c0_266 = arith.constant 0 : index
    %c0_267 = arith.constant 0 : index
    %456 = vector.load %arg46[%c0_266, %c0_267] : memref<1x128xf32, #tpu.memory_space<vmem>>, vector<1x128xf32>
    %457 = arith.mulf %437, %455 : vector<1x128xf32>
    %458 = arith.subf %456, %457 : vector<1x128xf32>
    %459 = vector.broadcast %455 : vector<1x128xf32> to vector<64x128xf32>
    %460 = arith.mulf %429, %459 : vector<64x128xf32>
    %461 = vector.broadcast %458 : vector<1x128xf32> to vector<64x128xf32>
    %462 = arith.addf %460, %461 : vector<64x128xf32>
    %cst_268 = arith.constant 0.000000e+00 : f32
    %463 = vector.broadcast %cst_268 : f32 to vector<64x128xf32>
    %464 = arith.maximumf %462, %463 : vector<64x128xf32>
    %465 = arith.truncf %464 : vector<64x128xf32> to vector<64x128xbf16>
    %c0_269 = arith.constant 0 : index
    %c0_270 = arith.constant 0 : index
    %466 = vector.load %arg59[%c0_269, %c0_270] : memref<128x128xbf16, #tpu.memory_space<vmem>>, vector<64x128xbf16>
    tpu.vector_store %arg59[%c0_269, %c0_270], %465 {strides = array<i32>} : memref<128x128xbf16, #tpu.memory_space<vmem>>, vector<64x128xbf16>,
    %467 = vector.broadcast %455 : vector<1x128xf32> to vector<64x128xf32>
    %468 = arith.mulf %430, %467 : vector<64x128xf32>
    %469 = vector.broadcast %458 : vector<1x128xf32> to vector<64x128xf32>
    %470 = arith.addf %468, %469 : vector<64x128xf32>
    %cst_271 = arith.constant 0.000000e+00 : f32
    %471 = vector.broadcast %cst_271 : f32 to vector<64x128xf32>
    %472 = arith.maximumf %470, %471 : vector<64x128xf32>
    %473 = arith.truncf %472 : vector<64x128xf32> to vector<64x128xbf16>
    %c64_272 = arith.constant 64 : index
    %c0_273 = arith.constant 0 : index
    %474 = vector.load %arg59[%c64_272, %c0_273] : memref<128x128xbf16, #tpu.memory_space<vmem>>, vector<64x128xbf16>
    tpu.vector_store %arg59[%c64_272, %c0_273], %473 {strides = array<i32>} : memref<128x128xbf16, #tpu.memory_space<vmem>>, vector<64x128xbf16>,
    %c0_274 = arith.constant 0 : index
    %c0_275 = arith.constant 0 : index
    %475 = vector.load %arg59[%c0_274, %c0_275] : memref<128x128xbf16, #tpu.memory_space<vmem>>, vector<128x128xbf16>
    %c0_276 = arith.constant 0 : index
    %c0_277 = arith.constant 0 : index
    %476 = vector.load %arg47[%c0_276, %c0_277] : memref<128x128xbf16, #tpu.memory_space<vmem>>, vector<128x128xbf16>
    %cst_278 = arith.constant dense<0.000000e+00> : vector<128x128xf32>
    %477 = tpu.matmul %475, %476, %cst_278 {dimension_numbers = #tpu.dot_dimension_numbers<[1], [0], [0], [1], [0, 0, 1, 1], [], []>} : vector<128x128xbf16>, vector<128x128xbf16>, vector<128x128xf32> -> vector<128x128xf32>
    %c0_279 = arith.constant 0 : index
    %c0_280 = arith.constant 0 : index
    %478 = vector.load %arg48[%c0_279, %c0_280] : memref<13x128xbf16, #tpu.memory_space<vmem>>, vector<13x128xbf16>
    %479 = arith.truncf %204 : vector<128x13xf32> to vector<128x13xbf16>
    %cst_281 = arith.constant dense<0.000000e+00> : vector<128x128xf32>
    %480 = tpu.matmul %479, %478, %cst_281 {dimension_numbers = #tpu.dot_dimension_numbers<[1], [0], [0], [1], [0, 0, 1, 1], [], []>} : vector<128x13xbf16>, vector<13x128xbf16>, vector<128x128xf32> -> vector<128x128xf32>
    %481 = arith.addf %477, %480 : vector<128x128xf32>
    %c0_282 = arith.constant 0 : index
    %c0_283 = arith.constant 0 : index
    %482 = vector.load %arg52[%c0_282, %c0_283] : memref<128x16xbf16, #tpu.memory_space<vmem>>, vector<128x16xbf16>
    %c0_284 = arith.constant 0 : index
    %c0_285 = arith.constant 0 : index
    %483 = vector.load %arg49[%c0_284, %c0_285] : memref<16x128xbf16, #tpu.memory_space<vmem>>, vector<16x128xbf16>
    %cst_286 = arith.constant dense<0.000000e+00> : vector<128x128xf32>
    %484 = tpu.matmul %482, %483, %cst_286 {dimension_numbers = #tpu.dot_dimension_numbers<[1], [0], [0], [1], [0, 0, 1, 1], [], []>} : vector<128x16xbf16>, vector<16x128xbf16>, vector<128x128xf32> -> vector<128x128xf32>
    %485 = arith.addf %481, %484 : vector<128x128xf32>
    %c0_287 = arith.constant 0 : index
    %c0_288 = arith.constant 0 : index
    %486 = vector.load %arg50[%c0_287, %c0_288] : memref<1x128xf32, #tpu.memory_space<vmem>>, vector<1x128xf32>
    %487 = vector.broadcast %486 : vector<1x128xf32> to vector<128x128xf32>
    %488 = arith.addf %485, %487 : vector<128x128xf32>
    %cst_289 = arith.constant 5.000000e-01 : f32
    %489 = vector.broadcast %cst_289 : f32 to vector<128x128xf32>
    %490 = arith.mulf %489, %488 : vector<128x128xf32>
    %491 = math.tanh %490 : vector<128x128xf32>
    %cst_290 = arith.constant 5.000000e-01 : f32
    %492 = vector.broadcast %cst_290 : f32 to vector<128x128xf32>
    %493 = arith.mulf %492, %491 : vector<128x128xf32>
    %cst_291 = arith.constant 5.000000e-01 : f32
    %494 = vector.broadcast %cst_291 : f32 to vector<128x128xf32>
    %495 = arith.addf %493, %494 : vector<128x128xf32>
    %496 = vector.extract_strided_slice %495 {offsets = [0, 0], sizes = [8, 128], strides = [1, 1]} : vector<128x128xf32> to vector<8x128xf32>
    %c0_292 = arith.constant 0 : index
    %c0_293 = arith.constant 0 : index
    %c0_294 = arith.constant 0 : index
    %497 = vector.load %arg51[%c0_292, %c0_293, %c0_294] : memref<8x16x128xf32, #tpu.memory_space<vmem>>, vector<8x1x128xf32>
    %498 = vector.shape_cast %497 : vector<8x1x128xf32> to vector<8x128xf32>
    %499 = vector.shape_cast %496 : vector<8x128xf32> to vector<8x1x128xf32>
    tpu.vector_store %arg51[%c0_292, %c0_293, %c0_294], %499 {strides = array<i32>} : memref<8x16x128xf32, #tpu.memory_space<vmem>>, vector<8x1x128xf32>,
    %500 = vector.extract_strided_slice %495 {offsets = [8, 0], sizes = [8, 128], strides = [1, 1]} : vector<128x128xf32> to vector<8x128xf32>
    %c0_295 = arith.constant 0 : index
    %c8_296 = arith.constant 8 : index
    %c0_297 = arith.constant 0 : index
    %501 = vector.load %arg51[%c0_295, %c8_296, %c0_297] : memref<8x16x128xf32, #tpu.memory_space<vmem>>, vector<8x1x128xf32>
    %502 = vector.shape_cast %501 : vector<8x1x128xf32> to vector<8x128xf32>
    %503 = vector.shape_cast %500 : vector<8x128xf32> to vector<8x1x128xf32>
    tpu.vector_store %arg51[%c0_295, %c8_296, %c0_297], %503 {strides = array<i32>} : memref<8x16x128xf32, #tpu.memory_space<vmem>>, vector<8x1x128xf32>,
    %504 = vector.extract_strided_slice %495 {offsets = [16, 0], sizes = [8, 128], strides = [1, 1]} : vector<128x128xf32> to vector<8x128xf32>
    %c0_298 = arith.constant 0 : index
    %c4_299 = arith.constant 4 : index
    %c0_300 = arith.constant 0 : index
    %505 = vector.load %arg51[%c0_298, %c4_299, %c0_300] : memref<8x16x128xf32, #tpu.memory_space<vmem>>, vector<8x1x128xf32>
    %506 = vector.shape_cast %505 : vector<8x1x128xf32> to vector<8x128xf32>
    %507 = vector.shape_cast %504 : vector<8x128xf32> to vector<8x1x128xf32>
    tpu.vector_store %arg51[%c0_298, %c4_299, %c0_300], %507 {strides = array<i32>} : memref<8x16x128xf32, #tpu.memory_space<vmem>>, vector<8x1x128xf32>,
    %508 = vector.extract_strided_slice %495 {offsets = [24, 0], sizes = [8, 128], strides = [1, 1]} : vector<128x128xf32> to vector<8x128xf32>
    %c0_301 = arith.constant 0 : index
    %c12_302 = arith.constant 12 : index
    %c0_303 = arith.constant 0 : index
    %509 = vector.load %arg51[%c0_301, %c12_302, %c0_303] : memref<8x16x128xf32, #tpu.memory_space<vmem>>, vector<8x1x128xf32>
    %510 = vector.shape_cast %509 : vector<8x1x128xf32> to vector<8x128xf32>
    %511 = vector.shape_cast %508 : vector<8x128xf32> to vector<8x1x128xf32>
    tpu.vector_store %arg51[%c0_301, %c12_302, %c0_303], %511 {strides = array<i32>} : memref<8x16x128xf32, #tpu.memory_space<vmem>>, vector<8x1x128xf32>,
    %512 = vector.extract_strided_slice %495 {offsets = [32, 0], sizes = [8, 128], strides = [1, 1]} : vector<128x128xf32> to vector<8x128xf32>
    %c0_304 = arith.constant 0 : index
    %c2_305 = arith.constant 2 : index
    %c0_306 = arith.constant 0 : index
    %513 = vector.load %arg51[%c0_304, %c2_305, %c0_306] : memref<8x16x128xf32, #tpu.memory_space<vmem>>, vector<8x1x128xf32>
    %514 = vector.shape_cast %513 : vector<8x1x128xf32> to vector<8x128xf32>
    %515 = vector.shape_cast %512 : vector<8x128xf32> to vector<8x1x128xf32>
    tpu.vector_store %arg51[%c0_304, %c2_305, %c0_306], %515 {strides = array<i32>} : memref<8x16x128xf32, #tpu.memory_space<vmem>>, vector<8x1x128xf32>,
    %516 = vector.extract_strided_slice %495 {offsets = [40, 0], sizes = [8, 128], strides = [1, 1]} : vector<128x128xf32> to vector<8x128xf32>
    %c0_307 = arith.constant 0 : index
    %c10_308 = arith.constant 10 : index
    %c0_309 = arith.constant 0 : index
    %517 = vector.load %arg51[%c0_307, %c10_308, %c0_309] : memref<8x16x128xf32, #tpu.memory_space<vmem>>, vector<8x1x128xf32>
    %518 = vector.shape_cast %517 : vector<8x1x128xf32> to vector<8x128xf32>
    %519 = vector.shape_cast %516 : vector<8x128xf32> to vector<8x1x128xf32>
    tpu.vector_store %arg51[%c0_307, %c10_308, %c0_309], %519 {strides = array<i32>} : memref<8x16x128xf32, #tpu.memory_space<vmem>>, vector<8x1x128xf32>,
    %520 = vector.extract_strided_slice %495 {offsets = [48, 0], sizes = [8, 128], strides = [1, 1]} : vector<128x128xf32> to vector<8x128xf32>
    %c0_310 = arith.constant 0 : index
    %c6_311 = arith.constant 6 : index
    %c0_312 = arith.constant 0 : index
    %521 = vector.load %arg51[%c0_310, %c6_311, %c0_312] : memref<8x16x128xf32, #tpu.memory_space<vmem>>, vector<8x1x128xf32>
    %522 = vector.shape_cast %521 : vector<8x1x128xf32> to vector<8x128xf32>
    %523 = vector.shape_cast %520 : vector<8x128xf32> to vector<8x1x128xf32>
    tpu.vector_store %arg51[%c0_310, %c6_311, %c0_312], %523 {strides = array<i32>} : memref<8x16x128xf32, #tpu.memory_space<vmem>>, vector<8x1x128xf32>,
    %524 = vector.extract_strided_slice %495 {offsets = [56, 0], sizes = [8, 128], strides = [1, 1]} : vector<128x128xf32> to vector<8x128xf32>
    %c0_313 = arith.constant 0 : index
    %c14_314 = arith.constant 14 : index
    %c0_315 = arith.constant 0 : index
    %525 = vector.load %arg51[%c0_313, %c14_314, %c0_315] : memref<8x16x128xf32, #tpu.memory_space<vmem>>, vector<8x1x128xf32>
    %526 = vector.shape_cast %525 : vector<8x1x128xf32> to vector<8x128xf32>
    %527 = vector.shape_cast %524 : vector<8x128xf32> to vector<8x1x128xf32>
    tpu.vector_store %arg51[%c0_313, %c14_314, %c0_315], %527 {strides = array<i32>} : memref<8x16x128xf32, #tpu.memory_space<vmem>>, vector<8x1x128xf32>,
    %528 = vector.extract_strided_slice %495 {offsets = [64, 0], sizes = [8, 128], strides = [1, 1]} : vector<128x128xf32> to vector<8x128xf32>
    %c0_316 = arith.constant 0 : index
    %c1_317 = arith.constant 1 : index
    %c0_318 = arith.constant 0 : index
    %529 = vector.load %arg51[%c0_316, %c1_317, %c0_318] : memref<8x16x128xf32, #tpu.memory_space<vmem>>, vector<8x1x128xf32>
    %530 = vector.shape_cast %529 : vector<8x1x128xf32> to vector<8x128xf32>
    %531 = vector.shape_cast %528 : vector<8x128xf32> to vector<8x1x128xf32>
    tpu.vector_store %arg51[%c0_316, %c1_317, %c0_318], %531 {strides = array<i32>} : memref<8x16x128xf32, #tpu.memory_space<vmem>>, vector<8x1x128xf32>,
    %532 = vector.extract_strided_slice %495 {offsets = [72, 0], sizes = [8, 128], strides = [1, 1]} : vector<128x128xf32> to vector<8x128xf32>
    %c0_319 = arith.constant 0 : index
    %c9_320 = arith.constant 9 : index
    %c0_321 = arith.constant 0 : index
    %533 = vector.load %arg51[%c0_319, %c9_320, %c0_321] : memref<8x16x128xf32, #tpu.memory_space<vmem>>, vector<8x1x128xf32>
    %534 = vector.shape_cast %533 : vector<8x1x128xf32> to vector<8x128xf32>
    %535 = vector.shape_cast %532 : vector<8x128xf32> to vector<8x1x128xf32>
    tpu.vector_store %arg51[%c0_319, %c9_320, %c0_321], %535 {strides = array<i32>} : memref<8x16x128xf32, #tpu.memory_space<vmem>>, vector<8x1x128xf32>,
    %536 = vector.extract_strided_slice %495 {offsets = [80, 0], sizes = [8, 128], strides = [1, 1]} : vector<128x128xf32> to vector<8x128xf32>
    %c0_322 = arith.constant 0 : index
    %c5_323 = arith.constant 5 : index
    %c0_324 = arith.constant 0 : index
    %537 = vector.load %arg51[%c0_322, %c5_323, %c0_324] : memref<8x16x128xf32, #tpu.memory_space<vmem>>, vector<8x1x128xf32>
    %538 = vector.shape_cast %537 : vector<8x1x128xf32> to vector<8x128xf32>
    %539 = vector.shape_cast %536 : vector<8x128xf32> to vector<8x1x128xf32>
    tpu.vector_store %arg51[%c0_322, %c5_323, %c0_324], %539 {strides = array<i32>} : memref<8x16x128xf32, #tpu.memory_space<vmem>>, vector<8x1x128xf32>,
    %540 = vector.extract_strided_slice %495 {offsets = [88, 0], sizes = [8, 128], strides = [1, 1]} : vector<128x128xf32> to vector<8x128xf32>
    %c0_325 = arith.constant 0 : index
    %c13_326 = arith.constant 13 : index
    %c0_327 = arith.constant 0 : index
    %541 = vector.load %arg51[%c0_325, %c13_326, %c0_327] : memref<8x16x128xf32, #tpu.memory_space<vmem>>, vector<8x1x128xf32>
    %542 = vector.shape_cast %541 : vector<8x1x128xf32> to vector<8x128xf32>
    %543 = vector.shape_cast %540 : vector<8x128xf32> to vector<8x1x128xf32>
    tpu.vector_store %arg51[%c0_325, %c13_326, %c0_327], %543 {strides = array<i32>} : memref<8x16x128xf32, #tpu.memory_space<vmem>>, vector<8x1x128xf32>,
    %544 = vector.extract_strided_slice %495 {offsets = [96, 0], sizes = [8, 128], strides = [1, 1]} : vector<128x128xf32> to vector<8x128xf32>
    %c0_328 = arith.constant 0 : index
    %c3_329 = arith.constant 3 : index
    %c0_330 = arith.constant 0 : index
    %545 = vector.load %arg51[%c0_328, %c3_329, %c0_330] : memref<8x16x128xf32, #tpu.memory_space<vmem>>, vector<8x1x128xf32>
    %546 = vector.shape_cast %545 : vector<8x1x128xf32> to vector<8x128xf32>
    %547 = vector.shape_cast %544 : vector<8x128xf32> to vector<8x1x128xf32>
    tpu.vector_store %arg51[%c0_328, %c3_329, %c0_330], %547 {strides = array<i32>} : memref<8x16x128xf32, #tpu.memory_space<vmem>>, vector<8x1x128xf32>,
    %548 = vector.extract_strided_slice %495 {offsets = [104, 0], sizes = [8, 128], strides = [1, 1]} : vector<128x128xf32> to vector<8x128xf32>
    %c0_331 = arith.constant 0 : index
    %c11_332 = arith.constant 11 : index
    %c0_333 = arith.constant 0 : index
    %549 = vector.load %arg51[%c0_331, %c11_332, %c0_333] : memref<8x16x128xf32, #tpu.memory_space<vmem>>, vector<8x1x128xf32>
    %550 = vector.shape_cast %549 : vector<8x1x128xf32> to vector<8x128xf32>
    %551 = vector.shape_cast %548 : vector<8x128xf32> to vector<8x1x128xf32>
    tpu.vector_store %arg51[%c0_331, %c11_332, %c0_333], %551 {strides = array<i32>} : memref<8x16x128xf32, #tpu.memory_space<vmem>>, vector<8x1x128xf32>,
    %552 = vector.extract_strided_slice %495 {offsets = [112, 0], sizes = [8, 128], strides = [1, 1]} : vector<128x128xf32> to vector<8x128xf32>
    %c0_334 = arith.constant 0 : index
    %c7_335 = arith.constant 7 : index
    %c0_336 = arith.constant 0 : index
    %553 = vector.load %arg51[%c0_334, %c7_335, %c0_336] : memref<8x16x128xf32, #tpu.memory_space<vmem>>, vector<8x1x128xf32>
    %554 = vector.shape_cast %553 : vector<8x1x128xf32> to vector<8x128xf32>
    %555 = vector.shape_cast %552 : vector<8x128xf32> to vector<8x1x128xf32>
    tpu.vector_store %arg51[%c0_334, %c7_335, %c0_336], %555 {strides = array<i32>} : memref<8x16x128xf32, #tpu.memory_space<vmem>>, vector<8x1x128xf32>,
    %556 = vector.extract_strided_slice %495 {offsets = [120, 0], sizes = [8, 128], strides = [1, 1]} : vector<128x128xf32> to vector<8x128xf32>
    %c0_337 = arith.constant 0 : index
    %c15_338 = arith.constant 15 : index
    %c0_339 = arith.constant 0 : index
    %557 = vector.load %arg51[%c0_337, %c15_338, %c0_339] : memref<8x16x128xf32, #tpu.memory_space<vmem>>, vector<8x1x128xf32>
    %558 = vector.shape_cast %557 : vector<8x1x128xf32> to vector<8x128xf32>
    %559 = vector.shape_cast %556 : vector<8x128xf32> to vector<8x1x128xf32>
    tpu.vector_store %arg51[%c0_337, %c15_338, %c0_339], %559 {strides = array<i32>} : memref<8x16x128xf32, #tpu.memory_space<vmem>>, vector<8x1x128xf32>,
    return
  }
}

</mosaic_0001>

<bundles_post_ra>
// kernel: sample_generator_forward.1
= control target key start
LH: loop header
LB: loop body
LE: loop exit
PB: predicated region body
PF: predicated region fallthrough
CT: control target
= control target key end

     0   :  { %s8934_s6 = smov 1   ;;  %s8935_s10 = smov 2   ;;  %s10882_s0 = inlined_call_operand.smem [shape: u32[52], index: -1, kind: input, shape index: {}] }
   0x1   :  { %s9055_s5 = sld [smem:[%s10882_s0]]   ;;  %s8936_s14 = smov 3  }
   0x2   :  { %s9060_s9 = sld [smem:[%s10882_s0 + %s8934_s6]]   ;;  %s8937_s18 = smov 4  }
   0x3   :  { %s9065_s13 = sld [smem:[%s10882_s0 + %s8935_s10]]   ;;  %s8938_s22 = smov 5  }
   0x4   :  { %s9070_s17 = sld [smem:[%s10882_s0 + %s8936_s14]]   ;;  %s8939_s26 = smov 6  }
   0x5   :  { %s9075_s21 = sld [smem:[%s10882_s0 + %s8937_s18]]   ;;  %s8940_s30 = smov 7  }
   0x6   :  { %s9080_s25 = sld [smem:[%s10882_s0 + %s8938_s22]]   ;;  %s8941_s4 = smov 8  }
   0x7   :  { %10914 = sst [smem:[#allocation114_spill]] %s9055_s5  ;;  %s8942_s10 = smov 9  }
   0x8   :  { %10915 = sst [smem:[#allocation115_spill]] %s9060_s9  ;;  %s8943_s15 = smov 10  }
   0x9   :  { %10916 = sst [smem:[#allocation116_spill]] %s9065_s13  ;;  %s8944_s20 = smov 11  }
   0xa   :  { %10917 = sst [smem:[#allocation117_spill]] %s9070_s17  ;;  %s8946_s1 = smov 13  }
   0xb   :  { %10918 = sst [smem:[#allocation118_spill]] %s9075_s21  ;;  %s8947_s7 = smov 14  }
   0xc   :  { %s9085_s29 = sld [smem:[%s10882_s0 + %s8939_s26]]   ;;  %s8945_s26 = smov 12  }
   0xd   :  { %s9090_s3 = sld [smem:[%s10882_s0 + %s8940_s30]]   ;;  %s8949_s22 = smov 16  }
   0xe   :  { %s9095_s8 = sld [smem:[%s10882_s0 + %s8941_s4]]   ;;  %s8950_s28 = smov 17  }
   0xf   :  { %s9100_s14 = sld [smem:[%s10882_s0 + %s8942_s10]]  }
  0x10   :  { %s9105_s19 = sld [smem:[%s10882_s0 + %s8943_s15]]   ;;  %s8948_s15 = smov 15  }
  0x11   :  { %s9110_s24 = sld [smem:[%s10882_s0 + %s8944_s20]]  }
  0x12   :  { %10919 = sst [smem:[#allocation119_spill]] %s9085_s29 }
  0x13   :  { %s9115_s30 = sld [smem:[%s10882_s0 + %s8945_s26]]  }
  0x14   :  { %10920 = sst [smem:[#allocation120_spill]] %s9095_s8 }
  0x15   :  { %s9120_s6 = sld [smem:[%s10882_s0 + %s8946_s1]]  }
  0x16   :  { %10921 = sst [smem:[#allocation121_spill]] %s9105_s19 }
  0x17   :  { %s9125_s12 = sld [smem:[%s10882_s0 + %s8947_s7]]   ;;  %s8951_s7 = smov 18  }
  0x18   :  { %s9130_s20 = sld [smem:[%s10882_s0 + %s8948_s15]]   ;;  %s8952_s15 = smov 19  }
  0x19   :  { %10922 = sst [smem:[#allocation122_spill]] %s9115_s30 }
  0x1a   :  { %s9135_s27 = sld [smem:[%s10882_s0 + %s8949_s22]]   ;;  %s8953_s22 = smov 20  }
  0x1b   :  { %s9140_s4 = sld [smem:[%s10882_s0 + %s8950_s28]]   ;;  %s8954_s28 = smov 21  }
  0x1c   :  { %s9145_s21 = sld [smem:[%s10882_s0 + %s8951_s7]]   ;;  %s8955_s7 = smov 22  }
  0x1d   :  { %10923 = sst [smem:[#allocation123_spill]] %s9125_s12 }
  0x1e   :  { %s9150_s5 = sld [smem:[%s10882_s0 + %s8952_s15]]   ;;  %s8956_s15 = smov 23  }
  0x1f   :  { %s9155_s17 = sld [smem:[%s10882_s0 + %s8953_s22]]   ;;  %s8957_s22 = smov 24  }
  0x20   :  { %10924 = sst [smem:[#allocation124_spill]] %s9135_s27 }
  0x21   :  { %s9160_s9 = sld [smem:[%s10882_s0 + %s8954_s28]]   ;;  %s8958_s28 = smov 25  }
  0x22   :  { %10925 = sst [smem:[#allocation125_spill]] %s9145_s21 }
  0x23   :  { %s9165_s21 = sld [smem:[%s10882_s0 + %s8955_s7]]   ;;  %s8959_s7 = smov 26  }
  0x24   :  { %10926 = sst [smem:[#allocation126_spill]] %s9150_s5 }
  0x25   :  { %s9170_s5 = sld [smem:[%s10882_s0 + %s8956_s15]]   ;;  %s8960_s15 = smov 27  }
  0x26   :  { %s9175_s27 = sld [smem:[%s10882_s0 + %s8957_s22]]   ;;  %s8961_s22 = smov 28  }
  0x27   :  { %10927 = sst [smem:[#allocation127_spill]] %s9160_s9 }
  0x28   :  { %s9180_s9 = sld [smem:[%s10882_s0 + %s8958_s28]]   ;;  %s8962_s28 = smov 29  }
  0x29   :  { %s9185_s12 = sld [smem:[%s10882_s0 + %s8959_s7]]   ;;  %s8963_s7 = smov 30  }
  0x2a   :  { %s9200_s30 = sld [smem:[%s10882_s0 + %s8962_s28]]   ;;  %s8966_s28 = smov 33  }
  0x2b   :  { %10928 = sst [smem:[#allocation128_spill]] %s9170_s5 }
  0x2c   :  { %10929 = sst [smem:[#allocation129_spill]] %s9175_s27 }
  0x2d   :  { %s9190_s5 = sld [smem:[%s10882_s0 + %s8960_s15]]   ;;  %s8964_s15 = smov 31  }
  0x2e   :  { %s9195_s27 = sld [smem:[%s10882_s0 + %s8961_s22]]   ;;  %s8965_s22 = smov 32  }
  0x2f   :  { %10930 = sst [smem:[#allocation130_spill]] %s9185_s12 }
  0x30   :  { %10932 = sst [smem:[#allocation132_spill]] %s9200_s30 }
  0x31   :  { %s9205_s12 = sld [smem:[%s10882_s0 + %s8963_s7]]   ;;  %s8967_s7 = smov 34  }
  0x32   :  { %s9210_s19 = sld [smem:[%s10882_s0 + %s8964_s15]]   ;;  %s8968_s15 = smov 35  }
  0x33   :  { %s9220_s30 = sld [smem:[%s10882_s0 + %s8966_s28]]   ;;  %s8970_s28 = smov 37  }
  0x34   :  { %10931 = sst [smem:[#allocation131_spill]] %s9195_s27 }
  0x35   :  { %s9215_s27 = sld [smem:[%s10882_s0 + %s8965_s22]]   ;;  %s8969_s22 = smov 36  }
  0x36   :  { %s9225_s8 = sld [smem:[%s10882_s0 + %s8967_s7]]   ;;  %s8971_s7 = smov 38  }
  0x37   :  { %s9235_s29 = sld [smem:[%s10882_s0 + %s8969_s22]]   ;;  %s8973_s22 = smov 40  }
  0x38   :  { %10933 = sst [smem:[#allocation133_spill]] %s9210_s19 }
  0x39   :  { %10934 = sst [smem:[#allocation134_spill]] %s9220_s30 }
  0x3a   :  { %s9230_s19 = sld [smem:[%s10882_s0 + %s8968_s15]]   ;;  %s8972_s15 = smov 39  }
  0x3b   :  { %s9240_s30 = sld [smem:[%s10882_s0 + %s8970_s28]]   ;;  %s8974_s28 = smov 41  }
  0x3c   :  { %s9245_s13 = sld [smem:[%s10882_s0 + %s8971_s7]]   ;;  %s8975_s7 = smov 42  }
  0x3d   :  { %10936 = sst [smem:[#allocation136_spill]] %s9235_s29 }
  0x3e   :  { %s9255_s29 = sld [smem:[%s10882_s0 + %s8973_s22]]   ;;  %s8977_s22 = smov 44  }
  0x40   :  { %10935 = sst [smem:[#allocation135_spill]] %s9230_s19 }
  0x41   :  { %10937 = sst [smem:[#allocation137_spill]] %s9240_s30 }
  0x42   :  { %10938 = sst [smem:[#allocation138_spill]] %s9245_s13 }
  0x43   :  { %s9250_s19 = sld [smem:[%s10882_s0 + %s8972_s15]]   ;;  %s8976_s15 = smov 43  }
  0x44   :  { %10940 = sst [smem:[#allocation140_spill]] %s9255_s29 }
  0x45   :  { %s9260_s30 = sld [smem:[%s10882_s0 + %s8974_s28]]   ;;  %s8978_s28 = smov 45  }
  0x46   :  { %s9265_s13 = sld [smem:[%s10882_s0 + %s8975_s7]]   ;;  %s8979_s7 = smov 46  }
  0x47   :  { %s9275_s29 = sld [smem:[%s10882_s0 + %s8977_s22]]   ;;  %s8981_s22 = smov 48  }
  0x49   :  { %10939 = sst [smem:[#allocation139_spill]] %s9250_s19 }
  0x4a   :  { %s9270_s19 = sld [smem:[%s10882_s0 + %s8976_s15]]   ;;  %s8980_s15 = smov 47  }
  0x4b   :  { %10941 = sst [smem:[#allocation141_spill]] %s9260_s30 }
  0x4c   :  { %10942 = sst [smem:[#allocation142_spill]] %s9265_s13 }
  0x4d   :  { %10944 = sst [smem:[#allocation144_spill]] %s9275_s29 }
  0x4e   :  { %s9280_s30 = sld [smem:[%s10882_s0 + %s8978_s28]]   ;;  %s8982_s28 = smov 49  }
  0x4f   :  { %s9285_s13 = sld [smem:[%s10882_s0 + %s8979_s7]]   ;;  %s8983_s7 = smov 50  }
  0x50   :  { %10943 = sst [smem:[#allocation143_spill]] %s9270_s19 }
  0x51   :  { %s9290_s19 = sld [smem:[%s10882_s0 + %s8980_s15]]   ;;  %s8984_s15 = smov 51  }
  0x52   :  { %s9295_s29 = sld [smem:[%s10882_s0 + %s8981_s22]]  }
  0x54   :  { %10945 = sst [smem:[#allocation145_spill]] %s9280_s30 }
  0x55   :  { %10946 = sst [smem:[#allocation146_spill]] %s9285_s13 }
  0x56   :  { %s9300_s30 = sld [smem:[%s10882_s0 + %s8982_s28]]  }
  0x57   :  { %10947 = sst [smem:[#allocation147_spill]] %s9290_s19 }
  0x58   :  { %s9305_s13 = sld [smem:[%s10882_s0 + %s8983_s7]]  }
  0x59   :  { %s9310_s19 = sld [smem:[%s10882_s0 + %s8984_s15]]  }
  0x5a   :  { %108 = vsyncpa [#allocation14], 0 }
  0x5b   :  { %109 = vsyncpa [#allocation17], 0 }
  0x5c   :  { %110 = vsyncpa [#allocation20], 0 }
  0x5d   :  { %111 = vsyncpa [#allocation23], 0 }
  0x5e   :  { %112 = vsyncpa [#allocation26], 0 }
  0x5f   :  { %113 = vsyncpa [#allocation29], 0 }
  0x60   :  { %114 = vsyncpa [#allocation32], 0 }
  0x61   :  { %115 = vsyncpa [#allocation35], 0 }
  0x62   :  { %116 = vsyncpa [#allocation38], 0 }
  0x63   :  { %117 = vsyncpa [#allocation41], 0 }
  0x64   :  { %118 = vsyncpa [#allocation44], 0 }
  0x65   :  { %119 = vsyncpa [#allocation47], 0 }
  0x66   :  { %120 = vsyncpa [#allocation50], 0 }
  0x67   :  { %121 = vsyncpa [#allocation53], 0 }
  0x68   :  { %122 = vsyncpa [#allocation56], 0 }
  0x69   :  { %123 = vsyncpa [#allocation59], 0 }
  0x6a   :  { %124 = vsyncpa [#allocation62], 0 }
  0x6b   :  { %125 = vsyncpa [#allocation65], 0 }
  0x6c   :  { %126 = vsyncpa [#allocation68], 0 }
  0x6d   :  { %127 = vsyncpa [#allocation71], 0 }
  0x6e   :  { %128 = vsyncpa [#allocation74], 0 }
  0x6f   :  { %129 = vsyncpa [#allocation77], 0 }
  0x70   :  { %130 = vsyncpa [#allocation80], 0 }
  0x71   :  { %131 = vsyncpa [#allocation15], 0  ;;  %s8985_s0 = smov [#allocation16]   ;;  %s8986_s23 = smov [#allocation19]  }
  0x72   :  { %s156_s22 = sshll.u32 %s8985_s0, 4  ;;  %s175_s26 = sshll.u32 %s8986_s23, 4  ;;  %s157_s22 = int_to_ptr.vmem [resolvable:$true] %s156_s22  ;;  %s9312_s26 = int_to_ptr.vmem [resolvable:$true] %s175_s26 }
  0x73   :  { %s7870_s28 = scalar_lea.hbm %s9080_s25, 16 }
  0x74   :  { %p7871_p0 = scmp.ne.s32.totalorder %s9080_s25, %s7870_s28  ;;  %p7874_p1 = scmp.lt.u32.totalorder %s7870_s28, %s9080_s25 }
  0x76   :  { %p7876_p2 = pnand %p7874_p1, %p7871_p0 }
  0x78   :  { %7879 = shalt.err (!%p7876_p2)
}
  0x79   :  { %s7880_s1 = scalar_lea.vmem %s157_s22, 16  ;;  %s7884_s2 = scalar_lea.vmem %s157_s22, 32 }
  0x7a   :  { %p7881_p3 = scmp.ne.s32.totalorder %s157_s22, %s7880_s1  ;;  %p7885_p4 = scmp.lt.s32.totalorder %s157_s22, %s157_s22 }
  0x7b   :  { %p7886_p5 = scmp.lt.s32.totalorder %s7884_s2, %s7880_s1 }
  0x7d   :  { %p7887_p6 = por %p7886_p5, %p7885_p4 }
  0x7f   :  { %p7888_p7 = pnand %p7887_p6, %p7881_p3 }
  0x81   :  { %7891 = shalt.err (!%p7888_p7)
}
  0x82   :  { %159 = dma.hbm_to_vmem [thread:$0]  %s9080_s25, 16, %s157_s22, [#allocation17]  }
  0x83   :  { %s7892_s7 = scalar_lea.hbm %s9090_s3, 256 }
  0x84   :  { %p7893_p8 = scmp.ne.s32.totalorder %s9090_s3, %s7892_s7  ;;  %p7896_p9 = scmp.lt.u32.totalorder %s7892_s7, %s9090_s3 }
  0x86   :  { %p7898_p10 = pnand %p7896_p9, %p7893_p8 }
  0x88   :  { %7901 = shalt.err (!%p7898_p10)
}
  0x89   :  { %s7902_s10 = scalar_lea.vmem %s9312_s26, 256  ;;  %p7907_p12 = scmp.lt.s32.totalorder %s9312_s26, %s9312_s26 }
  0x8a   :  { %p7903_p11 = scmp.ne.s32.totalorder %s9312_s26, %s7902_s10  ;;  %p7908_p13 = scmp.lt.s32.totalorder %s7902_s10, %s7902_s10 }
  0x8c   :  { %p7909_p0 = por %p7908_p13, %p7907_p12 }
  0x8e   :  { %p7910_p1 = pnand %p7909_p0, %p7903_p11 }
  0x90   :  { %7913 = shalt.err (!%p7910_p1)
}
  0x91   :  { %s8987_s11 = smov 64   ;;  %s8988_s25 = smov 4  }
  0x92   :  { %181 = dma.hbm_to_vmem [thread:$0]  %s9090_s3, 256, %s9312_s26, [#allocation20], %s8987_s11, %s8987_s11, %s8988_s25  }
  0x93   :  { %s8989_s15 = smov [#allocation22]   ;;  %s8990_s18 = smov [#allocation25]  }
  0x94   :  { %s198_s16 = sshll.u32 %s8989_s15, 4  ;;  %s217_s0 = sshll.u32 %s8990_s18, 4  ;;  %s199_s16 = int_to_ptr.vmem [resolvable:$true] %s198_s16  ;;  %s9330_s0 = int_to_ptr.vmem [resolvable:$true] %s217_s0 }
  0x95   :  { %s7914_s22 = scalar_lea.hbm %s9100_s14, 16 }
  0x96   :  { %p7915_p2 = scmp.ne.s32.totalorder %s9100_s14, %s7914_s22  ;;  %p7918_p3 = scmp.lt.u32.totalorder %s7914_s22, %s9100_s14 }
  0x98   :  { %p7920_p4 = pnand %p7918_p3, %p7915_p2 }
  0x9a   :  { %7923 = shalt.err (!%p7920_p4)
}
  0x9b   :  { %s7924_s23 = scalar_lea.vmem %s199_s16, 16  ;;  %s7928_s28 = scalar_lea.vmem %s199_s16, 32 }
  0x9c   :  { %p7925_p5 = scmp.ne.s32.totalorder %s199_s16, %s7924_s23  ;;  %p7929_p6 = scmp.lt.s32.totalorder %s199_s16, %s199_s16 }
  0x9d   :  { %p7930_p7 = scmp.lt.s32.totalorder %s7928_s28, %s7924_s23 }
  0x9f   :  { %p7931_p8 = por %p7930_p7, %p7929_p6 }
  0xa1   :  { %p7932_p9 = pnand %p7931_p8, %p7925_p5 }
  0xa3   :  { %7935 = shalt.err (!%p7932_p9)
}
  0xa4   :  { %201 = dma.hbm_to_vmem [thread:$0]  %s9100_s14, 16, %s199_s16, [#allocation23]  }
  0xa5   :  { %s7936_s3 = scalar_lea.hbm %s9110_s24, 256 }
  0xa6   :  { %p7937_p10 = scmp.ne.s32.totalorder %s9110_s24, %s7936_s3  ;;  %p7940_p11 = scmp.lt.u32.totalorder %s7936_s3, %s9110_s24 }
  0xa8   :  { %p7942_p12 = pnand %p7940_p11, %p7937_p10 }
  0xaa   :  { %7945 = shalt.err (!%p7942_p12)
}
  0xab   :  { %s7946_s26 = scalar_lea.vmem %s9330_s0, 256  ;;  %p7951_p0 = scmp.lt.s32.totalorder %s9330_s0, %s9330_s0 }
  0xac   :  { %p7947_p13 = scmp.ne.s32.totalorder %s9330_s0, %s7946_s26  ;;  %p7952_p1 = scmp.lt.s32.totalorder %s7946_s26, %s7946_s26 }
  0xae   :  { %p7953_p2 = por %p7952_p1, %p7951_p0 }
  0xb0   :  { %p7954_p3 = pnand %p7953_p2, %p7947_p13 }
  0xb2   :  { %7957 = shalt.err (!%p7954_p3)
}
  0xb3   :  { %223 = dma.hbm_to_vmem [thread:$0]  %s9110_s24, 256, %s9330_s0, [#allocation26], %s8987_s11, %s8987_s11, %s8988_s25  }
  0xb4   :  { %s8991_s14 = smov [#allocation28]   ;;  %s8992_s2 = smov [#allocation31]  }
  0xb5   :  { %s240_s1 = sshll.u32 %s8991_s14, 4  ;;  %s259_s7 = sshll.u32 %s8992_s2, 4  ;;  %s241_s1 = int_to_ptr.vmem [resolvable:$true] %s240_s1  ;;  %s9348_s7 = int_to_ptr.vmem [resolvable:$true] %s259_s7 }
  0xb6   :  { %s7958_s10 = scalar_lea.hbm %s9120_s6, 16 }
  0xb7   :  { %p7959_p4 = scmp.ne.s32.totalorder %s9120_s6, %s7958_s10  ;;  %p7962_p5 = scmp.lt.u32.totalorder %s7958_s10, %s9120_s6 }
  0xb9   :  { %p7964_p6 = pnand %p7962_p5, %p7959_p4 }
  0xbb   :  { %7967 = shalt.err (!%p7964_p6)
}
  0xbc   :  { %s7968_s15 = scalar_lea.vmem %s241_s1, 16  ;;  %s7972_s16 = scalar_lea.vmem %s241_s1, 32 }
  0xbd   :  { %p7969_p7 = scmp.ne.s32.totalorder %s241_s1, %s7968_s15  ;;  %p7973_p8 = scmp.lt.s32.totalorder %s241_s1, %s241_s1 }
  0xbe   :  { %p7974_p9 = scmp.lt.s32.totalorder %s7972_s16, %s7968_s15 }
  0xc0   :  { %p7975_p10 = por %p7974_p9, %p7973_p8 }
  0xc2   :  { %p7976_p11 = pnand %p7975_p10, %p7969_p7 }
  0xc4   :  { %7979 = shalt.err (!%p7976_p11)
}
  0xc5   :  { %243 = dma.hbm_to_vmem [thread:$0]  %s9120_s6, 16, %s241_s1, [#allocation29]  }
  0xc6   :  { %s7980_s24 = scalar_lea.hbm %s9130_s20, 256 }
  0xc7   :  { %p7981_p12 = scmp.ne.s32.totalorder %s9130_s20, %s7980_s24  ;;  %p7984_p13 = scmp.lt.u32.totalorder %s7980_s24, %s9130_s20 }
  0xc9   :  { %p7986_p0 = pnand %p7984_p13, %p7981_p12 }
  0xcb   :  { %7989 = shalt.err (!%p7986_p0)
}
  0xcc   :  { %s7990_s18 = scalar_lea.vmem %s9348_s7, 256  ;;  %p7995_p2 = scmp.lt.s32.totalorder %s9348_s7, %s9348_s7 }
  0xcd   :  { %p7991_p1 = scmp.ne.s32.totalorder %s9348_s7, %s7990_s18  ;;  %p7996_p3 = scmp.lt.s32.totalorder %s7990_s18, %s7990_s18 }
  0xcf   :  { %p7997_p4 = por %p7996_p3, %p7995_p2 }
  0xd1   :  { %p7998_p5 = pnand %p7997_p4, %p7991_p1 }
  0xd3   :  { %8001 = shalt.err (!%p7998_p5)
}
  0xd4   :  { %265 = dma.hbm_to_vmem [thread:$0]  %s9130_s20, 256, %s9348_s7, [#allocation32], %s8987_s11, %s8987_s11, %s8988_s25  }
  0xd5   :  { %s8993_s6 = smov [#allocation34]   ;;  %s8994_s22 = smov [#allocation37]  }
  0xd6   :  { %s282_s0 = sshll.u32 %s8993_s6, 4  ;;  %s301_s23 = sshll.u32 %s8994_s22, 4  ;;  %s283_s0 = int_to_ptr.vmem [resolvable:$true] %s282_s0  ;;  %s9366_s23 = int_to_ptr.vmem [resolvable:$true] %s301_s23 }
  0xd7   :  { %s8002_s28 = scalar_lea.hbm %s9140_s4, 16 }
  0xd8   :  { %p8003_p6 = scmp.ne.s32.totalorder %s9140_s4, %s8002_s28  ;;  %p8006_p7 = scmp.lt.u32.totalorder %s8002_s28, %s9140_s4 }
  0xda   :  { %p8008_p8 = pnand %p8006_p7, %p8003_p6 }
  0xdc   :  { %8011 = shalt.err (!%p8008_p8)
}
  0xdd   :  { %s8012_s3 = scalar_lea.vmem %s283_s0, 16  ;;  %s8016_s26 = scalar_lea.vmem %s283_s0, 32 }
  0xde   :  { %p8013_p9 = scmp.ne.s32.totalorder %s283_s0, %s8012_s3  ;;  %p8017_p10 = scmp.lt.s32.totalorder %s283_s0, %s283_s0 }
  0xdf   :  { %p8018_p11 = scmp.lt.s32.totalorder %s8016_s26, %s8012_s3 }
  0xe1   :  { %p8019_p12 = por %p8018_p11, %p8017_p10 }
  0xe3   :  { %p8020_p13 = pnand %p8019_p12, %p8013_p9 }
  0xe5   :  { %8023 = shalt.err (!%p8020_p13)
}
  0xe6   :  { %285 = dma.hbm_to_vmem [thread:$0]  %s9140_s4, 16, %s283_s0, [#allocation35]  }
  0xe7   :  { %s8024_s20 = scalar_lea.hbm %s9155_s17, 1024 }
  0xe8   :  { %p8025_p0 = scmp.ne.s32.totalorder %s9155_s17, %s8024_s20  ;;  %p8028_p1 = scmp.lt.u32.totalorder %s8024_s20, %s9155_s17 }
  0xea   :  { %p8030_p2 = pnand %p8028_p1, %p8025_p0 }
  0xec   :  { %8033 = shalt.err (!%p8030_p2)
}
  0xed   :  { %s8034_s14 = scalar_lea.vmem %s9366_s23, 1024  ;;  %p8039_p4 = scmp.lt.s32.totalorder %s9366_s23, %s9366_s23 }
  0xee   :  { %p8035_p3 = scmp.ne.s32.totalorder %s9366_s23, %s8034_s14  ;;  %p8040_p5 = scmp.lt.s32.totalorder %s8034_s14, %s8034_s14 }
  0xf0   :  { %p8041_p6 = por %p8040_p5, %p8039_p4 }
  0xf2   :  { %p8042_p7 = pnand %p8041_p6, %p8035_p3 }
  0xf4   :  { %8045 = shalt.err (!%p8042_p7)
}
  0xf5   :  { %s8995_s1 = smov 512   ;;  %s8996_s4 = smov 32  }
  0xf6   :  { %307 = dma.hbm_to_vmem [thread:$0]  %s9155_s17, 1024, %s9366_s23, [#allocation38], %s8995_s1, %s8995_s1, %s8996_s4  }
  0xf7   :  { %s8997_s2 = smov [#allocation40]   ;;  %s8998_s10 = smov [#allocation43]  }
  0xf8   :  { %s324_s7 = sshll.u32 %s8997_s2, 4  ;;  %s343_s15 = sshll.u32 %s8998_s10, 4  ;;  %s325_s7 = int_to_ptr.vmem [resolvable:$true] %s324_s7  ;;  %s9381_s15 = int_to_ptr.vmem [resolvable:$true] %s343_s15 }
  0xf9   :  { %s8046_s16 = scalar_lea.hbm %s9165_s21, 128 }
  0xfa   :  { %p8047_p8 = scmp.ne.s32.totalorder %s9165_s21, %s8046_s16  ;;  %p8050_p9 = scmp.lt.u32.totalorder %s8046_s16, %s9165_s21 }
  0xfc   :  { %p8052_p10 = pnand %p8050_p9, %p8047_p8 }
  0xfe   :  { %8055 = shalt.err (!%p8052_p10)
}
  0xff   :  { %s8056_s24 = scalar_lea.vmem %s325_s7, 128  ;;  %p8061_p12 = scmp.lt.s32.totalorder %s325_s7, %s325_s7 }
 0x100   :  { %p8057_p11 = scmp.ne.s32.totalorder %s325_s7, %s8056_s24  ;;  %p8062_p13 = scmp.lt.s32.totalorder %s8056_s24, %s8056_s24 }
 0x102   :  { %p8063_p0 = por %p8062_p13, %p8061_p12 }
 0x104   :  { %p8064_p1 = pnand %p8063_p0, %p8057_p11 }
 0x106   :  { %8067 = shalt.err (!%p8064_p1)
}
 0x107   :  { %327 = dma.hbm_to_vmem [thread:$0]  %s9165_s21, 128, %s325_s7, [#allocation41]  }
 0x108   :  { %s8068_s17 = scalar_lea.hbm %s9180_s9, 256 }
 0x109   :  { %p8069_p2 = scmp.ne.s32.totalorder %s9180_s9, %s8068_s17  ;;  %p8072_p3 = scmp.lt.u32.totalorder %s8068_s17, %s9180_s9 }
 0x10b   :  { %p8074_p4 = pnand %p8072_p3, %p8069_p2 }
 0x10d   :  { %8077 = shalt.err (!%p8074_p4)
}
 0x10e   :  { %s8078_s18 = scalar_lea.vmem %s9381_s15, 256  ;;  %p8083_p6 = scmp.lt.s32.totalorder %s9381_s15, %s9381_s15 }
 0x10f   :  { %p8079_p5 = scmp.ne.s32.totalorder %s9381_s15, %s8078_s18  ;;  %p8084_p7 = scmp.lt.s32.totalorder %s8078_s18, %s8078_s18 }
 0x111   :  { %p8085_p8 = por %p8084_p7, %p8083_p6 }
 0x113   :  { %p8086_p9 = pnand %p8085_p8, %p8079_p5 }
 0x115   :  { %8089 = shalt.err (!%p8086_p9)
}
 0x116   :  { %s8999_s6 = smov 128   ;;  %s9000_s21 = smov 8  }
 0x117   :  { %349 = dma.hbm_to_vmem [thread:$0]  %s9180_s9, 256, %s9381_s15, [#allocation44], %s8999_s6, %s8999_s6, %s9000_s21  }
 0x118   :  { %s9001_s0 = smov [#allocation46]   ;;  %s9002_s23 = smov [#allocation49]  }
 0x119   :  { %s366_s22 = sshll.u32 %s9001_s0, 4  ;;  %s387_s28 = sshll.u32 %s9002_s23, 4  ;;  %s367_s22 = int_to_ptr.vmem [resolvable:$true] %s366_s22  ;;  %s9399_s28 = int_to_ptr.vmem [resolvable:$true] %s387_s28 }
 0x11a   :  { %s8090_s3 = scalar_lea.hbm %s9190_s5, 32 }
 0x11b   :  { %p8091_p10 = scmp.ne.s32.totalorder %s9190_s5, %s8090_s3  ;;  %p8094_p11 = scmp.lt.u32.totalorder %s8090_s3, %s9190_s5 }
 0x11d   :  { %p8096_p12 = pnand %p8094_p11, %p8091_p10 }
 0x11f   :  { %8099 = shalt.err (!%p8096_p12)
}
 0x120   :  { %s8100_s26 = scalar_lea.vmem %s367_s22, 32  ;;  %p8105_p0 = scmp.lt.s32.totalorder %s367_s22, %s367_s22 }
 0x121   :  { %p8101_p13 = scmp.ne.s32.totalorder %s367_s22, %s8100_s26  ;;  %p8106_p1 = scmp.lt.s32.totalorder %s8100_s26, %s8100_s26 }
 0x123   :  { %p8107_p2 = por %p8106_p1, %p8105_p0 }
 0x125   :  { %p8108_p3 = pnand %p8107_p2, %p8101_p13 }
 0x127   :  { %8111 = shalt.err (!%p8108_p3)
}
 0x128   :  { %369 = dma.hbm_to_vmem [thread:$0]  %s9190_s5, 32, %s367_s22, [#allocation47]  }
 0x129   :  { %s8112_s9 = scalar_lea.hbm %s9205_s12, 256 }
 0x12a   :  { %p8113_p4 = scmp.ne.s32.totalorder %s9205_s12, %s8112_s9  ;;  %p8116_p5 = scmp.lt.u32.totalorder %s8112_s9, %s9205_s12 }
 0x12c   :  { %p8118_p6 = pnand %p8116_p5, %p8113_p4 }
 0x12e   :  { %8121 = shalt.err (!%p8118_p6)
}
 0x12f   :  { %s8122_s20 = scalar_lea.vmem %s9399_s28, 256  ;;  %p8127_p8 = scmp.lt.s32.totalorder %s9399_s28, %s9399_s28 }
 0x130   :  { %p8123_p7 = scmp.ne.s32.totalorder %s9399_s28, %s8122_s20  ;;  %p8128_p9 = scmp.lt.s32.totalorder %s8122_s20, %s8122_s20 }
 0x132   :  { %p8129_p10 = por %p8128_p9, %p8127_p8 }
 0x134   :  { %p8130_p11 = pnand %p8129_p10, %p8123_p7 }
 0x136   :  { %8133 = shalt.err (!%p8130_p11)
}
 0x137   :  { %393 = dma.hbm_to_vmem [thread:$0]  %s9205_s12, 256, %s9399_s28, [#allocation50], %s8999_s6, %s8999_s6, %s9000_s21  }
 0x138   :  { %s9003_s5 = smov [#allocation52]   ;;  %s9004_s1 = smov [#allocation55]  }
 0x139   :  { %s412_s14 = sshll.u32 %s9003_s5, 4  ;;  %s432_s4 = sshll.u32 %s9004_s1, 4  ;;  %s413_s14 = int_to_ptr.vmem [resolvable:$true] %s412_s14  ;;  %s433_s4 = int_to_ptr.vmem [resolvable:$true] %s432_s4 }
 0x13a   :  { %s8134_s2 = scalar_lea.hbm %s9215_s27, 32 }
 0x13b   :  { %p8135_p12 = scmp.ne.s32.totalorder %s9215_s27, %s8134_s2  ;;  %p8138_p13 = scmp.lt.u32.totalorder %s8134_s2, %s9215_s27 }
 0x13d   :  { %p8140_p0 = pnand %p8138_p13, %p8135_p12 }
 0x13f   :  { %8143 = shalt.err (!%p8140_p0)
}
 0x140   :  { %s8144_s7 = scalar_lea.vmem %s413_s14, 32  ;;  %p8149_p2 = scmp.lt.s32.totalorder %s413_s14, %s413_s14 }
 0x141   :  { %p8145_p1 = scmp.ne.s32.totalorder %s413_s14, %s8144_s7  ;;  %p8150_p3 = scmp.lt.s32.totalorder %s8144_s7, %s8144_s7 }
 0x143   :  { %p8151_p4 = por %p8150_p3, %p8149_p2 }
 0x145   :  { %p8152_p5 = pnand %p8151_p4, %p8145_p1 }
 0x147   :  { %8155 = shalt.err (!%p8152_p5)
}
 0x148   :  { %415 = dma.hbm_to_vmem [thread:$0]  %s9215_s27, 32, %s413_s14, [#allocation53]  }
 0x149   :  { %s8156_s12 = scalar_lea.hbm %s9225_s8, 16 }
 0x14a   :  { %p8157_p6 = scmp.ne.s32.totalorder %s9225_s8, %s8156_s12  ;;  %p8160_p7 = scmp.lt.u32.totalorder %s8156_s12, %s9225_s8 }
 0x14c   :  { %p8162_p8 = pnand %p8160_p7, %p8157_p6 }
 0x14e   :  { %8165 = shalt.err (!%p8162_p8)
}
 0x14f   :  { %s8166_s10 = scalar_lea.vmem %s433_s4, 16  ;;  %s8170_s15 = scalar_lea.vmem %s433_s4, 32 }
 0x150   :  { %p8167_p9 = scmp.ne.s32.totalorder %s433_s4, %s8166_s10  ;;  %p8171_p10 = scmp.lt.s32.totalorder %s433_s4, %s433_s4 }
 0x151   :  { %p8172_p11 = scmp.lt.s32.totalorder %s8170_s15, %s8166_s10 }
 0x153   :  { %p8173_p12 = por %p8172_p11, %p8171_p10 }
 0x155   :  { %p8174_p13 = pnand %p8173_p12, %p8167_p9 }
 0x157   :  { %8177 = shalt.err (!%p8174_p13)
}
 0x158   :  { %s10948_s16 = sld [smem:[#allocation136_spill]]  ;;  %s9005_s24 = smov [#allocation58]  }
 0x159   :  { %435 = dma.hbm_to_vmem [thread:$0]  %s9225_s8, 16, %s433_s4, [#allocation56]  }
 0x15a   :  { %s453_s27 = sshll.u32 %s9005_s24, 4  ;;  %s9006_s17 = smov [#allocation61]   ;;  %s454_s27 = int_to_ptr.vmem [resolvable:$true] %s453_s27 }
 0x15b   :  { %s478_s18 = sshll.u32 %s9006_s17, 4  ;;  %s479_s18 = int_to_ptr.vmem [resolvable:$true] %s478_s18 }
 0x15e   :  { %s8178_s0 = scalar_lea.hbm %s10948_s16, 256 }
 0x15f   :  { %p8179_p0 = scmp.ne.s32.totalorder %s10948_s16, %s8178_s0  ;;  %p8182_p1 = scmp.lt.u32.totalorder %s8178_s0, %s10948_s16 }
 0x161   :  { %p8184_p2 = pnand %p8182_p1, %p8179_p0 }
 0x163   :  { %8187 = shalt.err (!%p8184_p2)
}
 0x164   :  { %s8188_s22 = scalar_lea.vmem %s454_s27, 256  ;;  %p8193_p4 = scmp.lt.s32.totalorder %s454_s27, %s454_s27 }
 0x165   :  { %p8189_p3 = scmp.ne.s32.totalorder %s454_s27, %s8188_s22  ;;  %p8194_p5 = scmp.lt.s32.totalorder %s8188_s22, %s8188_s22 }
 0x167   :  { %p8195_p6 = por %p8194_p5, %p8193_p4 }
 0x169   :  { %p8196_p7 = pnand %p8195_p6, %p8189_p3 }
 0x16b   :  { %8199 = shalt.err (!%p8196_p7)
}
 0x16c   :  { %s10949_s8 = sld [smem:[#allocation138_spill]] }
 0x16d   :  { %459 = dma.hbm_to_vmem [thread:$0]  %s10948_s16, 256, %s454_s27, [#allocation59], %s8999_s6, %s8999_s6, %s9000_s21  }
 0x172   :  { %s8200_s23 = scalar_lea.hbm %s10949_s8, 32 }
 0x173   :  { %p8201_p8 = scmp.ne.s32.totalorder %s10949_s8, %s8200_s23  ;;  %p8204_p9 = scmp.lt.u32.totalorder %s8200_s23, %s10949_s8 }
 0x175   :  { %p8206_p10 = pnand %p8204_p9, %p8201_p8 }
 0x177   :  { %8209 = shalt.err (!%p8206_p10)
}
 0x178   :  { %s8210_s28 = scalar_lea.vmem %s479_s18, 32  ;;  %p8215_p12 = scmp.lt.s32.totalorder %s479_s18, %s479_s18 }
 0x179   :  { %p8211_p11 = scmp.ne.s32.totalorder %s479_s18, %s8210_s28  ;;  %p8216_p13 = scmp.lt.s32.totalorder %s8210_s28, %s8210_s28 }
 0x17b   :  { %p8217_p0 = por %p8216_p13, %p8215_p12 }
 0x17d   :  { %p8218_p1 = pnand %p8217_p0, %p8211_p11 }
 0x17f   :  { %8221 = shalt.err (!%p8218_p1)
}
 0x180   :  { %s10950_s3 = sld [smem:[#allocation140_spill]]  ;;  %s9007_s26 = smov [#allocation64]  }
 0x181   :  { %481 = dma.hbm_to_vmem [thread:$0]  %s10949_s8, 32, %s479_s18, [#allocation62]  }
 0x182   :  { %s498_s9 = sshll.u32 %s9007_s26, 4  ;;  %s9008_s20 = smov [#allocation67]   ;;  %s499_s9 = int_to_ptr.vmem [resolvable:$true] %s498_s9 }
 0x183   :  { %s519_s5 = sshll.u32 %s9008_s20, 4  ;;  %s9436_s5 = int_to_ptr.vmem [resolvable:$true] %s519_s5 }
 0x186   :  { %s8222_s14 = scalar_lea.hbm %s10950_s3, 16 }
 0x187   :  { %p8223_p2 = scmp.ne.s32.totalorder %s10950_s3, %s8222_s14  ;;  %p8226_p3 = scmp.lt.u32.totalorder %s8222_s14, %s10950_s3 }
 0x189   :  { %p8228_p4 = pnand %p8226_p3, %p8223_p2 }
 0x18b   :  { %8231 = shalt.err (!%p8228_p4)
}
 0x18c   :  { %s8232_s1 = scalar_lea.vmem %s499_s9, 16  ;;  %s8236_s4 = scalar_lea.vmem %s499_s9, 32 }
 0x18d   :  { %p8233_p5 = scmp.ne.s32.totalorder %s499_s9, %s8232_s1  ;;  %p8237_p6 = scmp.lt.s32.totalorder %s499_s9, %s499_s9 }
 0x18e   :  { %p8238_p7 = scmp.lt.s32.totalorder %s8236_s4, %s8232_s1 }
 0x190   :  { %p8239_p8 = por %p8238_p7, %p8237_p6 }
 0x192   :  { %p8240_p9 = pnand %p8239_p8, %p8233_p5 }
 0x194   :  { %8243 = shalt.err (!%p8240_p9)
}
 0x195   :  { %s10951_s2 = sld [smem:[#allocation142_spill]] }
 0x196   :  { %501 = dma.hbm_to_vmem [thread:$0]  %s10950_s3, 16, %s499_s9, [#allocation65]  }
 0x19b   :  { %s8244_s7 = scalar_lea.hbm %s10951_s2, 256 }
 0x19c   :  { %p8245_p10 = scmp.ne.s32.totalorder %s10951_s2, %s8244_s7  ;;  %p8248_p11 = scmp.lt.u32.totalorder %s8244_s7, %s10951_s2 }
 0x19e   :  { %p8250_p12 = pnand %p8248_p11, %p8245_p10 }
 0x1a0   :  { %8253 = shalt.err (!%p8250_p12)
}
 0x1a1   :  { %s8254_s12 = scalar_lea.vmem %s9436_s5, 256  ;;  %p8259_p0 = scmp.lt.s32.totalorder %s9436_s5, %s9436_s5 }
 0x1a2   :  { %p8255_p13 = scmp.ne.s32.totalorder %s9436_s5, %s8254_s12  ;;  %p8260_p1 = scmp.lt.s32.totalorder %s8254_s12, %s8254_s12 }
 0x1a4   :  { %p8261_p2 = por %p8260_p1, %p8259_p0 }
 0x1a6   :  { %p8262_p3 = pnand %p8261_p2, %p8255_p13 }
 0x1a8   :  { %8265 = shalt.err (!%p8262_p3)
}
 0x1a9   :  { %s10952_s10 = sld [smem:[#allocation144_spill]]  ;;  %s9009_s15 = smov [#allocation70]  }
 0x1aa   :  { %525 = dma.hbm_to_vmem [thread:$0]  %s10951_s2, 256, %s9436_s5, [#allocation68], %s8999_s6, %s8999_s6, %s9000_s21  }
 0x1ab   :  { %s544_s16 = sshll.u32 %s9009_s15, 4  ;;  %s9010_s24 = smov [#allocation73]   ;;  %s545_s16 = int_to_ptr.vmem [resolvable:$true] %s544_s16 }
 0x1ac   :  { %s564_s27 = sshll.u32 %s9010_s24, 4  ;;  %s565_s27 = int_to_ptr.vmem [resolvable:$true] %s564_s27 }
 0x1af   :  { %s8266_s17 = scalar_lea.hbm %s10952_s10, 32 }
 0x1b0   :  { %p8267_p4 = scmp.ne.s32.totalorder %s10952_s10, %s8266_s17  ;;  %p8270_p5 = scmp.lt.u32.totalorder %s8266_s17, %s10952_s10 }
 0x1b2   :  { %p8272_p6 = pnand %p8270_p5, %p8267_p4 }
 0x1b4   :  { %8275 = shalt.err (!%p8272_p6)
}
 0x1b5   :  { %s8276_s18 = scalar_lea.vmem %s545_s16, 32  ;;  %p8281_p8 = scmp.lt.s32.totalorder %s545_s16, %s545_s16 }
 0x1b6   :  { %p8277_p7 = scmp.ne.s32.totalorder %s545_s16, %s8276_s18  ;;  %p8282_p9 = scmp.lt.s32.totalorder %s8276_s18, %s8276_s18 }
 0x1b8   :  { %p8283_p10 = por %p8282_p9, %p8281_p8 }
 0x1ba   :  { %p8284_p11 = pnand %p8283_p10, %p8277_p7 }
 0x1bc   :  { %8287 = shalt.err (!%p8284_p11)
}
 0x1bd   :  { %s10953_s0 = sld [smem:[#allocation146_spill]] }
 0x1be   :  { %547 = dma.hbm_to_vmem [thread:$0]  %s10952_s10, 32, %s545_s16, [#allocation71]  }
 0x1c3   :  { %s8288_s22 = scalar_lea.hbm %s10953_s0, 16 }
 0x1c4   :  { %p8289_p12 = scmp.ne.s32.totalorder %s10953_s0, %s8288_s22  ;;  %p8292_p13 = scmp.lt.u32.totalorder %s8288_s22, %s10953_s0 }
 0x1c6   :  { %p8294_p0 = pnand %p8292_p13, %p8289_p12 }
 0x1c8   :  { %8297 = shalt.err (!%p8294_p0)
}
 0x1c9   :  { %s8298_s8 = scalar_lea.vmem %s565_s27, 16  ;;  %s8302_s23 = scalar_lea.vmem %s565_s27, 32 }
 0x1ca   :  { %p8299_p1 = scmp.ne.s32.totalorder %s565_s27, %s8298_s8  ;;  %p8303_p2 = scmp.lt.s32.totalorder %s565_s27, %s565_s27 }
 0x1cb   :  { %p8304_p3 = scmp.lt.s32.totalorder %s8302_s23, %s8298_s8 }
 0x1cd   :  { %p8305_p4 = por %p8304_p3, %p8303_p2 }
 0x1cf   :  { %p8306_p5 = pnand %p8305_p4, %p8299_p1 }
 0x1d1   :  { %8309 = shalt.err (!%p8306_p5)
}
 0x1d2   :  { %567 = dma.hbm_to_vmem [thread:$0]  %s10953_s0, 16, %s565_s27, [#allocation74]  }
 0x1d3   :  { %s9011_s28 = smov [#allocation76]   ;;  %s9012_s26 = smov [#allocation13]  }
 0x1d4   :  { %s585_s3 = sshll.u32 %s9011_s28, 4  ;;  %s142_s9 = sshll.u32 %s9012_s26, 4  ;;  %s586_s3 = int_to_ptr.vmem [resolvable:$true] %s585_s3  ;;  %s143_s9 = int_to_ptr.vmem [resolvable:$true] %s142_s9 }
 0x1d5   :  { %s8310_s20 = scalar_lea.hbm %s9295_s29, 128 }
 0x1d6   :  { %p8311_p6 = scmp.ne.s32.totalorder %s9295_s29, %s8310_s20  ;;  %p8314_p7 = scmp.lt.u32.totalorder %s8310_s20, %s9295_s29 }
 0x1d8   :  { %p8316_p8 = pnand %p8314_p7, %p8311_p6 }
 0x1da   :  { %8319 = shalt.err (!%p8316_p8)
}
 0x1db   :  { %s8320_s5 = scalar_lea.vmem %s586_s3, 128  ;;  %p8325_p10 = scmp.lt.s32.totalorder %s586_s3, %s586_s3 }
 0x1dc   :  { %p8321_p9 = scmp.ne.s32.totalorder %s586_s3, %s8320_s5  ;;  %p8326_p11 = scmp.lt.s32.totalorder %s8320_s5, %s8320_s5 }
 0x1de   :  { %p8327_p12 = por %p8326_p11, %p8325_p10 }
 0x1e0   :  { %p8328_p13 = pnand %p8327_p12, %p8321_p9 }
 0x1e2   :  { %8331 = shalt.err (!%p8328_p13)
}
 0x1e3   :  { %s10954_s14 = sld [smem:[#allocation116_spill]] }
 0x1e4   :  { %591 = dma.hbm_to_vmem [thread:$0]  %s9295_s29, 128, %s586_s3, [#allocation77], %s8987_s11, %s8987_s11, %s8988_s25  }
 0x1e9   :  { %s8332_s1 = scalar_lea.hbm %s10954_s14, 128 }
 0x1ea   :  { %p8333_p0 = scmp.ne.s32.totalorder %s10954_s14, %s8332_s1  ;;  %p8336_p1 = scmp.lt.u32.totalorder %s8332_s1, %s10954_s14 }
 0x1ec   :  { %p8338_p2 = pnand %p8336_p1, %p8333_p0 }
 0x1ee   :  { %8341 = shalt.err (!%p8338_p2)
}
 0x1ef   :  { %s8342_s4 = scalar_lea.vmem %s143_s9, 128  ;;  %p8347_p4 = scmp.lt.s32.totalorder %s143_s9, %s143_s9 }
 0x1f0   :  { %p8343_p3 = scmp.ne.s32.totalorder %s143_s9, %s8342_s4  ;;  %p8348_p5 = scmp.lt.s32.totalorder %s8342_s4, %s8342_s4 }
 0x1f2   :  { %p8349_p6 = por %p8348_p5, %p8347_p4 }
 0x1f4   :  { %p8350_p7 = pnand %p8349_p6, %p8343_p3 }
 0x1f6   :  { %8353 = shalt.err (!%p8350_p7)
}
 0x1f7   :  { %s10955_s2 = sld [smem:[#allocation119_spill]]  ;;  %s9013_s7 = smov [#allocation18]  }
 0x1f8   :  { %145 = dma.hbm_to_vmem [thread:$0]  %s10954_s14, 128, %s143_s9, [#allocation14]  }
 0x1f9   :  { %s166_s12 = sshll.u32 %s9013_s7, 4  ;;  %s9014_s29 = smov [#allocation21]   ;;  %s167_s12 = int_to_ptr.vmem [resolvable:$true] %s166_s12 }
 0x1fa   :  { %s188_s10 = sshll.u32 %s9014_s29, 4  ;;  %s189_s10 = int_to_ptr.vmem [resolvable:$true] %s188_s10 }
 0x1fd   :  { %s8354_s15 = scalar_lea.hbm %s10955_s2, 16 }
 0x1fe   :  { %p8355_p8 = scmp.ne.s32.totalorder %s10955_s2, %s8354_s15  ;;  %p8358_p9 = scmp.lt.u32.totalorder %s8354_s15, %s10955_s2 }
 0x200   :  { %p8360_p10 = pnand %p8358_p9, %p8355_p8 }
 0x202   :  { %8363 = shalt.err (!%p8360_p10)
}
 0x203   :  { %s8364_s16 = scalar_lea.vmem %s167_s12, 16  ;;  %s8368_s24 = scalar_lea.vmem %s167_s12, 32 }
 0x204   :  { %p8365_p11 = scmp.ne.s32.totalorder %s167_s12, %s8364_s16  ;;  %p8369_p12 = scmp.lt.s32.totalorder %s167_s12, %s167_s12 }
 0x205   :  { %p8370_p13 = scmp.lt.s32.totalorder %s8368_s24, %s8364_s16 }
 0x207   :  { %p8371_p0 = por %p8370_p13, %p8369_p12 }
 0x209   :  { %p8372_p1 = pnand %p8371_p0, %p8365_p11 }
 0x20b   :  { %8375 = shalt.err (!%p8372_p1)
}
 0x20c   :  { %s10956_s27 = sld [smem:[#allocation120_spill]] }
 0x20d   :  { %169 = dma.hbm_to_vmem [thread:$0]  %s10955_s2, 16, %s167_s12, [#allocation17]  }
 0x212   :  { %s8376_s17 = scalar_lea.hbm %s10956_s27, 16 }
 0x213   :  { %p8377_p2 = scmp.ne.s32.totalorder %s10956_s27, %s8376_s17  ;;  %p8380_p3 = scmp.lt.u32.totalorder %s8376_s17, %s10956_s27 }
 0x215   :  { %p8382_p4 = pnand %p8380_p3, %p8377_p2 }
 0x217   :  { %8385 = shalt.err (!%p8382_p4)
}
 0x218   :  { %s8386_s18 = scalar_lea.vmem %s189_s10, 16  ;;  %s8390_s0 = scalar_lea.vmem %s189_s10, 32 }
 0x219   :  { %p8387_p5 = scmp.ne.s32.totalorder %s189_s10, %s8386_s18  ;;  %p8391_p6 = scmp.lt.s32.totalorder %s189_s10, %s189_s10 }
 0x21a   :  { %p8392_p7 = scmp.lt.s32.totalorder %s8390_s0, %s8386_s18 }
 0x21c   :  { %p8393_p8 = por %p8392_p7, %p8391_p6 }
 0x21e   :  { %p8394_p9 = pnand %p8393_p8, %p8387_p5 }
 0x220   :  { %8397 = shalt.err (!%p8394_p9)
}
 0x221   :  { %s10957_s22 = sld [smem:[#allocation121_spill]]  ;;  %s9015_s8 = smov [#allocation24]  }
 0x222   :  { %191 = dma.hbm_to_vmem [thread:$0]  %s10956_s27, 16, %s189_s10, [#allocation20]  }
 0x223   :  { %s208_s23 = sshll.u32 %s9015_s8, 4  ;;  %s9016_s28 = smov [#allocation27]   ;;  %s209_s23 = int_to_ptr.vmem [resolvable:$true] %s208_s23 }
 0x224   :  { %s230_s3 = sshll.u32 %s9016_s28, 4  ;;  %s231_s3 = int_to_ptr.vmem [resolvable:$true] %s230_s3 }
 0x227   :  { %s8398_s26 = scalar_lea.hbm %s10957_s22, 16 }
 0x228   :  { %p8399_p10 = scmp.ne.s32.totalorder %s10957_s22, %s8398_s26  ;;  %p8402_p11 = scmp.lt.u32.totalorder %s8398_s26, %s10957_s22 }
 0x22a   :  { %p8404_p12 = pnand %p8402_p11, %p8399_p10 }
 0x22c   :  { %8407 = shalt.err (!%p8404_p12)
}
 0x22d   :  { %s8408_s9 = scalar_lea.vmem %s209_s23, 16  ;;  %s8412_s20 = scalar_lea.vmem %s209_s23, 32 }
 0x22e   :  { %p8409_p13 = scmp.ne.s32.totalorder %s209_s23, %s8408_s9  ;;  %p8413_p0 = scmp.lt.s32.totalorder %s209_s23, %s209_s23 }
 0x22f   :  { %p8414_p1 = scmp.lt.s32.totalorder %s8412_s20, %s8408_s9 }
 0x231   :  { %p8415_p2 = por %p8414_p1, %p8413_p0 }
 0x233   :  { %p8416_p3 = pnand %p8415_p2, %p8409_p13 }
 0x235   :  { %8419 = shalt.err (!%p8416_p3)
}
 0x236   :  { %s10958_s5 = sld [smem:[#allocation122_spill]] }
 0x237   :  { %211 = dma.hbm_to_vmem [thread:$0]  %s10957_s22, 16, %s209_s23, [#allocation23]  }
 0x23c   :  { %s8420_s14 = scalar_lea.hbm %s10958_s5, 16 }
 0x23d   :  { %p8421_p4 = scmp.ne.s32.totalorder %s10958_s5, %s8420_s14  ;;  %p8424_p5 = scmp.lt.u32.totalorder %s8420_s14, %s10958_s5 }
 0x23f   :  { %p8426_p6 = pnand %p8424_p5, %p8421_p4 }
 0x241   :  { %8429 = shalt.err (!%p8426_p6)
}
 0x242   :  { %s8430_s1 = scalar_lea.vmem %s231_s3, 16  ;;  %s8434_s4 = scalar_lea.vmem %s231_s3, 32 }
 0x243   :  { %p8431_p7 = scmp.ne.s32.totalorder %s231_s3, %s8430_s1  ;;  %p8435_p8 = scmp.lt.s32.totalorder %s231_s3, %s231_s3 }
 0x244   :  { %p8436_p9 = scmp.lt.s32.totalorder %s8434_s4, %s8430_s1 }
 0x246   :  { %p8437_p10 = por %p8436_p9, %p8435_p8 }
 0x248   :  { %p8438_p11 = pnand %p8437_p10, %p8431_p7 }
 0x24a   :  { %8441 = shalt.err (!%p8438_p11)
}
 0x24b   :  { %s10959_s2 = sld [smem:[#allocation123_spill]]  ;;  %s9017_s7 = smov [#allocation30]  }
 0x24c   :  { %233 = dma.hbm_to_vmem [thread:$0]  %s10958_s5, 16, %s231_s3, [#allocation26]  }
 0x24d   :  { %s250_s12 = sshll.u32 %s9017_s7, 4  ;;  %s9018_s29 = smov [#allocation33]   ;;  %s251_s12 = int_to_ptr.vmem [resolvable:$true] %s250_s12 }
 0x24e   :  { %s272_s10 = sshll.u32 %s9018_s29, 4  ;;  %s273_s10 = int_to_ptr.vmem [resolvable:$true] %s272_s10 }
 0x251   :  { %s8442_s15 = scalar_lea.hbm %s10959_s2, 16 }
 0x252   :  { %p8443_p12 = scmp.ne.s32.totalorder %s10959_s2, %s8442_s15  ;;  %p8446_p13 = scmp.lt.u32.totalorder %s8442_s15, %s10959_s2 }
 0x254   :  { %p8448_p0 = pnand %p8446_p13, %p8443_p12 }
 0x256   :  { %8451 = shalt.err (!%p8448_p0)
}
 0x257   :  { %s8452_s16 = scalar_lea.vmem %s251_s12, 16  ;;  %s8456_s24 = scalar_lea.vmem %s251_s12, 32 }
 0x258   :  { %p8453_p1 = scmp.ne.s32.totalorder %s251_s12, %s8452_s16  ;;  %p8457_p2 = scmp.lt.s32.totalorder %s251_s12, %s251_s12 }
 0x259   :  { %p8458_p3 = scmp.lt.s32.totalorder %s8456_s24, %s8452_s16 }
 0x25b   :  { %p8459_p4 = por %p8458_p3, %p8457_p2 }
 0x25d   :  { %p8460_p5 = pnand %p8459_p4, %p8453_p1 }
 0x25f   :  { %8463 = shalt.err (!%p8460_p5)
}
 0x260   :  { %s10960_s27 = sld [smem:[#allocation124_spill]] }
 0x261   :  { %253 = dma.hbm_to_vmem [thread:$0]  %s10959_s2, 16, %s251_s12, [#allocation29]  }
 0x266   :  { %s8464_s17 = scalar_lea.hbm %s10960_s27, 16 }
 0x267   :  { %p8465_p6 = scmp.ne.s32.totalorder %s10960_s27, %s8464_s17  ;;  %p8468_p7 = scmp.lt.u32.totalorder %s8464_s17, %s10960_s27 }
 0x269   :  { %p8470_p8 = pnand %p8468_p7, %p8465_p6 }
 0x26b   :  { %8473 = shalt.err (!%p8470_p8)
}
 0x26c   :  { %s8474_s18 = scalar_lea.vmem %s273_s10, 16  ;;  %s8478_s0 = scalar_lea.vmem %s273_s10, 32 }
 0x26d   :  { %p8475_p9 = scmp.ne.s32.totalorder %s273_s10, %s8474_s18  ;;  %p8479_p10 = scmp.lt.s32.totalorder %s273_s10, %s273_s10 }
 0x26e   :  { %p8480_p11 = scmp.lt.s32.totalorder %s8478_s0, %s8474_s18 }
 0x270   :  { %p8481_p12 = por %p8480_p11, %p8479_p10 }
 0x272   :  { %p8482_p13 = pnand %p8481_p12, %p8475_p9 }
 0x274   :  { %8485 = shalt.err (!%p8482_p13)
}
 0x275   :  { %s10961_s22 = sld [smem:[#allocation125_spill]]  ;;  %s9019_s8 = smov [#allocation36]  }
 0x276   :  { %275 = dma.hbm_to_vmem [thread:$0]  %s10960_s27, 16, %s273_s10, [#allocation32]  }
 0x277   :  { %s292_s23 = sshll.u32 %s9019_s8, 4  ;;  %s9020_s28 = smov [#allocation39]   ;;  %s293_s23 = int_to_ptr.vmem [resolvable:$true] %s292_s23 }
 0x278   :  { %s314_s3 = sshll.u32 %s9020_s28, 4  ;;  %s315_s3 = int_to_ptr.vmem [resolvable:$true] %s314_s3 }
 0x27b   :  { %s8486_s26 = scalar_lea.hbm %s10961_s22, 16 }
 0x27c   :  { %p8487_p0 = scmp.ne.s32.totalorder %s10961_s22, %s8486_s26  ;;  %p8490_p1 = scmp.lt.u32.totalorder %s8486_s26, %s10961_s22 }
 0x27e   :  { %p8492_p2 = pnand %p8490_p1, %p8487_p0 }
 0x280   :  { %8495 = shalt.err (!%p8492_p2)
}
 0x281   :  { %s8496_s9 = scalar_lea.vmem %s293_s23, 16  ;;  %s8500_s20 = scalar_lea.vmem %s293_s23, 32 }
 0x282   :  { %p8497_p3 = scmp.ne.s32.totalorder %s293_s23, %s8496_s9  ;;  %p8501_p4 = scmp.lt.s32.totalorder %s293_s23, %s293_s23 }
 0x283   :  { %p8502_p5 = scmp.lt.s32.totalorder %s8500_s20, %s8496_s9 }
 0x285   :  { %p8503_p6 = por %p8502_p5, %p8501_p4 }
 0x287   :  { %p8504_p7 = pnand %p8503_p6, %p8497_p3 }
 0x289   :  { %8507 = shalt.err (!%p8504_p7)
}
 0x28a   :  { %s10962_s5 = sld [smem:[#allocation127_spill]] }
 0x28b   :  { %295 = dma.hbm_to_vmem [thread:$0]  %s10961_s22, 16, %s293_s23, [#allocation35]  }
 0x290   :  { %s8508_s14 = scalar_lea.hbm %s10962_s5, 128 }
 0x291   :  { %p8509_p8 = scmp.ne.s32.totalorder %s10962_s5, %s8508_s14  ;;  %p8512_p9 = scmp.lt.u32.totalorder %s8508_s14, %s10962_s5 }
 0x293   :  { %p8514_p10 = pnand %p8512_p9, %p8509_p8 }
 0x295   :  { %8517 = shalt.err (!%p8514_p10)
}
 0x296   :  { %s8518_s1 = scalar_lea.vmem %s315_s3, 128  ;;  %p8523_p12 = scmp.lt.s32.totalorder %s315_s3, %s315_s3 }
 0x297   :  { %p8519_p11 = scmp.ne.s32.totalorder %s315_s3, %s8518_s1  ;;  %p8524_p13 = scmp.lt.s32.totalorder %s8518_s1, %s8518_s1 }
 0x299   :  { %p8525_p0 = por %p8524_p13, %p8523_p12 }
 0x29b   :  { %p8526_p1 = pnand %p8525_p0, %p8519_p11 }
 0x29d   :  { %8529 = shalt.err (!%p8526_p1)
}
 0x29e   :  { %s10963_s4 = sld [smem:[#allocation128_spill]]  ;;  %s9021_s2 = smov [#allocation42]  }
 0x29f   :  { %317 = dma.hbm_to_vmem [thread:$0]  %s10962_s5, 128, %s315_s3, [#allocation38]  }
 0x2a0   :  { %s334_s7 = sshll.u32 %s9021_s2, 4  ;;  %s9022_s12 = smov [#allocation45]   ;;  %s335_s7 = int_to_ptr.vmem [resolvable:$true] %s334_s7 }
 0x2a1   :  { %s356_s29 = sshll.u32 %s9022_s12, 4  ;;  %s357_s29 = int_to_ptr.vmem [resolvable:$true] %s356_s29 }
 0x2a4   :  { %s8530_s10 = scalar_lea.hbm %s10963_s4, 128 }
 0x2a5   :  { %p8531_p2 = scmp.ne.s32.totalorder %s10963_s4, %s8530_s10  ;;  %p8534_p3 = scmp.lt.u32.totalorder %s8530_s10, %s10963_s4 }
 0x2a7   :  { %p8536_p4 = pnand %p8534_p3, %p8531_p2 }
 0x2a9   :  { %8539 = shalt.err (!%p8536_p4)
}
 0x2aa   :  { %s8540_s15 = scalar_lea.vmem %s335_s7, 128  ;;  %p8545_p6 = scmp.lt.s32.totalorder %s335_s7, %s335_s7 }
 0x2ab   :  { %p8541_p5 = scmp.ne.s32.totalorder %s335_s7, %s8540_s15  ;;  %p8546_p7 = scmp.lt.s32.totalorder %s8540_s15, %s8540_s15 }
 0x2ad   :  { %p8547_p8 = por %p8546_p7, %p8545_p6 }
 0x2af   :  { %p8548_p9 = pnand %p8547_p8, %p8541_p5 }
 0x2b1   :  { %8551 = shalt.err (!%p8548_p9)
}
 0x2b2   :  { %s10964_s16 = sld [smem:[#allocation130_spill]] }
 0x2b3   :  { %337 = dma.hbm_to_vmem [thread:$0]  %s10963_s4, 128, %s335_s7, [#allocation41]  }
 0x2b8   :  { %s8552_s24 = scalar_lea.hbm %s10964_s16, 32 }
 0x2b9   :  { %p8553_p10 = scmp.ne.s32.totalorder %s10964_s16, %s8552_s24  ;;  %p8556_p11 = scmp.lt.u32.totalorder %s8552_s24, %s10964_s16 }
 0x2bb   :  { %p8558_p12 = pnand %p8556_p11, %p8553_p10 }
 0x2bd   :  { %8561 = shalt.err (!%p8558_p12)
}
 0x2be   :  { %s8562_s27 = scalar_lea.vmem %s357_s29, 32  ;;  %p8567_p0 = scmp.lt.s32.totalorder %s357_s29, %s357_s29 }
 0x2bf   :  { %p8563_p13 = scmp.ne.s32.totalorder %s357_s29, %s8562_s27  ;;  %p8568_p1 = scmp.lt.s32.totalorder %s8562_s27, %s8562_s27 }
 0x2c1   :  { %p8569_p2 = por %p8568_p1, %p8567_p0 }
 0x2c3   :  { %p8570_p3 = pnand %p8569_p2, %p8563_p13 }
 0x2c5   :  { %8573 = shalt.err (!%p8570_p3)
}
 0x2c6   :  { %s10965_s17 = sld [smem:[#allocation131_spill]]  ;;  %s9023_s18 = smov [#allocation48]  }
 0x2c7   :  { %359 = dma.hbm_to_vmem [thread:$0]  %s10964_s16, 32, %s357_s29, [#allocation44]  }
 0x2c8   :  { %s376_s0 = sshll.u32 %s9023_s18, 4  ;;  %s9024_s22 = smov [#allocation51]   ;;  %s377_s0 = int_to_ptr.vmem [resolvable:$true] %s376_s0 }
 0x2c9   :  { %s399_s8 = sshll.u32 %s9024_s22, 4  ;;  %s9513_s8 = int_to_ptr.vmem [resolvable:$true] %s399_s8 }
 0x2cc   :  { %s8574_s23 = scalar_lea.hbm %s10965_s17, 32 }
 0x2cd   :  { %p8575_p4 = scmp.ne.s32.totalorder %s10965_s17, %s8574_s23  ;;  %p8578_p5 = scmp.lt.u32.totalorder %s8574_s23, %s10965_s17 }
 0x2cf   :  { %p8580_p6 = pnand %p8578_p5, %p8575_p4 }
 0x2d1   :  { %8583 = shalt.err (!%p8580_p6)
}
 0x2d2   :  { %s8584_s28 = scalar_lea.vmem %s377_s0, 32  ;;  %p8589_p8 = scmp.lt.s32.totalorder %s377_s0, %s377_s0 }
 0x2d3   :  { %p8585_p7 = scmp.ne.s32.totalorder %s377_s0, %s8584_s28  ;;  %p8590_p9 = scmp.lt.s32.totalorder %s8584_s28, %s8584_s28 }
 0x2d5   :  { %p8591_p10 = por %p8590_p9, %p8589_p8 }
 0x2d7   :  { %p8592_p11 = pnand %p8591_p10, %p8585_p7 }
 0x2d9   :  { %8595 = shalt.err (!%p8592_p11)
}
 0x2da   :  { %s10966_s3 = sld [smem:[#allocation133_spill]] }
 0x2db   :  { %379 = dma.hbm_to_vmem [thread:$0]  %s10965_s17, 32, %s377_s0, [#allocation47]  }
 0x2e0   :  { %s8596_s26 = scalar_lea.hbm %s10966_s3, 256 }
 0x2e1   :  { %p8597_p12 = scmp.ne.s32.totalorder %s10966_s3, %s8596_s26  ;;  %p8600_p13 = scmp.lt.u32.totalorder %s8596_s26, %s10966_s3 }
 0x2e3   :  { %p8602_p0 = pnand %p8600_p13, %p8597_p12 }
 0x2e5   :  { %8605 = shalt.err (!%p8602_p0)
}
 0x2e6   :  { %s8606_s9 = scalar_lea.vmem %s9513_s8, 256  ;;  %p8611_p2 = scmp.lt.s32.totalorder %s9513_s8, %s9513_s8 }
 0x2e7   :  { %p8607_p1 = scmp.ne.s32.totalorder %s9513_s8, %s8606_s9  ;;  %p8612_p3 = scmp.lt.s32.totalorder %s8606_s9, %s8606_s9 }
 0x2e9   :  { %p8613_p4 = por %p8612_p3, %p8611_p2 }
 0x2eb   :  { %p8614_p5 = pnand %p8613_p4, %p8607_p1 }
 0x2ed   :  { %8617 = shalt.err (!%p8614_p5)
}
 0x2ee   :  { %s10967_s20 = sld [smem:[#allocation134_spill]]  ;;  %s9025_s5 = smov [#allocation54]  }
 0x2ef   :  { %405 = dma.hbm_to_vmem [thread:$0]  %s10966_s3, 256, %s9513_s8, [#allocation50], %s8999_s6, %s8999_s6, %s9000_s21  }
 0x2f0   :  { %s422_s14 = sshll.u32 %s9025_s5, 4  ;;  %s9026_s1 = smov [#allocation57]   ;;  %s423_s14 = int_to_ptr.vmem [resolvable:$true] %s422_s14 }
 0x2f1   :  { %s441_s4 = sshll.u32 %s9026_s1, 4  ;;  %s9531_s4 = int_to_ptr.vmem [resolvable:$true] %s441_s4 }
 0x2f4   :  { %s8618_s2 = scalar_lea.hbm %s10967_s20, 16 }
 0x2f5   :  { %p8619_p6 = scmp.ne.s32.totalorder %s10967_s20, %s8618_s2  ;;  %p8622_p7 = scmp.lt.u32.totalorder %s8618_s2, %s10967_s20 }
 0x2f7   :  { %p8624_p8 = pnand %p8622_p7, %p8619_p6 }
 0x2f9   :  { %8627 = shalt.err (!%p8624_p8)
}
 0x2fa   :  { %s8628_s7 = scalar_lea.vmem %s423_s14, 16  ;;  %s8632_s12 = scalar_lea.vmem %s423_s14, 32 }
 0x2fb   :  { %p8629_p9 = scmp.ne.s32.totalorder %s423_s14, %s8628_s7  ;;  %p8633_p10 = scmp.lt.s32.totalorder %s423_s14, %s423_s14 }
 0x2fc   :  { %p8634_p11 = scmp.lt.s32.totalorder %s8632_s12, %s8628_s7 }
 0x2fe   :  { %p8635_p12 = por %p8634_p11, %p8633_p10 }
 0x300   :  { %p8636_p13 = pnand %p8635_p12, %p8629_p9 }
 0x302   :  { %8639 = shalt.err (!%p8636_p13)
}
 0x303   :  { %s10968_s29 = sld [smem:[#allocation135_spill]] }
 0x304   :  { %425 = dma.hbm_to_vmem [thread:$0]  %s10967_s20, 16, %s423_s14, [#allocation53]  }
 0x309   :  { %s8640_s10 = scalar_lea.hbm %s10968_s29, 2048 }
 0x30a   :  { %p8641_p0 = scmp.ne.s32.totalorder %s10968_s29, %s8640_s10  ;;  %p8644_p1 = scmp.lt.u32.totalorder %s8640_s10, %s10968_s29 }
 0x30c   :  { %p8646_p2 = pnand %p8644_p1, %p8641_p0 }
 0x30e   :  { %8649 = shalt.err (!%p8646_p2)
}
 0x30f   :  { %s8650_s15 = scalar_lea.vmem %s9531_s4, 2048  ;;  %p8655_p4 = scmp.lt.s32.totalorder %s9531_s4, %s9531_s4 }
 0x310   :  { %p8651_p3 = scmp.ne.s32.totalorder %s9531_s4, %s8650_s15  ;;  %p8656_p5 = scmp.lt.s32.totalorder %s8650_s15, %s8650_s15 }
 0x312   :  { %p8657_p6 = por %p8656_p5, %p8655_p4 }
 0x314   :  { %p8658_p7 = pnand %p8657_p6, %p8651_p3 }
 0x316   :  { %8661 = shalt.err (!%p8658_p7)
}
 0x317   :  { %s10969_s16 = sld [smem:[#allocation137_spill]]  ;;  %s9027_s24 = smov [#allocation60]  }
 0x318   :  { %447 = dma.hbm_to_vmem [thread:$0]  %s10968_s29, 2048, %s9531_s4, [#allocation56], %s8999_s6, %s8999_s6, %s9000_s21  }
 0x319   :  { %s465_s27 = sshll.u32 %s9027_s24, 4  ;;  %s9028_s17 = smov [#allocation63]   ;;  %s466_s27 = int_to_ptr.vmem [resolvable:$true] %s465_s27 }
 0x31a   :  { %s488_s18 = sshll.u32 %s9028_s17, 4  ;;  %s489_s18 = int_to_ptr.vmem [resolvable:$true] %s488_s18 }
 0x31d   :  { %s8662_s0 = scalar_lea.hbm %s10969_s16, 256 }
 0x31e   :  { %p8663_p8 = scmp.ne.s32.totalorder %s10969_s16, %s8662_s0  ;;  %p8666_p9 = scmp.lt.u32.totalorder %s8662_s0, %s10969_s16 }
 0x320   :  { %p8668_p10 = pnand %p8666_p9, %p8663_p8 }
 0x322   :  { %8671 = shalt.err (!%p8668_p10)
}
 0x323   :  { %s8672_s22 = scalar_lea.vmem %s466_s27, 256  ;;  %p8677_p12 = scmp.lt.s32.totalorder %s466_s27, %s466_s27 }
 0x324   :  { %p8673_p11 = scmp.ne.s32.totalorder %s466_s27, %s8672_s22  ;;  %p8678_p13 = scmp.lt.s32.totalorder %s8672_s22, %s8672_s22 }
 0x326   :  { %p8679_p0 = por %p8678_p13, %p8677_p12 }
 0x328   :  { %p8680_p1 = pnand %p8679_p0, %p8673_p11 }
 0x32a   :  { %8683 = shalt.err (!%p8680_p1)
}
 0x32b   :  { %s10970_s8 = sld [smem:[#allocation139_spill]] }
 0x32c   :  { %471 = dma.hbm_to_vmem [thread:$0]  %s10969_s16, 256, %s466_s27, [#allocation59], %s8999_s6, %s8999_s6, %s9000_s21  }
 0x331   :  { %s8684_s23 = scalar_lea.hbm %s10970_s8, 16 }
 0x332   :  { %p8685_p2 = scmp.ne.s32.totalorder %s10970_s8, %s8684_s23  ;;  %p8688_p3 = scmp.lt.u32.totalorder %s8684_s23, %s10970_s8 }
 0x334   :  { %p8690_p4 = pnand %p8688_p3, %p8685_p2 }
 0x336   :  { %8693 = shalt.err (!%p8690_p4)
}
 0x337   :  { %s8694_s28 = scalar_lea.vmem %s489_s18, 16  ;;  %s8698_s3 = scalar_lea.vmem %s489_s18, 32 }
 0x338   :  { %p8695_p5 = scmp.ne.s32.totalorder %s489_s18, %s8694_s28  ;;  %p8699_p6 = scmp.lt.s32.totalorder %s489_s18, %s489_s18 }
 0x339   :  { %p8700_p7 = scmp.lt.s32.totalorder %s8698_s3, %s8694_s28 }
 0x33b   :  { %p8701_p8 = por %p8700_p7, %p8699_p6 }
 0x33d   :  { %p8702_p9 = pnand %p8701_p8, %p8695_p5 }
 0x33f   :  { %8705 = shalt.err (!%p8702_p9)
}
 0x340   :  { %s10971_s26 = sld [smem:[#allocation141_spill]]  ;;  %s9029_s9 = smov [#allocation66]  }
 0x341   :  { %491 = dma.hbm_to_vmem [thread:$0]  %s10970_s8, 16, %s489_s18, [#allocation62]  }
 0x342   :  { %s507_s20 = sshll.u32 %s9029_s9, 4  ;;  %s9030_s5 = smov [#allocation69]   ;;  %s508_s20 = int_to_ptr.vmem [resolvable:$true] %s507_s20 }
 0x343   :  { %s531_s14 = sshll.u32 %s9030_s5, 4  ;;  %s9560_s14 = int_to_ptr.vmem [resolvable:$true] %s531_s14 }
 0x346   :  { %s8706_s1 = scalar_lea.hbm %s10971_s26, 2048 }
 0x347   :  { %p8707_p10 = scmp.ne.s32.totalorder %s10971_s26, %s8706_s1  ;;  %p8710_p11 = scmp.lt.u32.totalorder %s8706_s1, %s10971_s26 }
 0x349   :  { %p8712_p12 = pnand %p8710_p11, %p8707_p10 }
 0x34b   :  { %8715 = shalt.err (!%p8712_p12)
}
 0x34c   :  { %s8716_s4 = scalar_lea.vmem %s508_s20, 2048  ;;  %p8721_p0 = scmp.lt.s32.totalorder %s508_s20, %s508_s20 }
 0x34d   :  { %p8717_p13 = scmp.ne.s32.totalorder %s508_s20, %s8716_s4  ;;  %p8722_p1 = scmp.lt.s32.totalorder %s8716_s4, %s8716_s4 }
 0x34f   :  { %p8723_p2 = por %p8722_p1, %p8721_p0 }
 0x351   :  { %p8724_p3 = pnand %p8723_p2, %p8717_p13 }
 0x353   :  { %8727 = shalt.err (!%p8724_p3)
}
 0x354   :  { %s10972_s2 = sld [smem:[#allocation143_spill]] }
 0x355   :  { %513 = dma.hbm_to_vmem [thread:$0]  %s10971_s26, 2048, %s508_s20, [#allocation65], %s8999_s6, %s8999_s6, %s9000_s21  }
 0x35a   :  { %s8728_s7 = scalar_lea.hbm %s10972_s2, 256 }
 0x35b   :  { %p8729_p4 = scmp.ne.s32.totalorder %s10972_s2, %s8728_s7  ;;  %p8732_p5 = scmp.lt.u32.totalorder %s8728_s7, %s10972_s2 }
 0x35d   :  { %p8734_p6 = pnand %p8732_p5, %p8729_p4 }
 0x35f   :  { %8737 = shalt.err (!%p8734_p6)
}
 0x360   :  { %s8738_s12 = scalar_lea.vmem %s9560_s14, 256  ;;  %p8743_p8 = scmp.lt.s32.totalorder %s9560_s14, %s9560_s14 }
 0x361   :  { %p8739_p7 = scmp.ne.s32.totalorder %s9560_s14, %s8738_s12  ;;  %p8744_p9 = scmp.lt.s32.totalorder %s8738_s12, %s8738_s12 }
 0x363   :  { %p8745_p10 = por %p8744_p9, %p8743_p8 }
 0x365   :  { %p8746_p11 = pnand %p8745_p10, %p8739_p7 }
 0x367   :  { %8749 = shalt.err (!%p8746_p11)
}
 0x368   :  { %s10973_s29 = sld [smem:[#allocation145_spill]]  ;;  %s9031_s10 = smov [#allocation72]  }
 0x369   :  { %537 = dma.hbm_to_vmem [thread:$0]  %s10972_s2, 256, %s9560_s14, [#allocation68], %s8999_s6, %s8999_s6, %s9000_s21  }
 0x36a   :  { %s554_s15 = sshll.u32 %s9031_s10, 4  ;;  %s9032_s16 = smov [#allocation75]   ;;  %s555_s15 = int_to_ptr.vmem [resolvable:$true] %s554_s15 }
 0x36b   :  { %s573_s24 = sshll.u32 %s9032_s16, 4  ;;  %s9581_s24 = int_to_ptr.vmem [resolvable:$true] %s573_s24 }
 0x36e   :  { %s8750_s27 = scalar_lea.hbm %s10973_s29, 16 }
 0x36f   :  { %p8751_p12 = scmp.ne.s32.totalorder %s10973_s29, %s8750_s27  ;;  %p8754_p13 = scmp.lt.u32.totalorder %s8750_s27, %s10973_s29 }
 0x371   :  { %p8756_p0 = pnand %p8754_p13, %p8751_p12 }
 0x373   :  { %8759 = shalt.err (!%p8756_p0)
}
 0x374   :  { %s8760_s17 = scalar_lea.vmem %s555_s15, 16  ;;  %s8764_s18 = scalar_lea.vmem %s555_s15, 32 }
 0x375   :  { %p8761_p1 = scmp.ne.s32.totalorder %s555_s15, %s8760_s17  ;;  %p8765_p2 = scmp.lt.s32.totalorder %s555_s15, %s555_s15 }
 0x376   :  { %p8766_p3 = scmp.lt.s32.totalorder %s8764_s18, %s8760_s17 }
 0x378   :  { %p8767_p4 = por %p8766_p3, %p8765_p2 }
 0x37a   :  { %p8768_p5 = pnand %p8767_p4, %p8761_p1 }
 0x37c   :  { %8771 = shalt.err (!%p8768_p5)
}
 0x37d   :  { %s10974_s0 = sld [smem:[#allocation147_spill]] }
 0x37e   :  { %557 = dma.hbm_to_vmem [thread:$0]  %s10973_s29, 16, %s555_s15, [#allocation71]  }
 0x383   :  { %s8772_s22 = scalar_lea.hbm %s10974_s0, 1024 }
 0x384   :  { %p8773_p6 = scmp.ne.s32.totalorder %s10974_s0, %s8772_s22  ;;  %p8776_p7 = scmp.lt.u32.totalorder %s8772_s22, %s10974_s0 }
 0x386   :  { %p8778_p8 = pnand %p8776_p7, %p8773_p6 }
 0x388   :  { %8781 = shalt.err (!%p8778_p8)
}
 0x389   :  { %s8782_s8 = scalar_lea.vmem %s9581_s24, 1024  ;;  %p8787_p10 = scmp.lt.s32.totalorder %s9581_s24, %s9581_s24 }
 0x38a   :  { %p8783_p9 = scmp.ne.s32.totalorder %s9581_s24, %s8782_s8  ;;  %p8788_p11 = scmp.lt.s32.totalorder %s8782_s8, %s8782_s8 }
 0x38c   :  { %p8789_p12 = por %p8788_p11, %p8787_p10 }
 0x38e   :  { %p8790_p13 = pnand %p8789_p12, %p8783_p9 }
 0x390   :  { %8793 = shalt.err (!%p8790_p13)
}
 0x391   :  { %579 = dma.hbm_to_vmem [thread:$0]  %s10974_s0, 1024, %s9581_s24, [#allocation74], %s8987_s11, %s8987_s11, %s8988_s25  }
 0x392   :  { %s9033_s23 = smov [#allocation78]   ;;  %s9034_s3 = smov [#allocation79]  }
 0x393   :  { %s597_s28 = sshll.u32 %s9033_s23, 4  ;;  %s610_s26 = sshll.u32 %s9034_s3, 4  ;;  %s598_s28 = int_to_ptr.vmem [resolvable:$true] %s597_s28  ;;  %s611_s26 = int_to_ptr.vmem [resolvable:$true] %s610_s26 }
 0x394   :  { %s8794_s9 = scalar_lea.hbm %s9300_s30, 128 }
 0x395   :  { %p8795_p0 = scmp.ne.s32.totalorder %s9300_s30, %s8794_s9  ;;  %p8798_p1 = scmp.lt.u32.totalorder %s8794_s9, %s9300_s30 }
 0x397   :  { %p8800_p2 = pnand %p8798_p1, %p8795_p0 }
 0x399   :  { %8803 = shalt.err (!%p8800_p2)
}
 0x39a   :  { %s8804_s20 = scalar_lea.vmem %s598_s28, 128  ;;  %p8809_p4 = scmp.lt.s32.totalorder %s598_s28, %s598_s28 }
 0x39b   :  { %p8805_p3 = scmp.ne.s32.totalorder %s598_s28, %s8804_s20  ;;  %p8810_p5 = scmp.lt.s32.totalorder %s8804_s20, %s8804_s20 }
 0x39d   :  { %p8811_p6 = por %p8810_p5, %p8809_p4 }
 0x39f   :  { %p8812_p7 = pnand %p8811_p6, %p8805_p3 }
 0x3a1   :  { %8815 = shalt.err (!%p8812_p7)
}
 0x3a2   :  { %603 = dma.hbm_to_vmem [thread:$0]  %s9300_s30, 128, %s598_s28, [#allocation77], %s8987_s11, %s8987_s11, %s8988_s25  }
 0x3a3   :  { %s8816_s5 = scalar_lea.hbm %s9305_s13, 16 }
 0x3a4   :  { %p8817_p8 = scmp.ne.s32.totalorder %s9305_s13, %s8816_s5  ;;  %p8820_p9 = scmp.lt.u32.totalorder %s8816_s5, %s9305_s13 }
 0x3a6   :  { %p8822_p10 = pnand %p8820_p9, %p8817_p8 }
 0x3a8   :  { %8825 = shalt.err (!%p8822_p10)
}
 0x3a9   :  { %s8826_s14 = scalar_lea.vmem %s611_s26, 16  ;;  %s8830_s1 = scalar_lea.vmem %s611_s26, 32 }
 0x3aa   :  { %p8827_p11 = scmp.ne.s32.totalorder %s611_s26, %s8826_s14  ;;  %p8831_p12 = scmp.lt.s32.totalorder %s611_s26, %s611_s26 }
 0x3ab   :  { %p8832_p13 = scmp.lt.s32.totalorder %s8830_s1, %s8826_s14 }
 0x3ad   :  { %p8833_p0 = por %p8832_p13, %p8831_p12 }
 0x3af   :  { %p8834_p1 = pnand %p8833_p0, %p8827_p11 }
 0x3b1   :  { %8837 = shalt.err (!%p8834_p1)
}
 0x3b2   :  { %613 = dma.hbm_to_vmem [thread:$0]  %s9305_s13, 16, %s611_s26, [#allocation80]  }
 0x3b3   :  { %8882 = dma.done.wait [#allocation14], 128  }
 0x3b4   :  { %8883 = vsyncadd [#allocation14], 4294967168 }
 0x3b5   :  { %8884 = dma.done.wait [#allocation17], 32  }
 0x3b6   :  { %8885 = vsyncadd [#allocation17], 4294967264 }
 0x3b7   :  { %8886 = dma.done.wait [#allocation20], 272  }
 0x3b8   :  { %8887 = vsyncadd [#allocation20], 4294967024 }
 0x3b9   :  { %8888 = dma.done.wait [#allocation23], 32  }
 0x3ba   :  { %8889 = vsyncadd [#allocation23], 4294967264 }
 0x3bb   :  { %8890 = dma.done.wait [#allocation26], 272  }
 0x3bc   :  { %8891 = vsyncadd [#allocation26], 4294967024 }
 0x3bd   :  { %8892 = dma.done.wait [#allocation29], 32  }
 0x3be   :  { %8893 = vsyncadd [#allocation29], 4294967264 }
 0x3bf   :  { %8894 = dma.done.wait [#allocation32], 272  }
 0x3c0   :  { %8895 = vsyncadd [#allocation32], 4294967024 }
 0x3c1   :  { %8896 = dma.done.wait [#allocation35], 32  }
 0x3c2   :  { %8897 = vsyncadd [#allocation35], 4294967264 }
 0x3c3   :  { %8898 = dma.done.wait [#allocation38], 1152  }
 0x3c4   :  { %8899 = vsyncadd [#allocation38], 4294966144 }
 0x3c5   :  { %8900 = dma.done.wait [#allocation41], 256  }
 0x3c6   :  { %8901 = vsyncadd [#allocation41], 4294967040 }
 0x3c7   :  { %8902 = dma.done.wait [#allocation44], 288  }
 0x3c8   :  { %8903 = vsyncadd [#allocation44], 4294967008 }
 0x3c9   :  { %8904 = dma.done.wait [#allocation47], 64  }
 0x3ca   :  { %8905 = vsyncadd [#allocation47], 4294967232 }
 0x3cb   :  { %8906 = dma.done.wait [#allocation50], 512  }
 0x3cc   :  { %8907 = vsyncadd [#allocation50], 4294966784 }
 0x3cd   :  { %8908 = dma.done.wait [#allocation53], 48  }
 0x3ce   :  { %8909 = vsyncadd [#allocation53], 4294967248 }
 0x3cf   :  { %8910 = dma.done.wait [#allocation56], 2064  }
 0x3d0   :  { %8911 = vsyncadd [#allocation56], 4294965232 }
 0x3d1   :  { %8912 = dma.done.wait [#allocation59], 512  }
 0x3d2   :  { %8913 = vsyncadd [#allocation59], 4294966784 }
 0x3d3   :  { %8914 = dma.done.wait [#allocation62], 48  }
 0x3d4   :  { %8915 = vsyncadd [#allocation62], 4294967248 }
 0x3d5   :  { %8916 = dma.done.wait [#allocation65], 2064  }
 0x3d6   :  { %8917 = vsyncadd [#allocation65], 4294965232 }
 0x3d7   :  { %8918 = dma.done.wait [#allocation68], 512  }
 0x3d8   :  { %8919 = vsyncadd [#allocation68], 4294966784 }
 0x3d9   :  { %8920 = dma.done.wait [#allocation71], 48  }
 0x3da   :  { %8921 = vsyncadd [#allocation71], 4294967248 }
 0x3db   :  { %8922 = dma.done.wait [#allocation74], 1040  }
 0x3dc   :  { %8923 = vsyncadd [#allocation74], 4294966256 }
 0x3dd   :  { %8924 = dma.done.wait [#allocation77], 256  }
 0x3de   :  { %8925 = vsyncadd [#allocation77], 4294967040 }
 0x3df   :  { %8926 = dma.done.wait [#allocation80], 16  }
 0x3e0   :  { %8927 = vsyncadd [#allocation80], 4294967280  ;;  %s763_s13 = sld [smem:[#allocation0]]   ;;  %s9035_s30 = smov 256  }
 0x3e1   :  { %775 = sst [smem:[#allocation87]] %s9035_s30  ;;  %s9036_s4 = smov 2  }
 0x3e2   :  { %777 = sst [smem:[#allocation87 + $0x1]] %s9035_s30  ;;  %s10975_s2 = sld [smem:[#allocation126_spill]] }
 0x3e3   :  { %779 = sst [smem:[#allocation87 + $0x2]] %s9036_s4  ;;  %s9037_s7 = smov [#allocation10]  }
 0x3e4   :  { %s754_s12 = sshll.u32 %s9037_s7, 4  ;;  %781 = sst [smem:[#allocation87 + $0x3]] %s8987_s11  ;;  %s755_s12 = int_to_ptr.vmem [resolvable:$true] %s754_s12 }
 0x3e5   :  { %783 = sst [smem:[#allocation87 + $0x4]] %s8999_s6  ;;  %s9038_s29 = smov [#allocation11]  }
 0x3e6   :  { %785 = sst [smem:[#allocation87 + $0x5]] %s9036_s4  ;;  %s771_s10 = sshll.u32 %s9038_s29, 4  ;;  %s772_s10 = int_to_ptr.vmem [resolvable:$true] %s771_s10 }
 0x3e7   :  { %s6964_s15 = sshll.u32 %s763_s13, 26  ;;  %787 = sst [smem:[#allocation87 + $0x6]] %s8999_s6 }
 0x3e8   :  { %s6965_s16 = sadd.s32 134217728, %s6964_s15  ;;  %789 = sst [smem:[#allocation87 + $0x7]] %s8987_s11 }
 0x3e9   :  { %791 = sst [smem:[#allocation87 + $0x8]] %s8988_s25  ;;  %s8838_s24 = scalar_lea.hbm %s10975_s2, 6656 }
 0x3ea   :  { %p8839_p2 = scmp.ne.s32.totalorder %s10975_s2, %s8838_s24  ;;  %p8842_p3 = scmp.lt.u32.totalorder %s8838_s24, %s10975_s2 }
 0x3ec   :  { %p8844_p4 = pnand %p8842_p3, %p8839_p2 }
 0x3ee   :  { %8847 = shalt.err (!%p8844_p4)  }
 0x3ef   :  { %s8848_s27 = scalar_lea.vmem %s755_s12, 6656  ;;  %p8853_p6 = scmp.lt.s32.totalorder %s755_s12, %s755_s12 }
 0x3f0   :  { %p8849_p5 = scmp.ne.s32.totalorder %s755_s12, %s8848_s27  ;;  %p8854_p7 = scmp.lt.s32.totalorder %s8848_s27, %s8848_s27 }
 0x3f2   :  { %p8855_p8 = por %p8854_p7, %p8853_p6 }
 0x3f4   :  { %p8856_p9 = pnand %p8855_p8, %p8849_p5 }
 0x3f6   :  { %8859 = shalt.err (!%p8856_p9)  }
 0x3f7   :  { %s10976_s17 = sld [smem:[#allocation129_spill]]  ;;  %s10977_s18 = sld [smem:[#allocation115_spill]]  ;;  %vm931_vm0 = vcmask 1041409   ;;  %vm934_vm1 = vcmask 1042434   ;;  %vm937_vm2 = vcmask 1043459   ;;  %vm940_vm3 = vcmask 1044484  }
 0x3f8   :  { %s10978_s0 = sld [smem:[#allocation117_spill]]  ;;  %s9039_s11 = smov [#allocation12 + $0x1]   ;;  %vm943_vm4 = vcmask 1045509   ;;  %vm946_vm5 = vcmask 1046534   ;;  %vm949_vm6 = vcmask 1047559   ;;  %vm1475_vm7 = vcmask 130048  }
 0x3f9   :  { %757 = dma.hbm_to_vmem [thread:$0]  %s10975_s2, 6656, %s755_s12, [#allocation12]  ;;  %vm9042_vm8 = vmmov 0  }
 0x3fa   :  { %s9040_s25 = smov [#allocation86]  }
 0x3fd   :  { %793 = dma.general %s10976_s17, 16384, %s772_s10, %s9039_s11, %s9040_s25, [#allocation87], %s6965_s16, 0  }
 0x3fe   :  { %v9621_v0 = vld [vmem:[%s10977_s18] sm:$0xff]  ;;  %s10979_s22 = sld [smem:[#allocation114_spill]]  ;;  %v7680_v2 = vld [vmem:[%s10978_s0 + $0x8] sm:$0xff]   ;;  %v7681_v3 = vld [vmem:[%s10978_s0 + $0x10] sm:$0xff]   ;;  %s10980_s8 = sld [smem:[#allocation118_spill]] }
 0x3ff   :  { %v7679_v1 = vld [vmem:[%s10978_s0] sm:$0xff]   ;;  %v7682_v4 = vld [vmem:[%s10978_s0 + $0x18] sm:$0xff]   ;;  %v7684_v34 = vld [vmem:[%s10978_s0 + $0x28] sm:$0xff]  }
 0x400   :  { %7322 = vmatprep.subr.bf16.mxu0 %v7679_v1  ;;  %v7683_v9 = vld [vmem:[%s10978_s0 + $0x20] sm:$0xff]   ;;  %v7685_v46 = vld [vmem:[%s10978_s0 + $0x30] sm:$0xff]  }
 0x401   :  { %7323 = vmatpush3.bf16.msra.mxu0 %v7679_v1 }
 0x402   :  { %7324 = vmatprep.subr.bf16.mxu0 %v7680_v2 }
 0x404   :  { %v794_v5 = vld [vmem:[%s10979_s22] sm:$0x1]  ;;  %v795_v6 = vld [vmem:[%s10979_s22 + $0x10] sm:$0x1]  ;;  %v802_v14 = vld [vmem:[%s10979_s22 + $0x8] sm:$0x1] }
 0x405   :  { %7325 = vmatpush3.bf16.msra.mxu0 %v7680_v2  ;;  %v796_v7 = vld [vmem:[%s10979_s22 + $0x20] sm:$0x1]  ;;  %v797_v8 = vld [vmem:[%s10979_s22 + $0x30] sm:$0x1]  ;;  %v803_v15 = vld [vmem:[%s10979_s22 + $0x18] sm:$0x1] }
 0x406   :  { %7326 = vmatprep.subr.bf16.mxu0 %v7681_v3  ;;  %v798_v10 = vld [vmem:[%s10979_s22 + $0x40] sm:$0x1]  ;;  %v799_v11 = vld [vmem:[%s10979_s22 + $0x50] sm:$0x1]  ;;  %v804_v16 = vld [vmem:[%s10979_s22 + $0x28] sm:$0x1] }
 0x407   :  { %v800_v12 = vld [vmem:[%s10979_s22 + $0x60] sm:$0x1]  ;;  %v801_v13 = vld [vmem:[%s10979_s22 + $0x70] sm:$0x1]  ;;  %v805_v17 = vld [vmem:[%s10979_s22 + $0x38] sm:$0x1] }
 0x408   :  { %v806_v18 = vld [vmem:[%s10979_s22 + $0x48] sm:$0x1]  ;;  %v930_v19 = vrot.slane %v795_v6, 7  ;;  %v933_v20 = vrot.slane %v796_v7, 6  ;;  %v807_v21 = vld [vmem:[%s10979_s22 + $0x58] sm:$0x1] }
 0x409   :  { %7327 = vmatpush3.bf16.msra.mxu0 %v7681_v3  ;;  %v808_v22 = vld [vmem:[%s10979_s22 + $0x68] sm:$0x1]  ;;  %v936_v23 = vrot.slane %v797_v8, 5  ;;  %v939_v24 = vrot.slane %v798_v10, 4  ;;  %v809_v25 = vld [vmem:[%s10979_s22 + $0x78] sm:$0x1] }
 0x40a   :  { %7328 = vmatprep.subr.bf16.mxu0 %v7682_v4  ;;  %v932_v26 = vsel %vm931_vm0, %v930_v19, %v794_v5  ;;  %v942_v27 = vrot.slane %v799_v11, 3  ;;  %v960_v28 = vrot.slane %v803_v15, 7  ;;  %v962_v29 = vrot.slane %v804_v16, 6  ;;  %v810_v43 = vld [vmem:[%s10979_s22 + $0x4] sm:$0x1]  ;;  %v7686_v5 = vld [vmem:[%s10978_s0 + $0x38] sm:$0xff]  }
 0x40b   :  { %v935_v30 = vsel %vm934_vm1, %v933_v20, %v932_v26  ;;  %v945_v31 = vrot.slane %v800_v12, 2  ;;  %v964_v32 = vrot.slane %v805_v17, 5  ;;  %v966_v33 = vrot.slane %v806_v18, 4  ;;  %v811_v44 = vld [vmem:[%s10979_s22 + $0x14] sm:$0x1] }
 0x40c   :  { %v938_v35 = vsel %vm937_vm2, %v936_v23, %v935_v30  ;;  %v948_v36 = vrot.slane %v801_v13, 1  ;;  %v961_v37 = vsel %vm931_vm0, %v960_v28, %v802_v14  ;;  %v968_v38 = vrot.slane %v807_v21, 3  ;;  %v812_v45 = vld [vmem:[%s10979_s22 + $0x24] sm:$0x1]  ;;  %v813_v49 = vld [vmem:[%s10979_s22 + $0x34] sm:$0x1] }
 0x40d   :  { %7329 = vmatpush3.bf16.msra.mxu0 %v7682_v4  ;;  %v941_v39 = vsel %vm940_vm3, %v939_v24, %v938_v35  ;;  %v963_v40 = vsel %vm934_vm1, %v962_v29, %v961_v37  ;;  %v970_v41 = vrot.slane %v808_v22, 2  ;;  %v972_v42 = vrot.slane %v809_v25, 1  ;;  %v814_v50 = vld [vmem:[%s10979_s22 + $0x44] sm:$0x1]  ;;  %v815_v51 = vld [vmem:[%s10979_s22 + $0x54] sm:$0x1] }
 0x40e   :  { %7330 = vmatprep.subr.bf16.mxu0 %v7683_v9  ;;  %v944_v47 = vsel %vm943_vm4, %v942_v27, %v941_v39  ;;  %v965_v48 = vsel %vm937_vm2, %v964_v32, %v963_v40  ;;  %v816_v54 = vld [vmem:[%s10979_s22 + $0x64] sm:$0x1]  ;;  %v817_v55 = vld [vmem:[%s10979_s22 + $0x74] sm:$0x1]  ;;  %v819_v56 = vld [vmem:[%s10979_s22 + $0x1c] sm:$0x1] }
 0x40f   :  { %v947_v52 = vsel %vm946_vm5, %v945_v31, %v944_v47  ;;  %v967_v53 = vsel %vm940_vm3, %v966_v33, %v965_v48  ;;  %v820_v59 = vld [vmem:[%s10979_s22 + $0x2c] sm:$0x1]  ;;  %v821_v60 = vld [vmem:[%s10979_s22 + $0x3c] sm:$0x1]  ;;  %v983_v61 = vrot.slane %v811_v44, 7  ;;  %v985_v62 = vrot.slane %v812_v45, 6 }
 0x410   :  { %v950_v57 = vsel %vm949_vm6, %v948_v36, %v947_v52  ;;  %v969_v58 = vsel %vm943_vm4, %v968_v38, %v967_v53  ;;  %v822_v1 = vld [vmem:[%s10979_s22 + $0x4c] sm:$0x1]  ;;  %v987_v2 = vrot.slane %v813_v49, 5  ;;  %v989_v3 = vrot.slane %v814_v50, 4  ;;  %v823_v8 = vld [vmem:[%s10979_s22 + $0x5c] sm:$0x1] }
 0x411   :  { %7331 = vmatpush3.bf16.msra.mxu0 %v7683_v9  ;;  %v971_v63 = vsel %vm946_vm5, %v970_v41, %v969_v58  ;;  %v991_v4 = vrot.slane %v815_v51, 3  ;;  %v818_v7 = vld [vmem:[%s10979_s22 + $0xc] sm:$0x1]  ;;  %v984_v9 = vsel %vm931_vm0, %v983_v61, %v810_v43  ;;  %v993_v10 = vrot.slane %v816_v54, 2  ;;  %v825_v14 = vld [vmem:[%s10979_s22 + $0x7c] sm:$0x1] }
 0x412   :  { %7332 = vmatprep.subr.bf16.mxu0 %v7684_v34  ;;  %v973_v6 = vsel %vm949_vm6, %v972_v42, %v971_v63  ;;  %v995_v11 = vrot.slane %v817_v55, 1  ;;  %v824_v13 = vld [vmem:[%s10979_s22 + $0x6c] sm:$0x1]  ;;  %v986_v15 = vsel %vm934_vm1, %v985_v62, %v984_v9  ;;  %v1006_v16 = vrot.slane %v819_v56, 7  ;;  %v827_v21 = vld [vmem:[%s10979_s22 + $0x12] sm:$0x1] }
 0x413   :  { %v1313_v12 = vpack.c.bf16 %v973_v6, %v950_v57  ;;  %v1008_v17 = vrot.slane %v820_v59, 6  ;;  %v988_v18 = vsel %vm937_vm2, %v987_v2, %v986_v15  ;;  %v1010_v19 = vrot.slane %v821_v60, 5  ;;  %v828_v22 = vld [vmem:[%s10979_s22 + $0x22] sm:$0x1]  ;;  %v829_v27 = vld [vmem:[%s10979_s22 + $0x32] sm:$0x1] }
 0x414   :  { %v1012_v20 = vrot.slane %v822_v1, 4  ;;  %v990_v23 = vsel %vm940_vm3, %v989_v3, %v988_v18  ;;  %v1007_v24 = vsel %vm931_vm0, %v1006_v16, %v818_v7  ;;  %v1014_v25 = vrot.slane %v823_v8, 3  ;;  %v826_v26 = vld [vmem:[%s10979_s22 + $0x2] sm:$0x1]  ;;  %v831_v33 = vld [vmem:[%s10979_s22 + $0x52] sm:$0x1] }
 0x415   :  { %7333 = vmatpush3.bf16.msra.mxu0 %v7684_v34  ;;  %7338 = vmatprep.mubr.bf16.mxu0 %v1313_v12  ;;  %v830_v28 = vld [vmem:[%s10979_s22 + $0x42] sm:$0x1]  ;;  %v992_v29 = vsel %vm943_vm4, %v991_v4, %v990_v23  ;;  %v1009_v30 = vsel %vm934_vm1, %v1008_v17, %v1007_v24  ;;  %v1016_v31 = vrot.slane %v824_v13, 2  ;;  %v1018_v32 = vrot.slane %v825_v14, 1  ;;  %v833_v37 = vld [vmem:[%s10979_s22 + $0x72] sm:$0x1] }
 0x416   :  { %7334 = vmatprep.subr.bf16.mxu0 %v7685_v46  ;;  %v832_v34 = vld [vmem:[%s10979_s22 + $0x62] sm:$0x1]  ;;  %v994_v35 = vsel %vm946_vm5, %v993_v10, %v992_v29  ;;  %v1011_v36 = vsel %vm937_vm2, %v1010_v19, %v1009_v30  ;;  %v835_v38 = vld [vmem:[%s10979_s22 + $0x1a] sm:$0x1]  ;;  %v836_v39 = vld [vmem:[%s10979_s22 + $0x2a] sm:$0x1] }
 0x417   :  { %v996_v40 = vsel %vm949_vm6, %v995_v11, %v994_v35  ;;  %v1013_v41 = vsel %vm940_vm3, %v1012_v20, %v1011_v36  ;;  %v834_v42 = vld [vmem:[%s10979_s22 + $0xa] sm:$0x1]  ;;  %v837_v43 = vld [vmem:[%s10979_s22 + $0x3a] sm:$0x1]  ;;  %v1029_v45 = vrot.slane %v827_v21, 7  ;;  %v1031_v47 = vrot.slane %v828_v22, 6 }
 0x418   :  { %v838_v44 = vld [vmem:[%s10979_s22 + $0x4a] sm:$0x1]  ;;  %v839_v48 = vld [vmem:[%s10979_s22 + $0x5a] sm:$0x1]  ;;  %v1033_v49 = vrot.slane %v829_v27, 5  ;;  %v1035_v50 = vrot.slane %v830_v28, 4 }
 0x419   :  { %7335 = vmatpush3.bf16.msra.mxu0 %v7685_v46  ;;  %v1015_v46 = vsel %vm943_vm4, %v1014_v25, %v1013_v41  ;;  %v1037_v51 = vrot.slane %v831_v33, 3  ;;  %v840_v53 = vld [vmem:[%s10979_s22 + $0x6a] sm:$0x1]  ;;  %v841_v54 = vld [vmem:[%s10979_s22 + $0x7a] sm:$0x1]  ;;  %v1030_v55 = vsel %vm931_vm0, %v1029_v45, %v826_v26  ;;  %v1039_v56 = vrot.slane %v832_v34, 2 }
 0x41a   :  { %7336 = vmatprep.subr.bf16.mxu0 %v7686_v5  ;;  %v1017_v52 = vsel %vm946_vm5, %v1016_v31, %v1015_v46  ;;  %v1041_v57 = vrot.slane %v833_v37, 1  ;;  %v1032_v59 = vsel %vm934_vm1, %v1031_v47, %v1030_v55  ;;  %v1052_v60 = vrot.slane %v835_v38, 7  ;;  %v842_v62 = vld [vmem:[%s10979_s22 + $0x6] sm:$0x1]  ;;  %v843_v63 = vld [vmem:[%s10979_s22 + $0x16] sm:$0x1] }
 0x41b   :  { %v1019_v58 = vsel %vm949_vm6, %v1018_v32, %v1017_v52  ;;  %v1054_v61 = vrot.slane %v836_v39, 6  ;;  %v1034_v2 = vsel %vm937_vm2, %v1033_v49, %v1032_v59  ;;  %v1056_v3 = vrot.slane %v837_v43, 5  ;;  %v844_v6 = vld [vmem:[%s10979_s22 + $0x26] sm:$0x1]  ;;  %v845_v7 = vld [vmem:[%s10979_s22 + $0x36] sm:$0x1] }
 0x41c   :  { %v1314_v1 = vpack.c.bf16 %v1019_v58, %v996_v40  ;;  %v1058_v4 = vrot.slane %v838_v44, 4  ;;  %v1053_v8 = vsel %vm931_vm0, %v1052_v60, %v834_v42  ;;  %v1060_v9 = vrot.slane %v839_v48, 3  ;;  %v846_v10 = vld [vmem:[%s10979_s22 + $0x46] sm:$0x1]  ;;  %v847_v11 = vld [vmem:[%s10979_s22 + $0x56] sm:$0x1] }
 0x41d   :  { %7337 = vmatpush3.bf16.msra.mxu0 %v7686_v5  ;;  %v1036_v5 = vsel %vm940_vm3, %v1035_v50, %v1034_v2  ;;  %v1055_v13 = vsel %vm934_vm1, %v1054_v61, %v1053_v8  ;;  %v1062_v14 = vrot.slane %v840_v53, 2  ;;  %v848_v15 = vld [vmem:[%s10979_s22 + $0x66] sm:$0x1]  ;;  %v849_v16 = vld [vmem:[%s10979_s22 + $0x76] sm:$0x1]  ;;  %v1075_v17 = vrot.slane %v843_v63, 7 }
 0x41e   :  { %v1038_v12 = vsel %vm943_vm4, %v1037_v51, %v1036_v5  ;;  %v1057_v19 = vsel %vm937_vm2, %v1056_v3, %v1055_v13  ;;  %v1064_v20 = vrot.slane %v841_v54, 1  ;;  %v851_v21 = vld [vmem:[%s10979_s22 + $0x1e] sm:$0x1]  ;;  %v852_v22 = vld [vmem:[%s10979_s22 + $0x2e] sm:$0x1]  ;;  %v1077_v29 = vrot.slane %v844_v6, 6 }
 0x41f   :  { %v1040_v18 = vsel %vm946_vm5, %v1039_v56, %v1038_v12  ;;  %v1059_v24 = vsel %vm940_vm3, %v1058_v4, %v1057_v19  ;;  %v850_v25 = vld [vmem:[%s10979_s22 + $0xe] sm:$0x1]  ;;  %v853_v26 = vld [vmem:[%s10979_s22 + $0x3e] sm:$0x1]  ;;  %v1076_v28 = vsel %vm931_vm0, %v1075_v17, %v842_v62  ;;  %v1079_v32 = vrot.slane %v845_v7, 5 }
 0x420   :  { %7339 = vmatmul.mubr.bf16.vlgmr.msra.gmra.mrb[0].mxu0 %v1314_v1  ;;  %v1042_v23 = vsel %vm949_vm6, %v1041_v57, %v1040_v18  ;;  %v854_v27 = vld [vmem:[%s10979_s22 + $0x4e] sm:$0x1]  ;;  %v1061_v30 = vsel %vm943_vm4, %v1060_v9, %v1059_v24  ;;  %v855_v31 = vld [vmem:[%s10979_s22 + $0x5e] sm:$0x1]  ;;  %v1081_v33 = vrot.slane %v846_v10, 4  ;;  %v1083_v34 = vrot.slane %v847_v11, 3 }
 0x421   :  { %v1063_v35 = vsel %vm946_vm5, %v1062_v14, %v1061_v30  ;;  %v856_v36 = vld [vmem:[%s10979_s22 + $0x6e] sm:$0x1]  ;;  %v857_v37 = vld [vmem:[%s10979_s22 + $0x7e] sm:$0x1]  ;;  %v1078_v38 = vsel %vm934_vm1, %v1077_v29, %v1076_v28  ;;  %v1085_v39 = vrot.slane %v848_v15, 2  ;;  %v1087_v40 = vrot.slane %v849_v16, 1 }
 0x422   :  { %v1065_v41 = vsel %vm949_vm6, %v1064_v20, %v1063_v35  ;;  %v1080_v42 = vsel %vm937_vm2, %v1079_v32, %v1078_v38  ;;  %v1098_v43 = vrot.slane %v851_v21, 7  ;;  %v1100_v44 = vrot.slane %v852_v22, 6  ;;  %v858_v45 = vld [vmem:[%s10979_s22 + $0x1] sm:$0x1]  ;;  %v859_v47 = vld [vmem:[%s10979_s22 + $0x11] sm:$0x1] }
 0x423   :  { %v1315_v46 = vpack.c.bf16 %v1065_v41, %v1042_v23  ;;  %v1082_v48 = vsel %vm940_vm3, %v1081_v33, %v1080_v42  ;;  %v1102_v49 = vrot.slane %v853_v26, 5  ;;  %v1104_v50 = vrot.slane %v854_v27, 4  ;;  %v860_v51 = vld [vmem:[%s10979_s22 + $0x21] sm:$0x1]  ;;  %v861_v52 = vld [vmem:[%s10979_s22 + $0x31] sm:$0x1] }
 0x424   :  { %v1084_v53 = vsel %vm943_vm4, %v1083_v34, %v1082_v48  ;;  %v1099_v54 = vsel %vm931_vm0, %v1098_v43, %v850_v25  ;;  %v1106_v55 = vrot.slane %v855_v31, 3  ;;  %v862_v56 = vld [vmem:[%s10979_s22 + $0x41] sm:$0x1]  ;;  %v863_v57 = vld [vmem:[%s10979_s22 + $0x51] sm:$0x1]  ;;  %v1108_v60 = vrot.slane %v856_v36, 2 }
 0x425   :  { %7342 = vmatprep.mubr.bf16.mxu0 %v1315_v46  ;;  %v1086_v58 = vsel %vm946_vm5, %v1085_v39, %v1084_v53  ;;  %v1101_v59 = vsel %vm934_vm1, %v1100_v44, %v1099_v54  ;;  %v864_v61 = vld [vmem:[%s10979_s22 + $0x61] sm:$0x1]  ;;  %v865_v62 = vld [vmem:[%s10979_s22 + $0x71] sm:$0x1]  ;;  %v1121_v63 = vrot.slane %v859_v47, 7  ;;  %v1110_v3 = vrot.slane %v857_v37, 1 }
 0x426   :  { %v1088_v1 = vsel %vm949_vm6, %v1087_v40, %v1086_v58  ;;  %v1103_v2 = vsel %vm937_vm2, %v1102_v49, %v1101_v59  ;;  %v866_v4 = vld [vmem:[%s10979_s22 + $0x9] sm:$0x1]  ;;  %v867_v6 = vld [vmem:[%s10979_s22 + $0x19] sm:$0x1]  ;;  %v1123_v11 = vrot.slane %v860_v51, 6  ;;  %v1125_v12 = vrot.slane %v861_v52, 5 }
 0x427   :  { %v868_v7 = vld [vmem:[%s10979_s22 + $0x29] sm:$0x1]  ;;  %v1105_v5 = vsel %vm940_vm3, %v1104_v50, %v1103_v2  ;;  %v869_v8 = vld [vmem:[%s10979_s22 + $0x39] sm:$0x1]  ;;  %v1122_v10 = vsel %vm931_vm0, %v1121_v63, %v858_v45  ;;  %v1127_v15 = vrot.slane %v862_v56, 4  ;;  %v1129_v16 = vrot.slane %v863_v57, 3 }
 0x428   :  { %v870_v9 = vld [vmem:[%s10979_s22 + $0x49] sm:$0x1]  ;;  %v1107_v13 = vsel %vm943_vm4, %v1106_v55, %v1105_v5  ;;  %v871_v14 = vld [vmem:[%s10979_s22 + $0x59] sm:$0x1]  ;;  %v1131_v17 = vrot.slane %v864_v61, 2  ;;  %v1124_v21 = vsel %vm934_vm1, %v1123_v11, %v1122_v10  ;;  %v1133_v22 = vrot.slane %v865_v62, 1 }
 0x429   :  { %v1109_v18 = vsel %vm946_vm5, %v1108_v60, %v1107_v13  ;;  %v872_v19 = vld [vmem:[%s10979_s22 + $0x69] sm:$0x1]  ;;  %v873_v20 = vld [vmem:[%s10979_s22 + $0x79] sm:$0x1]  ;;  %v1144_v23 = vrot.slane %v867_v6, 7  ;;  %v1126_v25 = vsel %vm937_vm2, %v1125_v12, %v1124_v21  ;;  %v1146_v26 = vrot.slane %v868_v7, 6 }
 0x42a   :  { %v1111_v24 = vsel %vm949_vm6, %v1110_v3, %v1109_v18  ;;  %v1148_v27 = vrot.slane %v869_v8, 5  ;;  %v874_v28 = vld [vmem:[%s10979_s22 + $0x5] sm:$0x1]  ;;  %v875_v29 = vld [vmem:[%s10979_s22 + $0x15] sm:$0x1]  ;;  %v1128_v31 = vsel %vm940_vm3, %v1127_v15, %v1126_v25  ;;  %v1150_v33 = vrot.slane %v870_v9, 4 }
 0x42b   :  { %v1316_v30 = vpack.c.bf16 %v1111_v24, %v1088_v1  ;;  %v1145_v32 = vsel %vm931_vm0, %v1144_v23, %v866_v4  ;;  %v876_v34 = vld [vmem:[%s10979_s22 + $0x25] sm:$0x1]  ;;  %v877_v35 = vld [vmem:[%s10979_s22 + $0x35] sm:$0x1]  ;;  %v1130_v36 = vsel %vm943_vm4, %v1129_v16, %v1128_v31  ;;  %v1152_v38 = vrot.slane %v871_v14, 3 }
 0x42c   :  { %v1147_v37 = vsel %vm934_vm1, %v1146_v26, %v1145_v32  ;;  %v1154_v39 = vrot.slane %v872_v19, 2  ;;  %v878_v40 = vld [vmem:[%s10979_s22 + $0x45] sm:$0x1]  ;;  %v879_v41 = vld [vmem:[%s10979_s22 + $0x55] sm:$0x1]  ;;  %v1132_v42 = vsel %vm946_vm5, %v1131_v17, %v1130_v36  ;;  %v1156_v44 = vrot.slane %v873_v20, 1 }
 0x42d   :  { %7343 = vmatmul.mubr.bf16.gmra.mrb[4].mxu0 %v1316_v30  ;;  %v1149_v43 = vsel %vm937_vm2, %v1148_v27, %v1147_v37  ;;  %v880_v45 = vld [vmem:[%s10979_s22 + $0x65] sm:$0x1]  ;;  %v881_v47 = vld [vmem:[%s10979_s22 + $0x75] sm:$0x1]  ;;  %v1167_v46 = vrot.slane %v875_v29, 7  ;;  %v1134_v48 = vsel %vm949_vm6, %v1133_v22, %v1132_v42  ;;  %v1169_v57 = vrot.slane %v876_v34, 6 }
 0x42e   :  { %v1151_v49 = vsel %vm940_vm3, %v1150_v33, %v1149_v43  ;;  %v882_v50 = vld [vmem:[%s10979_s22 + $0xd] sm:$0x1]  ;;  %v883_v51 = vld [vmem:[%s10979_s22 + $0x1d] sm:$0x1]  ;;  %v1171_v58 = vrot.slane %v877_v35, 5  ;;  %v1173_v61 = vrot.slane %v878_v40, 4 }
 0x42f   :  { %v884_v52 = vld [vmem:[%s10979_s22 + $0x2d] sm:$0x1]  ;;  %v1153_v53 = vsel %vm943_vm4, %v1152_v38, %v1151_v49  ;;  %v885_v54 = vld [vmem:[%s10979_s22 + $0x3d] sm:$0x1]  ;;  %v1168_v56 = vsel %vm931_vm0, %v1167_v46, %v874_v28  ;;  %v1175_v62 = vrot.slane %v879_v41, 3  ;;  %v1177_v63 = vrot.slane %v880_v45, 2 }
 0x430   :  { %v886_v55 = vld [vmem:[%s10979_s22 + $0x4d] sm:$0x1]  ;;  %v1155_v59 = vsel %vm946_vm5, %v1154_v39, %v1153_v53  ;;  %v887_v60 = vld [vmem:[%s10979_s22 + $0x5d] sm:$0x1]  ;;  %v1170_v3 = vsel %vm934_vm1, %v1169_v57, %v1168_v56  ;;  %v1179_v4 = vrot.slane %v881_v47, 1  ;;  %v1190_v6 = vrot.slane %v883_v51, 7 }
 0x431   :  { %v1157_v1 = vsel %vm949_vm6, %v1156_v44, %v1155_v59  ;;  %v888_v2 = vld [vmem:[%s10979_s22 + $0x6d] sm:$0x1]  ;;  %v889_v5 = vld [vmem:[%s10979_s22 + $0x7d] sm:$0x1]  ;;  %v1172_v8 = vsel %vm937_vm2, %v1171_v58, %v1170_v3  ;;  %v1192_v9 = vrot.slane %v884_v52, 6  ;;  %v1194_v10 = vrot.slane %v885_v54, 5 }
 0x432   :  { %v1317_v7 = vpack.c.bf16 %v1157_v1, %v1134_v48  ;;  %v891_v11 = vld [vmem:[%s10979_s22 + $0x13] sm:$0x1]  ;;  %v1174_v12 = vsel %vm940_vm3, %v1173_v61, %v1172_v8  ;;  %v1191_v13 = vsel %vm931_vm0, %v1190_v6, %v882_v50  ;;  %v1196_v14 = vrot.slane %v886_v55, 4  ;;  %v892_v16 = vld [vmem:[%s10979_s22 + $0x23] sm:$0x1] }
 0x433   :  { %v1198_v15 = vrot.slane %v887_v60, 3  ;;  %v893_v17 = vld [vmem:[%s10979_s22 + $0x33] sm:$0x1]  ;;  %v1176_v18 = vsel %vm943_vm4, %v1175_v62, %v1174_v12  ;;  %v1193_v19 = vsel %vm934_vm1, %v1192_v9, %v1191_v13  ;;  %v1200_v20 = vrot.slane %v888_v2, 2  ;;  %v890_v21 = vld [vmem:[%s10979_s22 + $0x3] sm:$0x1] }
 0x434   :  { %7346 = vmatprep.mubr.bf16.mxu0 %v1317_v7  ;;  %v894_v22 = vld [vmem:[%s10979_s22 + $0x43] sm:$0x1]  ;;  %v895_v23 = vld [vmem:[%s10979_s22 + $0x53] sm:$0x1]  ;;  %v1178_v24 = vsel %vm946_vm5, %v1177_v63, %v1176_v18  ;;  %v1195_v25 = vsel %vm937_vm2, %v1194_v10, %v1193_v19  ;;  %v1202_v26 = vrot.slane %v889_v5, 1  ;;  %v1213_v37 = vrot.slane %v891_v11, 7 }
 0x435   :  { %v896_v27 = vld [vmem:[%s10979_s22 + $0x63] sm:$0x1]  ;;  %v897_v28 = vld [vmem:[%s10979_s22 + $0x73] sm:$0x1]  ;;  %v1180_v29 = vsel %vm949_vm6, %v1179_v4, %v1178_v24  ;;  %v1197_v30 = vsel %vm940_vm3, %v1196_v14, %v1195_v25  ;;  %v898_v31 = vld [vmem:[%s10979_s22 + $0xb] sm:$0x1] }
 0x436   :  { %v899_v32 = vld [vmem:[%s10979_s22 + $0x1b] sm:$0x1]  ;;  %v900_v33 = vld [vmem:[%s10979_s22 + $0x2b] sm:$0x1]  ;;  %v1199_v35 = vsel %vm943_vm4, %v1198_v15, %v1197_v30  ;;  %v1215_v38 = vrot.slane %v892_v16, 6  ;;  %v1217_v39 = vrot.slane %v893_v17, 5  ;;  %v1214_v46 = vsel %vm931_vm0, %v1213_v37, %v890_v21 }
 0x437   :  { %v901_v34 = vld [vmem:[%s10979_s22 + $0x3b] sm:$0x1]  ;;  %v902_v36 = vld [vmem:[%s10979_s22 + $0x4b] sm:$0x1]  ;;  %v1201_v40 = vsel %vm946_vm5, %v1200_v20, %v1199_v35  ;;  %v1219_v42 = vrot.slane %v894_v22, 4  ;;  %v1221_v43 = vrot.slane %v895_v23, 3 }
 0x438   :  { %v903_v41 = vld [vmem:[%s10979_s22 + $0x5b] sm:$0x1]  ;;  %v1223_v44 = vrot.slane %v896_v27, 2  ;;  %v1203_v45 = vsel %vm949_vm6, %v1202_v26, %v1201_v40  ;;  %v904_v47 = vld [vmem:[%s10979_s22 + $0x6b] sm:$0x1]  ;;  %v1225_v48 = vrot.slane %v897_v28, 1  ;;  %v1216_v52 = vsel %vm934_vm1, %v1215_v38, %v1214_v46 }
 0x439   :  { %v1236_v49 = vrot.slane %v899_v32, 7  ;;  %v1318_v50 = vpack.c.bf16 %v1203_v45, %v1180_v29  ;;  %v905_v51 = vld [vmem:[%s10979_s22 + $0x7b] sm:$0x1]  ;;  %v1238_v53 = vrot.slane %v900_v33, 6  ;;  %v1240_v54 = vrot.slane %v901_v34, 5 }
 0x43a   :  { %v907_v55 = vld [vmem:[%s10979_s22 + $0x17] sm:$0x1]  ;;  %v1218_v56 = vsel %vm937_vm2, %v1217_v39, %v1216_v52  ;;  %v1242_v58 = vrot.slane %v902_v36, 4  ;;  %v1244_v59 = vrot.slane %v903_v41, 3  ;;  %v908_v60 = vld [vmem:[%s10979_s22 + $0x27] sm:$0x1] }
 0x43b   :  { %v1237_v57 = vsel %vm931_vm0, %v1236_v49, %v898_v31  ;;  %v909_v61 = vld [vmem:[%s10979_s22 + $0x37] sm:$0x1]  ;;  %7347 = vmatmul.mubr.bf16.gmra.mrb[8].mxu0 %v1318_v50  ;;  %v1220_v62 = vsel %vm940_vm3, %v1219_v42, %v1218_v56  ;;  %v1246_v1 = vrot.slane %v904_v47, 2  ;;  %v906_v2 = vld [vmem:[%s10979_s22 + $0x7] sm:$0x1]  ;;  %v1248_v5 = vrot.slane %v905_v51, 1 }
 0x43c   :  { %v1239_v63 = vsel %vm934_vm1, %v1238_v53, %v1237_v57  ;;  %v910_v3 = vld [vmem:[%s10979_s22 + $0x47] sm:$0x1]  ;;  %v911_v4 = vld [vmem:[%s10979_s22 + $0x57] sm:$0x1]  ;;  %v1222_v6 = vsel %vm943_vm4, %v1221_v43, %v1220_v62  ;;  %v915_v9 = vld [vmem:[%s10979_s22 + $0x1f] sm:$0x1] }
 0x43d   :  { %v1241_v7 = vsel %vm937_vm2, %v1240_v54, %v1239_v63  ;;  %v912_v8 = vld [vmem:[%s10979_s22 + $0x67] sm:$0x1]  ;;  %v1224_v10 = vsel %vm946_vm5, %v1223_v44, %v1222_v6  ;;  %v913_v12 = vld [vmem:[%s10979_s22 + $0x77] sm:$0x1]  ;;  %v916_v13 = vld [vmem:[%s10979_s22 + $0x2f] sm:$0x1] }
 0x43e   :  { %v1243_v11 = vsel %vm940_vm3, %v1242_v58, %v1241_v7  ;;  %v917_v14 = vld [vmem:[%s10979_s22 + $0x3f] sm:$0x1]  ;;  %v918_v15 = vld [vmem:[%s10979_s22 + $0x4f] sm:$0x1]  ;;  %v1226_v16 = vsel %vm949_vm6, %v1225_v48, %v1224_v10  ;;  %v1259_v20 = vrot.slane %v907_v55, 7  ;;  %v1261_v21 = vrot.slane %v908_v60, 6 }
 0x43f   :  { %v1245_v17 = vsel %vm943_vm4, %v1244_v59, %v1243_v11  ;;  %v914_v18 = vld [vmem:[%s10979_s22 + $0xf] sm:$0x1]  ;;  %v919_v19 = vld [vmem:[%s10979_s22 + $0x5f] sm:$0x1]  ;;  %v1263_v24 = vrot.slane %v909_v61, 5  ;;  %v1265_v25 = vrot.slane %v910_v3, 4 }
 0x440   :  { %v1247_v22 = vsel %vm946_vm5, %v1246_v1, %v1245_v17  ;;  %v920_v23 = vld [vmem:[%s10979_s22 + $0x6f] sm:$0x1]  ;;  %v921_v27 = vld [vmem:[%s10979_s22 + $0x7f] sm:$0x1]  ;;  %v1260_v28 = vsel %vm931_vm0, %v1259_v20, %v906_v2  ;;  %v1267_v29 = vrot.slane %v911_v4, 3  ;;  %v1269_v30 = vrot.slane %v912_v8, 2 }
 0x441   :  { %v1249_v26 = vsel %vm949_vm6, %v1248_v5, %v1247_v22  ;;  %v1262_v32 = vsel %vm934_vm1, %v1261_v21, %v1260_v28  ;;  %v1282_v33 = vrot.slane %v915_v9, 7  ;;  %v1284_v34 = vrot.slane %v916_v13, 6  ;;  %v7687_v54 = vld [vmem:[#allocation19 + $0x8] sm:$0xff]   ;;  %v9871_v55 = vld [vmem:[#allocation19] sm:$0xff]   ;;  %v9875_v56 = vld [vmem:[%s10980_s8] ss:$0 sm:$0xff] }
 0x442   :  { %v1319_v31 = vpack.c.bf16 %v1249_v26, %v1226_v16  ;;  %v1264_v35 = vsel %vm937_vm2, %v1263_v24, %v1262_v32  ;;  %v1271_v36 = vrot.slane %v913_v12, 1  ;;  %v1286_v37 = vrot.slane %v917_v14, 5  ;;  %7354 = vmatprep.subr.bf16.mxu1 %v7687_v54 }
 0x443   :  { %v1288_v38 = vrot.slane %v918_v15, 4  ;;  %v1266_v39 = vsel %vm940_vm3, %v1265_v25, %v1264_v35  ;;  %v1283_v40 = vsel %vm931_vm0, %v1282_v33, %v914_v18  ;;  %v1290_v41 = vrot.slane %v919_v19, 3  ;;  %7355 = vmatpush3.bf16.msra.mxu1 %v7687_v54 }
 0x444   :  { %7350 = vmatprep.mubr.bf16.mxu0 %v1319_v31  ;;  %v1292_v42 = vrot.slane %v920_v23, 2  ;;  %v1268_v43 = vsel %vm943_vm4, %v1267_v29, %v1266_v39  ;;  %v1285_v44 = vsel %vm934_vm1, %v1284_v34, %v1283_v40  ;;  %v1294_v46 = vrot.slane %v921_v27, 1  ;;  %7364 = vmatprep.subr.bf16.mxu1 %v9871_v55 }
 0x445   :  { %v1270_v45 = vsel %vm946_vm5, %v1269_v30, %v1268_v43  ;;  %v1287_v47 = vsel %vm937_vm2, %v1286_v37, %v1285_v44 }
 0x446   :  { %v1289_v48 = vsel %vm940_vm3, %v1288_v38, %v1287_v47  ;;  %v1272_v49 = vsel %vm949_vm6, %v1271_v36, %v1270_v45 }
 0x447   :  { %v1291_v50 = vsel %vm943_vm4, %v1290_v41, %v1289_v48 }
 0x448   :  { %v1293_v51 = vsel %vm946_vm5, %v1292_v42, %v1291_v50 }
 0x449   :  { %v1295_v52 = vsel %vm949_vm6, %v1294_v46, %v1293_v51 }
 0x44a   :  { %v1320_v53 = vpack.c.bf16 %v1295_v52, %v1272_v49 }
 0x44c   :  { %7351 = vmatmul.mubr.bf16.gmra.mrb[12].mxu0 %v1320_v53 }
 0x4f3   :  { %v7340_v57 = vpop.f32.mrb[0].mxu0 }
 0x4f4   :  { %v1410_v58 = vpop.f32.mrb[1].mxu0  ;;  %v9884_v63 = vadd.f32 %v7340_v57, %v9875_v56 }
 0x4f5   :  { %v9878_v59 = vadd.f32 %v9875_v56, %v1410_v58  ;;  %v7341_v60 = vpop.f32.mrb[2].mxu0 }
 0x4f6   :  { %v1413_v61 = vpop.f32.mrb[3].mxu0  ;;  %v1516_v5 = vmul.f32 %v9884_v63, %v9884_v63  ;;  %v9899_v9 = vadd.f32 %v7341_v60, %v9875_v56  ;;  %v1479_v11 = vsel %vm1475_vm7, %v9884_v63, 0.0 }
 0x4f7   :  { %v9881_v62 = vadd.f32 %v9875_v56, %v1413_v61  ;;  %v1514_v1 = vmul.f32 %v9878_v59, %v9878_v59  ;;  %v1476_v4 = vsel %vm1475_vm7, %v9878_v59, 0.0 }
 0x4f8   :  { %v1533_v13 = vsel %vm1475_vm7, %v1516_v5, 0.0  ;;  %v1517_v14 = vmul.f32 %v9899_v9, %v9899_v9  ;;  %v1481_v16 = vsel %vm1475_vm7, %v9899_v9, 0.0 }
 0x4f9   :  { %v1477_v2 = vsel %vm1475_vm7, %v9881_v62, 0.0  ;;  %v1515_v3 = vmul.f32 %v9881_v62, %v9881_v62  ;;  %v1530_v8 = vsel %vm1475_vm7, %v1514_v1, 0.0 }
 0x4fa   :  { %v1478_v7 = vadd.f32 %v1477_v2, %v1476_v4  ;;  %v1535_v20 = vsel %vm1475_vm7, %v1517_v14, 0.0 }
 0x4fb   :  { %v1531_v6 = vsel %vm1475_vm7, %v1515_v3, 0.0 }
 0x4fc   :  { %v1532_v10 = vadd.f32 %v1531_v6, %v1530_v8  ;;  %v1480_v12 = vadd.f32 %v1479_v11, %v1478_v7 }
 0x4fe   :  { %v1534_v15 = vadd.f32 %v1533_v13, %v1532_v10  ;;  %v1482_v19 = vadd.f32 %v1481_v16, %v1480_v12 }
 0x500   :  { %v7344_v17 = vpop.f32.mrb[4].mxu0  ;;  %v1536_v24 = vadd.f32 %v1535_v20, %v1534_v15 }
 0x501   :  { %v1426_v18 = vpop.f32.mrb[5].mxu0  ;;  %v9910_v21 = vadd.f32 %v7344_v17, %v9875_v56 }
 0x502   :  { %v9913_v22 = vadd.f32 %v9875_v56, %v1426_v18  ;;  %v7345_v23 = vpop.f32.mrb[6].mxu0 }
 0x503   :  { %v1429_v25 = vpop.f32.mrb[7].mxu0  ;;  %v9920_v28 = vadd.f32 %v7345_v23, %v9875_v56  ;;  %v1520_v31 = vmul.f32 %v9910_v21, %v9910_v21  ;;  %v1487_v37 = vsel %vm1475_vm7, %v9910_v21, 0.0 }
 0x504   :  { %v1483_v26 = vsel %vm1475_vm7, %v9913_v22, 0.0  ;;  %v1518_v27 = vmul.f32 %v9913_v22, %v9913_v22  ;;  %v9923_v29 = vadd.f32 %v9875_v56, %v1429_v25 }
 0x505   :  { %v1484_v30 = vadd.f32 %v1483_v26, %v1482_v19  ;;  %v1521_v38 = vmul.f32 %v9920_v28, %v9920_v28  ;;  %v1541_v42 = vsel %vm1475_vm7, %v1520_v31, 0.0  ;;  %v1489_v43 = vsel %vm1475_vm7, %v9920_v28, 0.0 }
 0x506   :  { %v1537_v32 = vsel %vm1475_vm7, %v1518_v27, 0.0  ;;  %v1485_v33 = vsel %vm1475_vm7, %v9923_v29, 0.0  ;;  %v1519_v34 = vmul.f32 %v9923_v29, %v9923_v29 }
 0x507   :  { %v1538_v35 = vadd.f32 %v1537_v32, %v1536_v24  ;;  %v1486_v36 = vadd.f32 %v1485_v33, %v1484_v30  ;;  %v1543_v47 = vsel %vm1475_vm7, %v1521_v38, 0.0 }
 0x508   :  { %v1539_v39 = vsel %vm1475_vm7, %v1519_v34, 0.0 }
 0x509   :  { %v1488_v40 = vadd.f32 %v1487_v37, %v1486_v36  ;;  %v1540_v41 = vadd.f32 %v1539_v39, %v1538_v35 }
 0x50b   :  { %v1542_v44 = vadd.f32 %v1541_v42, %v1540_v41  ;;  %v1490_v45 = vadd.f32 %v1489_v43, %v1488_v40 }
 0x50d   :  { %v1544_v46 = vadd.f32 %v1543_v47, %v1542_v44 }
 0x50e   :  { %v7348_v48 = vpop.f32.mrb[8].mxu0 }
 0x50f   :  { %v1442_v49 = vpop.f32.mrb[9].mxu0  ;;  %v9942_v50 = vadd.f32 %v7348_v48, %v9875_v56 }
 0x510   :  { %v9945_v51 = vadd.f32 %v9875_v56, %v1442_v49  ;;  %v7349_v52 = vpop.f32.mrb[10].mxu0 }
 0x511   :  { %v1445_v53 = vpop.f32.mrb[11].mxu0  ;;  %v9952_v58 = vadd.f32 %v7349_v52, %v9875_v56  ;;  %v1524_v1 = vmul.f32 %v9942_v50, %v9942_v50  ;;  %v1495_v5 = vsel %vm1475_vm7, %v9942_v50, 0.0 }
 0x512   :  { %v1491_v54 = vsel %vm1475_vm7, %v9945_v51, 0.0  ;;  %v1522_v57 = vmul.f32 %v9945_v51, %v9945_v51  ;;  %v9955_v60 = vadd.f32 %v9875_v56, %v1445_v53 }
 0x513   :  { %v1492_v61 = vadd.f32 %v1491_v54, %v1490_v45  ;;  %v1525_v8 = vmul.f32 %v9952_v58, %v9952_v58  ;;  %v1549_v13 = vsel %vm1475_vm7, %v1524_v1, 0.0  ;;  %v1497_v14 = vsel %vm1475_vm7, %v9952_v58, 0.0 }
 0x514   :  { %v1545_v2 = vsel %vm1475_vm7, %v1522_v57, 0.0  ;;  %v1493_v3 = vsel %vm1475_vm7, %v9955_v60, 0.0  ;;  %v1523_v4 = vmul.f32 %v9955_v60, %v9955_v60 }
 0x515   :  { %v1546_v6 = vadd.f32 %v1545_v2, %v1544_v46  ;;  %v1494_v7 = vadd.f32 %v1493_v3, %v1492_v61  ;;  %v1551_v17 = vsel %vm1475_vm7, %v1525_v8, 0.0 }
 0x516   :  { %v1547_v10 = vsel %vm1475_vm7, %v1523_v4, 0.0 }
 0x517   :  { %v1496_v11 = vadd.f32 %v1495_v5, %v1494_v7  ;;  %v1548_v12 = vadd.f32 %v1547_v10, %v1546_v6 }
 0x519   :  { %v1550_v15 = vadd.f32 %v1549_v13, %v1548_v12  ;;  %v1498_v16 = vadd.f32 %v1497_v14, %v1496_v11 }
 0x51b   :  { %v1552_v18 = vadd.f32 %v1551_v17, %v1550_v15 }
 0x51f   :  { %v7352_v19 = vpop.f32.mrb[12].mxu0 }
 0x520   :  { %v1458_v20 = vpop.f32.mrb[13].mxu0  ;;  %v9974_v23 = vadd.f32 %v7352_v19, %v9875_v56 }
 0x521   :  { %v9977_v24 = vadd.f32 %v9875_v56, %v1458_v20  ;;  %v7353_v25 = vpop.f32.mrb[14].mxu0 }
 0x522   :  { %v1461_v26 = vpop.f32.mrb[15].mxu0  ;;  %v9984_v31 = vadd.f32 %v7353_v25, %v9875_v56  ;;  %v1528_v34 = vmul.f32 %v9974_v23, %v9974_v23  ;;  %v1503_v40 = vsel %vm1475_vm7, %v9974_v23, 0.0 }
 0x523   :  { %v1499_v27 = vsel %vm1475_vm7, %v9977_v24, 0.0  ;;  %v1526_v30 = vmul.f32 %v9977_v24, %v9977_v24  ;;  %v1462_v32 = vadd.f32 %v9875_v56, %v1461_v26 }
 0x524   :  { %v1500_v33 = vadd.f32 %v1499_v27, %v1498_v16  ;;  %v1529_v41 = vmul.f32 %v9984_v31, %v9984_v31  ;;  %v1557_v44 = vsel %vm1475_vm7, %v1528_v34, 0.0  ;;  %v1505_v45 = vsel %vm1475_vm7, %v9984_v31, 0.0 }
 0x525   :  { %v1553_v35 = vsel %vm1475_vm7, %v1526_v30, 0.0  ;;  %v1501_v36 = vsel %vm1475_vm7, %v1462_v32, 0.0  ;;  %v1527_v37 = vmul.f32 %v1462_v32, %v1462_v32 }
 0x526   :  { %v1554_v38 = vadd.f32 %v1553_v35, %v1552_v18  ;;  %v1502_v39 = vadd.f32 %v1501_v36, %v1500_v33  ;;  %v1559_v48 = vsel %vm1475_vm7, %v1529_v41, 0.0 }
 0x527   :  { %v1555_v42 = vsel %vm1475_vm7, %v1527_v37, 0.0  ;;  %v10043_v37 = vld [vmem:[#allocation18] ss:$0 sm:$0xff] }
 0x528   :  { %v1504_v56 = vadd.f32 %v1503_v40, %v1502_v39  ;;  %v1556_v43 = vadd.f32 %v1555_v42, %v1554_v38 }
 0x52a   :  { %v1506_v47 = vadd.f32 %v1505_v45, %v1504_v56  ;;  %v1558_v46 = vadd.f32 %v1557_v44, %v1556_v43 }
 0x52c   :  { %v1507_v49 = vrot.slane %v1506_v47, 4  ;;  %v1560_v52 = vadd.f32 %v1559_v48, %v1558_v46 }
 0x52e   :  { %v1508_v53 = vadd.f32 %v1507_v49, %v1506_v47  ;;  %v1561_v54 = vrot.slane %v1560_v52, 4 }
 0x530   :  { %v1509_v57 = vrot.slane %v1508_v53, 2  ;;  %v1562_v61 = vadd.f32 %v1561_v54, %v1560_v52 }
 0x532   :  { %v1510_v1 = vadd.f32 %v1509_v57, %v1508_v53  ;;  %v1563_v2 = vrot.slane %v1562_v61, 2 }
 0x534   :  { %v1511_v3 = vrot.slane %v1510_v1, 1  ;;  %v1564_v4 = vadd.f32 %v1563_v2, %v1562_v61 }
 0x536   :  { %v1512_v6 = vadd.f32 %v1511_v3, %v1510_v1  ;;  %v1565_v7 = vrot.slane %v1564_v4, 1 }
 0x538   :  { %v10000_v5 = vmul.f32 0.0078125, %v1512_v6  ;;  %v1566_v8 = vadd.f32 %v1565_v7, %v1564_v4 }
 0x53a   :  { %v1567_v10 = vmul.f32 0.0078125, %v1566_v8  ;;  %v1568_v11 = vmul.f32 %v10000_v5, %v10000_v5  ;;  %v1583_v12 = vsub.f32 %v9977_v24, %v10000_v5  ;;  %v1584_v13 = vsub.f32 %v1462_v32, %v10000_v5 }
 0x53b   :  { %v1579_v14 = vsub.f32 %v9945_v51, %v10000_v5  ;;  %v1580_v15 = vsub.f32 %v9955_v60, %v10000_v5  ;;  %v1581_v16 = vsub.f32 %v9942_v50, %v10000_v5  ;;  %v1582_v17 = vsub.f32 %v9952_v58, %v10000_v5 }
 0x53c   :  { %v1569_v18 = vsub.f32 %v1567_v10, %v1568_v11  ;;  %v1585_v19 = vsub.f32 %v9974_v23, %v10000_v5  ;;  %v1586_v20 = vsub.f32 %v9984_v31, %v10000_v5  ;;  %v1575_v24 = vsub.f32 %v9913_v22, %v10000_v5  ;;  %v10029_v23 = vld [vmem:[#allocation16] ss:$0 sm:$0xff] }
 0x53d   :  { %v1576_v60 = vsub.f32 %v9923_v29, %v10000_v5  ;;  %v1577_v50 = vsub.f32 %v9910_v21, %v10000_v5  ;;  %v1578_v58 = vsub.f32 %v9920_v28, %v10000_v5  ;;  %v1571_v27 = vsub.f32 %v9878_v59, %v10000_v5 }
 0x53e   :  { %v1570_v51 = vmax.f32 %v1569_v18, 0.0  ;;  %v1572_v30 = vsub.f32 %v9881_v62, %v10000_v5  ;;  %v1573_v31 = vsub.f32 %v9884_v63, %v10000_v5  ;;  %v1574_v32 = vsub.f32 %v9899_v9, %v10000_v5 }
 0x540   :  { %v1587_v25 = vadd.f32 1e-05, %v1570_v51 }
 0x542   :  { %7693 = vrsqrt.f32 %v1587_v25 }
 0x54c   :  { %v10027_v26 = vpop.eup %7693 }
 0x54d   :  { %v1601_v33 = vmul.f32 %v10027_v26, %v1583_v12  ;;  %v1602_v34 = vmul.f32 %v10027_v26, %v1584_v13  ;;  %v1597_v35 = vmul.f32 %v10027_v26, %v1579_v14  ;;  %v1598_v36 = vmul.f32 %v10027_v26, %v1580_v15 }
 0x54e   :  { %v1599_v59 = vmul.f32 %v10027_v26, %v1581_v16  ;;  %v1600_v62 = vmul.f32 %v10027_v26, %v1582_v17  ;;  %v1603_v38 = vmul.f32 %v10027_v26, %v1585_v19  ;;  %v1604_v63 = vmul.f32 %v10027_v26, %v1586_v20 }
 0x54f   :  { %v1623_v9 = vmul.f32 %v10029_v23, %v1601_v33  ;;  %v1624_v39 = vmul.f32 %v10029_v23, %v1602_v34  ;;  %v1619_v40 = vmul.f32 %v10029_v23, %v1597_v35  ;;  %v1620_v41 = vmul.f32 %v10029_v23, %v1598_v36 }
 0x550   :  { %v1621_v42 = vmul.f32 %v10029_v23, %v1599_v59  ;;  %v1622_v56 = vmul.f32 %v10029_v23, %v1600_v62  ;;  %v1625_v43 = vmul.f32 %v10029_v23, %v1603_v38  ;;  %v1626_v44 = vmul.f32 %v10029_v23, %v1604_v63 }
 0x551   :  { %v1645_v45 = vadd.f32 %v10043_v37, %v1623_v9  ;;  %v1646_v47 = vadd.f32 %v10043_v37, %v1624_v39  ;;  %v1641_v46 = vadd.f32 %v10043_v37, %v1619_v40  ;;  %v1642_v48 = vadd.f32 %v10043_v37, %v1620_v41 }
 0x552   :  { %v1643_v49 = vadd.f32 %v10043_v37, %v1621_v42  ;;  %v1644_v52 = vadd.f32 %v10043_v37, %v1622_v56  ;;  %v1647_v53 = vadd.f32 %v10043_v37, %v1625_v43  ;;  %v1648_v54 = vadd.f32 %v10043_v37, %v1626_v44 }
 0x553   :  { %v1661_v57 = vmul.f32 0.2, %v1645_v45  ;;  %v1662_v61 = vmul.f32 0.2, %v1646_v47  ;;  %v1657_v1 = vmul.f32 0.2, %v1641_v46  ;;  %v1589_v2 = vmul.f32 %v10027_v26, %v1571_v27 }
 0x554   :  { %v1658_v3 = vmul.f32 0.2, %v1642_v48  ;;  %v1659_v4 = vmul.f32 0.2, %v1643_v49  ;;  %v1660_v6 = vmul.f32 0.2, %v1644_v52  ;;  %v1590_v7 = vmul.f32 %v10027_v26, %v1572_v30 }
 0x555   :  { %v1677_v8 = vmax.f32 %v1645_v45, %v1661_v57  ;;  %v1678_v10 = vmax.f32 %v1646_v47, %v1662_v61  ;;  %v1673_v11 = vmax.f32 %v1641_v46, %v1657_v1  ;;  %v1663_v12 = vmul.f32 0.2, %v1647_v53 }
 0x556   :  { %v1674_v13 = vmax.f32 %v1642_v48, %v1658_v3  ;;  %v1675_v14 = vmax.f32 %v1643_v49, %v1659_v4  ;;  %v1676_v15 = vmax.f32 %v1644_v52, %v1660_v6  ;;  %v1664_v16 = vmul.f32 0.2, %v1648_v54 }
 0x557   :  { %v1687_v17 = vpack.c.bf16 %v1678_v10, %v1677_v8  ;;  %v1679_v18 = vmax.f32 %v1647_v53, %v1663_v12  ;;  %v1611_v19 = vmul.f32 %v10029_v23, %v1589_v2  ;;  %v1612_v20 = vmul.f32 %v10029_v23, %v1590_v7  ;;  %v7689_v10 = vld [vmem:[#allocation25 + $0x8] sm:$0xff]   ;;  %v6987_v12 = vld [vmem:[#allocation21] ss:$0 sm:$0xff] }
 0x558   :  { %v1685_v51 = vpack.c.bf16 %v1674_v13, %v1673_v11  ;;  %v1686_v25 = vpack.c.bf16 %v1676_v15, %v1675_v14  ;;  %v1680_v27 = vmax.f32 %v1648_v54, %v1664_v16  ;;  %v1591_v33 = vmul.f32 %v10027_v26, %v1573_v31  ;;  %v10118_v11 = vld [vmem:[#allocation25] sm:$0xff]  }
 0x559   :  { %1695 = vst.msk [vmem:[#allocation2 + $0x30] sm:$0xff] %vm1475_vm7, %v1687_v17  ;;  %v1633_v30 = vadd.f32 %v10043_v37, %v1611_v19  ;;  %v1634_v34 = vadd.f32 %v10043_v37, %v1612_v20  ;;  %v1592_v35 = vmul.f32 %v10027_v26, %v1574_v32  ;;  %v1593_v36 = vmul.f32 %v10027_v26, %v1575_v24 }
 0x55a   :  { %1693 = vst.msk [vmem:[#allocation2 + $0x20] sm:$0xff] %vm1475_vm7, %v1685_v51  ;;  %1694 = vst.msk [vmem:[#allocation2 + $0x28] sm:$0xff] %vm1475_vm7, %v1686_v25  ;;  %v1688_v59 = vpack.c.bf16 %v1680_v27, %v1679_v18  ;;  %v1613_v31 = vmul.f32 %v10029_v23, %v1591_v33  ;;  %v1594_v62 = vmul.f32 %v10027_v26, %v1576_v60 }
 0x55b   :  { %v1595_v32 = vmul.f32 %v10027_v26, %v1577_v50  ;;  %v1649_v22 = vmul.f32 0.2, %v1633_v30  ;;  %v1650_v38 = vmul.f32 0.2, %v1634_v34  ;;  %v1614_v24 = vmul.f32 %v10029_v23, %v1592_v35 }
 0x55c   :  { %v1615_v63 = vmul.f32 %v10029_v23, %v1593_v36  ;;  %1696 = vst.msk [vmem:[#allocation2 + $0x38] sm:$0xff] %vm1475_vm7, %v1688_v59  ;;  %v1635_v9 = vadd.f32 %v10043_v37, %v1613_v31  ;;  %v1616_v39 = vmul.f32 %v10029_v23, %v1594_v62  ;;  %v1596_v29 = vmul.f32 %v10027_v26, %v1578_v58 }
 0x55d   :  { %v1617_v21 = vmul.f32 %v10029_v23, %v1595_v32  ;;  %v1665_v60 = vmax.f32 %v1633_v30, %v1649_v22  ;;  %v1666_v50 = vmax.f32 %v1634_v34, %v1650_v38  ;;  %v1636_v40 = vadd.f32 %v10043_v37, %v1614_v24 }
 0x55e   :  { %v1637_v41 = vadd.f32 %v10043_v37, %v1615_v63  ;;  %v1651_v42 = vmul.f32 0.2, %v1635_v9  ;;  %v1638_v56 = vadd.f32 %v10043_v37, %v1616_v39  ;;  %v1618_v43 = vmul.f32 %v10029_v23, %v1596_v29 }
 0x55f   :  { %v1639_v44 = vadd.f32 %v10043_v37, %v1617_v21  ;;  %v1681_v45 = vpack.c.bf16 %v1666_v50, %v1665_v60  ;;  %v1652_v47 = vmul.f32 0.2, %v1636_v40 }
 0x560   :  { %v1653_v28 = vmul.f32 0.2, %v1637_v41  ;;  %v1667_v5 = vmax.f32 %v1635_v9, %v1651_v42  ;;  %v1654_v58 = vmul.f32 0.2, %v1638_v56  ;;  %v1640_v26 = vadd.f32 %v10043_v37, %v1618_v43  ;;  %v1705_v61 = vld [vmem:[#allocation2 + $0x30] sm:$0xff] }
 0x561   :  { %v1655_v46 = vmul.f32 0.2, %v1639_v44  ;;  %v1703_v48 = vld [vmem:[#allocation2 + $0x20] sm:$0xff]  ;;  %v1704_v49 = vld [vmem:[#allocation2 + $0x28] sm:$0xff]  ;;  %1689 = vst.msk [vmem:[#allocation2] sm:$0xff] %vm1475_vm7, %v1681_v45  ;;  %v1668_v52 = vmax.f32 %v1636_v40, %v1652_v47 }
 0x562   :  { %v1669_v53 = vmax.f32 %v1637_v41, %v1653_v28  ;;  %7356 = vmatprep.mubr.msk.bf16.mxu1 %vm1475_vm7, %v1703_v48  ;;  %v1670_v54 = vmax.f32 %v1638_v56, %v1654_v58  ;;  %v1656_v23 = vmul.f32 0.2, %v1640_v26 }
 0x563   :  { %v1671_v57 = vmax.f32 %v1639_v44, %v1655_v46  ;;  %7357 = vmatmul.mubr.msk.bf16.vlgmr.msra.gmra.mrb[0].mxu1 %vm1475_vm7, %v1704_v49  ;;  %v1682_v1 = vpack.c.bf16 %v1668_v52, %v1667_v5  ;;  %v1706_v4 = vld [vmem:[#allocation2 + $0x38] sm:$0xff] }
 0x564   :  { %7365 = vmatpush3.bf16.msra.mxu1 %v9871_v55  ;;  %7360 = vmatprep.mubr.msk.bf16.mxu1 %vm1475_vm7, %v1705_v61  ;;  %v1683_v37 = vpack.c.bf16 %v1670_v54, %v1669_v53  ;;  %v1672_v2 = vmax.f32 %v1640_v26, %v1656_v23 }
 0x565   :  { %1690 = vst.msk [vmem:[#allocation2 + $0x8] sm:$0xff] %vm1475_vm7, %v1682_v1  ;;  %7374 = vmatprep.subr.bf16.mxu1 %v7689_v10 }
 0x566   :  { %1691 = vst.msk [vmem:[#allocation2 + $0x10] sm:$0xff] %vm1475_vm7, %v1683_v37  ;;  %v1684_v3 = vpack.c.bf16 %v1672_v2, %v1671_v57 }
 0x568   :  { %1692 = vst.msk [vmem:[#allocation2 + $0x18] sm:$0xff] %vm1475_vm7, %v1684_v3  ;;  %v1697_v6 = vld [vmem:[#allocation2] sm:$0xff] }
 0x56b   :  { %7361 = vmatmul.mubr.msk.bf16.gmra.mrb[4].mxu1 %vm1475_vm7, %v1706_v4 }
 0x56c   :  { %7366 = vmatprep.mubr.msk.bf16.mxu1 %vm1475_vm7, %v1697_v6  ;;  %v1698_v7 = vld [vmem:[#allocation2 + $0x8] sm:$0xff] }
 0x56d   :  { %v1699_v55 = vld [vmem:[#allocation2 + $0x10] sm:$0xff] }
 0x56f   :  { %v1700_v8 = vld [vmem:[#allocation2 + $0x18] sm:$0xff] }
 0x573   :  { %7367 = vmatmul.mubr.msk.bf16.vlgmr.msra.gmra.mrb[0].mxu1 %vm1475_vm7, %v1698_v7 }
 0x574   :  { %7370 = vmatprep.mubr.msk.bf16.mxu1 %vm1475_vm7, %v1699_v55  ;;  %7375 = vmatpush3.bf16.msra.mxu1 %v7689_v10 }
 0x575   :  { %7380 = vmatprep.subr.bf16.mxu1 %v10118_v11 }
 0x57b   :  { %7371 = vmatmul.mubr.msk.bf16.gmra.mrb[4].mxu1 %vm1475_vm7, %v1700_v8 }
 0x646   :  { %v7368_v13 = vpop.f32.mrb[0].mxu1 }
 0x647   :  { %v1845_v14 = vpop.f32.mrb[1].mxu1  ;;  %v10121_v15 = vadd.f32 %v7368_v13, %v6987_v12 }
 0x648   :  { %v10123_v16 = vadd.f32 %v6987_v12, %v1845_v14  ;;  %v7369_v17 = vpop.f32.mrb[2].mxu1 }
 0x649   :  { %v1848_v18 = vpop.f32.mrb[3].mxu1  ;;  %v10127_v20 = vadd.f32 %v7369_v17, %v6987_v12  ;;  %v1917_v25 = vmul.f32 %v10121_v15, %v10121_v15  ;;  %v1896_v35 = vsel %vm1475_vm7, %v10121_v15, 0.0 }
 0x64a   :  { %v1915_v19 = vmul.f32 %v10123_v16, %v10123_v16  ;;  %v10129_v51 = vadd.f32 %v6987_v12, %v1848_v18  ;;  %v1893_v27 = vsel %vm1475_vm7, %v10123_v16, 0.0 }
 0x64b   :  { %v1918_v59 = vmul.f32 %v10127_v20, %v10127_v20  ;;  %v1926_v24 = vsel %vm1475_vm7, %v1917_v25, 0.0  ;;  %v1898_v63 = vsel %vm1475_vm7, %v10127_v20, 0.0 }
 0x64c   :  { %v1894_v33 = vsel %vm1475_vm7, %v10129_v51, 0.0  ;;  %v1916_v30 = vmul.f32 %v10129_v51, %v10129_v51  ;;  %v1923_v36 = vsel %vm1475_vm7, %v1915_v19, 0.0 }
 0x64d   :  { %v1895_v34 = vadd.f32 %v1894_v33, %v1893_v27  ;;  %v1928_v40 = vsel %vm1475_vm7, %v1918_v59, 0.0 }
 0x64e   :  { %v1924_v31 = vsel %vm1475_vm7, %v1916_v30, 0.0  ;;  %v7372_v62 = vpop.f32.mrb[4].mxu1 }
 0x64f   :  { %v1897_v32 = vadd.f32 %v1896_v35, %v1895_v34  ;;  %v1925_v22 = vadd.f32 %v1924_v31, %v1923_v36  ;;  %v1861_v38 = vpop.f32.mrb[5].mxu1  ;;  %v10150_v21 = vadd.f32 %v7372_v62, %v6987_v12 }
 0x650   :  { %v10148_v9 = vadd.f32 %v6987_v12, %v1861_v38  ;;  %v7373_v39 = vpop.f32.mrb[6].mxu1 }
 0x651   :  { %v1927_v29 = vadd.f32 %v1926_v24, %v1925_v22  ;;  %v1899_v60 = vadd.f32 %v1898_v63, %v1897_v32  ;;  %v1864_v50 = vpop.f32.mrb[7].mxu1  ;;  %v1890_v45 = vadd.f32 %v7373_v39, %v6987_v12  ;;  %v1921_v5 = vmul.f32 %v10150_v21, %v10150_v21  ;;  %v6988_v63 = vld [vmem:[#allocation22] ss:$0 sm:$0xff] }
 0x652   :  { %v1900_v41 = vsel %vm1475_vm7, %v10148_v9, 0.0  ;;  %v1919_v42 = vmul.f32 %v10148_v9, %v10148_v9  ;;  %v1888_v56 = vadd.f32 %v6987_v12, %v1864_v50  ;;  %v1904_v48 = vsel %vm1475_vm7, %v10150_v21, 0.0 }
 0x653   :  { %v1901_v43 = vadd.f32 %v1900_v41, %v1899_v60  ;;  %v1929_v44 = vadd.f32 %v1928_v40, %v1927_v29  ;;  %v1922_v49 = vmul.f32 %v1890_v45, %v1890_v45  ;;  %v1906_v54 = vsel %vm1475_vm7, %v1890_v45, 0.0 }
 0x654   :  { %v1930_v47 = vsel %vm1475_vm7, %v1919_v42, 0.0  ;;  %v1902_v28 = vsel %vm1475_vm7, %v1888_v56, 0.0  ;;  %v1920_v46 = vmul.f32 %v1888_v56, %v1888_v56  ;;  %v1934_v57 = vsel %vm1475_vm7, %v1921_v5, 0.0 }
 0x655   :  { %v1931_v58 = vadd.f32 %v1930_v47, %v1929_v44  ;;  %v1903_v26 = vadd.f32 %v1902_v28, %v1901_v43  ;;  %v1936_v37 = vsel %vm1475_vm7, %v1922_v49, 0.0 }
 0x656   :  { %v1932_v53 = vsel %vm1475_vm7, %v1920_v46, 0.0 }
 0x657   :  { %v1905_v52 = vadd.f32 %v1904_v48, %v1903_v26  ;;  %v1933_v23 = vadd.f32 %v1932_v53, %v1931_v58 }
 0x659   :  { %v1907_v61 = vadd.f32 %v1906_v54, %v1905_v52  ;;  %v1935_v1 = vadd.f32 %v1934_v57, %v1933_v23 }
 0x65b   :  { %v1908_v2 = vrot.slane %v1907_v61, 4  ;;  %v1937_v3 = vadd.f32 %v1936_v37, %v1935_v1 }
 0x65d   :  { %v1909_v4 = vadd.f32 %v1908_v2, %v1907_v61  ;;  %v1938_v6 = vrot.slane %v1937_v3, 4 }
 0x65f   :  { %v1910_v7 = vrot.slane %v1909_v4, 2  ;;  %v1939_v55 = vadd.f32 %v1938_v6, %v1937_v3 }
 0x661   :  { %v1911_v8 = vadd.f32 %v1910_v7, %v1909_v4  ;;  %v1940_v10 = vrot.slane %v1939_v55, 2 }
 0x663   :  { %v1912_v12 = vrot.slane %v1911_v8, 1  ;;  %v1941_v13 = vadd.f32 %v1940_v10, %v1939_v55 }
 0x665   :  { %v1913_v14 = vadd.f32 %v1912_v12, %v1911_v8  ;;  %v1942_v17 = vrot.slane %v1941_v13, 1 }
 0x667   :  { %v1914_v18 = vmul.f32 0.015625, %v1913_v14  ;;  %v1943_v19 = vadd.f32 %v1942_v17, %v1941_v13 }
 0x669   :  { %v1945_v25 = vmul.f32 %v1914_v18, %v1914_v18  ;;  %v1948_v27 = vsub.f32 %v10123_v16, %v1914_v18  ;;  %v1949_v33 = vsub.f32 %v10129_v51, %v1914_v18  ;;  %v1950_v30 = vsub.f32 %v10121_v15, %v1914_v18  ;;  %v6989_v15 = vld [vmem:[#allocation24] ss:$0 sm:$0xff] }
 0x66a   :  { %v1944_v34 = vmul.f32 0.015625, %v1943_v19  ;;  %v1951_v35 = vsub.f32 %v10127_v20, %v1914_v18  ;;  %v1952_v36 = vsub.f32 %v10148_v9, %v1914_v18  ;;  %v1953_v59 = vsub.f32 %v1888_v56, %v1914_v18 }
 0x66b   :  { %v1954_v31 = vsub.f32 %v10150_v21, %v1914_v18  ;;  %v1955_v62 = vsub.f32 %v1890_v45, %v1914_v18 }
 0x66c   :  { %v1946_v32 = vsub.f32 %v1944_v34, %v1945_v25  ;;  %v6996_v34 = vld [vmem:[#allocation27] ss:$0 sm:$0xff] }
 0x66e   :  { %v1947_v22 = vmax.f32 %v1946_v32, 0.0 }
 0x670   :  { %v1956_v38 = vadd.f32 1e-05, %v1947_v22 }
 0x672   :  { %7695 = vrsqrt.f32 %v1956_v38 }
 0x67c   :  { %v7696_v24 = vpop.eup %7695 }
 0x67d   :  { %v1958_v16 = vmul.f32 %v7696_v24, %v1948_v27  ;;  %v1959_v39 = vmul.f32 %v7696_v24, %v1949_v33  ;;  %v1960_v51 = vmul.f32 %v7696_v24, %v1950_v30  ;;  %v1961_v29 = vmul.f32 %v7696_v24, %v1951_v35  ;;  %v7691_v33 = vld [vmem:[#allocation31 + $0x8] sm:$0xff]  }
 0x67e   :  { %v1962_v60 = vmul.f32 %v7696_v24, %v1952_v36  ;;  %v1963_v50 = vmul.f32 %v7696_v24, %v1953_v59  ;;  %v1964_v20 = vmul.f32 %v7696_v24, %v1954_v31  ;;  %v1965_v40 = vmul.f32 %v7696_v24, %v1955_v62 }
 0x67f   :  { %v1972_v9 = vmul.f32 %v6988_v63, %v1958_v16  ;;  %v1973_v41 = vmul.f32 %v6988_v63, %v1959_v39  ;;  %v1974_v42 = vmul.f32 %v6988_v63, %v1960_v51  ;;  %v1975_v21 = vmul.f32 %v6988_v63, %v1961_v29 }
 0x680   :  { %v1976_v56 = vmul.f32 %v6988_v63, %v1962_v60  ;;  %v1977_v43 = vmul.f32 %v6988_v63, %v1963_v50  ;;  %v1978_v44 = vmul.f32 %v6988_v63, %v1964_v20  ;;  %v1979_v45 = vmul.f32 %v6988_v63, %v1965_v40 }
 0x681   :  { %v1986_v47 = vadd.f32 %v6989_v15, %v1972_v9  ;;  %v1987_v28 = vadd.f32 %v6989_v15, %v1973_v41  ;;  %v1988_v5 = vadd.f32 %v6989_v15, %v1974_v42  ;;  %v1989_v58 = vadd.f32 %v6989_v15, %v1975_v21 }
 0x682   :  { %v1990_v26 = vadd.f32 %v6989_v15, %v1976_v56  ;;  %v1991_v46 = vadd.f32 %v6989_v15, %v1977_v43  ;;  %v1992_v48 = vadd.f32 %v6989_v15, %v1978_v44  ;;  %v1993_v49 = vadd.f32 %v6989_v15, %v1979_v45 }
 0x683   :  { %v1996_v52 = vmul.f32 0.2, %v1988_v5  ;;  %v1997_v53 = vmul.f32 0.2, %v1989_v58  ;;  %v1994_v54 = vmul.f32 0.2, %v1986_v47 }
 0x684   :  { %v1998_v23 = vmul.f32 0.2, %v1990_v26  ;;  %v1999_v57 = vmul.f32 0.2, %v1991_v46  ;;  %v2000_v61 = vmul.f32 0.2, %v1992_v48 }
 0x685   :  { %v2001_v1 = vmul.f32 0.2, %v1993_v49  ;;  %v1995_v37 = vmul.f32 0.2, %v1987_v28  ;;  %v2002_v2 = vmax.f32 %v1986_v47, %v1994_v54  ;;  %v2004_v3 = vmax.f32 %v1988_v5, %v1996_v52 }
 0x686   :  { %v2006_v4 = vmax.f32 %v1990_v26, %v1998_v23  ;;  %v2007_v6 = vmax.f32 %v1991_v46, %v1999_v57  ;;  %v2008_v7 = vmax.f32 %v1992_v48, %v2000_v61  ;;  %v2005_v55 = vmax.f32 %v1989_v58, %v1997_v53 }
 0x687   :  { %v2009_v8 = vmax.f32 %v1993_v49, %v2001_v1  ;;  %v2003_v10 = vmax.f32 %v1987_v28, %v1995_v37  ;;  %v9041_v30 = vmov 0.0  }
 0x688   :  { %v2012_v12 = vpack.c.bf16 %v2007_v6, %v2006_v4  ;;  %v2011_v13 = vpack.c.bf16 %v2005_v55, %v2004_v3  ;;  %v6997_v55 = vld [vmem:[#allocation28] ss:$0 sm:$0xff] }
 0x689   :  { %v2013_v14 = vpack.c.bf16 %v2009_v8, %v2008_v7  ;;  %v2010_v17 = vpack.c.bf16 %v2003_v10, %v2002_v2 }
 0x68a   :  { %2016 = vst.msk [vmem:[#allocation3 + $0x10] sm:$0xff] %vm1475_vm7, %v2012_v12  ;;  %2015 = vst.msk [vmem:[#allocation3 + $0x8] sm:$0xff] %vm1475_vm7, %v2011_v13 }
 0x68b   :  { %2017 = vst.msk [vmem:[#allocation3 + $0x18] sm:$0xff] %vm1475_vm7, %v2013_v14  ;;  %2014 = vst.msk [vmem:[#allocation3] sm:$0xff] %vm1475_vm7, %v2010_v17  ;;  %v6998_v14 = vld [vmem:[#allocation30] ss:$0 sm:$0xff] }
 0x691   :  { %v2022_v18 = vld [vmem:[#allocation3 + $0x10] sm:$0xff]  ;;  %v2019_v27 = vld [vmem:[#allocation3 + $0x8] sm:$0xff] }
 0x692   :  { %7376 = vmatprep.mubr.msk.bf16.mxu1 %vm1475_vm7, %v2022_v18  ;;  %v2023_v19 = vld [vmem:[#allocation3 + $0x18] sm:$0xff]  ;;  %v2018_v25 = vld [vmem:[#allocation3] sm:$0xff] }
 0x693   :  { %7377 = vmatmul.mubr.msk.bf16.vlgmr.msra.gmra.mrb[8].mxu1 %vm1475_vm7, %v2023_v19 }
 0x694   :  { %7381 = vmatpush3.bf16.msra.mxu1 %v10118_v11  ;;  %7382 = vmatprep.mubr.msk.bf16.mxu1 %vm1475_vm7, %v2018_v25 }
 0x695   :  { %7386 = vmatprep.subr.bf16.mxu1 %v9041_v30 }
 0x69f   :  { %7383 = vmatmul.mubr.msk.bf16.vlgmr.msra.gmra.mrb[8].mxu1 %vm1475_vm7, %v2019_v27 }
 0x6a0   :  { %7388 = vmatprep.mubr.msk.bf16.mxu1 %vm9042_vm8, %v9041_v30  ;;  %7387 = vmatpush3.bf16.msra.mxu1 %v7691_v33 }
 0x6a1   :  { %7392 = vmatprep.subr.bf16.mxu1 %v9041_v30 }
 0x772   :  { %v7384_v35 = vpop.f32.mrb[8].mxu1 }
 0x773   :  { %v2134_v36 = vpop.f32.mrb[9].mxu1  ;;  %v2158_v11 = vadd.f32 %v7384_v35, %v6996_v34 }
 0x774   :  { %v2156_v59 = vadd.f32 %v6996_v34, %v2134_v36  ;;  %v7385_v31 = vpop.f32.mrb[10].mxu1 }
 0x775   :  { %v2137_v62 = vpop.f32.mrb[11].mxu1  ;;  %v2159_v22 = vadd.f32 %v7385_v31, %v6996_v34  ;;  %v2178_v24 = vmul.f32 %v2158_v11, %v2158_v11  ;;  %v2165_v29 = vsel %vm1475_vm7, %v2158_v11, 0.0 }
 0x776   :  { %v2176_v32 = vmul.f32 %v2156_v59, %v2156_v59  ;;  %v2157_v38 = vadd.f32 %v6996_v34, %v2137_v62  ;;  %v2162_v63 = vsel %vm1475_vm7, %v2156_v59, 0.0 }
 0x777   :  { %v2179_v60 = vmul.f32 %v2159_v22, %v2159_v22  ;;  %v2183_v9 = vsel %vm1475_vm7, %v2178_v24, 0.0  ;;  %v2167_v41 = vsel %vm1475_vm7, %v2159_v22, 0.0 }
 0x778   :  { %v2163_v16 = vsel %vm1475_vm7, %v2157_v38, 0.0  ;;  %v2177_v39 = vmul.f32 %v2157_v38, %v2157_v38  ;;  %v2180_v15 = vsel %vm1475_vm7, %v2176_v32, 0.0 }
 0x779   :  { %v2164_v51 = vadd.f32 %v2163_v16, %v2162_v63  ;;  %v2185_v56 = vsel %vm1475_vm7, %v2179_v60, 0.0  ;;  %v7692_v16 = vld [vmem:[#allocation31] sm:$0xff]  }
 0x77a   :  { %v2181_v50 = vsel %vm1475_vm7, %v2177_v39, 0.0 }
 0x77b   :  { %v2166_v20 = vadd.f32 %v2165_v29, %v2164_v51  ;;  %v2182_v40 = vadd.f32 %v2181_v50, %v2180_v15 }
 0x77d   :  { %v2168_v42 = vadd.f32 %v2167_v41, %v2166_v20  ;;  %v2184_v21 = vadd.f32 %v2183_v9, %v2182_v40  ;;  %v7003_v40 = vld [vmem:[#allocation33] ss:$0 sm:$0xff] }
 0x77f   :  { %v2169_v43 = vrot.slane %v2168_v42, 4  ;;  %v2186_v44 = vadd.f32 %v2185_v56, %v2184_v21 }
 0x781   :  { %v2170_v45 = vadd.f32 %v2169_v43, %v2168_v42  ;;  %v2187_v47 = vrot.slane %v2186_v44, 4 }
 0x783   :  { %v2171_v28 = vrot.slane %v2170_v45, 2  ;;  %v2188_v5 = vadd.f32 %v2187_v47, %v2186_v44 }
 0x785   :  { %v2172_v58 = vadd.f32 %v2171_v28, %v2170_v45  ;;  %v2189_v26 = vrot.slane %v2188_v5, 2 }
 0x787   :  { %v2173_v46 = vrot.slane %v2172_v58, 1  ;;  %v2190_v48 = vadd.f32 %v2189_v26, %v2188_v5 }
 0x789   :  { %v2174_v49 = vadd.f32 %v2173_v46, %v2172_v58  ;;  %v2191_v52 = vrot.slane %v2190_v48, 1 }
 0x78b   :  { %v2175_v53 = vmul.f32 0.03125, %v2174_v49  ;;  %v2192_v54 = vadd.f32 %v2191_v52, %v2190_v48 }
 0x78d   :  { %v2193_v23 = vmul.f32 0.03125, %v2192_v54  ;;  %v2194_v57 = vmul.f32 %v2175_v53, %v2175_v53  ;;  %v2197_v61 = vsub.f32 %v2156_v59, %v2175_v53  ;;  %v2198_v1 = vsub.f32 %v2157_v38, %v2175_v53 }
 0x78e   :  { %v2199_v37 = vsub.f32 %v2158_v11, %v2175_v53  ;;  %v2200_v2 = vsub.f32 %v2159_v22, %v2175_v53 }
 0x78f   :  { %v2195_v3 = vsub.f32 %v2193_v23, %v2194_v57 }
 0x791   :  { %v2196_v4 = vmax.f32 %v2195_v3, 0.0 }
 0x793   :  { %v2201_v6 = vadd.f32 1e-05, %v2196_v4 }
 0x795   :  { %7697 = vrsqrt.f32 %v2201_v6 }
 0x79f   :  { %v7698_v7 = vpop.eup %7697 }
 0x7a0   :  { %v2203_v8 = vmul.f32 %v7698_v7, %v2197_v61  ;;  %v2204_v10 = vmul.f32 %v7698_v7, %v2198_v1  ;;  %v2205_v12 = vmul.f32 %v7698_v7, %v2199_v37  ;;  %v2206_v13 = vmul.f32 %v7698_v7, %v2200_v2 }
 0x7a2   :  { %v2213_v17 = vmul.f32 %v6997_v55, %v2203_v8  ;;  %v2214_v18 = vmul.f32 %v6997_v55, %v2204_v10  ;;  %v2215_v19 = vmul.f32 %v6997_v55, %v2205_v12  ;;  %v2216_v25 = vmul.f32 %v6997_v55, %v2206_v13 }
 0x7a4   :  { %v2223_v27 = vadd.f32 %v6998_v14, %v2213_v17  ;;  %v2224_v33 = vadd.f32 %v6998_v14, %v2214_v18  ;;  %v2225_v34 = vadd.f32 %v6998_v14, %v2215_v19  ;;  %v2226_v35 = vadd.f32 %v6998_v14, %v2216_v25  ;;  %v7004_v17 = vld [vmem:[#allocation34] ss:$0 sm:$0xff]  ;;  %v7005_v25 = vld [vmem:[#allocation36] ss:$0 sm:$0xff] }
 0x7a6   :  { %v2227_v36 = vmul.f32 0.2, %v2223_v27  ;;  %v2228_v11 = vmul.f32 0.2, %v2224_v33  ;;  %v2229_v59 = vmul.f32 0.2, %v2225_v34 }
 0x7a7   :  { %v2230_v31 = vmul.f32 0.2, %v2226_v35 }
 0x7a8   :  { %v2231_v62 = vmax.f32 %v2223_v27, %v2227_v36  ;;  %v2232_v32 = vmax.f32 %v2224_v33, %v2228_v11  ;;  %v2233_v22 = vmax.f32 %v2225_v34, %v2229_v59 }
 0x7a9   :  { %v2234_v38 = vmax.f32 %v2226_v35, %v2230_v31 }
 0x7aa   :  { %v2235_v24 = vpack.c.bf16 %v2232_v32, %v2231_v62 }
 0x7ab   :  { %v2236_v63 = vpack.c.bf16 %v2234_v38, %v2233_v22 }
 0x7ac   :  { %2237 = vst.msk [vmem:[#allocation4] sm:$0xff] %vm1475_vm7, %v2235_v24 }
 0x7ad   :  { %2238 = vst.msk [vmem:[#allocation4 + $0x8] sm:$0xff] %vm1475_vm7, %v2236_v63 }
 0x7b3   :  { %v2239_v51 = vld [vmem:[#allocation4] sm:$0xff] }
 0x7b4   :  { %v2242_v39 = vld [vmem:[#allocation4 + $0x8] sm:$0xff] }
 0x7b5   :  { %7389 = vmatmul.mubr.msk.bf16.vlgmr.msra.gmra.mrb[12].mxu1 %vm1475_vm7, %v2242_v39 }
 0x7b6   :  { %7393 = vmatpush3.bf16.msra.mxu1 %v7692_v16  ;;  %7394 = vmatprep.mubr.msk.bf16.mxu1 %vm9042_vm8, %v9041_v30 }
 0x7bd   :  { %7395 = vmatmul.mubr.msk.bf16.vlgmr.msra.gmra.mrb[16].mxu1 %vm1475_vm7, %v2239_v51 }
 0x888   :  { %v2289_v29 = vpop.f32.mrb[12].mxu1 }
 0x889   :  { %v7390_v15 = vpop.f32.mrb[13].mxu1 }
 0x88a   :  { %v2292_v60 = vpop.f32.mrb[14].mxu1 }
 0x88b   :  { %v7391_v50 = vpop.f32.mrb[15].mxu1 }
 0x890   :  { %v2339_v20 = vpop.f32.mrb[16].mxu1 }
 0x891   :  { %v2340_v9 = vadd.f32 %v2339_v20, %v2289_v29  ;;  %v7396_v41 = vpop.f32.mrb[17].mxu1 }
 0x892   :  { %v2342_v42 = vpop.f32.mrb[18].mxu1 }
 0x893   :  { %v2353_v21 = vadd.f32 %v7003_v40, %v2340_v9  ;;  %v2343_v56 = vadd.f32 %v2342_v42, %v2292_v60  ;;  %v7397_v43 = vpop.f32.mrb[19].mxu1 }
 0x895   :  { %v2367_v44 = vmul.f32 %v2353_v21, %v2353_v21  ;;  %v2354_v45 = vadd.f32 %v7003_v40, %v2343_v56  ;;  %v2357_v47 = vsel %vm1475_vm7, %v2353_v21, 0.0 }
 0x897   :  { %v2358_v30 = vsel %vm1475_vm7, %v2354_v45, 0.0  ;;  %v2368_v28 = vmul.f32 %v2354_v45, %v2354_v45  ;;  %v2369_v58 = vsel %vm1475_vm7, %v2367_v44, 0.0 }
 0x898   :  { %v2359_v5 = vadd.f32 %v2358_v30, %v2357_v47 }
 0x899   :  { %v2370_v26 = vsel %vm1475_vm7, %v2368_v28, 0.0 }
 0x89a   :  { %v2360_v46 = vrot.slane %v2359_v5, 4  ;;  %v2371_v48 = vadd.f32 %v2370_v26, %v2369_v58 }
 0x89c   :  { %v2361_v49 = vadd.f32 %v2360_v46, %v2359_v5  ;;  %v2372_v52 = vrot.slane %v2371_v48, 4 }
 0x89e   :  { %v2362_v53 = vrot.slane %v2361_v49, 2  ;;  %v2373_v54 = vadd.f32 %v2372_v52, %v2371_v48 }
 0x8a0   :  { %v2363_v23 = vadd.f32 %v2362_v53, %v2361_v49  ;;  %v2374_v57 = vrot.slane %v2373_v54, 2 }
 0x8a2   :  { %v2364_v61 = vrot.slane %v2363_v23, 1  ;;  %v2375_v1 = vadd.f32 %v2374_v57, %v2373_v54 }
 0x8a4   :  { %v2365_v37 = vadd.f32 %v2364_v61, %v2363_v23  ;;  %v2376_v2 = vrot.slane %v2375_v1, 1 }
 0x8a6   :  { %v2366_v3 = vmul.f32 0.0625, %v2365_v37  ;;  %v2377_v4 = vadd.f32 %v2376_v2, %v2375_v1 }
 0x8a8   :  { %v2378_v6 = vmul.f32 0.0625, %v2377_v4  ;;  %v2379_v7 = vmul.f32 %v2366_v3, %v2366_v3  ;;  %v2382_v55 = vsub.f32 %v2353_v21, %v2366_v3  ;;  %v2383_v8 = vsub.f32 %v2354_v45, %v2366_v3 }
 0x8aa   :  { %v2380_v10 = vsub.f32 %v2378_v6, %v2379_v7 }
 0x8ac   :  { %v2381_v12 = vmax.f32 %v2380_v10, 0.0 }
 0x8ae   :  { %v2384_v13 = vadd.f32 1e-05, %v2381_v12 }
 0x8b0   :  { %7699 = vrsqrt.f32 %v2384_v13 }
 0x8ba   :  { %v7700_v14 = vpop.eup %7699 }
 0x8bb   :  { %v2386_v18 = vmul.f32 %v7700_v14, %v2382_v55  ;;  %v2387_v19 = vmul.f32 %v7700_v14, %v2383_v8 }
 0x8bd   :  { %v2394_v27 = vmul.f32 %v7004_v17, %v2386_v18  ;;  %v2395_v33 = vmul.f32 %v7004_v17, %v2387_v19 }
 0x8bf   :  { %v2402_v34 = vadd.f32 %v7005_v25, %v2394_v27  ;;  %v2403_v35 = vadd.f32 %v7005_v25, %v2395_v33 }
 0x8c1   :  { %v2404_v36 = vmul.f32 0.2, %v2402_v34  ;;  %v2405_v11 = vmul.f32 0.2, %v2403_v35 }
 0x8c3   :  { %v2406_v59 = vmax.f32 %v2402_v34, %v2404_v36  ;;  %v2407_v31 = vmax.f32 %v2403_v35, %v2405_v11 }
 0x8c5   :  { %v2408_v62 = vpack.c.bf16 %v2407_v31, %v2406_v59 }
 0x8c7   :  { %2409 = vst.msk [vmem:[#allocation5] sm:$0xff] %vm1475_vm7, %v2408_v62 }
 0x8c8   :  { %8928 = dma.done.wait [#allocation12], 6656 }
 0x8c9   :  { %8929 = vsyncadd [#allocation12], 4294960640  ;;  %vm2514_vm9 = vcmask 1045504   ;;  %v9043_v32 = vmov 0   ;;  %vm2515_vm10 = vcmask 1046528   ;;  %v9044_v22 = vmov 65535  }
 0x8ca   :  { %2574 = vmatprep.mubr.bf16.mxu1 %v9043_v32  ;;  %2656 = vmatprep.mubr.bf16.mxu0 %v9043_v32  ;;  %v2516_v38 = vsel %vm2514_vm9, 4294967295, %v9044_v22  ;;  %v2469_v24 = vld [vmem:[#allocation37] sm:$0xff]  ;;  %v2471_v39 = vld [vmem:[#allocation37 + $0x10] sm:$0xff]  ;;  %v2470_v60 = vld [vmem:[#allocation37 + $0x8] sm:$0xff]  ;;  %v10216_v58 = vpack.c.bf16 %v9621_v0, %v9621_v0  ;;  %vm2510_vm11 = vcmask 105472   ;;  %vm2970_vm12 = vcmask 1041408  }
 0x8cb   :  { %v2473_v63 = vld [vmem:[#allocation37 + $0x20] sm:$0x77]  ;;  %v10207_v16 = vsel %vm2515_vm10, %v2516_v38, 0  ;;  %v2475_v29 = vld [vmem:[#allocation37 + $0x30] sm:$0x77]  ;;  %v2472_v44 = vld [vmem:[#allocation37 + $0x18] sm:$0xff] }
 0x8cc   :  { %v7007_v51 = vcombine.high %v2469_v24, %v2473_v63  ;;  %v7006_v15 = vcombine.low %v2469_v24, %v2473_v63  ;;  %v2474_v50 = vld [vmem:[#allocation37 + $0x28] sm:$0x77]  ;;  %v7011_v20 = vcombine.high %v2471_v39, %v2475_v29  ;;  %v7010_v40 = vcombine.low %v2471_v39, %v2475_v29  ;;  %v2416_v42 = vld [vmem:[#allocation10] sm:$0xff]  ;;  %v2417_v37 = vld [vmem:[#allocation10 + $0x8] sm:$0xff] }
 0x8cd   :  { %v7008_v9 = vcombine.low %v2470_v60, %v2474_v50  ;;  %v7009_v41 = vcombine.high %v2470_v60, %v2474_v50  ;;  %v2420_v21 = vld [vmem:[#allocation10 + $0x20] sm:$0xff]  ;;  %v2421_v2 = vld [vmem:[#allocation10 + $0x28] sm:$0xff]  ;;  %v2422_v29 = vld [vmem:[#allocation10 + $0x30] sm:$0xff]  ;;  %vm2966_vm13 = vcmask 818176  }
 0x8ce   :  { %v2522_v56 = vand.u32 %v7007_v51, %v10207_v16  ;;  %v2519_v43 = vand.u32 %v7006_v15, %v10207_v16  ;;  %v2476_v45 = vld [vmem:[#allocation37 + $0x38] sm:$0x77]  ;;  %v2534_v47 = vand.u32 %v7011_v20, %v10207_v16  ;;  %v2531_v30 = vand.u32 %v7010_v40, %v10207_v16  ;;  %v2464_v59 = vld [vmem:[#allocation10 + $0x180] sm:$0x33]  ;;  %v2418_v51 = vld [vmem:[#allocation10 + $0x10] sm:$0xff] }
 0x8cf   :  { %v2528_v28 = vand.u32 %v7009_v41, %v10207_v16  ;;  %v7019_v5 = vcombine.high %v2416_v42, %v2420_v21  ;;  %v2424_v26 = vld [vmem:[#allocation10 + $0x40] sm:$0xff]  ;;  %v7013_v48 = vcombine.high %v2472_v44, %v2476_v45  ;;  %v2525_v49 = vand.u32 %v7008_v9, %v10207_v16  ;;  %v2425_v17 = vld [vmem:[#allocation10 + $0x48] sm:$0xff] }
 0x8d0   :  { %2542 = vmatprep.subr.bf16.mxu1 %v2522_v56  ;;  %v2428_v46 = vld [vmem:[#allocation10 + $0x60] sm:$0xff]  ;;  %2624 = vmatprep.subr.bf16.mxu0 %v2534_v47  ;;  %v7018_v52 = vcombine.low %v2416_v42, %v2420_v21  ;;  %v7012_v57 = vcombine.low %v2472_v44, %v2476_v45  ;;  %v7021_v55 = vcombine.high %v2417_v37, %v2421_v2  ;;  %v2429_v18 = vld [vmem:[#allocation10 + $0x68] sm:$0xff]  ;;  %v2426_v42 = vld [vmem:[#allocation10 + $0x50] sm:$0xff] }
 0x8d1   :  { %2543 = vmatpush1.bf16.msra.mxu1 %v2519_v43  ;;  %2625 = vmatpush1.bf16.msra.mxu0 %v2531_v30  ;;  %v7027_v53 = vcombine.high %v2424_v26, %v2428_v46  ;;  %v2540_v54 = vand.u32 %v7013_v48, %v10207_v16  ;;  %v2432_v0 = vld [vmem:[#allocation10 + $0x80] sm:$0xff]  ;;  %v7026_v61 = vcombine.low %v2424_v26, %v2428_v46  ;;  %v2433_v36 = vld [vmem:[#allocation10 + $0x88] sm:$0xff]  ;;  %v2430_v21 = vld [vmem:[#allocation10 + $0x70] sm:$0xff] }
 0x8d2   :  { %2583 = vmatprep.subr.bf16.mxu1 %v2528_v28  ;;  %2995 = vmatprep.subr.bf16.mxu0 %v7019_v5  ;;  %v2436_v23 = vld [vmem:[#allocation10 + $0xa0] sm:$0xff]  ;;  %v2537_v6 = vand.u32 %v7012_v57, %v10207_v16  ;;  %v7020_v27 = vcombine.low %v2417_v37, %v2421_v2  ;;  %v7029_v34 = vcombine.high %v2425_v17, %v2429_v18  ;;  %v2437_v11 = vld [vmem:[#allocation10 + $0xa8] sm:$0xff]  ;;  %v2434_v5 = vld [vmem:[#allocation10 + $0x90] sm:$0xff] }
 0x8d3   :  { %v7035_v1 = vcombine.high %v2432_v0, %v2436_v23  ;;  %v2440_v3 = vld [vmem:[#allocation10 + $0xc0] sm:$0xff]  ;;  %v7034_v7 = vcombine.low %v2432_v0, %v2436_v23  ;;  %v7028_v31 = vcombine.low %v2425_v17, %v2429_v18  ;;  %v7037_v22 = vcombine.high %v2433_v36, %v2437_v11  ;;  %v2441_v63 = vld [vmem:[#allocation10 + $0xc8] sm:$0xff]  ;;  %v2438_v26 = vld [vmem:[#allocation10 + $0xb0] sm:$0xff] }
 0x8d4   :  { %7014 = vmatmul.mubr.msk.bf16.vlgmr.msra.gmra.mrb[20].mxu1 %vm2510_vm11, %v10216_v58  ;;  %7016 = vmatmul.mubr.msk.bf16.vlgmr.msra.gmra.mrb[16].mxu0 %vm2510_vm11, %v10216_v58  ;;  %v2444_v4 = vld [vmem:[#allocation10 + $0xe0] sm:$0xff]  ;;  %v7067_v38 = vcombine.high %v2464_v59, %v2464_v59  ;;  %v7066_v24 = vcombine.low %v2464_v59, %v2464_v59  ;;  %v2445_v39 = vld [vmem:[#allocation10 + $0xe8] sm:$0xff]  ;;  %v7036_v15 = vcombine.low %v2433_v36, %v2437_v11  ;;  %v2446_v0 = vld [vmem:[#allocation10 + $0xf0] sm:$0xff] }
 0x8d5   :  { %2584 = vmatpush1.bf16.msra.mxu1 %v2525_v49  ;;  %2996 = vmatpush1.bf16.msra.mxu0 %v7018_v52  ;;  %v7043_v8 = vcombine.high %v2440_v3, %v2444_v4  ;;  %v2448_v10 = vld [vmem:[#allocation10 + $0x100] sm:$0xff]  ;;  %v7042_v13 = vcombine.low %v2440_v3, %v2444_v4  ;;  %v7045_v60 = vcombine.high %v2441_v63, %v2445_v39  ;;  %v2449_v9 = vld [vmem:[#allocation10 + $0x108] sm:$0xff]  ;;  %v2419_v2 = vld [vmem:[#allocation10 + $0x18] sm:$0xff] }
 0x8d6   :  { %2615 = vmatprep.mubr.bf16.mxu1 %v9043_v32  ;;  %2997 = vmatprep.subr.bf16.mxu0 %v7027_v53  ;;  %v2452_v12 = vld [vmem:[#allocation10 + $0x120] sm:$0xff]  ;;  %v2972_v20 = vsel %vm2970_vm12, %v7066_v24, 0  ;;  %v7023_v40 = vcombine.high %v2418_v51, %v2422_v29  ;;  %v2453_v41 = vld [vmem:[#allocation10 + $0x128] sm:$0xff]  ;;  %v7044_v56 = vcombine.low %v2441_v63, %v2445_v39  ;;  %v7022_v44 = vcombine.low %v2418_v51, %v2422_v29  ;;  %v2423_v3 = vld [vmem:[#allocation10 + $0x38] sm:$0xff] }
 0x8d7   :  { %2665 = vmatprep.subr.bf16.mxu1 %v2540_v54  ;;  %3027 = vmatprep.mubr.bf16.mxu0 %v9043_v32  ;;  %v7051_v14 = vcombine.high %v2448_v10, %v2452_v12  ;;  %v2456_v19 = vld [vmem:[#allocation10 + $0x140] sm:$0xff]  ;;  %v7050_v33 = vcombine.low %v2448_v10, %v2452_v12  ;;  %v7053_v45 = vcombine.high %v2449_v9, %v2453_v41  ;;  %v2457_v30 = vld [vmem:[#allocation10 + $0x148] sm:$0xff]  ;;  %v2442_v54 = vld [vmem:[#allocation10 + $0xd0] sm:$0xff] }
 0x8d8   :  { %v2460_v25 = vld [vmem:[#allocation10 + $0x160] sm:$0xff]  ;;  %v7031_v47 = vcombine.high %v2426_v42, %v2430_v21  ;;  %v2461_v28 = vld [vmem:[#allocation10 + $0x168] sm:$0xff]  ;;  %v7052_v46 = vcombine.low %v2449_v9, %v2453_v41  ;;  %v7030_v48 = vcombine.low %v2426_v42, %v2430_v21  ;;  %v7039_v52 = vcombine.high %v2434_v5, %v2438_v26  ;;  %v2450_v4 = vld [vmem:[#allocation10 + $0x110] sm:$0xff] }
 0x8d9   :  { %2998 = vmatpush1.bf16.msra.mxu0 %v7026_v61  ;;  %v7059_v35 = vcombine.high %v2456_v19, %v2460_v25  ;;  %v7058_v62 = vcombine.low %v2456_v19, %v2460_v25  ;;  %v2415_v50 = vld [vmem:[#allocation13] sm:$0xff]  ;;  %v7061_v49 = vcombine.high %v2457_v30, %v2461_v28  ;;  %v2465_v53 = vld [vmem:[#allocation10 + $0x188] sm:$0x33]  ;;  %v7060_v23 = vcombine.low %v2457_v30, %v2461_v28  ;;  %v2427_v12 = vld [vmem:[#allocation10 + $0x58] sm:$0xff] }
 0x8da   :  { %2999 = vmatprep.subr.bf16.mxu0 %v7035_v1  ;;  %v10235_v43 = vpack.c.bf16 %v2415_v50, %v2415_v50  ;;  %v7038_v57 = vcombine.low %v2434_v5, %v2438_v26  ;;  %v7069_v61 = vcombine.high %v2465_v53, %v2465_v53  ;;  %v7068_v1 = vcombine.low %v2465_v53, %v2465_v53  ;;  %v2462_v17 = vld [vmem:[#allocation10 + $0x170] sm:$0xff]  ;;  %v2451_v51 = vld [vmem:[#allocation10 + $0x118] sm:$0xff] }
 0x8db   :  { %v7047_v37 = vcombine.high %v2442_v54, %v2446_v0  ;;  %v7024_v18 = vcombine.low %v2419_v2, %v2423_v3  ;;  %v2455_v29 = vld [vmem:[#allocation10 + $0x138] sm:$0xff] }
 0x8dc   :  { %7015 = vmatmul.mubr.msk.bf16.vlgmr.msra.gmra.mrb[24].mxu1 %vm2510_vm11, %v10216_v58  ;;  %v2459_v50 = vld [vmem:[#allocation10 + $0x158] sm:$0xff] }
 0x8dd   :  { %2666 = vmatpush1.bf16.msra.mxu1 %v2537_v6  ;;  %2697 = vmatprep.mubr.bf16.mxu1 %v9043_v32  ;;  %v2454_v6 = vld [vmem:[#allocation10 + $0x130] sm:$0xff]  ;;  %v2467_v41 = vld [vmem:[#allocation10 + $0x198] sm:$0x33] }
 0x8de   :  { %3000 = vmatpush1.bf16.msra.mxu0 %v7034_v7  ;;  %3036 = vmatprep.subr.bf16.mxu1 %v7021_v55  ;;  %v2978_v7 = vsel %vm2970_vm12, %v7068_v1, 0  ;;  %v7046_v55 = vcombine.low %v2442_v54, %v2446_v0  ;;  %v7055_v10 = vcombine.high %v2450_v4, %v2454_v6  ;;  %v7054_v19 = vcombine.low %v2450_v4, %v2454_v6 }
 0x8df   :  { %3001 = vmatprep.subr.bf16.mxu0 %v7043_v8  ;;  %v7025_v8 = vcombine.high %v2419_v2, %v2423_v3  ;;  %v7073_v21 = vcombine.high %v2467_v41, %v2467_v41  ;;  %v10266_v2 = vld [vmem:[#allocation39] sm:$0xff] }
 0x8e2   :  { %3002 = vmatpush1.bf16.msra.mxu0 %v7042_v13  ;;  %v2431_v13 = vld [vmem:[#allocation10 + $0x78] sm:$0xff] }
 0x8e3   :  { %3003 = vmatprep.subr.bf16.mxu0 %v7051_v14  ;;  %v2458_v14 = vld [vmem:[#allocation10 + $0x150] sm:$0xff]  ;;  %v7033_v25 = vcombine.high %v2427_v12, %v2431_v13  ;;  %v7032_v36 = vcombine.low %v2427_v12, %v2431_v13 }
 0x8e4   :  { %7017 = vmatmul.mubr.msk.bf16.vlgmr.msra.gmra.mrb[28].mxu1 %vm2510_vm11, %v10216_v58  ;;  %v7062_v11 = vcombine.low %v2458_v14, %v2462_v17 }
 0x8e5   :  { %3037 = vmatpush1.bf16.msra.mxu1 %v7020_v27  ;;  %3068 = vmatprep.mubr.bf16.mxu1 %v9043_v32  ;;  %v7063_v27 = vcombine.high %v2458_v14, %v2462_v17 }
 0x8e6   :  { %3004 = vmatpush1.bf16.msra.mxu0 %v7050_v33  ;;  %3038 = vmatprep.subr.bf16.mxu1 %v7029_v34  ;;  %v2435_v33 = vld [vmem:[#allocation10 + $0x98] sm:$0xff] }
 0x8e7   :  { %3005 = vmatprep.subr.bf16.mxu0 %v7059_v35  ;;  %v2439_v34 = vld [vmem:[#allocation10 + $0xb8] sm:$0xff]  ;;  %v2466_v35 = vld [vmem:[#allocation10 + $0x190] sm:$0x33] }
 0x8e8   :  { %v7041_v59 = vcombine.high %v2435_v33, %v2439_v34  ;;  %v7040_v24 = vcombine.low %v2435_v33, %v2439_v34 }
 0x8e9   :  { %3039 = vmatpush1.bf16.msra.mxu1 %v7028_v31  ;;  %v7071_v31 = vcombine.high %v2466_v35, %v2466_v35 }
 0x8ea   :  { %3006 = vmatpush1.bf16.msra.mxu0 %v7058_v62  ;;  %3040 = vmatprep.subr.bf16.mxu1 %v7037_v22  ;;  %v7070_v62 = vcombine.low %v2466_v35, %v2466_v35  ;;  %v2443_v22 = vld [vmem:[#allocation10 + $0xd8] sm:$0xff] }
 0x8eb   :  { %7074 = vmatprep.subr.msk.bf16.mxu0 %vm2970_vm12, %v7067_v38  ;;  %v2447_v38 = vld [vmem:[#allocation10 + $0xf8] sm:$0xff] }
 0x8ec   :  { %v7049_v63 = vcombine.high %v2443_v22, %v2447_v38  ;;  %v2984_v39 = vsel %vm2970_vm12, %v7070_v62, 0 }
 0x8ed   :  { %3041 = vmatpush1.bf16.msra.mxu1 %v7036_v15  ;;  %v7048_v15 = vcombine.low %v2443_v22, %v2447_v38 }
 0x8ee   :  { %3008 = vmatpush1.bf16.msra.mxu0 %v2972_v20  ;;  %3042 = vmatprep.subr.bf16.mxu1 %v7045_v60  ;;  %v7057_v60 = vcombine.high %v2451_v51, %v2455_v29  ;;  %v2463_v20 = vld [vmem:[#allocation10 + $0x178] sm:$0xff] }
 0x8ef   :  { %3077 = vmatprep.subr.bf16.mxu0 %v7023_v40  ;;  %v7056_v40 = vcombine.low %v2451_v51, %v2455_v29  ;;  %v7065_v9 = vcombine.high %v2459_v50, %v2463_v20  ;;  %v7064_v42 = vcombine.low %v2459_v50, %v2463_v20 }
 0x8f1   :  { %7075 = vmatmul.mubr.msk.bf16.vlgmr.msra.gmra.mrb[20].mxu0 %vm2966_vm13, %v10235_v43  ;;  %3043 = vmatpush1.bf16.msra.mxu1 %v7044_v56  ;;  %v7072_v56 = vcombine.low %v2467_v41, %v2467_v41 }
 0x8f2   :  { %3078 = vmatpush1.bf16.msra.mxu0 %v7022_v44  ;;  %3044 = vmatprep.subr.bf16.mxu1 %v7053_v45 }
 0x8f3   :  { %3079 = vmatprep.subr.bf16.mxu0 %v7031_v47  ;;  %3109 = vmatprep.mubr.bf16.mxu0 %v9043_v32  ;;  %v2990_v44 = vsel %vm2970_vm12, %v7072_v56, 0 }
 0x8f5   :  { %3045 = vmatpush1.bf16.msra.mxu1 %v7052_v46 }
 0x8f6   :  { %3080 = vmatpush1.bf16.msra.mxu0 %v7030_v48  ;;  %3046 = vmatprep.subr.bf16.mxu1 %v7061_v49 }
 0x8f7   :  { %3081 = vmatprep.subr.bf16.mxu0 %v7039_v52 }
 0x8f9   :  { %3047 = vmatpush1.bf16.msra.mxu1 %v7060_v23  ;;  %v3161_v23 = vlaneseq }
 0x8fa   :  { %3082 = vmatpush1.bf16.msra.mxu0 %v7038_v57  ;;  %7076 = vmatprep.subr.msk.bf16.mxu1 %vm2970_vm12, %v7069_v61 }
 0x8fb   :  { %3083 = vmatprep.subr.bf16.mxu0 %v7047_v37  ;;  %v10261_v1 = vshrl.u32 %v3161_v23, 7 }
 0x8fd   :  { %3049 = vmatpush1.bf16.msra.mxu1 %v2978_v7  ;;  %v10264_v37 = vsub.s32 0, %v10261_v1  ;;  %v10269_v3 = vsub.s32 1, %v10261_v1  ;;  %v10288_v22 = vsub.s32 2, %v10261_v1 }
 0x8fe   :  { %3084 = vmatpush1.bf16.msra.mxu0 %v7046_v55  ;;  %3118 = vmatprep.subr.bf16.mxu1 %v7025_v8 }
 0x8ff   :  { %3085 = vmatprep.subr.bf16.mxu0 %v7055_v10  ;;  %v3164_v4 = vrot.slane %v10266_v2, %v10264_v37  ;;  %v3168_v7 = vrot.slane %v10266_v2, %v10269_v3  ;;  %v3172_v20 = vrot.slane %v10266_v2, %v10288_v22 }
 0x900   :  { %7077 = vmatmul.mubr.msk.bf16.vlgmr.msra.gmra.mrb[32].mxu1 %vm2966_vm13, %v10235_v43 }
 0x901   :  { %3119 = vmatpush1.bf16.msra.mxu1 %v7024_v18  ;;  %3150 = vmatprep.mubr.bf16.mxu1 %v9043_v32 }
 0x902   :  { %3086 = vmatpush1.bf16.msra.mxu0 %v7054_v19  ;;  %3120 = vmatprep.subr.bf16.mxu1 %v7033_v25 }
 0x903   :  { %3087 = vmatprep.subr.bf16.mxu0 %v7063_v27 }
 0x905   :  { %3121 = vmatpush1.bf16.msra.mxu1 %v7032_v36 }
 0x906   :  { %3088 = vmatpush1.bf16.msra.mxu0 %v7062_v11  ;;  %3122 = vmatprep.subr.bf16.mxu1 %v7041_v59 }
 0x907   :  { %7078 = vmatprep.subr.msk.bf16.mxu0 %vm2970_vm12, %v7071_v31 }
 0x909   :  { %3123 = vmatpush1.bf16.msra.mxu1 %v7040_v24 }
 0x90a   :  { %3090 = vmatpush1.bf16.msra.mxu0 %v2984_v39  ;;  %3124 = vmatprep.subr.bf16.mxu1 %v7049_v63  ;;  %v10291_v63 = vsub.s32 3, %v10261_v1 }
 0x90d   :  { %7079 = vmatmul.mubr.msk.bf16.vlgmr.msra.gmra.mrb[24].mxu0 %vm2966_vm13, %v10235_v43  ;;  %3125 = vmatpush1.bf16.msra.mxu1 %v7048_v15 }
 0x90e   :  { %3126 = vmatprep.subr.bf16.mxu1 %v7057_v60 }
 0x911   :  { %3127 = vmatpush1.bf16.msra.mxu1 %v7056_v40 }
 0x912   :  { %3128 = vmatprep.subr.bf16.mxu1 %v7065_v9 }
 0x915   :  { %3129 = vmatpush1.bf16.msra.mxu1 %v7064_v42  ;;  %v3176_v42 = vrot.slane %v10266_v2, %v10291_v63 }
 0x916   :  { %7080 = vmatprep.subr.msk.bf16.mxu1 %vm2970_vm12, %v7073_v21 }
 0x919   :  { %3131 = vmatpush1.bf16.msra.mxu1 %v2990_v44 }
 0x91c   :  { %7081 = vmatmul.mubr.msk.bf16.vlgmr.msra.gmra.mrb[36].mxu1 %vm2966_vm13, %v10235_v43 }
 0x9a7   :  { %v2576_v45 = vpop.f32.mrb[20].mxu1  ;;  %v10253_v30 = vpop.f32.mrb[16].mxu0 }
 0x9a8   :  { %v2578_v47 = vpop.f32.mrb[21].mxu1  ;;  %v10255_v5 = vpop.f32.mrb[17].mxu0 }
 0x9a9   :  { %v2580_v28 = vpop.f32.mrb[22].mxu1  ;;  %v2662_v46 = vpop.f32.mrb[18].mxu0 }
 0x9aa   :  { %v2581_v26 = vpop.f32.mrb[23].mxu1  ;;  %v2663_v48 = vpop.f32.mrb[19].mxu0 }
 0x9af   :  { %v2617_v49 = vpop.f32.mrb[24].mxu1 }
 0x9b0   :  { %v2619_v52 = vpop.f32.mrb[25].mxu1 }
 0x9b1   :  { %v2621_v53 = vpop.f32.mrb[26].mxu1 }
 0x9b2   :  { %v2622_v54 = vpop.f32.mrb[27].mxu1 }
 0x9b7   :  { %v10257_v0 = vpop.f32.mrb[28].mxu1 }
 0x9b8   :  { %v10259_v57 = vpop.f32.mrb[29].mxu1 }
 0x9b9   :  { %v2703_v43 = vpop.f32.mrb[30].mxu1 }
 0x9ba   :  { %v2704_v61 = vpop.f32.mrb[31].mxu1 }
 0x9c4   :  { %v3029_v6 = vpop.f32.mrb[20].mxu0 }
 0x9c5   :  { %v3030_v55 = vadd.f32 %v3029_v6, %v2576_v45  ;;  %v3031_v8 = vpop.f32.mrb[21].mxu0 }
 0x9c6   :  { %v3032_v10 = vadd.f32 %v3031_v8, %v2578_v47  ;;  %v3033_v12 = vpop.f32.mrb[22].mxu0 }
 0x9c7   :  { %v10275_v13 = vadd.f32 %v3164_v4, %v3030_v55  ;;  %v3034_v14 = vpop.f32.mrb[23].mxu0 }
 0x9c8   :  { %v10277_v17 = vadd.f32 %v3168_v7, %v3032_v10 }
 0x9c9   :  { %v3211_v18 = vrot.slane %v10275_v13, 4  ;;  %v3267_v19 = vmul.f32 %v10275_v13, %v10275_v13 }
 0x9ca   :  { %v3217_v25 = vrot.slane %v10277_v17, 4  ;;  %v3268_v27 = vmul.f32 %v10277_v17, %v10277_v17 }
 0x9cb   :  { %v3212_v33 = vadd.f32 %v3211_v18, %v10275_v13  ;;  %v3275_v34 = vrot.slane %v3267_v19, 4  ;;  %v10317_v18 = vsub.s32 4, %v10261_v1 }
 0x9cc   :  { %v3218_v35 = vadd.f32 %v3217_v25, %v10277_v17  ;;  %v3281_v36 = vrot.slane %v3268_v27, 4 }
 0x9cd   :  { %v3213_v11 = vrot.slane %v3212_v33, 2  ;;  %v3276_v59 = vadd.f32 %v3275_v34, %v3267_v19 }
 0x9ce   :  { %v3219_v31 = vrot.slane %v3218_v35, 2  ;;  %v3282_v62 = vadd.f32 %v3281_v36, %v3268_v27  ;;  %v10321_v36 = vsub.s32 5, %v10261_v1 }
 0x9cf   :  { %v3214_v38 = vadd.f32 %v3213_v11, %v3212_v33  ;;  %v3277_v24 = vrot.slane %v3276_v59, 2  ;;  %v10323_v11 = vld [vmem:[#allocation40] sm:$0xff] }
 0x9d0   :  { %v3220_v39 = vadd.f32 %v3219_v31, %v3218_v35  ;;  %v3283_v51 = vrot.slane %v3282_v62, 2 }
 0x9d1   :  { %v3215_v29 = vrot.slane %v3214_v38, 1  ;;  %v3278_v15 = vadd.f32 %v3277_v24, %v3276_v59 }
 0x9d2   :  { %v3221_v60 = vrot.slane %v3220_v39, 1  ;;  %v3284_v50 = vadd.f32 %v3283_v51, %v3282_v62  ;;  %v3180_v51 = vrot.slane %v10266_v2, %v10317_v18 }
 0x9d3   :  { %v3216_v40 = vadd.f32 %v3215_v29, %v3214_v38  ;;  %v3279_v9 = vrot.slane %v3278_v15, 1  ;;  %v3070_v41 = vpop.f32.mrb[32].mxu1  ;;  %v10327_v29 = vld [vmem:[#allocation42] sm:$0xff] }
 0x9d4   :  { %v3222_v21 = vadd.f32 %v3221_v60, %v3220_v39  ;;  %v3285_v56 = vrot.slane %v3284_v50, 1  ;;  %v3071_v44 = vadd.f32 %v3070_v41, %v2617_v49  ;;  %v3072_v45 = vpop.f32.mrb[33].mxu1  ;;  %v3184_v41 = vrot.slane %v10266_v2, %v10321_v36 }
 0x9d5   :  { %v10297_v47 = vmul.f32 0.125, %v3216_v40  ;;  %v3280_v28 = vadd.f32 %v3279_v9, %v3278_v15  ;;  %v3073_v26 = vadd.f32 %v3072_v45, %v2619_v52  ;;  %v3074_v46 = vpop.f32.mrb[34].mxu1 }
 0x9d6   :  { %v10299_v48 = vmul.f32 0.125, %v3222_v21  ;;  %v3286_v53 = vadd.f32 %v3285_v56, %v3284_v50  ;;  %v10301_v54 = vadd.f32 %v3172_v20, %v3071_v44  ;;  %v3075_v23 = vpop.f32.mrb[35].mxu1  ;;  %v3391_v20 = vrot.slane %v10323_v11, %v10264_v37 }
 0x9d7   :  { %v3323_v43 = vmul.f32 0.125, %v3280_v28  ;;  %v3331_v61 = vmul.f32 %v10297_v47, %v10297_v47  ;;  %v10305_v4 = vadd.f32 %v3176_v42, %v3073_v26  ;;  %v3440_v28 = vrot.slane %v10327_v29, %v10264_v37 }
 0x9d8   :  { %v3324_v6 = vmul.f32 0.125, %v3286_v53  ;;  %v3332_v49 = vmul.f32 %v10299_v48, %v10299_v48  ;;  %v3223_v7 = vrot.slane %v10301_v54, 4  ;;  %v3269_v55 = vmul.f32 %v10301_v54, %v10301_v54 }
 0x9d9   :  { %v3339_v52 = vsub.f32 %v3323_v43, %v3331_v61  ;;  %v3229_v8 = vrot.slane %v10305_v4, 4  ;;  %v3270_v10 = vmul.f32 %v10305_v4, %v10305_v4  ;;  %v3395_v26 = vrot.slane %v10323_v11, %v10269_v3 }
 0x9da   :  { %v3340_v12 = vsub.f32 %v3324_v6, %v3332_v49  ;;  %v3224_v14 = vadd.f32 %v3223_v7, %v10301_v54  ;;  %v3287_v25 = vrot.slane %v3269_v55, 4 }
 0x9db   :  { %v3347_v19 = vmax.f32 %v3339_v52, 0.0  ;;  %v3230_v27 = vadd.f32 %v3229_v8, %v10305_v4  ;;  %v3293_v33 = vrot.slane %v3270_v10, 4  ;;  %v10348_v8 = vsub.s32 6, %v10261_v1 }
 0x9dc   :  { %v3348_v34 = vmax.f32 %v3340_v12, 0.0  ;;  %v3225_v35 = vrot.slane %v3224_v14, 2  ;;  %v3288_v31 = vadd.f32 %v3287_v25, %v3269_v55 }
 0x9dd   :  { %v3363_v59 = vadd.f32 1e-05, %v3347_v19  ;;  %v3231_v62 = vrot.slane %v3230_v27, 2  ;;  %v3294_v38 = vadd.f32 %v3293_v33, %v3270_v10  ;;  %v10359_v33 = vsub.s32 7, %v10261_v1 }
 0x9de   :  { %v3364_v24 = vadd.f32 1e-05, %v3348_v34  ;;  %v3226_v39 = vadd.f32 %v3225_v35, %v3224_v14  ;;  %v3289_v15 = vrot.slane %v3288_v31, 2  ;;  %v3355_v34 = vsub.f32 %v10275_v13, %v10297_v47 }
 0x9df   :  { %7709 = vrsqrt.f32 %v3363_v59  ;;  %v3232_v60 = vadd.f32 %v3231_v62, %v3230_v27  ;;  %v3295_v50 = vrot.slane %v3294_v38, 2  ;;  %v3188_v13 = vrot.slane %v10266_v2, %v10348_v8 }
 0x9e0   :  { %7711 = vrsqrt.f32 %v3364_v24  ;;  %v3227_v40 = vrot.slane %v3226_v39, 1  ;;  %v3111_v9 = vpop.f32.mrb[24].mxu0  ;;  %v3290_v42 = vadd.f32 %v3289_v15, %v3288_v31  ;;  %v3356_v15 = vsub.f32 %v10277_v17, %v10299_v48 }
 0x9e1   :  { %v3233_v21 = vrot.slane %v3232_v60, 1  ;;  %v3296_v56 = vadd.f32 %v3295_v50, %v3294_v38  ;;  %v3112_v44 = vadd.f32 %v3111_v9, %v10253_v30  ;;  %v3113_v45 = vpop.f32.mrb[25].mxu0  ;;  %v3444_v30 = vrot.slane %v10327_v29, %v10269_v3 }
 0x9e2   :  { %v3228_v46 = vadd.f32 %v3227_v40, %v3226_v39  ;;  %v3114_v53 = vadd.f32 %v3113_v45, %v10255_v5  ;;  %v3115_v23 = vpop.f32.mrb[26].mxu0  ;;  %v3291_v43 = vrot.slane %v3290_v42, 1 }
 0x9e3   :  { %v3234_v61 = vadd.f32 %v3233_v21, %v3232_v60  ;;  %v3297_v6 = vrot.slane %v3296_v56, 1  ;;  %v10339_v49 = vadd.f32 %v3180_v51, %v3112_v44  ;;  %v3116_v7 = vpop.f32.mrb[27].mxu0 }
 0x9e4   :  { %v10343_v52 = vmul.f32 0.125, %v3228_v46  ;;  %v10345_v55 = vadd.f32 %v3184_v41, %v3114_v53  ;;  %v3292_v10 = vadd.f32 %v3291_v43, %v3290_v42 }
 0x9e5   :  { %v10350_v12 = vmul.f32 0.125, %v3234_v61  ;;  %v3298_v5 = vadd.f32 %v3297_v6, %v3296_v56  ;;  %v3235_v14 = vrot.slane %v10339_v49, 4  ;;  %v3271_v25 = vmul.f32 %v10339_v49, %v10339_v49 }
 0x9e6   :  { %v3333_v19 = vmul.f32 %v10343_v52, %v10343_v52  ;;  %v3241_v27 = vrot.slane %v10345_v55, 4  ;;  %v3325_v35 = vmul.f32 0.125, %v3292_v10  ;;  %v3272_v39 = vmul.f32 %v10345_v55, %v10345_v55 }
 0x9e7   :  { %v3326_v59 = vmul.f32 0.125, %v3298_v5  ;;  %v3334_v31 = vmul.f32 %v10350_v12, %v10350_v12  ;;  %v3236_v62 = vadd.f32 %v3235_v14, %v10339_v49  ;;  %v3299_v38 = vrot.slane %v3271_v25, 4 }
 0x9e8   :  { %v3242_v24 = vadd.f32 %v3241_v27, %v10345_v55  ;;  %v3341_v60 = vsub.f32 %v3325_v35, %v3333_v19  ;;  %v3305_v45 = vrot.slane %v3272_v39, 4 }
 0x9e9   :  { %v7710_v51 = vpop.eup %7709  ;;  %v3342_v50 = vsub.f32 %v3326_v59, %v3334_v31  ;;  %v3237_v9 = vrot.slane %v3236_v62, 2  ;;  %v3300_v41 = vadd.f32 %v3299_v38, %v3271_v25 }
 0x9ea   :  { %v7712_v47 = vpop.eup %7711  ;;  %v3379_v40 = vmul.f32 %v7710_v51, %v3355_v34  ;;  %v3243_v42 = vrot.slane %v3242_v24, 2  ;;  %v3349_v56 = vmax.f32 %v3341_v60, 0.0  ;;  %v3306_v6 = vadd.f32 %v3305_v45, %v3272_v39 }
 0x9eb   :  { %v3380_v21 = vmul.f32 %v7712_v47, %v3356_v15  ;;  %v3350_v44 = vmax.f32 %v3342_v50, 0.0  ;;  %v3238_v53 = vadd.f32 %v3237_v9, %v3236_v62  ;;  %v3301_v23 = vrot.slane %v3300_v41, 2 }
 0x9ec   :  { %v3428_v46 = vmul.f32 %v3391_v20, %v3379_v40  ;;  %v3244_v43 = vadd.f32 %v3243_v42, %v3242_v24  ;;  %v3365_v17 = vadd.f32 1e-05, %v3349_v56  ;;  %v3307_v25 = vrot.slane %v3306_v6, 2 }
 0x9ed   :  { %v3429_v61 = vmul.f32 %v3395_v26, %v3380_v21  ;;  %v3366_v48 = vadd.f32 1e-05, %v3350_v44  ;;  %v3239_v10 = vrot.slane %v3238_v53, 1  ;;  %v3302_v5 = vadd.f32 %v3301_v23, %v3300_v41 }
 0x9ee   :  { %v10373_v7 = vadd.f32 %v3440_v28, %v3428_v46  ;;  %v3245_v14 = vrot.slane %v3244_v43, 1  ;;  %7713 = vrsqrt.f32 %v3365_v17  ;;  %v3192_v20 = vrot.slane %v10266_v2, %v10359_v33 }
 0x9ef   :  { %v10375_v19 = vadd.f32 %v3444_v30, %v3429_v61  ;;  %v3152_v27 = vpop.f32.mrb[36].mxu1  ;;  %7715 = vrsqrt.f32 %v3366_v48  ;;  %v3240_v26 = vadd.f32 %v3239_v10, %v3238_v53  ;;  %v3303_v35 = vrot.slane %v3302_v5, 1 }
 0x9f0   :  { %v3485_v34 = vmax.f32 %v10373_v7, 0.0  ;;  %v3154_v59 = vpop.f32.mrb[37].mxu1  ;;  %v3246_v31 = vadd.f32 %v3245_v14, %v3244_v43  ;;  %v3308_v62 = vadd.f32 %v3307_v25, %v3306_v6  ;;  %v3153_v38 = vadd.f32 %v3152_v27, %v10257_v0 }
 0x9f1   :  { %v3486_v28 = vmax.f32 %v10375_v19, 0.0  ;;  %v3156_v30 = vpop.f32.mrb[38].mxu1  ;;  %v10382_v24 = vmul.f32 0.125, %v3240_v26  ;;  %v3304_v39 = vadd.f32 %v3303_v35, %v3302_v5  ;;  %v3155_v51 = vadd.f32 %v3154_v59, %v10259_v57 }
 0x9f2   :  { %v3157_v15 = vpop.f32.mrb[39].mxu1  ;;  %v10385_v2 = vmul.f32 0.125, %v3246_v31  ;;  %v3309_v60 = vrot.slane %v3308_v62, 1  ;;  %v10387_v50 = vadd.f32 %v3188_v13, %v3153_v38  ;;  %v3399_v47 = vrot.slane %v10323_v11, %v10288_v22 }
 0x9f3   :  { %v3327_v40 = vmul.f32 0.125, %v3304_v39  ;;  %v3335_v9 = vmul.f32 %v10382_v24, %v10382_v24  ;;  %v10393_v0 = vadd.f32 %v3192_v20, %v3155_v51  ;;  %v3403_v41 = vrot.slane %v10323_v11, %v10291_v63 }
 0x9f4   :  { %v3310_v42 = vadd.f32 %v3309_v60, %v3308_v62  ;;  %v3336_v57 = vmul.f32 %v10385_v2, %v10385_v2  ;;  %v3247_v21 = vrot.slane %v10387_v50, 4  ;;  %v3273_v56 = vmul.f32 %v10387_v50, %v10387_v50 }
 0x9f5   :  { %v3343_v13 = vsub.f32 %v3327_v40, %v3335_v9  ;;  %v3253_v44 = vrot.slane %v10393_v0, 4  ;;  %v3274_v45 = vmul.f32 %v10393_v0, %v10393_v0  ;;  %v3357_v46 = vsub.f32 %v10301_v54, %v10343_v52 }
 0x9f6   :  { %v3448_v53 = vrot.slane %v10327_v29, %v10288_v22  ;;  %v3328_v23 = vmul.f32 0.125, %v3310_v42  ;;  %v3248_v43 = vadd.f32 %v3247_v21, %v10387_v50  ;;  %v3311_v17 = vrot.slane %v3273_v56, 4 }
 0x9f7   :  { %v3351_v61 = vmax.f32 %v3343_v13, 0.0  ;;  %v3254_v48 = vadd.f32 %v3253_v44, %v10393_v0  ;;  %v3317_v6 = vrot.slane %v3274_v45, 4  ;;  %v3358_v5 = vsub.f32 %v10305_v4, %v10350_v12 }
 0x9f8   :  { %v7714_v10 = vpop.eup %7713  ;;  %v3452_v14 = vrot.slane %v10327_v29, %v10291_v63  ;;  %v3344_v25 = vsub.f32 %v3328_v23, %v3336_v57  ;;  %v3249_v54 = vrot.slane %v3248_v43, 2  ;;  %v3312_v20 = vadd.f32 %v3311_v17, %v3273_v56 }
 0x9f9   :  { %v7716_v52 = vpop.eup %7715  ;;  %v3381_v27 = vmul.f32 %v7714_v10, %v3357_v46  ;;  %v3367_v22 = vadd.f32 1e-05, %v3351_v61  ;;  %v3255_v26 = vrot.slane %v3254_v48, 2  ;;  %v3318_v62 = vadd.f32 %v3317_v6, %v3274_v45 }
 0x9fa   :  { %v3382_v35 = vmul.f32 %v7716_v52, %v3358_v5  ;;  %v3352_v59 = vmax.f32 %v3344_v25, 0.0  ;;  %v3250_v31 = vadd.f32 %v3249_v54, %v3248_v43  ;;  %v3313_v30 = vrot.slane %v3312_v20, 2 }
 0x9fb   :  { %v3430_v38 = vmul.f32 %v3399_v47, %v3381_v27  ;;  %7717 = vrsqrt.f32 %v3367_v22  ;;  %v3256_v39 = vadd.f32 %v3255_v26, %v3254_v48  ;;  %v3319_v15 = vrot.slane %v3318_v62, 2 }
 0x9fc   :  { %v3431_v51 = vmul.f32 %v3403_v41, %v3382_v35  ;;  %v3368_v4 = vadd.f32 1e-05, %v3352_v59  ;;  %v3251_v12 = vrot.slane %v3250_v31, 1  ;;  %v3314_v60 = vadd.f32 %v3313_v30, %v3312_v20 }
 0x9fd   :  { %v10415_v63 = vadd.f32 %v3448_v53, %v3430_v38  ;;  %v3257_v40 = vrot.slane %v3256_v39, 1  ;;  %v3320_v57 = vadd.f32 %v3319_v15, %v3318_v62  ;;  %v3359_v17 = vsub.f32 %v10339_v49, %v10382_v24 }
 0x9fe   :  { %v10417_v9 = vadd.f32 %v3452_v14, %v3431_v51  ;;  %7719 = vrsqrt.f32 %v3368_v4  ;;  %v3252_v42 = vadd.f32 %v3251_v12, %v3250_v31  ;;  %v3315_v13 = vrot.slane %v3314_v60, 1 }
 0x9ff   :  { %v3487_v21 = vmax.f32 %v10415_v63, 0.0  ;;  %v3258_v47 = vadd.f32 %v3257_v40, %v3256_v39  ;;  %v3321_v41 = vrot.slane %v3320_v57, 1  ;;  %v3407_v48 = vrot.slane %v10323_v11, %v10317_v18 }
 0xa00   :  { %v3488_v56 = vmax.f32 %v10417_v9, 0.0  ;;  %v3265_v44 = vmul.f32 0.125, %v3252_v42  ;;  %v3316_v45 = vadd.f32 %v3315_v13, %v3314_v60  ;;  %v3456_v25 = vrot.slane %v10327_v29, %v10317_v18 }
 0xa01   :  { %v3266_v46 = vmul.f32 0.125, %v3258_v47  ;;  %v3322_v53 = vadd.f32 %v3321_v41, %v3320_v57  ;;  %v3360_v52 = vsub.f32 %v10345_v55, %v10385_v2  ;;  %v3411_v27 = vrot.slane %v10323_v11, %v10321_v36 }
 0xa02   :  { %v3337_v23 = vmul.f32 %v3265_v44, %v3265_v44  ;;  %v3329_v43 = vmul.f32 0.125, %v3316_v45  ;;  %v3460_v35 = vrot.slane %v10327_v29, %v10321_v36  ;;  %v3361_v30 = vsub.f32 %v10387_v50, %v3265_v44 }
 0xa03   :  { %v3338_v61 = vmul.f32 %v3266_v46, %v3266_v46  ;;  %v3330_v6 = vmul.f32 0.125, %v3322_v53  ;;  %v3415_v39 = vrot.slane %v10323_v11, %v10348_v8  ;;  %v3362_v36 = vsub.f32 %v10393_v0, %v3266_v46 }
 0xa04   :  { %v3345_v5 = vsub.f32 %v3329_v43, %v3337_v23  ;;  %v3419_v4 = vrot.slane %v10323_v11, %v10359_v33  ;;  %v3464_v60 = vrot.slane %v10327_v29, %v10348_v8  ;;  %v3468_v42 = vrot.slane %v10327_v29, %v10359_v33 }
 0xa05   :  { %v7718_v10 = vpop.eup %7717  ;;  %v3346_v54 = vsub.f32 %v3330_v6, %v3338_v61 }
 0xa06   :  { %v3383_v14 = vmul.f32 %v7718_v10, %v3359_v17  ;;  %v3353_v22 = vmax.f32 %v3345_v5, 0.0 }
 0xa07   :  { %v3354_v24 = vmax.f32 %v3346_v54, 0.0 }
 0xa08   :  { %v7720_v20 = vpop.eup %7719  ;;  %v3432_v49 = vmul.f32 %v3407_v48, %v3383_v14  ;;  %v3369_v59 = vadd.f32 1e-05, %v3353_v22 }
 0xa09   :  { %v3384_v26 = vmul.f32 %v7720_v20, %v3360_v52  ;;  %v3370_v62 = vadd.f32 1e-05, %v3354_v24 }
 0xa0a   :  { %v10433_v31 = vadd.f32 %v3456_v25, %v3432_v49  ;;  %7721 = vrsqrt.f32 %v3369_v59 }
 0xa0b   :  { %v3433_v18 = vmul.f32 %v3411_v27, %v3384_v26  ;;  %7723 = vrsqrt.f32 %v3370_v62 }
 0xa0c   :  { %v3489_v38 = vmax.f32 %v10433_v31, 0.0 }
 0xa0d   :  { %v10436_v55 = vadd.f32 %v3460_v35, %v3433_v18 }
 0xa0f   :  { %v3490_v2 = vmax.f32 %v10436_v55, 0.0 }
 0xa14   :  { %v7722_v51 = vpop.eup %7721 }
 0xa15   :  { %v7724_v12 = vpop.eup %7723  ;;  %v3385_v15 = vmul.f32 %v7722_v51, %v3361_v30 }
 0xa16   :  { %v3386_v40 = vmul.f32 %v7724_v12, %v3362_v36 }
 0xa17   :  { %v3434_v57 = vmul.f32 %v3415_v39, %v3385_v15 }
 0xa18   :  { %v3435_v50 = vmul.f32 %v3419_v4, %v3386_v40 }
 0xa19   :  { %v10449_v13 = vadd.f32 %v3464_v60, %v3434_v57 }
 0xa1a   :  { %v10451_v47 = vadd.f32 %v3468_v42, %v3435_v50 }
 0xa1b   :  { %v3491_v0 = vmax.f32 %v10449_v13, 0.0 }
 0xa1c   :  { %v3492_v44 = vmax.f32 %v10451_v47, 0.0 }
 0xa1d   :  { %8930 = dma.done.wait [#allocation12 + $0x1], 16384 }
 0xa1e   :  { %8931 = vsyncadd [#allocation12 + $0x1], 4294950912  ;;  %3681 = vmatprep.mubr.bf16.mxu0 %v9043_v32  ;;  %v3626_v11 = vpack.c.bf16 %v3486_v28, %v3486_v28  ;;  %v3498_v29 = vld [vmem:[#allocation11 + $0x8] sm:$0xff]  ;;  %v3497_v8 = vld [vmem:[#allocation11] sm:$0xff]  ;;  %v3628_v6 = vpack.c.bf16 %v3488_v56, %v3488_v56  ;;  %s10981_s23 = sld [smem:[#allocation132_spill]]  ;;  %s9046_s28 = smov [#allocation81]  }
 0xa1f   :  { %3690 = vmatprep.subr.bf16.mxu1 %v3498_v29  ;;  %v7725_v33 = vld [vmem:[#allocation43 + $0x4] ss:$8 sps:$4 sm:$0x7f]   ;;  %v3500_v41 = vld [vmem:[#allocation11 + $0x18] sm:$0xff]  ;;  %v3501_v19 = vld [vmem:[#allocation11 + $0x20] sm:$0xff]  ;;  %s6866_s3 = sshll.u32 %s9046_s28, 4  ;;  %s6867_s3 = int_to_ptr.vmem [resolvable:$true] %s6866_s3 }
 0xa20   :  { %3722 = vmatprep.mubr.bf16.mxu1 %v3626_v11  ;;  %3691 = vmatpush1.bf16.msra.mxu1 %v3497_v8  ;;  %v7727_v45 = vld [vmem:[#allocation43] ss:$8 sps:$4 sm:$0x7f]   ;;  %v3647_v46 = vand.u32 %v7725_v33, %v10207_v16  ;;  %v3504_v17 = vld [vmem:[#allocation11 + $0x38] sm:$0xff]  ;;  %s8860_s26 = scalar_lea.vmem %s6867_s3, 2048  ;;  %p8865_p11 = scmp.lt.s32.totalorder %s6867_s3, %s6867_s3 }
 0xa21   :  { %3692 = vmatprep.subr.bf16.mxu1 %v3500_v41  ;;  %v3499_v23 = vld [vmem:[#allocation11 + $0x10] sm:$0xff]  ;;  %v3644_v53 = vand.u32 %v7727_v45, %v10207_v16  ;;  %v3502_v43 = vld [vmem:[#allocation11 + $0x28] sm:$0xff]  ;;  %v3529_v28 = vld [vmem:[#allocation11 + $0x100] sm:$0xff]  ;;  %p8861_p10 = scmp.ne.s32.totalorder %s6867_s3, %s8860_s26  ;;  %p8866_p12 = scmp.lt.s32.totalorder %s8860_s26, %s8860_s26 }
 0xa22   :  { %v3530_v61 = vld [vmem:[#allocation11 + $0x108] sm:$0xff]  ;;  %3649 = vmatprep.subr.bf16.mxu0 %v3647_v46  ;;  %v3532_v48 = vld [vmem:[#allocation11 + $0x118] sm:$0xff]  ;;  %v3503_v10 = vld [vmem:[#allocation11 + $0x30] sm:$0xff] }
 0xa23   :  { %3650 = vmatpush1.bf16.msra.mxu0 %v3644_v53  ;;  %v3531_v5 = vld [vmem:[#allocation11 + $0x110] sm:$0xff]  ;;  %v3506_v14 = vld [vmem:[#allocation11 + $0x48] sm:$0xff]  ;;  %v3505_v54 = vld [vmem:[#allocation11 + $0x40] sm:$0xff]  ;;  %p8867_p13 = por %p8866_p12, %p8865_p11 }
 0xa24   :  { %3693 = vmatpush1.bf16.msra.mxu1 %v3499_v23  ;;  %3731 = vmatprep.subr.bf16.mxu0 %v3530_v61  ;;  %v3534_v25 = vld [vmem:[#allocation11 + $0x128] sm:$0xff]  ;;  %v3533_v9 = vld [vmem:[#allocation11 + $0x120] sm:$0xff]  ;;  %v3508_v52 = vld [vmem:[#allocation11 + $0x58] sm:$0xff] }
 0xa25   :  { %3694 = vmatprep.subr.bf16.mxu1 %v3502_v43  ;;  %v3536_v56 = vld [vmem:[#allocation11 + $0x138] sm:$0xff]  ;;  %v3507_v27 = vld [vmem:[#allocation11 + $0x50] sm:$0xff]  ;;  %v3510_v20 = vld [vmem:[#allocation11 + $0x68] sm:$0xff]  ;;  %p8868_p0 = pnand %p8867_p13, %p8861_p10 }
 0xa26   :  { %7084 = vmatmul.mubr.msk.bf16.vlgmr.msra.gmra.mrb[28].mxu0 %vm2510_vm11, %v10216_v58  ;;  %v3535_v22 = vld [vmem:[#allocation11 + $0x130] sm:$0xff]  ;;  %v3538_v49 = vld [vmem:[#allocation11 + $0x148] sm:$0xff]  ;;  %v3509_v24 = vld [vmem:[#allocation11 + $0x60] sm:$0xff] }
 0xa27   :  { %3732 = vmatpush1.bf16.msra.mxu0 %v3529_v28  ;;  %3763 = vmatprep.mubr.bf16.mxu0 %v3628_v6  ;;  %v3537_v26 = vld [vmem:[#allocation11 + $0x140] sm:$0xff]  ;;  %v3512_v35 = vld [vmem:[#allocation11 + $0x78] sm:$0xff]  ;;  %v3511_v62 = vld [vmem:[#allocation11 + $0x70] sm:$0xff] }
 0xa28   :  { %3695 = vmatpush1.bf16.msra.mxu1 %v3501_v19  ;;  %3733 = vmatprep.subr.bf16.mxu0 %v3532_v48  ;;  %v3540_v59 = vld [vmem:[#allocation11 + $0x158] sm:$0xff]  ;;  %v3539_v18 = vld [vmem:[#allocation11 + $0x150] sm:$0xff]  ;;  %v3514_v30 = vld [vmem:[#allocation11 + $0x88] sm:$0xff] }
 0xa29   :  { %3696 = vmatprep.subr.bf16.mxu1 %v3504_v17  ;;  %v3542_v39 = vld [vmem:[#allocation11 + $0x168] sm:$0xff]  ;;  %v3513_v51 = vld [vmem:[#allocation11 + $0x80] sm:$0xff]  ;;  %v3516_v4 = vld [vmem:[#allocation11 + $0x98] sm:$0xff] }
 0xa2a   :  { %v3541_v36 = vld [vmem:[#allocation11 + $0x160] sm:$0xff]  ;;  %v3544_v12 = vld [vmem:[#allocation11 + $0x178] sm:$0xff]  ;;  %v3515_v15 = vld [vmem:[#allocation11 + $0x90] sm:$0xff] }
 0xa2b   :  { %3734 = vmatpush1.bf16.msra.mxu0 %v3531_v5  ;;  %v3543_v60 = vld [vmem:[#allocation11 + $0x170] sm:$0xff]  ;;  %v3518_v40 = vld [vmem:[#allocation11 + $0xa8] sm:$0xff]  ;;  %v3517_v57 = vld [vmem:[#allocation11 + $0xa0] sm:$0xff] }
 0xa2c   :  { %3697 = vmatpush1.bf16.msra.mxu1 %v3503_v10  ;;  %3735 = vmatprep.subr.bf16.mxu0 %v3534_v25  ;;  %v3546_v42 = vld [vmem:[#allocation11 + $0x188] sm:$0xff]  ;;  %v3545_v50 = vld [vmem:[#allocation11 + $0x180] sm:$0xff]  ;;  %v3520_v11 = vld [vmem:[#allocation11 + $0xb8] sm:$0xff] }
 0xa2d   :  { %3698 = vmatprep.subr.bf16.mxu1 %v3506_v14  ;;  %v3548_v29 = vld [vmem:[#allocation11 + $0x198] sm:$0xff]  ;;  %v3519_v8 = vld [vmem:[#allocation11 + $0xb0] sm:$0xff]  ;;  %v3522_v41 = vld [vmem:[#allocation11 + $0xc8] sm:$0xff] }
 0xa2e   :  { %v3547_v33 = vld [vmem:[#allocation11 + $0x190] sm:$0xff]  ;;  %v3550_v45 = vld [vmem:[#allocation11 + $0x1a8] sm:$0xff]  ;;  %v3521_v46 = vld [vmem:[#allocation11 + $0xc0] sm:$0xff] }
 0xa2f   :  { %3736 = vmatpush1.bf16.msra.mxu0 %v3533_v9  ;;  %v3549_v23 = vld [vmem:[#allocation11 + $0x1a0] sm:$0xff]  ;;  %v3524_v53 = vld [vmem:[#allocation11 + $0xd8] sm:$0xff]  ;;  %v3523_v61 = vld [vmem:[#allocation11 + $0xd0] sm:$0xff] }
 0xa30   :  { %3699 = vmatpush1.bf16.msra.mxu1 %v3505_v54  ;;  %3737 = vmatprep.subr.bf16.mxu0 %v3536_v56  ;;  %v3552_v43 = vld [vmem:[#allocation11 + $0x1b8] sm:$0xff]  ;;  %v3551_v19 = vld [vmem:[#allocation11 + $0x1b0] sm:$0xff]  ;;  %v3526_v28 = vld [vmem:[#allocation11 + $0xe8] sm:$0xff] }
 0xa31   :  { %3700 = vmatprep.subr.bf16.mxu1 %v3508_v52  ;;  %v3554_v17 = vld [vmem:[#allocation11 + $0x1c8] sm:$0xff]  ;;  %v3525_v48 = vld [vmem:[#allocation11 + $0xe0] sm:$0xff]  ;;  %v3528_v10 = vld [vmem:[#allocation11 + $0xf8] sm:$0xff]  ;;  %v3625_v52 = vpack.c.bf16 %v3485_v34, %v3485_v34  ;;  %v3627_v34 = vpack.c.bf16 %v3487_v21, %v3487_v21 }
 0xa32   :  { %v3553_v6 = vld [vmem:[#allocation11 + $0x1c0] sm:$0xff]  ;;  %v3556_v5 = vld [vmem:[#allocation11 + $0x1d8] sm:$0xff]  ;;  %v3527_v14 = vld [vmem:[#allocation11 + $0xf0] sm:$0xff] }
 0xa33   :  { %3738 = vmatpush1.bf16.msra.mxu0 %v3535_v22  ;;  %v3555_v25 = vld [vmem:[#allocation11 + $0x1d0] sm:$0xff]  ;;  %v3558_v54 = vld [vmem:[#allocation11 + $0x1e8] sm:$0xff]  ;;  %v3557_v56 = vld [vmem:[#allocation11 + $0x1e0] sm:$0xff] }
 0xa34   :  { %3701 = vmatpush1.bf16.msra.mxu1 %v3507_v27  ;;  %3739 = vmatprep.subr.bf16.mxu0 %v3538_v49  ;;  %v3562_v9 = vld [vmem:[#allocation11 + $0x208] sm:$0xff]  ;;  %v3561_v27 = vld [vmem:[#allocation11 + $0x200] sm:$0xff]  ;;  %v3560_v22 = vld [vmem:[#allocation11 + $0x1f8] sm:$0xff]  ;;  %v3630_v49 = vpack.c.bf16 %v3490_v2, %v3490_v2 }
 0xa35   :  { %3702 = vmatprep.subr.bf16.mxu1 %v3510_v20  ;;  %v3564_v20 = vld [vmem:[#allocation11 + $0x218] sm:$0xff]  ;;  %v3566_v7 = vld [vmem:[#allocation11 + $0x228] sm:$0xff]  ;;  %v3565_v55 = vld [vmem:[#allocation11 + $0x220] sm:$0xff] }
 0xa36   :  { %v3593_v2 = vld [vmem:[#allocation11 + $0x300] sm:$0xff]  ;;  %v3567_v63 = vld [vmem:[#allocation11 + $0x230] sm:$0xff]  ;;  %v3570_v21 = vld [vmem:[#allocation11 + $0x248] sm:$0xff] }
 0xa37   :  { %3740 = vmatpush1.bf16.msra.mxu0 %v3537_v26  ;;  %v3563_v26 = vld [vmem:[#allocation11 + $0x210] sm:$0xff]  ;;  %v3600_v47 = vld [vmem:[#allocation11 + $0x338] sm:$0xff] }
 0xa38   :  { %3703 = vmatpush1.bf16.msra.mxu1 %v3509_v24  ;;  %3741 = vmatprep.subr.bf16.mxu0 %v3540_v59  ;;  %v3559_v24 = vld [vmem:[#allocation11 + $0x1f0] sm:$0xff]  ;;  %v3568_v59 = vld [vmem:[#allocation11 + $0x238] sm:$0xff] }
 0xa39   :  { %3704 = vmatprep.subr.bf16.mxu1 %v3512_v35  ;;  %v3594_v35 = vld [vmem:[#allocation11 + $0x308] sm:$0xff] }
 0xa3b   :  { %3742 = vmatpush1.bf16.msra.mxu0 %v3539_v18  ;;  %v3632_v18 = vpack.c.bf16 %v3492_v44, %v3492_v44  ;;  %v3571_v44 = vld [vmem:[#allocation11 + $0x250] sm:$0xff] }
 0xa3c   :  { %3705 = vmatpush1.bf16.msra.mxu1 %v3511_v62  ;;  %3743 = vmatprep.subr.bf16.mxu0 %v3542_v39  ;;  %v3596_v62 = vld [vmem:[#allocation11 + $0x318] sm:$0xff]  ;;  %v3598_v39 = vld [vmem:[#allocation11 + $0x328] sm:$0xff] }
 0xa3d   :  { %3706 = vmatprep.subr.bf16.mxu1 %v3514_v30  ;;  %v3595_v30 = vld [vmem:[#allocation11 + $0x310] sm:$0xff] }
 0xa3f   :  { %3744 = vmatpush1.bf16.msra.mxu0 %v3541_v36  ;;  %v3597_v36 = vld [vmem:[#allocation11 + $0x320] sm:$0xff] }
 0xa40   :  { %3707 = vmatpush1.bf16.msra.mxu1 %v3513_v51  ;;  %3745 = vmatprep.subr.bf16.mxu0 %v3544_v12  ;;  %v3569_v51 = vld [vmem:[#allocation11 + $0x240] sm:$0xff]  ;;  %v3599_v12 = vld [vmem:[#allocation11 + $0x330] sm:$0xff] }
 0xa41   :  { %3708 = vmatprep.subr.bf16.mxu1 %v3516_v4  ;;  %v3572_v4 = vld [vmem:[#allocation11 + $0x258] sm:$0xff] }
 0xa43   :  { %3746 = vmatpush1.bf16.msra.mxu0 %v3543_v60  ;;  %v3602_v60 = vld [vmem:[#allocation11 + $0x348] sm:$0xff] }
 0xa44   :  { %3709 = vmatpush1.bf16.msra.mxu1 %v3515_v15  ;;  %3747 = vmatprep.subr.bf16.mxu0 %v3546_v42  ;;  %v3574_v15 = vld [vmem:[#allocation11 + $0x268] sm:$0xff]  ;;  %v3601_v42 = vld [vmem:[#allocation11 + $0x340] sm:$0xff] }
 0xa45   :  { %3710 = vmatprep.subr.bf16.mxu1 %v3518_v40  ;;  %v3573_v40 = vld [vmem:[#allocation11 + $0x260] sm:$0xff] }
 0xa47   :  { %3748 = vmatpush1.bf16.msra.mxu0 %v3545_v50  ;;  %v3604_v50 = vld [vmem:[#allocation11 + $0x358] sm:$0xff] }
 0xa48   :  { %3711 = vmatpush1.bf16.msra.mxu1 %v3517_v57  ;;  %3749 = vmatprep.subr.bf16.mxu0 %v3548_v29  ;;  %v3576_v57 = vld [vmem:[#allocation11 + $0x278] sm:$0xff]  ;;  %v3603_v29 = vld [vmem:[#allocation11 + $0x350] sm:$0xff] }
 0xa49   :  { %3712 = vmatprep.subr.bf16.mxu1 %v3520_v11  ;;  %v3575_v11 = vld [vmem:[#allocation11 + $0x270] sm:$0xff] }
 0xa4b   :  { %3750 = vmatpush1.bf16.msra.mxu0 %v3547_v33  ;;  %v3606_v33 = vld [vmem:[#allocation11 + $0x368] sm:$0xff] }
 0xa4c   :  { %3713 = vmatpush1.bf16.msra.mxu1 %v3519_v8  ;;  %3751 = vmatprep.subr.bf16.mxu0 %v3550_v45  ;;  %v3578_v8 = vld [vmem:[#allocation11 + $0x288] sm:$0xff]  ;;  %v3605_v45 = vld [vmem:[#allocation11 + $0x360] sm:$0xff] }
 0xa4d   :  { %3714 = vmatprep.subr.bf16.mxu1 %v3522_v41  ;;  %v3577_v41 = vld [vmem:[#allocation11 + $0x280] sm:$0xff] }
 0xa4f   :  { %3752 = vmatpush1.bf16.msra.mxu0 %v3549_v23  ;;  %v3608_v23 = vld [vmem:[#allocation11 + $0x378] sm:$0xff] }
 0xa50   :  { %3715 = vmatpush1.bf16.msra.mxu1 %v3521_v46  ;;  %3753 = vmatprep.subr.bf16.mxu0 %v3552_v43  ;;  %v3580_v46 = vld [vmem:[#allocation11 + $0x298] sm:$0xff]  ;;  %v3607_v43 = vld [vmem:[#allocation11 + $0x370] sm:$0xff] }
 0xa51   :  { %3716 = vmatprep.subr.bf16.mxu1 %v3524_v53  ;;  %v3579_v53 = vld [vmem:[#allocation11 + $0x290] sm:$0xff] }
 0xa53   :  { %3754 = vmatpush1.bf16.msra.mxu0 %v3551_v19  ;;  %v3610_v19 = vld [vmem:[#allocation11 + $0x388] sm:$0xff] }
 0xa54   :  { %3717 = vmatpush1.bf16.msra.mxu1 %v3523_v61  ;;  %3755 = vmatprep.subr.bf16.mxu0 %v3554_v17  ;;  %v3582_v61 = vld [vmem:[#allocation11 + $0x2a8] sm:$0xff]  ;;  %v3609_v17 = vld [vmem:[#allocation11 + $0x380] sm:$0xff] }
 0xa55   :  { %3718 = vmatprep.subr.bf16.mxu1 %v3526_v28  ;;  %v3581_v28 = vld [vmem:[#allocation11 + $0x2a0] sm:$0xff] }
 0xa57   :  { %3756 = vmatpush1.bf16.msra.mxu0 %v3553_v6  ;;  %v3612_v6 = vld [vmem:[#allocation11 + $0x398] sm:$0xff] }
 0xa58   :  { %3719 = vmatpush1.bf16.msra.mxu1 %v3525_v48  ;;  %3757 = vmatprep.subr.bf16.mxu0 %v3556_v5  ;;  %v3584_v48 = vld [vmem:[#allocation11 + $0x2b8] sm:$0xff]  ;;  %v3611_v5 = vld [vmem:[#allocation11 + $0x390] sm:$0xff] }
 0xa59   :  { %3720 = vmatprep.subr.bf16.mxu1 %v3528_v10  ;;  %v3583_v10 = vld [vmem:[#allocation11 + $0x2b0] sm:$0xff] }
 0xa5b   :  { %3758 = vmatpush1.bf16.msra.mxu0 %v3555_v25  ;;  %v3614_v25 = vld [vmem:[#allocation11 + $0x3a8] sm:$0xff] }
 0xa5c   :  { %3721 = vmatpush1.bf16.msra.mxu1 %v3527_v14  ;;  %3759 = vmatprep.subr.bf16.mxu0 %v3558_v54  ;;  %v3586_v14 = vld [vmem:[#allocation11 + $0x2c8] sm:$0xff]  ;;  %v3585_v54 = vld [vmem:[#allocation11 + $0x2c0] sm:$0xff] }
 0xa5d   :  { %3772 = vmatprep.subr.bf16.mxu1 %v3562_v9  ;;  %v3613_v9 = vld [vmem:[#allocation11 + $0x3a0] sm:$0xff] }
 0xa5f   :  { %3723 = vmatmul.mubr.bf16.vlgmr.msra.gmra.mrb[40].mxu1 %v3625_v52  ;;  %3760 = vmatpush1.bf16.msra.mxu0 %v3557_v56  ;;  %v3588_v52 = vld [vmem:[#allocation11 + $0x2d8] sm:$0xff] }
 0xa60   :  { %3773 = vmatpush1.bf16.msra.mxu1 %v3561_v27  ;;  %3761 = vmatprep.subr.bf16.mxu0 %v3560_v22  ;;  %v3616_v56 = vld [vmem:[#allocation11 + $0x3b8] sm:$0xff]  ;;  %v3587_v27 = vld [vmem:[#allocation11 + $0x2d0] sm:$0xff] }
 0xa61   :  { %3774 = vmatprep.subr.bf16.mxu1 %v3564_v20  ;;  %3804 = vmatprep.mubr.bf16.mxu1 %v3630_v49  ;;  %v3615_v22 = vld [vmem:[#allocation11 + $0x3b0] sm:$0xff]  ;;  %v3590_v20 = vld [vmem:[#allocation11 + $0x2e8] sm:$0xff] }
 0xa62   :  { %v3618_v49 = vld [vmem:[#allocation11 + $0x3c8] sm:$0xff] }
 0xa63   :  { %3762 = vmatpush1.bf16.msra.mxu0 %v3559_v24  ;;  %v3589_v24 = vld [vmem:[#allocation11 + $0x2e0] sm:$0xff] }
 0xa64   :  { %3775 = vmatpush1.bf16.msra.mxu1 %v3563_v26  ;;  %3813 = vmatprep.subr.bf16.mxu0 %v3594_v35  ;;  %v3617_v26 = vld [vmem:[#allocation11 + $0x3c0] sm:$0xff]  ;;  %v3620_v35 = vld [vmem:[#allocation11 + $0x3d8] sm:$0xff] }
 0xa65   :  { %3776 = vmatprep.subr.bf16.mxu1 %v3566_v7  ;;  %v3592_v7 = vld [vmem:[#allocation11 + $0x2f8] sm:$0xff] }
 0xa66   :  { %3764 = vmatmul.mubr.bf16.vlgmr.msra.gmra.mrb[32].mxu0 %v3627_v34  ;;  %v3591_v34 = vld [vmem:[#allocation11 + $0x2f0] sm:$0xff] }
 0xa67   :  { %3814 = vmatpush1.bf16.msra.mxu0 %v3593_v2  ;;  %3845 = vmatprep.mubr.bf16.mxu0 %v3632_v18  ;;  %v3622_v2 = vld [vmem:[#allocation11 + $0x3e8] sm:$0xff]  ;;  %v3624_v18 = vld [vmem:[#allocation11 + $0x3f8] sm:$0xff] }
 0xa68   :  { %3777 = vmatpush1.bf16.msra.mxu1 %v3565_v55  ;;  %3815 = vmatprep.subr.bf16.mxu0 %v3596_v62  ;;  %v3619_v55 = vld [vmem:[#allocation11 + $0x3d0] sm:$0xff]  ;;  %v3621_v62 = vld [vmem:[#allocation11 + $0x3e0] sm:$0xff] }
 0xa69   :  { %3778 = vmatprep.subr.bf16.mxu1 %v3568_v59  ;;  %v3629_v59 = vpack.c.bf16 %v3489_v38, %v3489_v38 }
 0xa6b   :  { %3816 = vmatpush1.bf16.msra.mxu0 %v3595_v30  ;;  %v3631_v30 = vpack.c.bf16 %v3491_v0, %v3491_v0  ;;  %v7733_v0 = vld [vmem:[%s10981_s23 + $0x4] ss:$8 sps:$4 sm:$0xff]  }
 0xa6c   :  { %3779 = vmatpush1.bf16.msra.mxu1 %v3567_v63  ;;  %3817 = vmatprep.subr.bf16.mxu0 %v3598_v39  ;;  %v3623_v63 = vld [vmem:[#allocation11 + $0x3f0] sm:$0xff] }
 0xa6d   :  { %3780 = vmatprep.subr.bf16.mxu1 %v3570_v21 }
 0xa6f   :  { %3818 = vmatpush1.bf16.msra.mxu0 %v3597_v36  ;;  %v7728_v36 = vld [vmem:[#allocation49] ss:$8 sps:$4 sm:$0x7f]  }
 0xa70   :  { %3781 = vmatpush1.bf16.msra.mxu1 %v3569_v51  ;;  %3819 = vmatprep.subr.bf16.mxu0 %v3600_v47  ;;  %v7730_v51 = vld [vmem:[#allocation49 + $0x4] ss:$8 sps:$4 sm:$0x7f]   ;;  %v3978_v13 = vand.u32 %v7728_v36, %v10207_v16 }
 0xa71   :  { %3782 = vmatprep.subr.bf16.mxu1 %v3572_v4  ;;  %v3981_v4 = vand.u32 %v7730_v51, %v10207_v16  ;;  %v7731_v47 = vld [vmem:[%s10981_s23] ss:$8 sps:$4 sm:$0xff]  }
 0xa73   :  { %3820 = vmatpush1.bf16.msra.mxu0 %v3599_v12  ;;  %v7734_v12 = vld [vmem:[%s10981_s23 + $0x10] ss:$8 sps:$4 sm:$0xff]  }
 0xa74   :  { %3783 = vmatpush1.bf16.msra.mxu1 %v3571_v44  ;;  %3821 = vmatprep.subr.bf16.mxu0 %v3602_v60  ;;  %v7736_v44 = vld [vmem:[%s10981_s23 + $0x14] ss:$8 sps:$4 sm:$0xff]   ;;  %v7737_v60 = vld [vmem:[%s10981_s23 + $0x20] ss:$8 sps:$4 sm:$0xff]  }
 0xa75   :  { %3784 = vmatprep.subr.bf16.mxu1 %v3574_v15  ;;  %v7739_v15 = vld [vmem:[%s10981_s23 + $0x24] ss:$8 sps:$4 sm:$0xff]  }
 0xa77   :  { %3822 = vmatpush1.bf16.msra.mxu0 %v3601_v42  ;;  %v7740_v42 = vld [vmem:[%s10981_s23 + $0x30] ss:$8 sps:$4 sm:$0xff]  }
 0xa78   :  { %3785 = vmatpush1.bf16.msra.mxu1 %v3573_v40  ;;  %3823 = vmatprep.subr.bf16.mxu0 %v3604_v50  ;;  %v7742_v40 = vld [vmem:[%s10981_s23 + $0x34] ss:$8 sps:$4 sm:$0xff]   ;;  %v7743_v50 = vld [vmem:[%s10981_s23 + $0x40] ss:$8 sps:$4 sm:$0xff]  }
 0xa79   :  { %3786 = vmatprep.subr.bf16.mxu1 %v3576_v57  ;;  %v7745_v57 = vld [vmem:[%s10981_s23 + $0x44] ss:$8 sps:$4 sm:$0xff]  }
 0xa7b   :  { %3824 = vmatpush1.bf16.msra.mxu0 %v3603_v29  ;;  %v7746_v29 = vld [vmem:[%s10981_s23 + $0x50] ss:$8 sps:$4 sm:$0xff]  }
 0xa7c   :  { %3787 = vmatpush1.bf16.msra.mxu1 %v3575_v11  ;;  %3825 = vmatprep.subr.bf16.mxu0 %v3606_v33  ;;  %v7748_v11 = vld [vmem:[%s10981_s23 + $0x54] ss:$8 sps:$4 sm:$0xff]   ;;  %v7749_v33 = vld [vmem:[%s10981_s23 + $0x60] ss:$8 sps:$4 sm:$0xff]  }
 0xa7d   :  { %3788 = vmatprep.subr.bf16.mxu1 %v3578_v8  ;;  %v7751_v8 = vld [vmem:[%s10981_s23 + $0x64] ss:$8 sps:$4 sm:$0xff]  }
 0xa7f   :  { %3826 = vmatpush1.bf16.msra.mxu0 %v3605_v45  ;;  %v7752_v45 = vld [vmem:[%s10981_s23 + $0x70] ss:$8 sps:$4 sm:$0xff]  }
 0xa80   :  { %3789 = vmatpush1.bf16.msra.mxu1 %v3577_v41  ;;  %3827 = vmatprep.subr.bf16.mxu0 %v3608_v23  ;;  %v7754_v41 = vld [vmem:[%s10981_s23 + $0x74] ss:$8 sps:$4 sm:$0xff]  }
 0xa81   :  { %3790 = vmatprep.subr.bf16.mxu1 %v3580_v46  ;;  %v7757_v46 = vld [vmem:[#allocation51 + $0x4] ss:$8 sps:$4 sm:$0xff]  }
 0xa83   :  { %3828 = vmatpush1.bf16.msra.mxu0 %v3607_v43 }
 0xa84   :  { %3791 = vmatpush1.bf16.msra.mxu1 %v3579_v53  ;;  %3829 = vmatprep.subr.bf16.mxu0 %v3610_v19 }
 0xa85   :  { %3792 = vmatprep.subr.bf16.mxu1 %v3582_v61 }
 0xa87   :  { %3830 = vmatpush1.bf16.msra.mxu0 %v3609_v17 }
 0xa88   :  { %3793 = vmatpush1.bf16.msra.mxu1 %v3581_v28  ;;  %3831 = vmatprep.subr.bf16.mxu0 %v3612_v6 }
 0xa89   :  { %3794 = vmatprep.subr.bf16.mxu1 %v3584_v48 }
 0xa8b   :  { %3832 = vmatpush1.bf16.msra.mxu0 %v3611_v5 }
 0xa8c   :  { %3795 = vmatpush1.bf16.msra.mxu1 %v3583_v10  ;;  %3833 = vmatprep.subr.bf16.mxu0 %v3614_v25 }
 0xa8d   :  { %3796 = vmatprep.subr.bf16.mxu1 %v3586_v14 }
 0xa8f   :  { %3834 = vmatpush1.bf16.msra.mxu0 %v3613_v9 }
 0xa90   :  { %3797 = vmatpush1.bf16.msra.mxu1 %v3585_v54  ;;  %3835 = vmatprep.subr.bf16.mxu0 %v3616_v56 }
 0xa91   :  { %3798 = vmatprep.subr.bf16.mxu1 %v3588_v52 }
 0xa93   :  { %3836 = vmatpush1.bf16.msra.mxu0 %v3615_v22  ;;  %v3854_v22 = vld [vmem:[#allocation45] sm:$0x3] }
 0xa94   :  { %3799 = vmatpush1.bf16.msra.mxu1 %v3587_v27  ;;  %3837 = vmatprep.subr.bf16.mxu0 %v3618_v49 }
 0xa95   :  { %3800 = vmatprep.subr.bf16.mxu1 %v3590_v20  ;;  %v3859_v20 = vrot.slane %v3854_v22, %v10264_v37 }
 0xa97   :  { %3838 = vmatpush1.bf16.msra.mxu0 %v3617_v26 }
 0xa98   :  { %3801 = vmatpush1.bf16.msra.mxu1 %v3589_v24  ;;  %3839 = vmatprep.subr.bf16.mxu0 %v3620_v35  ;;  %v3863_v24 = vrot.slane %v3854_v22, %v10269_v3 }
 0xa99   :  { %3802 = vmatprep.subr.bf16.mxu1 %v3592_v7 }
 0xa9b   :  { %3840 = vmatpush1.bf16.msra.mxu0 %v3619_v55 }
 0xa9c   :  { %3803 = vmatpush1.bf16.msra.mxu1 %v3591_v34  ;;  %3841 = vmatprep.subr.bf16.mxu0 %v3622_v2 }
 0xa9d   :  { %3983 = vmatprep.subr.bf16.mxu1 %v3981_v4 }
 0xa9f   :  { %3805 = vmatmul.mubr.bf16.vlgmr.msra.gmra.mrb[44].mxu1 %v3629_v59  ;;  %3842 = vmatpush1.bf16.msra.mxu0 %v3621_v62 }
 0xaa0   :  { %4015 = vmatprep.mubr.bf16.mxu1 %v9043_v32  ;;  %3843 = vmatprep.subr.bf16.mxu0 %v3624_v18 }
 0xaa1   :  { %3984 = vmatpush1.bf16.msra.mxu1 %v3978_v13 }
 0xaa2   :  { %4106 = vmatprep.subr.bf16.mxu1 %v7733_v0 }
 0xaa3   :  { %3844 = vmatpush1.bf16.msra.mxu0 %v3623_v63 }
 0xaa6   :  { %3846 = vmatmul.mubr.bf16.vlgmr.msra.gmra.mrb[36].mxu0 %v3631_v30 }
 0xaa7   :  { %4369 = vmatprep.mubr.bf16.mxu0 %v9043_v32  ;;  %7087 = vmatmul.mubr.msk.bf16.vlgmr.msra.gmra.mrb[48].mxu1 %vm2510_vm11, %v10216_v58 }
 0xaa8   :  { %4107 = vmatpush1.bf16.msra.mxu1 %v7731_v47  ;;  %4138 = vmatprep.mubr.bf16.mxu1 %v9043_v32 }
 0xaa9   :  { %4108 = vmatprep.subr.bf16.mxu1 %v7736_v44 }
 0xaac   :  { %4109 = vmatpush1.bf16.msra.mxu1 %v7734_v12 }
 0xaad   :  { %4110 = vmatprep.subr.bf16.mxu1 %v7739_v15 }
 0xab0   :  { %4111 = vmatpush1.bf16.msra.mxu1 %v7737_v60 }
 0xab1   :  { %4112 = vmatprep.subr.bf16.mxu1 %v7742_v40 }
 0xab4   :  { %4113 = vmatpush1.bf16.msra.mxu1 %v7740_v42 }
 0xab5   :  { %4114 = vmatprep.subr.bf16.mxu1 %v7745_v57 }
 0xab8   :  { %4115 = vmatpush1.bf16.msra.mxu1 %v7743_v50 }
 0xab9   :  { %4116 = vmatprep.subr.bf16.mxu1 %v7748_v11 }
 0xabc   :  { %4117 = vmatpush1.bf16.msra.mxu1 %v7746_v29 }
 0xabd   :  { %4118 = vmatprep.subr.bf16.mxu1 %v7751_v8 }
 0xac0   :  { %4119 = vmatpush1.bf16.msra.mxu1 %v7749_v33 }
 0xac1   :  { %4120 = vmatprep.subr.bf16.mxu1 %v7754_v41 }
 0xac4   :  { %4121 = vmatpush1.bf16.msra.mxu1 %v7752_v45 }
 0xac5   :  { %4164 = vmatprep.subr.bf16.mxu1 %v7757_v46 }
 0xaf9   :  { %v3683_v31 = vpop.f32.mrb[28].mxu0 }
 0xafa   :  { %v3685_v38 = vpop.f32.mrb[29].mxu0 }
 0xafb   :  { %v3687_v21 = vpop.f32.mrb[30].mxu0 }
 0xafc   :  { %v3688_v39 = vpop.f32.mrb[31].mxu0 }
 0xb32   :  { %v3724_v23 = vpop.f32.mrb[40].mxu1 }
 0xb33   :  { %v3725_v53 = vadd.f32 %v3724_v23, %v3683_v31  ;;  %v3726_v43 = vpop.f32.mrb[41].mxu1 }
 0xb34   :  { %v3727_v61 = vadd.f32 %v3726_v43, %v3685_v38  ;;  %v3728_v19 = vpop.f32.mrb[42].mxu1 }
 0xb35   :  { %v3729_v28 = vpop.f32.mrb[43].mxu1 }
 0xb39   :  { %v3765_v17 = vpop.f32.mrb[32].mxu0 }
 0xb3a   :  { %v3766_v48 = vadd.f32 %v3765_v17, %v3725_v53  ;;  %v3767_v6 = vpop.f32.mrb[33].mxu0 }
 0xb3b   :  { %v3768_v10 = vadd.f32 %v3767_v6, %v3727_v61  ;;  %v3769_v5 = vpop.f32.mrb[34].mxu0 }
 0xb3c   :  { %v3770_v14 = vpop.f32.mrb[35].mxu0  ;;  %v3869_v5 = vld [vmem:[#allocation48] sm:$0x3] }
 0xb3d   :  { %v3931_v22 = vrot.slane %v3869_v5, %v10264_v37 }
 0xb72   :  { %v3806_v25 = vpop.f32.mrb[44].mxu1 }
 0xb73   :  { %v3807_v54 = vadd.f32 %v3806_v25, %v3766_v48  ;;  %v3808_v9 = vpop.f32.mrb[45].mxu1 }
 0xb74   :  { %v3809_v52 = vadd.f32 %v3808_v9, %v3768_v10  ;;  %v3810_v56 = vpop.f32.mrb[46].mxu1  ;;  %v3868_v10 = vld [vmem:[#allocation46] sm:$0x3] }
 0xb75   :  { %v3811_v27 = vpop.f32.mrb[47].mxu1  ;;  %v3918_v25 = vrot.slane %v3868_v10, %v10264_v37 }
 0xb79   :  { %v3847_v49 = vpop.f32.mrb[36].mxu0 }
 0xb7a   :  { %v3848_v26 = vadd.f32 %v3847_v49, %v3807_v54  ;;  %v3849_v7 = vpop.f32.mrb[37].mxu0  ;;  %v3935_v49 = vrot.slane %v3869_v5, %v10269_v3 }
 0xb7b   :  { %v3850_v35 = vadd.f32 %v3849_v7, %v3809_v52  ;;  %v3851_v34 = vpop.f32.mrb[38].mxu0  ;;  %v3922_v52 = vrot.slane %v3868_v10, %v10269_v3 }
 0xb7c   :  { %v3866_v55 = vadd.f32 %v3859_v20, %v3848_v26  ;;  %v3852_v2 = vpop.f32.mrb[39].mxu0 }
 0xb7d   :  { %v3867_v59 = vadd.f32 %v3863_v24, %v3850_v35 }
 0xb7e   :  { %v3870_v62 = vrot.slane %v3866_v55, 4  ;;  %v3884_v18 = vmul.f32 %v3866_v55, %v3866_v55 }
 0xb7f   :  { %v3876_v63 = vrot.slane %v3867_v59, 4  ;;  %v3885_v30 = vmul.f32 %v3867_v59, %v3867_v59 }
 0xb80   :  { %v3871_v31 = vadd.f32 %v3870_v62, %v3866_v55  ;;  %v3886_v38 = vrot.slane %v3884_v18, 4 }
 0xb81   :  { %v3877_v21 = vadd.f32 %v3876_v63, %v3867_v59  ;;  %v3892_v39 = vrot.slane %v3885_v30, 4 }
 0xb82   :  { %v3872_v51 = vrot.slane %v3871_v31, 2  ;;  %v3887_v36 = vadd.f32 %v3886_v38, %v3884_v18  ;;  %v7758_v38 = vld [vmem:[#allocation58] ss:$8 sps:$4 sm:$0x7f]  }
 0xb83   :  { %v3878_v4 = vrot.slane %v3877_v21, 2  ;;  %v3893_v13 = vadd.f32 %v3892_v39, %v3885_v30  ;;  %v3950_v30 = vld [vmem:[#allocation5] sm:$0xff]  ;;  %v4332_v39 = vand.u32 %v7758_v38, %v10207_v16 }
 0xb84   :  { %v3873_v0 = vadd.f32 %v3872_v51, %v3871_v31  ;;  %v3888_v47 = vrot.slane %v3887_v36, 2  ;;  %v7760_v31 = vld [vmem:[#allocation58 + $0x4] ss:$8 sps:$4 sm:$0x7f]  }
 0xb85   :  { %v3879_v44 = vadd.f32 %v3878_v4, %v3877_v21  ;;  %v3894_v12 = vrot.slane %v3893_v13, 2  ;;  %v4335_v21 = vand.u32 %v7760_v31, %v10207_v16  ;;  %v7763_v51 = vld [vmem:[#allocation57 + $0x4] ss:$8 sps:$4 sm:$0xff]   ;;  %v7766_v4 = vld [vmem:[#allocation57 + $0x14] ss:$8 sps:$4 sm:$0xff]  }
 0xb86   :  { %v3874_v15 = vrot.slane %v3873_v0, 1  ;;  %v3889_v60 = vadd.f32 %v3888_v47, %v3887_v36  ;;  %v7761_v36 = vld [vmem:[#allocation57] ss:$8 sps:$4 sm:$0xff]  }
 0xb87   :  { %v3880_v40 = vrot.slane %v3879_v44, 1  ;;  %v3895_v42 = vadd.f32 %v3894_v12, %v3893_v13  ;;  %4337 = vmatprep.subr.bf16.mxu0 %v4335_v21  ;;  %v7764_v13 = vld [vmem:[#allocation57 + $0x10] ss:$8 sps:$4 sm:$0xff]   ;;  %v7767_v47 = vld [vmem:[#allocation57 + $0x20] ss:$8 sps:$4 sm:$0xff]  }
 0xb88   :  { %v3875_v57 = vadd.f32 %v3874_v15, %v3873_v0  ;;  %v3890_v50 = vrot.slane %v3889_v60, 1  ;;  %4338 = vmatpush1.bf16.msra.mxu0 %v4332_v39  ;;  %v7769_v0 = vld [vmem:[#allocation57 + $0x24] ss:$8 sps:$4 sm:$0xff]   ;;  %v7770_v12 = vld [vmem:[#allocation57 + $0x30] ss:$8 sps:$4 sm:$0xff]  }
 0xb89   :  { %v3881_v11 = vadd.f32 %v3880_v40, %v3879_v44  ;;  %v3896_v29 = vrot.slane %v3895_v42, 1  ;;  %4470 = vmatprep.subr.bf16.mxu0 %v7763_v51  ;;  %v7772_v44 = vld [vmem:[#allocation57 + $0x34] ss:$8 sps:$4 sm:$0xff]   ;;  %v7775_v15 = vld [vmem:[#allocation57 + $0x44] ss:$8 sps:$4 sm:$0xff]  }
 0xb8a   :  { %v3882_v8 = vmul.f32 0.125, %v3875_v57  ;;  %v3891_v33 = vadd.f32 %v3890_v50, %v3889_v60  ;;  %v7773_v60 = vld [vmem:[#allocation57 + $0x40] ss:$8 sps:$4 sm:$0xff]   ;;  %v7778_v40 = vld [vmem:[#allocation57 + $0x54] ss:$8 sps:$4 sm:$0xff]  }
 0xb8b   :  { %v3883_v41 = vmul.f32 0.125, %v3881_v11  ;;  %v3897_v45 = vadd.f32 %v3896_v29, %v3895_v42  ;;  %7109 = vmatmul.mubr.msk.bf16.vlgmr.msra.gmra.mrb[40].mxu0 %vm2510_vm11, %v10216_v58  ;;  %v7776_v42 = vld [vmem:[#allocation57 + $0x50] ss:$8 sps:$4 sm:$0xff]   ;;  %v7781_v57 = vld [vmem:[#allocation57 + $0x64] ss:$8 sps:$4 sm:$0xff]  }
 0xb8c   :  { %v3898_v46 = vmul.f32 0.125, %v3891_v33  ;;  %v3900_v23 = vmul.f32 %v3882_v8, %v3882_v8  ;;  %v3906_v14 = vsub.f32 %v3866_v55, %v3882_v8  ;;  %4471 = vmatpush1.bf16.msra.mxu0 %v7761_v36  ;;  %4379 = vmatprep.mubr.bf16.mxu0 %v9043_v32  ;;  %v7779_v50 = vld [vmem:[#allocation57 + $0x60] ss:$8 sps:$4 sm:$0xff]   ;;  %v7784_v11 = vld [vmem:[#allocation57 + $0x74] ss:$8 sps:$4 sm:$0xff]  }
 0xb8d   :  { %v3899_v53 = vmul.f32 0.125, %v3897_v45  ;;  %v3901_v43 = vmul.f32 %v3883_v41, %v3883_v41  ;;  %v3907_v9 = vsub.f32 %v3867_v59, %v3883_v41  ;;  %v7755_v59 = vld [vmem:[#allocation51] ss:$8 sps:$4 sm:$0xff]   ;;  %4472 = vmatprep.subr.bf16.mxu0 %v7766_v4  ;;  %v4211_v33 = vld [vmem:[#allocation52] sm:$0x3] }
 0xb8e   :  { %v3902_v61 = vsub.f32 %v3898_v46, %v3900_v23  ;;  %v7782_v29 = vld [vmem:[#allocation57 + $0x70] ss:$8 sps:$4 sm:$0xff]   ;;  %v7787_v8 = vld [vmem:[#allocation60 + $0x4] ss:$8 sps:$4 sm:$0xff]   ;;  %v4216_v41 = vrot.slane %v4211_v33, %v10264_v37  ;;  %v4220_v45 = vrot.slane %v4211_v33, %v10269_v3 }
 0xb8f   :  { %v3903_v19 = vsub.f32 %v3899_v53, %v3901_v43 }
 0xb90   :  { %v3904_v28 = vmax.f32 %v3902_v61, 0.0  ;;  %4473 = vmatpush1.bf16.msra.mxu0 %v7764_v13 }
 0xb91   :  { %v3905_v17 = vmax.f32 %v3903_v19, 0.0  ;;  %4474 = vmatprep.subr.bf16.mxu0 %v7769_v0 }
 0xb92   :  { %v3908_v48 = vadd.f32 1e-05, %v3904_v28 }
 0xb93   :  { %v3909_v6 = vadd.f32 1e-05, %v3905_v17  ;;  %7110 = vmatmul.mubr.msk.bf16.gmra.mrb[44].mxu0 %vm2510_vm11, %v10216_v58 }
 0xb94   :  { %7828 = vrsqrt.f32 %v3908_v48  ;;  %4475 = vmatpush1.bf16.msra.mxu0 %v7767_v47  ;;  %4502 = vmatprep.mubr.bf16.mxu0 %v9043_v32 }
 0xb95   :  { %7830 = vrsqrt.f32 %v3909_v6  ;;  %4476 = vmatprep.subr.bf16.mxu0 %v7772_v44 }
 0xb98   :  { %4477 = vmatpush1.bf16.msra.mxu0 %v7770_v12 }
 0xb99   :  { %4478 = vmatprep.subr.bf16.mxu0 %v7775_v15 }
 0xb9c   :  { %4479 = vmatpush1.bf16.msra.mxu0 %v7773_v60 }
 0xb9d   :  { %4480 = vmatprep.subr.bf16.mxu0 %v7778_v40  ;;  %v4266_v40 = vld [vmem:[#allocation54] sm:$0x1] }
 0xb9e   :  { %v7829_v54 = vpop.eup %7828 }
 0xb9f   :  { %v7831_v56 = vpop.eup %7830  ;;  %v3912_v27 = vmul.f32 %v7829_v54, %v3906_v14 }
 0xba0   :  { %v3913_v20 = vmul.f32 %v7831_v56, %v3907_v9  ;;  %4481 = vmatpush1.bf16.msra.mxu0 %v7776_v42 }
 0xba1   :  { %v3925_v24 = vmul.f32 %v3918_v25, %v3912_v27  ;;  %4482 = vmatprep.subr.bf16.mxu0 %v7781_v57 }
 0xba2   :  { %v3926_v26 = vmul.f32 %v3922_v52, %v3913_v20 }
 0xba3   :  { %v3938_v7 = vadd.f32 %v3931_v22, %v3925_v24 }
 0xba4   :  { %v3939_v35 = vadd.f32 %v3935_v49, %v3926_v26  ;;  %4483 = vmatpush1.bf16.msra.mxu0 %v7779_v50  ;;  %v4270_v50 = vld [vmem:[#allocation55] sm:$0x1] }
 0xba5   :  { %v3940_v34 = vmax.f32 %v3938_v7, 0.0  ;;  %4484 = vmatprep.subr.bf16.mxu0 %v7784_v11 }
 0xba6   :  { %v3941_v2 = vmax.f32 %v3939_v35, 0.0 }
 0xba7   :  { %v3942_v55 = vpack.c.bf16 %v3940_v34, %v3940_v34 }
 0xba8   :  { %v3944_v62 = vpack.c.bf16 %v3941_v2, %v3941_v2  ;;  %4485 = vmatpush1.bf16.msra.mxu0 %v7782_v29 }
 0xba9   :  { %3943 = vst [vmem:[#allocation6] sm:$0xf] %v3942_v55  ;;  %4541 = vmatprep.subr.bf16.mxu0 %v7787_v8 }
 0xbaa   :  { %v3946_v18 = vrot.slane %v3944_v62, 4 }
 0xbac   :  { %3948 = vst [vmem:[#allocation6] sm:$0xf0] %v3946_v18 }
 0xbb3   :  { %v3949_v63 = vld [vmem:[#allocation6] sm:$0xff] }
 0xbb4   :  { %4139 = vmatmul.mubr.bf16.vlgmr.msra.gmra.mrb[48].mxu1 %v3949_v63 }
 0xbb5   :  { %4165 = vmatpush1.bf16.msra.mxu1 %v7755_v59  ;;  %4196 = vmatprep.mubr.bf16.mxu1 %v9043_v32 }
 0xbc0   :  { %7106 = vmatmul.mubr.msk.bf16.vlgmr.msra.gmra.mrb[48].mxu1 %vm1475_vm7, %v3950_v30 }
 0xbc1   :  { %4796 = vmatprep.mubr.bf16.mxu1 %v9043_v32 }
 0xc93   :  { %v4198_v46 = vpop.f32.mrb[48].mxu1 }
 0xc94   :  { %v4223_v23 = vadd.f32 %v4216_v41, %v4198_v46  ;;  %v4200_v53 = vpop.f32.mrb[49].mxu1 }
 0xc95   :  { %v4224_v43 = vadd.f32 %v4220_v45, %v4200_v53  ;;  %v4202_v61 = vpop.f32.mrb[50].mxu1 }
 0xc96   :  { %v4225_v19 = vadd.f32 %v4216_v41, %v4202_v61  ;;  %v4204_v28 = vpop.f32.mrb[51].mxu1  ;;  %v4243_v48 = vmul.f32 %v4223_v23, %v4223_v23 }
 0xc97   :  { %v4226_v17 = vadd.f32 %v4220_v45, %v4204_v28  ;;  %v4252_v5 = vmul.f32 %v4224_v43, %v4224_v43 }
 0xc98   :  { %v4227_v6 = vadd.f32 %v4225_v19, %v4223_v23  ;;  %v4244_v10 = vmul.f32 %v4225_v19, %v4225_v19 }
 0xc99   :  { %v4234_v14 = vadd.f32 %v4226_v17, %v4224_v43  ;;  %v4253_v25 = vmul.f32 %v4226_v17, %v4226_v17 }
 0xc9a   :  { %v4228_v54 = vrot.slane %v4227_v6, 4  ;;  %v4245_v9 = vadd.f32 %v4244_v10, %v4243_v48 }
 0xc9b   :  { %v4235_v52 = vrot.slane %v4234_v14, 4  ;;  %v4254_v56 = vadd.f32 %v4253_v25, %v4252_v5 }
 0xc9c   :  { %v4229_v27 = vadd.f32 %v4228_v54, %v4227_v6  ;;  %v4246_v22 = vrot.slane %v4245_v9, 4  ;;  %v7785_v54 = vld [vmem:[#allocation60] ss:$8 sps:$4 sm:$0xff]  }
 0xc9d   :  { %v4236_v20 = vadd.f32 %v4235_v52, %v4234_v14  ;;  %v4255_v49 = vrot.slane %v4254_v56, 4 }
 0xc9e   :  { %v4230_v24 = vrot.slane %v4229_v27, 2  ;;  %v4247_v26 = vadd.f32 %v4246_v22, %v4245_v9  ;;  %v7793_v22 = vld [vmem:[#allocation66 + $0x4] ss:$8 sps:$4 sm:$0xff]  }
 0xc9f   :  { %v4237_v7 = vrot.slane %v4236_v20, 2  ;;  %v4256_v35 = vadd.f32 %v4255_v49, %v4254_v56  ;;  %v7796_v49 = vld [vmem:[#allocation66 + $0x14] ss:$8 sps:$4 sm:$0xff]  }
 0xca0   :  { %v4231_v34 = vadd.f32 %v4230_v24, %v4229_v27  ;;  %v4248_v2 = vrot.slane %v4247_v26, 2  ;;  %v7794_v24 = vld [vmem:[#allocation66 + $0x10] ss:$8 sps:$4 sm:$0xff]  }
 0xca1   :  { %v4238_v55 = vadd.f32 %v4237_v7, %v4236_v20  ;;  %v4257_v62 = vrot.slane %v4256_v35, 2  ;;  %v7791_v20 = vld [vmem:[#allocation66] ss:$8 sps:$4 sm:$0xff]  }
 0xca2   :  { %v4232_v18 = vrot.slane %v4231_v34, 1  ;;  %v4249_v59 = vadd.f32 %v4248_v2, %v4247_v26  ;;  %v7799_v26 = vld [vmem:[#allocation66 + $0x24] ss:$8 sps:$4 sm:$0xff]   ;;  %v7797_v7 = vld [vmem:[#allocation66 + $0x20] ss:$8 sps:$4 sm:$0xff]  }
 0xca3   :  { %v4239_v63 = vrot.slane %v4238_v55, 1  ;;  %v4258_v30 = vadd.f32 %v4257_v62, %v4256_v35  ;;  %v7802_v35 = vld [vmem:[#allocation66 + $0x34] ss:$8 sps:$4 sm:$0xff]   ;;  %v7805_v2 = vld [vmem:[#allocation66 + $0x44] ss:$8 sps:$4 sm:$0xff]  }
 0xca4   :  { %v4233_v31 = vadd.f32 %v4232_v18, %v4231_v34  ;;  %v4250_v38 = vrot.slane %v4249_v59, 1  ;;  %v7800_v34 = vld [vmem:[#allocation66 + $0x30] ss:$8 sps:$4 sm:$0xff]   ;;  %v7808_v62 = vld [vmem:[#allocation66 + $0x54] ss:$8 sps:$4 sm:$0xff]  }
 0xca5   :  { %v4240_v21 = vadd.f32 %v4239_v63, %v4238_v55  ;;  %v4259_v39 = vrot.slane %v4258_v30, 1  ;;  %v7803_v55 = vld [vmem:[#allocation66 + $0x40] ss:$8 sps:$4 sm:$0xff]   ;;  %v7806_v18 = vld [vmem:[#allocation66 + $0x50] ss:$8 sps:$4 sm:$0xff]  }
 0xca6   :  { %v4251_v51 = vadd.f32 %v4250_v38, %v4249_v59  ;;  %v7811_v59 = vld [vmem:[#allocation66 + $0x64] ss:$8 sps:$4 sm:$0xff]   ;;  %v7809_v63 = vld [vmem:[#allocation66 + $0x60] ss:$8 sps:$4 sm:$0xff]   ;;  %v7817_v38 = vld [vmem:[#allocation69 + $0x4] ss:$8 sps:$4 sm:$0xff]  }
 0xca7   :  { %v4241_v36 = vadd.f32 %v4240_v21, %v4233_v31  ;;  %v4260_v4 = vadd.f32 %v4259_v39, %v4258_v30  ;;  %v7814_v30 = vld [vmem:[#allocation66 + $0x74] ss:$8 sps:$4 sm:$0xff]   ;;  %v7812_v31 = vld [vmem:[#allocation66 + $0x70] ss:$8 sps:$4 sm:$0xff]  }
 0xca8   :  { %v4602_v21 = vld [vmem:[#allocation61] sm:$0x3] }
 0xca9   :  { %v4242_v13 = vmul.f32 0.03125, %v4241_v36  ;;  %v4261_v0 = vadd.f32 %v4260_v4, %v4251_v51  ;;  %v4607_v39 = vrot.slane %v4602_v21, %v10264_v37  ;;  %v4611_v51 = vrot.slane %v4602_v21, %v10269_v3 }
 0xcab   :  { %v4262_v47 = vmul.f32 0.03125, %v4261_v0  ;;  %v4263_v44 = vmul.f32 %v4242_v13, %v4242_v13 }
 0xcad   :  { %v4264_v12 = vsub.f32 %v4262_v47, %v4263_v44 }
 0xcaf   :  { %v4265_v15 = vmax.f32 %v4264_v12, 0.0 }
 0xcb1   :  { %v4267_v60 = vadd.f32 1e-05, %v4265_v15 }
 0xcb3   :  { %7832 = vrsqrt.f32 %v4267_v60 }
 0xcbd   :  { %v7833_v42 = vpop.eup %7832 }
 0xcbe   :  { %v4269_v57 = vmul.f32 %v7833_v42, %v4266_v40 }
 0xcc0   :  { %v4271_v11 = vmul.f32 %v4269_v57, %v4242_v13  ;;  %v4277_v29 = vrot.slane %v4269_v57, %v10264_v37 }
 0xcc2   :  { %v4272_v8 = vsub.f32 %v4270_v50, %v4271_v11  ;;  %v4294_v33 = vmul.f32 %v4277_v29, %v4226_v17  ;;  %v4279_v41 = vmul.f32 %v4277_v29, %v4223_v23  ;;  %v4280_v45 = vmul.f32 %v4277_v29, %v4225_v19  ;;  %v4303_v23 = vld [vmem:[#allocation4] sm:$0xff]  ;;  %v7790_v19 = vld [vmem:[#allocation67 + $0x4] ss:$8 sps:$4 sm:$0x7f]  }
 0xcc3   :  { %v4293_v46 = vmul.f32 %v4277_v29, %v4224_v43  ;;  %v4304_v43 = vld [vmem:[#allocation4 + $0x8] sm:$0xff]  ;;  %v4762_v56 = vand.u32 %v7790_v19, %v10207_v16 }
 0xcc4   :  { %v4285_v53 = vrot.slane %v4272_v8, %v10264_v37  ;;  %v7788_v17 = vld [vmem:[#allocation67] ss:$8 sps:$4 sm:$0x7f]  }
 0xcc5   :  { %v4759_v27 = vand.u32 %v7788_v17, %v10207_v16  ;;  %4764 = vmatprep.subr.bf16.mxu1 %v4762_v56 }
 0xcc6   :  { %v4287_v61 = vadd.f32 %v4285_v53, %v4279_v41  ;;  %v4288_v28 = vadd.f32 %v4285_v53, %v4280_v45  ;;  %v4295_v48 = vadd.f32 %v4293_v46, %v4285_v53  ;;  %v4296_v6 = vadd.f32 %v4294_v33, %v4285_v53 }
 0xcc7   :  { %4765 = vmatpush1.bf16.msra.mxu1 %v4759_v27 }
 0xcc8   :  { %v4289_v10 = vmax.f32 %v4287_v61, 0.0  ;;  %v4290_v5 = vmax.f32 %v4288_v28, 0.0  ;;  %v4297_v14 = vmax.f32 %v4295_v48, 0.0  ;;  %v4298_v25 = vmax.f32 %v4296_v6, 0.0  ;;  %4917 = vmatprep.subr.bf16.mxu1 %v7793_v22 }
 0xcca   :  { %v4291_v9 = vpack.c.bf16 %v4290_v5, %v4289_v10  ;;  %v4299_v52 = vpack.c.bf16 %v4298_v25, %v4297_v14  ;;  %7133 = vmatmul.mubr.msk.bf16.vlgmr.msra.gmra.mrb[52].mxu1 %vm2510_vm11, %v10216_v58 }
 0xccb   :  { %4918 = vmatpush1.bf16.msra.mxu1 %v7791_v20  ;;  %4806 = vmatprep.mubr.bf16.mxu1 %v9043_v32 }
 0xccc   :  { %4503 = vmatmul.mubr.bf16.vlgmr.msra.gmra.mrb[40].mxu0 %v4291_v9  ;;  %4919 = vmatprep.subr.bf16.mxu1 %v7796_v49 }
 0xccd   :  { %4542 = vmatpush1.bf16.msra.mxu0 %v7785_v54  ;;  %4512 = vmatprep.mubr.bf16.mxu0 %v9043_v32 }
 0xccf   :  { %4920 = vmatpush1.bf16.msra.mxu1 %v7794_v24 }
 0xcd0   :  { %4921 = vmatprep.subr.bf16.mxu1 %v7799_v26 }
 0xcd2   :  { %7134 = vmatmul.mubr.msk.bf16.gmra.mrb[56].mxu1 %vm2510_vm11, %v10216_v58 }
 0xcd3   :  { %4922 = vmatpush1.bf16.msra.mxu1 %v7797_v7  ;;  %4816 = vmatprep.mubr.bf16.mxu1 %v9043_v32 }
 0xcd4   :  { %4513 = vmatmul.mubr.bf16.gmra.mrb[44].mxu0 %v4299_v52  ;;  %4923 = vmatprep.subr.bf16.mxu1 %v7802_v35 }
 0xcd5   :  { %4573 = vmatprep.mubr.bf16.mxu0 %v9043_v32 }
 0xcd7   :  { %4924 = vmatpush1.bf16.msra.mxu1 %v7800_v34 }
 0xcd8   :  { %4925 = vmatprep.subr.bf16.mxu1 %v7805_v2 }
 0xcda   :  { %7135 = vmatmul.mubr.msk.bf16.gmra.mrb[60].mxu1 %vm2510_vm11, %v10216_v58 }
 0xcdb   :  { %4926 = vmatpush1.bf16.msra.mxu1 %v7803_v55  ;;  %4826 = vmatprep.mubr.bf16.mxu1 %v9043_v32 }
 0xcdc   :  { %7129 = vmatmul.mubr.msk.bf16.vlgmr.msra.gmra.mrb[40].mxu0 %vm1475_vm7, %v4303_v23  ;;  %4927 = vmatprep.subr.bf16.mxu1 %v7808_v62 }
 0xcdd   :  { %4583 = vmatprep.mubr.bf16.mxu0 %v9043_v32 }
 0xcdf   :  { %4928 = vmatpush1.bf16.msra.mxu1 %v7806_v18 }
 0xce0   :  { %4929 = vmatprep.subr.bf16.mxu1 %v7811_v59 }
 0xce2   :  { %7136 = vmatmul.mubr.msk.bf16.gmra.mrb[64].mxu1 %vm2510_vm11, %v10216_v58 }
 0xce3   :  { %4930 = vmatpush1.bf16.msra.mxu1 %v7809_v63  ;;  %4949 = vmatprep.mubr.bf16.mxu1 %v9043_v32 }
 0xce4   :  { %7130 = vmatmul.mubr.msk.bf16.gmra.mrb[44].mxu0 %vm1475_vm7, %v4304_v43  ;;  %4931 = vmatprep.subr.bf16.mxu1 %v7814_v30 }
 0xce5   :  { %7400 = vmatprep.mubr.msk.bf16.mxu0 %vm2510_vm11, %v10216_v58 }
 0xce7   :  { %4932 = vmatpush1.bf16.msra.mxu1 %v7812_v31 }
 0xce8   :  { %5014 = vmatprep.subr.bf16.mxu1 %v7817_v38 }
 0xdaf   :  { %v4575_v36 = vpop.f32.mrb[40].mxu0 }
 0xdb0   :  { %v10551_v4 = vadd.f32 %v4607_v39, %v4575_v36  ;;  %v4577_v13 = vpop.f32.mrb[41].mxu0 }
 0xdb1   :  { %v10553_v0 = vadd.f32 %v4611_v51, %v4577_v13  ;;  %v4579_v47 = vpop.f32.mrb[42].mxu0 }
 0xdb2   :  { %v10555_v44 = vadd.f32 %v4607_v39, %v4579_v47  ;;  %v4581_v12 = vpop.f32.mrb[43].mxu0  ;;  %v4642_v60 = vmul.f32 %v10551_v4, %v10551_v4 }
 0xdb3   :  { %v10557_v15 = vadd.f32 %v4611_v51, %v4581_v12  ;;  %v4655_v57 = vmul.f32 %v10553_v0, %v10553_v0 }
 0xdb4   :  { %v4622_v40 = vadd.f32 %v10555_v44, %v10551_v4  ;;  %v4643_v42 = vmul.f32 %v10555_v44, %v10555_v44 }
 0xdb5   :  { %v4631_v50 = vadd.f32 %v10557_v15, %v10553_v0  ;;  %v4656_v11 = vmul.f32 %v10557_v15, %v10557_v15 }
 0xdb6   :  { %v4646_v29 = vadd.f32 %v4643_v42, %v4642_v60 }
 0xdb7   :  { %v4659_v8 = vadd.f32 %v4656_v11, %v4655_v57  ;;  %v4585_v33 = vpop.f32.mrb[44].mxu0 }
 0xdb8   :  { %v4618_v41 = vadd.f32 %v4607_v39, %v4585_v33  ;;  %v4587_v45 = vpop.f32.mrb[45].mxu0 }
 0xdb9   :  { %v10571_v46 = vadd.f32 %v4611_v51, %v4587_v45  ;;  %v4589_v53 = vpop.f32.mrb[46].mxu0  ;;  %v4677_v45 = vld [vmem:[#allocation64] sm:$0x1] }
 0xdba   :  { %v4623_v61 = vadd.f32 %v4622_v40, %v4618_v41  ;;  %v4644_v28 = vmul.f32 %v4618_v41, %v4618_v41  ;;  %v4620_v48 = vadd.f32 %v4607_v39, %v4589_v53  ;;  %v4591_v6 = vpop.f32.mrb[47].mxu0 }
 0xdbb   :  { %v4632_v10 = vadd.f32 %v4631_v50, %v10571_v46  ;;  %v4657_v5 = vmul.f32 %v10571_v46, %v10571_v46  ;;  %v4621_v14 = vadd.f32 %v4611_v51, %v4591_v6 }
 0xdbc   :  { %v4647_v25 = vadd.f32 %v4646_v29, %v4644_v28  ;;  %v4624_v54 = vadd.f32 %v4623_v61, %v4620_v48  ;;  %v4645_v9 = vmul.f32 %v4620_v48, %v4620_v48  ;;  %v4673_v29 = vld [vmem:[#allocation63] sm:$0x1] }
 0xdbd   :  { %v4660_v52 = vadd.f32 %v4659_v8, %v4657_v5  ;;  %v4633_v23 = vadd.f32 %v4632_v10, %v4621_v14  ;;  %v4658_v43 = vmul.f32 %v4621_v14, %v4621_v14 }
 0xdbe   :  { %v4625_v19 = vrot.slane %v4624_v54, 4  ;;  %v4648_v17 = vadd.f32 %v4647_v25, %v4645_v9 }
 0xdbf   :  { %v4634_v56 = vrot.slane %v4633_v23, 4  ;;  %v4661_v27 = vadd.f32 %v4660_v52, %v4658_v43 }
 0xdc0   :  { %v4626_v22 = vadd.f32 %v4625_v19, %v4624_v54  ;;  %v4649_v20 = vrot.slane %v4648_v17, 4 }
 0xdc1   :  { %v4635_v49 = vadd.f32 %v4634_v56, %v4633_v23  ;;  %v4662_v24 = vrot.slane %v4661_v27, 4 }
 0xdc2   :  { %v4627_v26 = vrot.slane %v4626_v22, 2  ;;  %v4650_v7 = vadd.f32 %v4649_v20, %v4648_v17 }
 0xdc3   :  { %v4636_v35 = vrot.slane %v4635_v49, 2  ;;  %v4663_v34 = vadd.f32 %v4662_v24, %v4661_v27  ;;  %v7815_v24 = vld [vmem:[#allocation69] ss:$8 sps:$4 sm:$0xff]  }
 0xdc4   :  { %v4628_v2 = vadd.f32 %v4627_v26, %v4626_v22  ;;  %v4651_v55 = vrot.slane %v4650_v7, 2 }
 0xdc5   :  { %v4637_v62 = vadd.f32 %v4636_v35, %v4635_v49  ;;  %v4664_v18 = vrot.slane %v4663_v34, 2 }
 0xdc6   :  { %v4629_v59 = vrot.slane %v4628_v2, 1  ;;  %v4652_v63 = vadd.f32 %v4651_v55, %v4650_v7  ;;  %v4728_v55 = vld [vmem:[#allocation3] sm:$0xff] }
 0xdc7   :  { %v4638_v30 = vrot.slane %v4637_v62, 1  ;;  %v4665_v31 = vadd.f32 %v4664_v18, %v4663_v34  ;;  %v4730_v18 = vld [vmem:[#allocation3 + $0x10] sm:$0xff] }
 0xdc8   :  { %v4630_v38 = vadd.f32 %v4629_v59, %v4628_v2  ;;  %v4653_v21 = vrot.slane %v4652_v63, 1  ;;  %v4731_v59 = vld [vmem:[#allocation3 + $0x18] sm:$0xff] }
 0xdc9   :  { %v4639_v39 = vadd.f32 %v4638_v30, %v4637_v62  ;;  %v4666_v51 = vrot.slane %v4665_v31, 1  ;;  %v4729_v62 = vld [vmem:[#allocation3 + $0x8] sm:$0xff] }
 0xdca   :  { %v4654_v36 = vadd.f32 %v4653_v21, %v4652_v63  ;;  %v7818_v63 = vld [vmem:[#allocation76] sm:$0x7f]  }
 0xdcb   :  { %v4640_v13 = vadd.f32 %v4639_v39, %v4630_v38  ;;  %v4667_v47 = vadd.f32 %v4666_v51, %v4665_v31  ;;  %v5321_v30 = vand.u32 %v7818_v63, %v10207_v16  ;;  %v7819_v31 = vld [vmem:[#allocation75] sm:$0xff]   ;;  %v7820_v38 = vld [vmem:[#allocation75 + $0x8] sm:$0xff]   ;;  %v7822_v16 = vld [vmem:[#allocation75 + $0x18] sm:$0xff]  }
 0xdcc   :  { %v7823_v21 = vld [vmem:[#allocation75 + $0x20] sm:$0xff]   ;;  %v7824_v39 = vld [vmem:[#allocation75 + $0x28] sm:$0xff]   ;;  %v7825_v51 = vld [vmem:[#allocation75 + $0x30] sm:$0xff]  }
 0xdcd   :  { %v4641_v12 = vmul.f32 0.015625, %v4640_v13  ;;  %v4668_v60 = vadd.f32 %v4667_v47, %v4654_v36  ;;  %7398 = vmatprep.subr.bf16.mxu0 %v5321_v30  ;;  %v7826_v36 = vld [vmem:[#allocation75 + $0x38] sm:$0xff]   ;;  %v10609_v13 = vld [vmem:[#allocation78] sm:$0xff]  }
 0xdce   :  { %7399 = vmatpush3.bf16.msra.mxu0 %v5321_v30  ;;  %v5103_v47 = vld [vmem:[#allocation70] sm:$0x3] }
 0xdcf   :  { %v4669_v40 = vmul.f32 0.015625, %v4668_v60  ;;  %v4670_v42 = vmul.f32 %v4641_v12, %v4641_v12  ;;  %7416 = vmatprep.subr.bf16.mxu0 %v7819_v31 }
 0xdd1   :  { %v4671_v57 = vsub.f32 %v4669_v40, %v4670_v42  ;;  %7401 = vmatmul.mubr.msk.bf16.vlgmr.msra.gmra.mrb[48].mxu0 %vm2510_vm11, %v10216_v58 }
 0xdd2   :  { %7417 = vmatpush3.bf16.msra.mxu0 %v7819_v31  ;;  %7404 = vmatprep.mubr.msk.bf16.mxu0 %vm2510_vm11, %v10216_v58 }
 0xdd3   :  { %v4672_v50 = vmax.f32 %v4671_v57, 0.0  ;;  %7418 = vmatprep.subr.bf16.mxu0 %v7820_v38  ;;  %v10619_v57 = vrot.slane %v5103_v47, %v10269_v3 }
 0xdd5   :  { %v4674_v11 = vadd.f32 1e-05, %v4672_v50 }
 0xdd6   :  { %7419 = vmatpush3.bf16.msra.mxu0 %v7820_v38 }
 0xdd7   :  { %7834 = vrsqrt.f32 %v4674_v11 }
 0xdd9   :  { %7405 = vmatmul.mubr.msk.bf16.gmra.mrb[52].mxu0 %vm2510_vm11, %v10216_v58 }
 0xdda   :  { %7408 = vmatprep.mubr.msk.bf16.mxu0 %vm2510_vm11, %v10216_v58 }
 0xde1   :  { %v7835_v8 = vpop.eup %7834  ;;  %7409 = vmatmul.mubr.msk.bf16.gmra.mrb[56].mxu0 %vm2510_vm11, %v10216_v58 }
 0xde2   :  { %v4676_v33 = vmul.f32 %v7835_v8, %v4673_v29  ;;  %7412 = vmatprep.mubr.msk.bf16.mxu0 %vm2510_vm11, %v10216_v58 }
 0xde4   :  { %v4678_v53 = vmul.f32 %v4676_v33, %v4641_v12  ;;  %v4684_v61 = vrot.slane %v4676_v33, %v10264_v37  ;;  %v10613_v12 = vrot.slane %v5103_v47, %v10264_v37 }
 0xde6   :  { %v4679_v28 = vsub.f32 %v4677_v45, %v4678_v53  ;;  %v4711_v6 = vmul.f32 %v4684_v61, %v4621_v14  ;;  %v4686_v10 = vmul.f32 %v4684_v61, %v10551_v4  ;;  %v4687_v5 = vmul.f32 %v4684_v61, %v10555_v44 }
 0xde7   :  { %v4688_v25 = vmul.f32 %v4684_v61, %v4618_v41  ;;  %v4689_v54 = vmul.f32 %v4684_v61, %v4620_v48  ;;  %v4708_v9 = vmul.f32 %v4684_v61, %v10553_v0  ;;  %v4709_v52 = vmul.f32 %v4684_v61, %v10557_v15 }
 0xde8   :  { %v4694_v23 = vrot.slane %v4679_v28, %v10264_v37  ;;  %v4710_v43 = vmul.f32 %v4684_v61, %v10571_v46 }
 0xde9   :  { %7413 = vmatmul.mubr.msk.bf16.gmra.mrb[60].mxu0 %vm2510_vm11, %v10216_v58 }
 0xdea   :  { %v4696_v19 = vadd.f32 %v4694_v23, %v4686_v10  ;;  %v4697_v17 = vadd.f32 %v4694_v23, %v4687_v5  ;;  %v4698_v56 = vadd.f32 %v4694_v23, %v4688_v25  ;;  %v4699_v27 = vadd.f32 %v4694_v23, %v4689_v54 }
 0xdeb   :  { %v4712_v22 = vadd.f32 %v4708_v9, %v4694_v23  ;;  %v4713_v14 = vadd.f32 %v4709_v52, %v4694_v23  ;;  %v4714_v20 = vadd.f32 %v4710_v43, %v4694_v23  ;;  %v4715_v4 = vadd.f32 %v4711_v6, %v4694_v23 }
 0xdec   :  { %v4700_v49 = vmax.f32 %v4696_v19, 0.0  ;;  %v4701_v44 = vmax.f32 %v4697_v17, 0.0  ;;  %v4702_v41 = vmax.f32 %v4698_v56, 0.0  ;;  %v4703_v48 = vmax.f32 %v4699_v27, 0.0 }
 0xded   :  { %v4716_v0 = vmax.f32 %v4712_v22, 0.0  ;;  %v4717_v26 = vmax.f32 %v4713_v14, 0.0  ;;  %v4718_v15 = vmax.f32 %v4714_v20, 0.0  ;;  %v4719_v7 = vmax.f32 %v4715_v4, 0.0 }
 0xdee   :  { %v4704_v35 = vpack.c.bf16 %v4701_v44, %v4700_v49  ;;  %v4705_v34 = vpack.c.bf16 %v4703_v48, %v4702_v41 }
 0xdef   :  { %v4720_v46 = vpack.c.bf16 %v4717_v26, %v4716_v0  ;;  %v4721_v2 = vpack.c.bf16 %v4719_v7, %v4718_v15 }
 0xdf0   :  { %4950 = vmatmul.mubr.bf16.vlgmr.msra.gmra.mrb[52].mxu1 %v4704_v35 }
 0xdf1   :  { %5015 = vmatpush1.bf16.msra.mxu1 %v7815_v24  ;;  %4959 = vmatprep.mubr.bf16.mxu1 %v9043_v32 }
 0xdf8   :  { %4960 = vmatmul.mubr.bf16.gmra.mrb[56].mxu1 %v4705_v34 }
 0xdf9   :  { %4969 = vmatprep.mubr.bf16.mxu1 %v9043_v32 }
 0xe00   :  { %4970 = vmatmul.mubr.bf16.gmra.mrb[60].mxu1 %v4720_v46 }
 0xe01   :  { %4979 = vmatprep.mubr.bf16.mxu1 %v9043_v32 }
 0xe08   :  { %4980 = vmatmul.mubr.bf16.gmra.mrb[64].mxu1 %v4721_v2 }
 0xe09   :  { %5046 = vmatprep.mubr.bf16.mxu1 %v9043_v32 }
 0xe10   :  { %7155 = vmatmul.mubr.msk.bf16.vlgmr.msra.gmra.mrb[52].mxu1 %vm1475_vm7, %v4728_v55 }
 0xe11   :  { %5056 = vmatprep.mubr.bf16.mxu1 %v9043_v32 }
 0xe18   :  { %7156 = vmatmul.mubr.msk.bf16.gmra.mrb[56].mxu1 %vm1475_vm7, %v4729_v62 }
 0xe19   :  { %5066 = vmatprep.mubr.bf16.mxu1 %v9043_v32 }
 0xe20   :  { %7157 = vmatmul.mubr.msk.bf16.gmra.mrb[60].mxu1 %vm1475_vm7, %v4730_v18 }
 0xe21   :  { %5076 = vmatprep.mubr.bf16.mxu1 %v9043_v32  ;;  %v7821_v32 = vld [vmem:[#allocation75 + $0x10] sm:$0xff]  }
 0xe22   :  { %7420 = vmatprep.subr.bf16.mxu0 %v7821_v32 }
 0xe23   :  { %7421 = vmatpush3.bf16.msra.mxu0 %v7821_v32 }
 0xe24   :  { %7422 = vmatprep.subr.bf16.mxu0 %v7822_v16 }
 0xe27   :  { %7423 = vmatpush3.bf16.msra.mxu0 %v7822_v16 }
 0xe28   :  { %7158 = vmatmul.mubr.msk.bf16.gmra.mrb[64].mxu1 %vm1475_vm7, %v4731_v59  ;;  %7424 = vmatprep.subr.bf16.mxu0 %v7823_v21 }
 0xe2b   :  { %7425 = vmatpush3.bf16.msra.mxu0 %v7823_v21 }
 0xe2c   :  { %7426 = vmatprep.subr.bf16.mxu0 %v7824_v39 }
 0xe2f   :  { %7427 = vmatpush3.bf16.msra.mxu0 %v7824_v39 }
 0xe30   :  { %7428 = vmatprep.subr.bf16.mxu0 %v7825_v51 }
 0xe33   :  { %7429 = vmatpush3.bf16.msra.mxu0 %v7825_v51 }
 0xe34   :  { %7430 = vmatprep.subr.bf16.mxu0 %v7826_v36 }
 0xe37   :  { %7431 = vmatpush3.bf16.msra.mxu0 %v7826_v36 }
 0xe38   :  { %7448 = vmatprep.subr.bf16.mxu0 %v10609_v13 }
 0xee3   :  { %v5048_v60 = vpop.f32.mrb[52].mxu1 }
 0xee4   :  { %v10616_v40 = vadd.f32 %v10613_v12, %v5048_v60  ;;  %v5050_v42 = vpop.f32.mrb[53].mxu1 }
 0xee5   :  { %v5052_v58 = vpop.f32.mrb[54].mxu1  ;;  %v10634_v3 = vadd.f32 %v10619_v57, %v5050_v42 }
 0xee6   :  { %v10622_v50 = vadd.f32 %v10613_v12, %v5052_v58  ;;  %v5054_v11 = vpop.f32.mrb[55].mxu1  ;;  %v5159_v8 = vmul.f32 %v10616_v40, %v10616_v40 }
 0xee7   :  { %v10625_v29 = vadd.f32 %v10619_v57, %v5054_v11  ;;  %v5180_v5 = vmul.f32 %v10634_v3, %v10634_v3 }
 0xee8   :  { %v5131_v33 = vadd.f32 %v10622_v50, %v10616_v40  ;;  %v5160_v45 = vmul.f32 %v10622_v50, %v10622_v50 }
 0xee9   :  { %v5181_v61 = vmul.f32 %v10625_v29, %v10625_v29  ;;  %v5144_v25 = vadd.f32 %v10625_v29, %v10634_v3 }
 0xeea   :  { %v5167_v53 = vadd.f32 %v5160_v45, %v5159_v8 }
 0xeeb   :  { %v5058_v28 = vpop.f32.mrb[56].mxu1  ;;  %v5188_v17 = vadd.f32 %v5181_v61, %v5180_v5 }
 0xeec   :  { %v10639_v6 = vadd.f32 %v10613_v12, %v5058_v28  ;;  %v5060_v10 = vpop.f32.mrb[57].mxu1 }
 0xeed   :  { %v10646_v54 = vadd.f32 %v10619_v57, %v5060_v10  ;;  %v5062_v9 = vpop.f32.mrb[58].mxu1 }
 0xeee   :  { %v5132_v52 = vadd.f32 %v5131_v33, %v10639_v6  ;;  %v5161_v23 = vmul.f32 %v10639_v6, %v10639_v6  ;;  %v10652_v43 = vadd.f32 %v10613_v12, %v5062_v9  ;;  %v5064_v19 = vpop.f32.mrb[59].mxu1 }
 0xeef   :  { %v5145_v56 = vadd.f32 %v5144_v25, %v10646_v54  ;;  %v5182_v27 = vmul.f32 %v10646_v54, %v10646_v54  ;;  %v10658_v22 = vadd.f32 %v10619_v57, %v5064_v19 }
 0xef0   :  { %v5168_v14 = vadd.f32 %v5167_v53, %v5161_v23  ;;  %v5133_v20 = vadd.f32 %v5132_v52, %v10652_v43  ;;  %v5162_v4 = vmul.f32 %v10652_v43, %v10652_v43 }
 0xef1   :  { %v5189_v49 = vadd.f32 %v5188_v17, %v5182_v27  ;;  %v5146_v44 = vadd.f32 %v5145_v56, %v10658_v22  ;;  %v5183_v41 = vmul.f32 %v10658_v22, %v10658_v22 }
 0xef2   :  { %v5169_v48 = vadd.f32 %v5168_v14, %v5162_v4 }
 0xef3   :  { %v5190_v24 = vadd.f32 %v5189_v49, %v5183_v41  ;;  %v5068_v0 = vpop.f32.mrb[60].mxu1 }
 0xef4   :  { %v10667_v26 = vadd.f32 %v10613_v12, %v5068_v0  ;;  %v5070_v15 = vpop.f32.mrb[61].mxu1 }
 0xef5   :  { %v10670_v7 = vadd.f32 %v10619_v57, %v5070_v15  ;;  %v5072_v35 = vpop.f32.mrb[62].mxu1 }
 0xef6   :  { %v5134_v34 = vadd.f32 %v5133_v20, %v10667_v26  ;;  %v5163_v46 = vmul.f32 %v10667_v26, %v10667_v26  ;;  %v10676_v2 = vadd.f32 %v10613_v12, %v5072_v35  ;;  %v5074_v55 = vpop.f32.mrb[63].mxu1 }
 0xef7   :  { %v5147_v62 = vadd.f32 %v5146_v44, %v10670_v7  ;;  %v5184_v18 = vmul.f32 %v10670_v7, %v10670_v7  ;;  %v10682_v59 = vadd.f32 %v10619_v57, %v5074_v55 }
 0xef8   :  { %v5170_v63 = vadd.f32 %v5169_v48, %v5163_v46  ;;  %v5135_v30 = vadd.f32 %v5134_v34, %v10676_v2  ;;  %v5164_v31 = vmul.f32 %v10676_v2, %v10676_v2 }
 0xef9   :  { %v5191_v38 = vadd.f32 %v5190_v24, %v5184_v18  ;;  %v5148_v32 = vadd.f32 %v5147_v62, %v10682_v59  ;;  %v5185_v16 = vmul.f32 %v10682_v59, %v10682_v59 }
 0xefa   :  { %v5171_v21 = vadd.f32 %v5170_v63, %v5164_v31 }
 0xefb   :  { %v5192_v39 = vadd.f32 %v5191_v38, %v5185_v16  ;;  %v5078_v51 = vpop.f32.mrb[64].mxu1 }
 0xefc   :  { %v10691_v36 = vadd.f32 %v10613_v12, %v5078_v51  ;;  %v5080_v47 = vpop.f32.mrb[65].mxu1 }
 0xefd   :  { %v10694_v60 = vadd.f32 %v10619_v57, %v5080_v47  ;;  %v5082_v42 = vpop.f32.mrb[66].mxu1 }
 0xefe   :  { %v5136_v58 = vadd.f32 %v5135_v30, %v10691_v36  ;;  %v5165_v11 = vmul.f32 %v10691_v36, %v10691_v36  ;;  %v5129_v8 = vadd.f32 %v10613_v12, %v5082_v42  ;;  %v5084_v33 = vpop.f32.mrb[67].mxu1 }
 0xeff   :  { %v5149_v45 = vadd.f32 %v5148_v32, %v10694_v60  ;;  %v5186_v53 = vmul.f32 %v10694_v60, %v10694_v60  ;;  %v5130_v61 = vadd.f32 %v10619_v57, %v5084_v33 }
 0xf00   :  { %v5172_v28 = vadd.f32 %v5171_v21, %v5165_v11  ;;  %v5137_v10 = vadd.f32 %v5136_v58, %v5129_v8  ;;  %v5166_v5 = vmul.f32 %v5129_v8, %v5129_v8  ;;  %v5206_v58 = vld [vmem:[#allocation72] sm:$0x1] }
 0xf01   :  { %v5193_v25 = vadd.f32 %v5192_v39, %v5186_v53  ;;  %v5150_v9 = vadd.f32 %v5149_v45, %v5130_v61  ;;  %v5187_v52 = vmul.f32 %v5130_v61, %v5130_v61  ;;  %v5210_v45 = vld [vmem:[#allocation73] sm:$0x1] }
 0xf02   :  { %v5138_v23 = vrot.slane %v5137_v10, 4  ;;  %v5173_v19 = vadd.f32 %v5172_v28, %v5166_v5 }
 0xf03   :  { %v5151_v17 = vrot.slane %v5150_v9, 4  ;;  %v5194_v56 = vadd.f32 %v5193_v25, %v5187_v52 }
 0xf04   :  { %v5139_v27 = vadd.f32 %v5138_v23, %v5137_v10  ;;  %v5174_v12 = vrot.slane %v5173_v19, 4 }
 0xf05   :  { %v5152_v14 = vadd.f32 %v5151_v17, %v5150_v9  ;;  %v5195_v20 = vrot.slane %v5194_v56, 4 }
 0xf06   :  { %v5140_v4 = vrot.slane %v5139_v27, 2  ;;  %v5175_v49 = vadd.f32 %v5174_v12, %v5173_v19 }
 0xf07   :  { %v5153_v44 = vrot.slane %v5152_v14, 2  ;;  %v5196_v41 = vadd.f32 %v5195_v20, %v5194_v56 }
 0xf08   :  { %v5141_v48 = vadd.f32 %v5140_v4, %v5139_v27  ;;  %v5176_v57 = vrot.slane %v5175_v49, 2 }
 0xf09   :  { %v5154_v24 = vadd.f32 %v5153_v44, %v5152_v14  ;;  %v5197_v0 = vrot.slane %v5196_v41, 2 }
 0xf0a   :  { %v5142_v15 = vrot.slane %v5141_v48, 1  ;;  %v5177_v35 = vadd.f32 %v5176_v57, %v5175_v49 }
 0xf0b   :  { %v5155_v34 = vrot.slane %v5154_v24, 1  ;;  %v5198_v46 = vadd.f32 %v5197_v0, %v5196_v41 }
 0xf0c   :  { %v5143_v55 = vadd.f32 %v5142_v15, %v5141_v48  ;;  %v5178_v62 = vrot.slane %v5177_v35, 1 }
 0xf0d   :  { %v5156_v18 = vadd.f32 %v5155_v34, %v5154_v24  ;;  %v5199_v63 = vrot.slane %v5198_v46, 1 }
 0xf0e   :  { %v5179_v30 = vadd.f32 %v5178_v62, %v5177_v35 }
 0xf0f   :  { %v5157_v31 = vadd.f32 %v5156_v18, %v5143_v55  ;;  %v5200_v38 = vadd.f32 %v5199_v63, %v5198_v46 }
 0xf11   :  { %v5158_v32 = vmul.f32 0.0078125, %v5157_v31  ;;  %v5201_v16 = vadd.f32 %v5200_v38, %v5179_v30 }
 0xf13   :  { %v5202_v21 = vmul.f32 0.0078125, %v5201_v16  ;;  %v5203_v39 = vmul.f32 %v5158_v32, %v5158_v32 }
 0xf15   :  { %v5204_v51 = vsub.f32 %v5202_v21, %v5203_v39 }
 0xf17   :  { %v5205_v47 = vmax.f32 %v5204_v51, 0.0 }
 0xf19   :  { %v5207_v42 = vadd.f32 1e-05, %v5205_v47 }
 0xf1b   :  { %7836 = vrsqrt.f32 %v5207_v42 }
 0xf25   :  { %v7837_v11 = vpop.eup %7836 }
 0xf26   :  { %v5209_v33 = vmul.f32 %v7837_v11, %v5206_v58 }
 0xf28   :  { %v5211_v53 = vmul.f32 %v5209_v33, %v5158_v32  ;;  %v5217_v28 = vrot.slane %v5209_v33, %v10264_v37 }
 0xf2a   :  { %v5212_v10 = vsub.f32 %v5210_v45, %v5211_v53  ;;  %v5264_v5 = vmul.f32 %v5217_v28, %v5130_v61  ;;  %v5219_v25 = vmul.f32 %v5217_v28, %v10616_v40  ;;  %v5220_v9 = vmul.f32 %v5217_v28, %v10622_v50  ;;  %v5565_v45 = vld [vmem:[#allocation2] sm:$0xff]  ;;  %v5568_v53 = vld [vmem:[#allocation2 + $0x18] sm:$0xff] }
 0xf2b   :  { %v5221_v52 = vmul.f32 %v5217_v28, %v10639_v6  ;;  %v5222_v23 = vmul.f32 %v5217_v28, %v10652_v43  ;;  %v5223_v19 = vmul.f32 %v5217_v28, %v10667_v26  ;;  %v5224_v17 = vmul.f32 %v5217_v28, %v10676_v2 }
 0xf2c   :  { %v5231_v56 = vrot.slane %v5212_v10, %v10264_v37  ;;  %v5225_v27 = vmul.f32 %v5217_v28, %v10691_v36  ;;  %v5226_v12 = vmul.f32 %v5217_v28, %v5129_v8  ;;  %v5257_v14 = vmul.f32 %v5217_v28, %v10634_v3  ;;  %v5570_v10 = vld [vmem:[#allocation2 + $0x28] sm:$0xff] }
 0xf2d   :  { %v5258_v61 = vmul.f32 %v5217_v28, %v10625_v29  ;;  %v5259_v40 = vmul.f32 %v5217_v28, %v10646_v54  ;;  %v5260_v50 = vmul.f32 %v5217_v28, %v10658_v22  ;;  %v5261_v6 = vmul.f32 %v5217_v28, %v10670_v7 }
 0xf2e   :  { %v5233_v43 = vadd.f32 %v5231_v56, %v5219_v25  ;;  %v5234_v20 = vadd.f32 %v5231_v56, %v5220_v9  ;;  %v5235_v26 = vadd.f32 %v5231_v56, %v5221_v52  ;;  %v5236_v4 = vadd.f32 %v5231_v56, %v5222_v23  ;;  %v5572_v25 = vld [vmem:[#allocation2 + $0x38] sm:$0xff] }
 0xf2f   :  { %v5237_v2 = vadd.f32 %v5231_v56, %v5223_v19  ;;  %v5238_v49 = vadd.f32 %v5231_v56, %v5224_v17  ;;  %v5239_v37 = vadd.f32 %v5231_v56, %v5225_v27  ;;  %v5240_v44 = vadd.f32 %v5231_v56, %v5226_v12  ;;  %v10729_v9 = vld [vmem:[#allocation79] ss:$0 sm:$0xff] }
 0xf30   :  { %v5241_v36 = vmax.f32 %v5233_v43, 0.0  ;;  %v5242_v8 = vmax.f32 %v5234_v20, 0.0  ;;  %v5243_v41 = vmax.f32 %v5235_v26, 0.0  ;;  %v5244_v3 = vmax.f32 %v5236_v4, 0.0 }
 0xf31   :  { %v5245_v48 = vmax.f32 %v5237_v2, 0.0  ;;  %v5246_v29 = vmax.f32 %v5238_v49, 0.0  ;;  %v5247_v57 = vmax.f32 %v5239_v37, 0.0  ;;  %v5248_v54 = vmax.f32 %v5240_v44, 0.0 }
 0xf32   :  { %v5249_v24 = vpack.c.bf16 %v5242_v8, %v5241_v36  ;;  %v5250_v22 = vpack.c.bf16 %v5244_v3, %v5243_v41  ;;  %v5265_v0 = vadd.f32 %v5257_v14, %v5231_v56  ;;  %v5266_v7 = vadd.f32 %v5258_v61, %v5231_v56 }
 0xf33   :  { %v5251_v15 = vpack.c.bf16 %v5246_v29, %v5245_v48  ;;  %v5252_v35 = vpack.c.bf16 %v5248_v54, %v5247_v57  ;;  %v5267_v34 = vadd.f32 %v5259_v40, %v5231_v56  ;;  %v5268_v46 = vadd.f32 %v5260_v50, %v5231_v56 }
 0xf34   :  { %7432 = vmatprep.mubr.bf16.mxu0 %v5249_v24  ;;  %v5273_v55 = vmax.f32 %v5265_v0, 0.0  ;;  %v5274_v62 = vmax.f32 %v5266_v7, 0.0  ;;  %v5262_v18 = vmul.f32 %v5217_v28, %v10682_v59  ;;  %v5269_v63 = vadd.f32 %v5261_v6, %v5231_v56 }
 0xf35   :  { %7433 = vmatmul.mubr.bf16.vlgmr.msra.gmra.mrb[48].mxu0 %v5250_v22  ;;  %v5275_v30 = vmax.f32 %v5267_v34, 0.0  ;;  %v5276_v31 = vmax.f32 %v5268_v46, 0.0  ;;  %v5263_v38 = vmul.f32 %v5217_v28, %v10694_v60  ;;  %v5272_v32 = vadd.f32 %v5264_v5, %v5231_v56  ;;  %v5567_v60 = vld [vmem:[#allocation2 + $0x10] sm:$0xff]  ;;  %v5569_v28 = vld [vmem:[#allocation2 + $0x20] sm:$0xff] }
 0xf36   :  { %7449 = vmatpush3.bf16.msra.mxu0 %v10609_v13  ;;  %7436 = vmatprep.mubr.bf16.mxu0 %v5251_v15  ;;  %v5281_v16 = vpack.c.bf16 %v5274_v62, %v5273_v55  ;;  %v5270_v21 = vadd.f32 %v5262_v18, %v5231_v56  ;;  %v5277_v39 = vmax.f32 %v5269_v63, 0.0  ;;  %v5566_v13 = vld [vmem:[#allocation2 + $0x8] sm:$0xff]  ;;  %v5571_v5 = vld [vmem:[#allocation2 + $0x30] sm:$0xff]  ;;  %v9045_v43 = vmov 1966171168  }
 0xf37   :  { %v5282_v51 = vpack.c.bf16 %v5276_v31, %v5275_v30  ;;  %v5271_v47 = vadd.f32 %v5263_v38, %v5231_v56  ;;  %v5280_v42 = vmax.f32 %v5272_v32, 0.0  ;;  %v5808_v20 = vunpack.c.l.s4 %v9045_v43 }
 0xf38   :  { %v5278_v58 = vmax.f32 %v5270_v21, 0.0 }
 0xf39   :  { %v5279_v11 = vmax.f32 %v5271_v47, 0.0  ;;  %v5809_v41 = vunpack.c.0.s8 %v5808_v20 }
 0xf3a   :  { %v5283_v33 = vpack.c.bf16 %v5278_v58, %v5277_v39 }
 0xf3b   :  { %v5284_v59 = vpack.c.bf16 %v5280_v42, %v5279_v11  ;;  %v10740_v0 = vsub.s32 %v5809_v41, %v10261_v1 }
 0xf3d   :  { %7437 = vmatmul.mubr.bf16.gmra.mrb[52].mxu0 %v5252_v35 }
 0xf3e   :  { %7440 = vmatprep.mubr.bf16.mxu0 %v5281_v16 }
 0xf45   :  { %7441 = vmatmul.mubr.bf16.gmra.mrb[56].mxu0 %v5282_v51 }
 0xf46   :  { %7444 = vmatprep.mubr.bf16.mxu0 %v5283_v33 }
 0xf4d   :  { %7445 = vmatmul.mubr.bf16.gmra.mrb[60].mxu0 %v5284_v59 }
 0xf4e   :  { %7450 = vmatprep.mubr.msk.bf16.mxu0 %vm1475_vm7, %v5565_v45 }
 0xf55   :  { %7451 = vmatmul.mubr.msk.bf16.vlgmr.msra.gmra.mrb[48].mxu0 %vm1475_vm7, %v5566_v13 }
 0xf56   :  { %7454 = vmatprep.mubr.msk.bf16.mxu0 %vm1475_vm7, %v5567_v60 }
 0xf5d   :  { %7455 = vmatmul.mubr.msk.bf16.gmra.mrb[52].mxu0 %vm1475_vm7, %v5568_v53 }
 0xf5e   :  { %7458 = vmatprep.mubr.msk.bf16.mxu0 %vm1475_vm7, %v5569_v28 }
 0xf65   :  { %7459 = vmatmul.mubr.msk.bf16.gmra.mrb[56].mxu0 %vm1475_vm7, %v5570_v10 }
 0xf66   :  { %7462 = vmatprep.mubr.msk.bf16.mxu0 %vm1475_vm7, %v5571_v5 }
 0xf6d   :  { %7463 = vmatmul.mubr.msk.bf16.gmra.mrb[60].mxu0 %vm1475_vm7, %v5572_v25 }
0x1028   :  { %v7452_v52 = vpop.f32.mrb[48].mxu0 }
0x1029   :  { %v5727_v23 = vadd.f32 %v7452_v52, %v10729_v9  ;;  %v5639_v19 = vpop.f32.mrb[49].mxu0 }
0x102a   :  { %v5725_v17 = vadd.f32 %v10729_v9, %v5639_v19  ;;  %v7453_v56 = vpop.f32.mrb[50].mxu0 }
0x102b   :  { %v5743_v27 = vmul.f32 0.5, %v5727_v23  ;;  %v5728_v12 = vadd.f32 %v7453_v56, %v10729_v9  ;;  %v5642_v14 = vpop.f32.mrb[51].mxu0 }
0x102c   :  { %v5741_v61 = vmul.f32 0.5, %v5725_v17  ;;  %v5726_v40 = vadd.f32 %v10729_v9, %v5642_v14 }
0x102d   :  { %7838 = vtanh.f32 %v5743_v27  ;;  %v5744_v50 = vmul.f32 0.5, %v5728_v12 }
0x102e   :  { %7840 = vtanh.f32 %v5741_v61  ;;  %v5742_v6 = vmul.f32 0.5, %v5726_v40 }
0x102f   :  { %7842 = vtanh.f32 %v5744_v50 }
0x1030   :  { %7844 = vtanh.f32 %v5742_v6  ;;  %v7456_v26 = vpop.f32.mrb[52].mxu0 }
0x1031   :  { %v5731_v4 = vadd.f32 %v7456_v26, %v10729_v9  ;;  %v5655_v2 = vpop.f32.mrb[53].mxu0 }
0x1032   :  { %v5729_v49 = vadd.f32 %v10729_v9, %v5655_v2  ;;  %v7457_v37 = vpop.f32.mrb[54].mxu0 }
0x1033   :  { %v5747_v44 = vmul.f32 0.5, %v5731_v4  ;;  %v5732_v36 = vadd.f32 %v7457_v37, %v10729_v9  ;;  %v5658_v8 = vpop.f32.mrb[55].mxu0 }
0x1034   :  { %v5745_v3 = vmul.f32 0.5, %v5729_v49  ;;  %v5730_v48 = vadd.f32 %v10729_v9, %v5658_v8 }
0x1035   :  { %v5748_v29 = vmul.f32 0.5, %v5732_v36  ;;  %7846 = vtanh.f32 %v5747_v44 }
0x1036   :  { %v5746_v57 = vmul.f32 0.5, %v5730_v48  ;;  %7848 = vtanh.f32 %v5745_v3 }
0x1037   :  { %v7839_v54 = vpop.eup %7838  ;;  %7850 = vtanh.f32 %v5748_v29 }
0x1038   :  { %v7841_v24 = vpop.eup %7840  ;;  %v5775_v22 = vmul.f32 0.5, %v7839_v54  ;;  %v7460_v7 = vpop.f32.mrb[56].mxu0  ;;  %7852 = vtanh.f32 %v5746_v57 }
0x1039   :  { %v7843_v15 = vpop.eup %7842  ;;  %v5773_v35 = vmul.f32 0.5, %v7841_v24  ;;  %v5735_v34 = vadd.f32 %v7460_v7, %v10729_v9  ;;  %v5671_v46 = vpop.f32.mrb[57].mxu0 }
0x103a   :  { %v7845_v55 = vpop.eup %7844  ;;  %v5791_v62 = vadd.f32 0.5, %v5775_v22  ;;  %v5776_v18 = vmul.f32 0.5, %v7843_v15  ;;  %v5733_v63 = vadd.f32 %v10729_v9, %v5671_v46  ;;  %v7461_v30 = vpop.f32.mrb[58].mxu0 }
0x103b   :  { %v5789_v31 = vadd.f32 0.5, %v5773_v35  ;;  %v5774_v38 = vmul.f32 0.5, %v7845_v55  ;;  %v5751_v32 = vmul.f32 0.5, %v5735_v34  ;;  %v10745_v1 = vadd.f32 %v7461_v30, %v10729_v9  ;;  %v10747_v16 = vpop.f32.mrb[59].mxu0 }
0x103c   :  { %v5938_v21 = vcombine.high %v5791_v62, %v5791_v62  ;;  %v5945_v39 = vrot.slane %v5791_v62, %v10740_v0  ;;  %v5792_v51 = vadd.f32 0.5, %v5776_v18  ;;  %v10750_v47 = vmul.f32 0.5, %v5733_v63 }
0x103d   :  { %v5806_v42 = vcombine.high %v5789_v31, %v5789_v31  ;;  %v5813_v58 = vrot.slane %v5789_v31, %v10740_v0  ;;  %v10753_v11 = vadd.f32 0.5, %v5774_v38  ;;  %7854 = vtanh.f32 %v5751_v32 }
0x103e   :  { %v5952_v33 = vrot.slane %v5938_v21, %v10740_v0  ;;  %v5953_v59 = vcombine.high %v5945_v39, %v5945_v39  ;;  %v5961_v45 = vrot.slane %v5945_v39, %v10740_v0  ;;  %7194 = vst.sshfl [vmem:[#allocation81 + $0x4] sm:$0x1 pattern:$0x73625140] %v5945_v39  ;;  %v6004_v13 = vcombine.high %v5792_v51, %v5792_v51 }
0x103f   :  { %v5820_v60 = vrot.slane %v5806_v42, %v10740_v0  ;;  %v5821_v53 = vcombine.high %v5813_v58, %v5813_v58  ;;  %v5829_v28 = vrot.slane %v5813_v58, %v10740_v0  ;;  %7186 = vst.sshfl [vmem:[#allocation81] sm:$0x1 pattern:$0x73625140] %v5813_v58  ;;  %v6011_v10 = vrot.slane %v5792_v51, %v10740_v0  ;;  %v7847_v17 = vpop.eup %7846 }
0x1040   :  { %v5954_v5 = vcombine.high %v5952_v33, %v5952_v33  ;;  %v5968_v25 = vrot.slane %v5952_v33, %v10740_v0  ;;  %v5975_v52 = vrot.slane %v5953_v59, %v10740_v0  ;;  %v5983_v23 = vcombine.high %v5961_v45, %v5961_v45  ;;  %7195 = vst.sshfl [vmem:[#allocation81 + $0x14] sm:$0x1 pattern:$0x73625140] %v5953_v59  ;;  %v10762_v19 = vpop.f32.mrb[60].mxu0  ;;  %v7849_v40 = vpop.eup %7848 }
0x1041   :  { %7196 = vst.sshfl [vmem:[#allocation81 + $0x44] sm:$0x1 pattern:$0x73625140] %v5952_v33  ;;  %v5822_v56 = vcombine.high %v5820_v60, %v5820_v60  ;;  %v5836_v27 = vrot.slane %v5820_v60, %v10740_v0  ;;  %v5843_v12 = vrot.slane %v5821_v53, %v10740_v0  ;;  %v5851_v14 = vcombine.high %v5829_v28, %v5829_v28  ;;  %v10766_v61 = vpop.f32.mrb[61].mxu0  ;;  %v7851_v4 = vpop.eup %7850 }
0x1042   :  { %7187 = vst.sshfl [vmem:[#allocation81 + $0x10] sm:$0x1 pattern:$0x73625140] %v5821_v53  ;;  %v5982_v50 = vrot.slane %v5954_v5, %v10740_v0  ;;  %v5984_v6 = vcombine.high %v5968_v25, %v5968_v25  ;;  %v5985_v43 = vcombine.high %v5975_v52, %v5975_v52  ;;  %5997 = vst [vmem:[#allocation81 + $0x24] sm:$0x1] %v5983_v23  ;;  %v7853_v8 = vpop.eup %7852  ;;  %7856 = vtanh.f32 %v10750_v47 }
0x1043   :  { %7188 = vst.sshfl [vmem:[#allocation81 + $0x40] sm:$0x1 pattern:$0x73625140] %v5820_v60  ;;  %v6018_v20 = vrot.slane %v6004_v13, %v10740_v0  ;;  %v10770_v26 = vpop.f32.mrb[62].mxu0  ;;  %v5850_v2 = vrot.slane %v5822_v56, %v10740_v0  ;;  %v5852_v49 = vcombine.high %v5836_v27, %v5836_v27  ;;  %v5853_v37 = vcombine.high %v5843_v12, %v5843_v12 }
0x1044   :  { %7198 = vst.sshfl [vmem:[#allocation81 + $0xc] sm:$0x1 pattern:$0x73625140] %v6011_v10  ;;  %5865 = vst [vmem:[#allocation81 + $0x20] sm:$0x1] %v5851_v14  ;;  %v6019_v44 = vcombine.high %v6011_v10, %v6011_v10  ;;  %v5986_v41 = vcombine.high %v5982_v50, %v5982_v50  ;;  %v6027_v48 = vrot.slane %v6011_v10, %v10740_v0 }
0x1045   :  { %7197 = vst.sshfl [vmem:[#allocation81 + $0x54] sm:$0x1 pattern:$0x73625140] %v5954_v5  ;;  %v10773_v36 = vpop.f32.mrb[63].mxu0  ;;  %v6020_v3 = vcombine.high %v6018_v20, %v6018_v20  ;;  %v6034_v29 = vrot.slane %v6018_v20, %v10740_v0  ;;  %v5854_v57 = vcombine.high %v5850_v2, %v5850_v2  ;;  %v5872_v24 = vcombine.high %v10753_v11, %v10753_v11 }
0x1046   :  { %7189 = vst.sshfl [vmem:[#allocation81 + $0x50] sm:$0x1 pattern:$0x73625140] %v5822_v56  ;;  %5998 = vst [vmem:[#allocation81 + $0x34] sm:$0x1] %v5985_v43  ;;  %v6041_v54 = vrot.slane %v6019_v44, %v10740_v0  ;;  %v5879_v22 = vrot.slane %v10753_v11, %v10740_v0  ;;  %v6049_v15 = vcombine.high %v6027_v48, %v6027_v48 }
0x1047   :  { %6001 = vst [vmem:[#allocation81 + $0x64] sm:$0x1] %v5984_v6  ;;  %7200 = vst.sshfl [vmem:[#allocation81 + $0x4c] sm:$0x1 pattern:$0x73625140] %v6018_v20  ;;  %v6048_v7 = vrot.slane %v6020_v3, %v10740_v0  ;;  %v6050_v35 = vcombine.high %v6034_v29, %v6034_v29  ;;  %v10783_v46 = vpop.eup %7854  ;;  %v5886_v62 = vrot.slane %v5872_v24, %v10740_v0 }
0x1048   :  { %5866 = vst [vmem:[#allocation81 + $0x30] sm:$0x1] %v5853_v37  ;;  %5869 = vst [vmem:[#allocation81 + $0x60] sm:$0x1] %v5852_v49  ;;  %v5779_v34 = vmul.f32 0.5, %v7847_v17  ;;  %v6051_v55 = vcombine.high %v6041_v54, %v6041_v54  ;;  %v5887_v18 = vcombine.high %v5879_v22, %v5879_v22  ;;  %v5895_v63 = vrot.slane %v5879_v22, %v10740_v0 }
0x1049   :  { %7199 = vst.sshfl [vmem:[#allocation81 + $0x1c] sm:$0x1 pattern:$0x73625140] %v6019_v44  ;;  %6002 = vst [vmem:[#allocation81 + $0x74] sm:$0x1] %v5986_v41  ;;  %v6052_v30 = vcombine.high %v6048_v7, %v6048_v7  ;;  %v5888_v21 = vcombine.high %v5886_v62, %v5886_v62  ;;  %v5902_v39 = vrot.slane %v5886_v62, %v10740_v0 }
0x104a   :  { %7201 = vst.sshfl [vmem:[#allocation81 + $0x5c] sm:$0x1 pattern:$0x73625140] %v6020_v3  ;;  %5870 = vst [vmem:[#allocation81 + $0x70] sm:$0x1] %v5854_v57  ;;  %v5909_v51 = vrot.slane %v5887_v18, %v10740_v0  ;;  %v5917_v42 = vcombine.high %v5895_v63, %v5895_v63  ;;  %v5737_v47 = vadd.f32 %v10729_v9, %v10766_v61 }
0x104b   :  { %7190 = vst.sshfl [vmem:[#allocation81 + $0x8] sm:$0x1 pattern:$0x73625140] %v5879_v22  ;;  %6063 = vst [vmem:[#allocation81 + $0x2c] sm:$0x1] %v6049_v15  ;;  %v5916_v45 = vrot.slane %v5888_v21, %v10740_v0  ;;  %v5918_v13 = vcombine.high %v5902_v39, %v5902_v39 }
0x104c   :  { %6067 = vst [vmem:[#allocation81 + $0x6c] sm:$0x1] %v6050_v35  ;;  %v5795_v31 = vadd.f32 0.5, %v5779_v34  ;;  %v5777_v38 = vmul.f32 0.5, %v7849_v40  ;;  %v5780_v32 = vmul.f32 0.5, %v7851_v4  ;;  %v5919_v60 = vcombine.high %v5909_v51, %v5909_v51 }
0x104d   :  { %6064 = vst [vmem:[#allocation81 + $0x3c] sm:$0x1] %v6051_v55  ;;  %7191 = vst.sshfl [vmem:[#allocation81 + $0x18] sm:$0x1 pattern:$0x73625140] %v5887_v18  ;;  %v5920_v52 = vcombine.high %v5916_v45, %v5916_v45  ;;  %v5734_v51 = vadd.f32 %v10729_v9, %v10747_v16 }
0x104e   :  { %7192 = vst.sshfl [vmem:[#allocation81 + $0x48] sm:$0x1 pattern:$0x73625140] %v5886_v62  ;;  %6068 = vst [vmem:[#allocation81 + $0x7c] sm:$0x1] %v6052_v30  ;;  %v6202_v58 = vcombine.high %v5795_v31, %v5795_v31  ;;  %v6209_v11 = vrot.slane %v5795_v31, %v10740_v0 }
0x104f   :  { %v5793_v33 = vadd.f32 0.5, %v5777_v38  ;;  %v5796_v59 = vadd.f32 0.5, %v5780_v32  ;;  %5931 = vst [vmem:[#allocation81 + $0x28] sm:$0x1] %v5917_v42  ;;  %v5778_v53 = vmul.f32 0.5, %v7853_v8  ;;  %v5783_v30 = vmul.f32 0.5, %v10783_v46 }
0x1050   :  { %7193 = vst.sshfl [vmem:[#allocation81 + $0x58] sm:$0x1 pattern:$0x73625140] %v5888_v21  ;;  %v6216_v28 = vrot.slane %v6202_v58, %v10740_v0  ;;  %v6217_v10 = vcombine.high %v6209_v11, %v6209_v11  ;;  %v6225_v5 = vrot.slane %v6209_v11, %v10740_v0  ;;  %5932 = vst [vmem:[#allocation81 + $0x38] sm:$0x1] %v5919_v60 }
0x1051   :  { %7210 = vst.sshfl [vmem:[#allocation81 + $0x6] sm:$0x1 pattern:$0x73625140] %v6209_v11  ;;  %v6070_v25 = vcombine.high %v5793_v33, %v5793_v33  ;;  %5935 = vst [vmem:[#allocation81 + $0x68] sm:$0x1] %v5918_v13  ;;  %v6077_v23 = vrot.slane %v5793_v33, %v10740_v0  ;;  %v6268_v17 = vcombine.high %v5796_v59, %v5796_v59 }
0x1052   :  { %v6275_v56 = vrot.slane %v5796_v59, %v10740_v0  ;;  %v6218_v27 = vcombine.high %v6216_v28, %v6216_v28  ;;  %v6232_v12 = vrot.slane %v6216_v28, %v10740_v0  ;;  %v6239_v14 = vrot.slane %v6217_v10, %v10740_v0  ;;  %7211 = vst.sshfl [vmem:[#allocation81 + $0x16] sm:$0x1 pattern:$0x73625140] %v6217_v10 }
0x1053   :  { %v6247_v40 = vcombine.high %v6225_v5, %v6225_v5  ;;  %7212 = vst.sshfl [vmem:[#allocation81 + $0x46] sm:$0x1 pattern:$0x73625140] %v6216_v28  ;;  %5936 = vst [vmem:[#allocation81 + $0x78] sm:$0x1] %v5920_v52  ;;  %v6084_v50 = vrot.slane %v6070_v25, %v10740_v0  ;;  %v6085_v6 = vcombine.high %v6077_v23, %v6077_v23 }
0x1054   :  { %v6093_v43 = vrot.slane %v6077_v23, %v10740_v0  ;;  %7202 = vst.sshfl [vmem:[#allocation81 + $0x2] sm:$0x1 pattern:$0x73625140] %v6077_v23  ;;  %v6282_v20 = vrot.slane %v6268_v17, %v10740_v0  ;;  %v6246_v4 = vrot.slane %v6218_v27, %v10740_v0  ;;  %v6248_v2 = vcombine.high %v6232_v12, %v6232_v12 }
0x1055   :  { %7214 = vst.sshfl [vmem:[#allocation81 + $0xe] sm:$0x1 pattern:$0x73625140] %v6275_v56  ;;  %v6249_v49 = vcombine.high %v6239_v14, %v6239_v14  ;;  %6261 = vst [vmem:[#allocation81 + $0x26] sm:$0x1] %v6247_v40  ;;  %v6283_v37 = vcombine.high %v6275_v56, %v6275_v56  ;;  %v6086_v44 = vcombine.high %v6084_v50, %v6084_v50  ;;  %v7857_v40 = vpop.eup %7856 }
0x1056   :  { %7213 = vst.sshfl [vmem:[#allocation81 + $0x56] sm:$0x1 pattern:$0x73625140] %v6218_v27  ;;  %v6100_v8 = vrot.slane %v6084_v50, %v10740_v0  ;;  %v6107_v41 = vrot.slane %v6085_v6, %v10740_v0  ;;  %v6115_v3 = vcombine.high %v6093_v43, %v6093_v43  ;;  %v6250_v48 = vcombine.high %v6246_v4, %v6246_v4 }
0x1057   :  { %7203 = vst.sshfl [vmem:[#allocation81 + $0x12] sm:$0x1 pattern:$0x73625140] %v6085_v6  ;;  %6262 = vst [vmem:[#allocation81 + $0x36] sm:$0x1] %v6249_v49  ;;  %v6284_v29 = vcombine.high %v6282_v20, %v6282_v20  ;;  %v6291_v57 = vrot.slane %v6275_v56, %v10740_v0  ;;  %v6298_v54 = vrot.slane %v6282_v20, %v10740_v0 }
0x1058   :  { %7204 = vst.sshfl [vmem:[#allocation81 + $0x42] sm:$0x1 pattern:$0x73625140] %v6084_v50  ;;  %6265 = vst [vmem:[#allocation81 + $0x66] sm:$0x1] %v6248_v2  ;;  %v6114_v24 = vrot.slane %v6086_v44, %v10740_v0  ;;  %v6116_v22 = vcombine.high %v6100_v8, %v6100_v8  ;;  %v6117_v7 = vcombine.high %v6107_v41, %v6107_v41 }
0x1059   :  { %7216 = vst.sshfl [vmem:[#allocation81 + $0x4e] sm:$0x1 pattern:$0x73625140] %v6282_v20  ;;  %6129 = vst [vmem:[#allocation81 + $0x22] sm:$0x1] %v6115_v3  ;;  %v6305_v15 = vrot.slane %v6283_v37, %v10740_v0  ;;  %v6312_v35 = vrot.slane %v6284_v29, %v10740_v0  ;;  %v6313_v34 = vcombine.high %v6291_v57, %v6291_v57 }
0x105a   :  { %7215 = vst.sshfl [vmem:[#allocation81 + $0x1e] sm:$0x1 pattern:$0x73625140] %v6283_v37  ;;  %6266 = vst [vmem:[#allocation81 + $0x76] sm:$0x1] %v6250_v48  ;;  %v6314_v55 = vcombine.high %v6298_v54, %v6298_v54  ;;  %v6118_v18 = vcombine.high %v6114_v24, %v6114_v24  ;;  %v5739_v42 = vadd.f32 %v10762_v19, %v10729_v9 }
0x105b   :  { %7205 = vst.sshfl [vmem:[#allocation81 + $0x52] sm:$0x1 pattern:$0x73625140] %v6086_v44  ;;  %v5794_v62 = vadd.f32 0.5, %v5778_v53  ;;  %v6315_v63 = vcombine.high %v6305_v15, %v6305_v15  ;;  %v6316_v31 = vcombine.high %v6312_v35, %v6312_v35  ;;  %v5752_v21 = vmul.f32 0.5, %v10745_v1 }
0x105c   :  { %7217 = vst.sshfl [vmem:[#allocation81 + $0x5e] sm:$0x1 pattern:$0x73625140] %v6284_v29  ;;  %6130 = vst [vmem:[#allocation81 + $0x32] sm:$0x1] %v6117_v7  ;;  %v5740_v14 = vadd.f32 %v10770_v26, %v10729_v9  ;;  %v5738_v20 = vadd.f32 %v10729_v9, %v10773_v36 }
0x105d   :  { %6133 = vst [vmem:[#allocation81 + $0x62] sm:$0x1] %v6116_v22  ;;  %6327 = vst [vmem:[#allocation81 + $0x2e] sm:$0x1] %v6313_v34  ;;  %v6136_v38 = vcombine.high %v5794_v62, %v5794_v62  ;;  %v6143_v32 = vrot.slane %v5794_v62, %v10740_v0  ;;  %v5799_v39 = vadd.f32 0.5, %v5783_v30  ;;  %7858 = vtanh.f32 %v5752_v21 }
0x105e   :  { %6331 = vst [vmem:[#allocation81 + $0x6e] sm:$0x1] %v6314_v55  ;;  %6134 = vst [vmem:[#allocation81 + $0x72] sm:$0x1] %v6118_v18  ;;  %v5750_v59 = vmul.f32 0.5, %v5734_v51  ;;  %v5755_v45 = vmul.f32 0.5, %v5739_v42 }
0x105f   :  { %6328 = vst [vmem:[#allocation81 + $0x3e] sm:$0x1] %v6315_v63  ;;  %6332 = vst [vmem:[#allocation81 + $0x7e] sm:$0x1] %v6316_v31  ;;  %v6150_v46 = vrot.slane %v6136_v38, %v10740_v0  ;;  %v6151_v58 = vcombine.high %v6143_v32, %v6143_v32  ;;  %v6159_v11 = vrot.slane %v6143_v32, %v10740_v0  ;;  %v5753_v12 = vmul.f32 0.5, %v5737_v47 }
0x1060   :  { %7206 = vst.sshfl [vmem:[#allocation81 + $0xa] sm:$0x1 pattern:$0x73625140] %v6143_v32  ;;  %v6466_v1 = vcombine.high %v5799_v39, %v5799_v39  ;;  %v6473_v33 = vrot.slane %v5799_v39, %v10740_v0  ;;  %7860 = vtanh.f32 %v5750_v59  ;;  %v5781_v4 = vmul.f32 0.5, %v7857_v40 }
0x1061   :  { %v6152_v16 = vcombine.high %v6150_v46, %v6150_v46  ;;  %v6166_v13 = vrot.slane %v6150_v46, %v10740_v0  ;;  %v6173_v19 = vrot.slane %v6151_v58, %v10740_v0  ;;  %v6181_v60 = vcombine.high %v6159_v11, %v6159_v11  ;;  %7207 = vst.sshfl [vmem:[#allocation81 + $0x1a] sm:$0x1 pattern:$0x73625140] %v6151_v58 }
0x1062   :  { %7208 = vst.sshfl [vmem:[#allocation81 + $0x4a] sm:$0x1 pattern:$0x73625140] %v6150_v46  ;;  %v6480_v61 = vrot.slane %v6466_v1, %v10740_v0  ;;  %v6481_v53 = vcombine.high %v6473_v33, %v6473_v33  ;;  %v6489_v28 = vrot.slane %v6473_v33, %v10740_v0  ;;  %7862 = vtanh.f32 %v5755_v45 }
0x1063   :  { %7226 = vst.sshfl [vmem:[#allocation81 + $0x5] sm:$0x1 pattern:$0x73625140] %v6473_v33  ;;  %v6180_v10 = vrot.slane %v6152_v16, %v10740_v0  ;;  %v6182_v5 = vcombine.high %v6166_v13, %v6166_v13  ;;  %v6183_v25 = vcombine.high %v6173_v19, %v6173_v19  ;;  %6195 = vst [vmem:[#allocation81 + $0x2a] sm:$0x1] %v6181_v60  ;;  %7864 = vtanh.f32 %v5753_v12 }
0x1064   :  { %7209 = vst.sshfl [vmem:[#allocation81 + $0x5a] sm:$0x1 pattern:$0x73625140] %v6152_v16  ;;  %v6482_v52 = vcombine.high %v6480_v61, %v6480_v61  ;;  %v6496_v23 = vrot.slane %v6480_v61, %v10740_v0  ;;  %v6503_v17 = vrot.slane %v6481_v53, %v10740_v0  ;;  %v6511_v56 = vcombine.high %v6489_v28, %v6489_v28 }
0x1065   :  { %7227 = vst.sshfl [vmem:[#allocation81 + $0x15] sm:$0x1 pattern:$0x73625140] %v6481_v53  ;;  %v6184_v27 = vcombine.high %v6180_v10, %v6180_v10  ;;  %6196 = vst [vmem:[#allocation81 + $0x3a] sm:$0x1] %v6183_v25 }
0x1066   :  { %7228 = vst.sshfl [vmem:[#allocation81 + $0x45] sm:$0x1 pattern:$0x73625140] %v6480_v61  ;;  %6199 = vst [vmem:[#allocation81 + $0x6a] sm:$0x1] %v6182_v5  ;;  %v6510_v50 = vrot.slane %v6482_v52, %v10740_v0  ;;  %v6512_v6 = vcombine.high %v6496_v23, %v6496_v23  ;;  %v6513_v43 = vcombine.high %v6503_v17, %v6503_v17 }
0x1067   :  { %6525 = vst [vmem:[#allocation81 + $0x25] sm:$0x1] %v6511_v56  ;;  %7229 = vst.sshfl [vmem:[#allocation81 + $0x55] sm:$0x1 pattern:$0x73625140] %v6482_v52  ;;  %v7859_v37 = vpop.eup %7858 }
0x1068   :  { %6200 = vst [vmem:[#allocation81 + $0x7a] sm:$0x1] %v6184_v27  ;;  %v6514_v2 = vcombine.high %v6510_v50, %v6510_v50  ;;  %6526 = vst [vmem:[#allocation81 + $0x35] sm:$0x1] %v6513_v43  ;;  %v5756_v49 = vmul.f32 0.5, %v5740_v14  ;;  %v5797_v44 = vadd.f32 0.5, %v5781_v4 }
0x1069   :  { %6529 = vst [vmem:[#allocation81 + $0x65] sm:$0x1] %v6512_v6  ;;  %v5784_v26 = vmul.f32 0.5, %v7859_v37  ;;  %v5754_v8 = vmul.f32 0.5, %v5738_v20 }
0x106a   :  { %6530 = vst [vmem:[#allocation81 + $0x75] sm:$0x1] %v6514_v2  ;;  %v6334_v41 = vcombine.high %v5797_v44, %v5797_v44  ;;  %v6341_v3 = vrot.slane %v5797_v44, %v10740_v0  ;;  %v7861_v48 = vpop.eup %7860  ;;  %7866 = vtanh.f32 %v5756_v49 }
0x106b   :  { %v5800_v29 = vadd.f32 0.5, %v5784_v26  ;;  %v5782_v24 = vmul.f32 0.5, %v7861_v48  ;;  %7868 = vtanh.f32 %v5754_v8 }
0x106c   :  { %v7863_v57 = vpop.eup %7862  ;;  %v6348_v9 = vrot.slane %v6334_v41, %v10740_v0  ;;  %v6349_v36 = vcombine.high %v6341_v3, %v6341_v3  ;;  %v6357_v54 = vrot.slane %v6341_v3, %v10740_v0  ;;  %7218 = vst.sshfl [vmem:[#allocation81 + $0x1] sm:$0x1 pattern:$0x73625140] %v6341_v3 }
0x106d   :  { %v6532_v22 = vcombine.high %v5800_v29, %v5800_v29  ;;  %v6539_v7 = vrot.slane %v5800_v29, %v10740_v0  ;;  %v5787_v15 = vmul.f32 0.5, %v7863_v57  ;;  %v5798_v31 = vadd.f32 0.5, %v5782_v24  ;;  %v7865_v58 = vpop.eup %7864 }
0x106e   :  { %v6350_v35 = vcombine.high %v6348_v9, %v6348_v9  ;;  %v6364_v34 = vrot.slane %v6348_v9, %v10740_v0  ;;  %v6371_v55 = vrot.slane %v6349_v36, %v10740_v0  ;;  %v6379_v62 = vcombine.high %v6357_v54, %v6357_v54  ;;  %7219 = vst.sshfl [vmem:[#allocation81 + $0x11] sm:$0x1 pattern:$0x73625140] %v6349_v36 }
0x106f   :  { %7220 = vst.sshfl [vmem:[#allocation81 + $0x41] sm:$0x1 pattern:$0x73625140] %v6348_v9  ;;  %v6546_v18 = vrot.slane %v6532_v22, %v10740_v0  ;;  %v6547_v63 = vcombine.high %v6539_v7, %v6539_v7  ;;  %v6555_v30 = vrot.slane %v6539_v7, %v10740_v0  ;;  %v5803_v39 = vadd.f32 0.5, %v5787_v15 }
0x1070   :  { %7230 = vst.sshfl [vmem:[#allocation81 + $0xd] sm:$0x1 pattern:$0x73625140] %v6539_v7  ;;  %v6378_v38 = vrot.slane %v6350_v35, %v10740_v0  ;;  %v6380_v32 = vcombine.high %v6364_v34, %v6364_v34  ;;  %v6381_v21 = vcombine.high %v6371_v55, %v6371_v55  ;;  %6393 = vst [vmem:[#allocation81 + $0x21] sm:$0x1] %v6379_v62 }
0x1071   :  { %7221 = vst.sshfl [vmem:[#allocation81 + $0x51] sm:$0x1 pattern:$0x73625140] %v6350_v35  ;;  %v6548_v51 = vcombine.high %v6546_v18, %v6546_v18  ;;  %v6562_v42 = vrot.slane %v6546_v18, %v10740_v0  ;;  %v6569_v47 = vrot.slane %v6547_v63, %v10740_v0  ;;  %v6577_v46 = vcombine.high %v6555_v30, %v6555_v30 }
0x1072   :  { %7231 = vst.sshfl [vmem:[#allocation81 + $0x1d] sm:$0x1 pattern:$0x73625140] %v6547_v63  ;;  %v6382_v11 = vcombine.high %v6378_v38, %v6378_v38  ;;  %6394 = vst [vmem:[#allocation81 + $0x31] sm:$0x1] %v6381_v21  ;;  %v6400_v1 = vcombine.high %v5798_v31, %v5798_v31  ;;  %v6407_v33 = vrot.slane %v5798_v31, %v10740_v0 }
0x1073   :  { %7232 = vst.sshfl [vmem:[#allocation81 + $0x4d] sm:$0x1 pattern:$0x73625140] %v6546_v18  ;;  %6397 = vst [vmem:[#allocation81 + $0x61] sm:$0x1] %v6380_v32  ;;  %v6730_v59 = vcombine.high %v5803_v39, %v5803_v39  ;;  %v6576_v45 = vrot.slane %v6548_v51, %v10740_v0  ;;  %v6578_v16 = vcombine.high %v6562_v42, %v6562_v42 }
0x1074   :  { %v6579_v13 = vcombine.high %v6569_v47, %v6569_v47  ;;  %6591 = vst [vmem:[#allocation81 + $0x2d] sm:$0x1] %v6577_v46  ;;  %7233 = vst.sshfl [vmem:[#allocation81 + $0x5d] sm:$0x1 pattern:$0x73625140] %v6548_v51  ;;  %v6737_v19 = vrot.slane %v5803_v39, %v10740_v0  ;;  %v6414_v60 = vrot.slane %v6400_v1, %v10740_v0  ;;  %v7867_v10 = vpop.eup %7866 }
0x1075   :  { %6398 = vst [vmem:[#allocation81 + $0x71] sm:$0x1] %v6382_v11  ;;  %v6415_v61 = vcombine.high %v6407_v33, %v6407_v33  ;;  %v6423_v53 = vrot.slane %v6407_v33, %v10740_v0  ;;  %7222 = vst.sshfl [vmem:[#allocation81 + $0x9] sm:$0x1 pattern:$0x73625140] %v6407_v33  ;;  %v6744_v28 = vrot.slane %v6730_v59, %v10740_v0  ;;  %v7869_v14 = vpop.eup %7868 }
0x1076   :  { %v6580_v5 = vcombine.high %v6576_v45, %v6576_v45  ;;  %6592 = vst [vmem:[#allocation81 + $0x3d] sm:$0x1] %v6579_v13  ;;  %6595 = vst [vmem:[#allocation81 + $0x6d] sm:$0x1] %v6578_v16  ;;  %v6745_v25 = vcombine.high %v6737_v19, %v6737_v19  ;;  %v6753_v52 = vrot.slane %v6737_v19, %v10740_v0  ;;  %v5785_v23 = vmul.f32 0.5, %v7865_v58 }
0x1077   :  { %7242 = vst.sshfl [vmem:[#allocation81 + $0x7] sm:$0x1 pattern:$0x73625140] %v6737_v19  ;;  %v6416_v17 = vcombine.high %v6414_v60, %v6414_v60  ;;  %v6430_v56 = vrot.slane %v6414_v60, %v10740_v0  ;;  %v6437_v27 = vrot.slane %v6415_v61, %v10740_v0  ;;  %v6445_v12 = vcombine.high %v6423_v53, %v6423_v53 }
0x1078   :  { %7223 = vst.sshfl [vmem:[#allocation81 + $0x19] sm:$0x1 pattern:$0x73625140] %v6415_v61  ;;  %6596 = vst [vmem:[#allocation81 + $0x7d] sm:$0x1] %v6580_v5  ;;  %v6746_v40 = vcombine.high %v6744_v28, %v6744_v28  ;;  %v6760_v50 = vrot.slane %v6744_v28, %v10740_v0  ;;  %v6767_v6 = vrot.slane %v6745_v25, %v10740_v0 }
0x1079   :  { %7224 = vst.sshfl [vmem:[#allocation81 + $0x49] sm:$0x1 pattern:$0x73625140] %v6414_v60  ;;  %v6775_v43 = vcombine.high %v6753_v52, %v6753_v52  ;;  %v6444_v20 = vrot.slane %v6416_v17, %v10740_v0  ;;  %v6446_v4 = vcombine.high %v6430_v56, %v6430_v56  ;;  %v6447_v2 = vcombine.high %v6437_v27, %v6437_v27 }
0x107a   :  { %7244 = vst.sshfl [vmem:[#allocation81 + $0x47] sm:$0x1 pattern:$0x73625140] %v6744_v28  ;;  %6459 = vst [vmem:[#allocation81 + $0x29] sm:$0x1] %v6445_v12  ;;  %v6774_v37 = vrot.slane %v6746_v40, %v10740_v0  ;;  %v6776_v44 = vcombine.high %v6760_v50, %v6760_v50  ;;  %v6777_v26 = vcombine.high %v6767_v6, %v6767_v6 }
0x107b   :  { %7243 = vst.sshfl [vmem:[#allocation81 + $0x17] sm:$0x1 pattern:$0x73625140] %v6745_v25  ;;  %v5801_v49 = vadd.f32 0.5, %v5785_v23  ;;  %v5788_v8 = vmul.f32 0.5, %v7867_v10  ;;  %v6448_v41 = vcombine.high %v6444_v20, %v6444_v20 }
0x107c   :  { %7225 = vst.sshfl [vmem:[#allocation81 + $0x59] sm:$0x1 pattern:$0x73625140] %v6416_v17  ;;  %6789 = vst [vmem:[#allocation81 + $0x27] sm:$0x1] %v6775_v43  ;;  %v6778_v57 = vcombine.high %v6774_v37, %v6774_v37 }
0x107d   :  { %7245 = vst.sshfl [vmem:[#allocation81 + $0x57] sm:$0x1 pattern:$0x73625140] %v6746_v40  ;;  %6460 = vst [vmem:[#allocation81 + $0x39] sm:$0x1] %v6447_v2  ;;  %v6598_v3 = vcombine.high %v5801_v49, %v5801_v49  ;;  %v6605_v48 = vrot.slane %v5801_v49, %v10740_v0 }
0x107e   :  { %6463 = vst [vmem:[#allocation81 + $0x69] sm:$0x1] %v6446_v4  ;;  %v5786_v29 = vmul.f32 0.5, %v7869_v14  ;;  %6790 = vst [vmem:[#allocation81 + $0x37] sm:$0x1] %v6777_v26  ;;  %v5804_v9 = vadd.f32 0.5, %v5788_v8 }
0x107f   :  { %6793 = vst [vmem:[#allocation81 + $0x67] sm:$0x1] %v6776_v44  ;;  %6464 = vst [vmem:[#allocation81 + $0x79] sm:$0x1] %v6448_v41  ;;  %v6612_v36 = vrot.slane %v6598_v3, %v10740_v0  ;;  %v6613_v54 = vcombine.high %v6605_v48, %v6605_v48  ;;  %v6621_v24 = vrot.slane %v6605_v48, %v10740_v0 }
0x1080   :  { %7234 = vst.sshfl [vmem:[#allocation81 + $0x3] sm:$0x1 pattern:$0x73625140] %v6605_v48  ;;  %v5802_v22 = vadd.f32 0.5, %v5786_v29  ;;  %v6796_v7 = vcombine.high %v5804_v9, %v5804_v9  ;;  %v6803_v15 = vrot.slane %v5804_v9, %v10740_v0 }
0x1081   :  { %6794 = vst [vmem:[#allocation81 + $0x77] sm:$0x1] %v6778_v57  ;;  %v6614_v35 = vcombine.high %v6612_v36, %v6612_v36  ;;  %v6628_v34 = vrot.slane %v6612_v36, %v10740_v0  ;;  %v6635_v55 = vrot.slane %v6613_v54, %v10740_v0  ;;  %v6643_v62 = vcombine.high %v6621_v24, %v6621_v24 }
0x1082   :  { %7235 = vst.sshfl [vmem:[#allocation81 + $0x13] sm:$0x1 pattern:$0x73625140] %v6613_v54  ;;  %v6810_v18 = vrot.slane %v6796_v7, %v10740_v0  ;;  %v6811_v63 = vcombine.high %v6803_v15, %v6803_v15  ;;  %v6819_v30 = vrot.slane %v6803_v15, %v10740_v0  ;;  %v6664_v31 = vcombine.high %v5802_v22, %v5802_v22 }
0x1083   :  { %7236 = vst.sshfl [vmem:[#allocation81 + $0x43] sm:$0x1 pattern:$0x73625140] %v6612_v36  ;;  %v6642_v38 = vrot.slane %v6614_v35, %v10740_v0  ;;  %v6644_v32 = vcombine.high %v6628_v34, %v6628_v34  ;;  %v6645_v21 = vcombine.high %v6635_v55, %v6635_v55  ;;  %6657 = vst [vmem:[#allocation81 + $0x23] sm:$0x1] %v6643_v62 }
0x1084   :  { %7246 = vst.sshfl [vmem:[#allocation81 + $0xf] sm:$0x1 pattern:$0x73625140] %v6803_v15  ;;  %v6671_v39 = vrot.slane %v5802_v22, %v10740_v0  ;;  %v6812_v51 = vcombine.high %v6810_v18, %v6810_v18  ;;  %v6826_v42 = vrot.slane %v6810_v18, %v10740_v0  ;;  %v6833_v47 = vrot.slane %v6811_v63, %v10740_v0 }
0x1085   :  { %7237 = vst.sshfl [vmem:[#allocation81 + $0x53] sm:$0x1 pattern:$0x73625140] %v6614_v35  ;;  %v6841_v46 = vcombine.high %v6819_v30, %v6819_v30  ;;  %v6646_v58 = vcombine.high %v6642_v38, %v6642_v38  ;;  %6658 = vst [vmem:[#allocation81 + $0x33] sm:$0x1] %v6645_v21  ;;  %v6678_v11 = vrot.slane %v6664_v31, %v10740_v0 }
0x1086   :  { %7247 = vst.sshfl [vmem:[#allocation81 + $0x1f] sm:$0x1 pattern:$0x73625140] %v6811_v63  ;;  %6661 = vst [vmem:[#allocation81 + $0x63] sm:$0x1] %v6644_v32  ;;  %v6679_v1 = vcombine.high %v6671_v39, %v6671_v39  ;;  %v6687_v33 = vrot.slane %v6671_v39, %v10740_v0  ;;  %v6840_v59 = vrot.slane %v6812_v51, %v10740_v0 }
0x1087   :  { %7248 = vst.sshfl [vmem:[#allocation81 + $0x4f] sm:$0x1 pattern:$0x73625140] %v6810_v18  ;;  %v6842_v45 = vcombine.high %v6826_v42, %v6826_v42  ;;  %v6843_v16 = vcombine.high %v6833_v47, %v6833_v47  ;;  %6855 = vst [vmem:[#allocation81 + $0x2f] sm:$0x1] %v6841_v46  ;;  %v6680_v13 = vcombine.high %v6678_v11, %v6678_v11 }
0x1088   :  { %7238 = vst.sshfl [vmem:[#allocation81 + $0xb] sm:$0x1 pattern:$0x73625140] %v6671_v39  ;;  %6662 = vst [vmem:[#allocation81 + $0x73] sm:$0x1] %v6646_v58  ;;  %v6694_v19 = vrot.slane %v6678_v11, %v10740_v0  ;;  %v6701_v60 = vrot.slane %v6679_v1, %v10740_v0  ;;  %v6709_v61 = vcombine.high %v6687_v33, %v6687_v33 }
0x1089   :  { %7249 = vst.sshfl [vmem:[#allocation81 + $0x5f] sm:$0x1 pattern:$0x73625140] %v6812_v51  ;;  %v6844_v53 = vcombine.high %v6840_v59, %v6840_v59  ;;  %6856 = vst [vmem:[#allocation81 + $0x3f] sm:$0x1] %v6843_v16  ;;  %v6708_v28 = vrot.slane %v6680_v13, %v10740_v0 }
0x108a   :  { %7239 = vst.sshfl [vmem:[#allocation81 + $0x1b] sm:$0x1 pattern:$0x73625140] %v6679_v1  ;;  %6859 = vst [vmem:[#allocation81 + $0x6f] sm:$0x1] %v6842_v45  ;;  %v6710_v10 = vcombine.high %v6694_v19, %v6694_v19  ;;  %v6711_v5 = vcombine.high %v6701_v60, %v6701_v60 }
0x108b   :  { %7240 = vst.sshfl [vmem:[#allocation81 + $0x4b] sm:$0x1 pattern:$0x73625140] %v6678_v11  ;;  %6723 = vst [vmem:[#allocation81 + $0x2b] sm:$0x1] %v6709_v61  ;;  %v6712_v25 = vcombine.high %v6708_v28, %v6708_v28 }
0x108c   :  { %7241 = vst.sshfl [vmem:[#allocation81 + $0x5b] sm:$0x1 pattern:$0x73625140] %v6680_v13  ;;  %6860 = vst [vmem:[#allocation81 + $0x7f] sm:$0x1] %v6844_v53 }
0x108d   :  { %6724 = vst [vmem:[#allocation81 + $0x3b] sm:$0x1] %v6711_v5  ;;  %6727 = vst [vmem:[#allocation81 + $0x6b] sm:$0x1] %v6710_v10 }
0x108e   :  { %6728 = vst [vmem:[#allocation81 + $0x7b] sm:$0x1] %v6712_v25 }
0x108f   :  { %8871 = shalt.err (!%p8868_p0)
}
0x1090   :  { %s8872_s9 = scalar_lea.hbm %s9310_s19, 2048 }
0x1091   :  { %p8873_p1 = scmp.ne.s32.totalorder %s9310_s19, %s8872_s9  ;;  %p8876_p2 = scmp.lt.u32.totalorder %s8872_s9, %s9310_s19 }
0x1093   :  { %p8878_p3 = pnand %p8876_p2, %p8873_p1 }
0x1095   :  { %8881 = shalt.err (!%p8878_p3)
}
0x1096   :  { %6872 = dma.vmem_to_hbm [thread:$0]  %s6867_s3, 2048, %s9310_s19, [#allocation15], %s8999_s6, %s8999_s6, %s9000_s21  }
0x1097   :  { %8932 = dma.done.wait [#allocation15], 2048  }
0x1098   :  { %8933 = vsyncadd [#allocation15], 4294965248 }
0x1099   :  { %6876 = vsyncpa [#allocation14], 1 }
0x109a   :  { %6877 = vsyncpa [#allocation17], 1 }
0x109b   :  { %6878 = vsyncpa [#allocation20], 1 }
0x109c   :  { %6879 = vsyncpa [#allocation23], 1 }
0x109d   :  { %6880 = vsyncpa [#allocation26], 1 }
0x109e   :  { %6881 = vsyncpa [#allocation29], 1 }
0x109f   :  { %6882 = vsyncpa [#allocation32], 1 }
0x10a0   :  { %6883 = vsyncpa [#allocation35], 1 }
0x10a1   :  { %6884 = vsyncpa [#allocation38], 1 }
0x10a2   :  { %6885 = vsyncpa [#allocation41], 1 }
0x10a3   :  { %6886 = vsyncpa [#allocation44], 1 }
0x10a4   :  { %6887 = vsyncpa [#allocation47], 1 }
0x10a5   :  { %6888 = vsyncpa [#allocation50], 1 }
0x10a6   :  { %6889 = vsyncpa [#allocation53], 1 }
0x10a7   :  { %6890 = vsyncpa [#allocation56], 1 }
0x10a8   :  { %6891 = vsyncpa [#allocation59], 1 }
0x10a9   :  { %6892 = vsyncpa [#allocation62], 1 }
0x10aa   :  { %6893 = vsyncpa [#allocation65], 1 }
0x10ab   :  { %6894 = vsyncpa [#allocation68], 1 }
0x10ac   :  { %6895 = vsyncpa [#allocation71], 1 }
0x10ad   :  { %6896 = vsyncpa [#allocation74], 1 }
0x10ae   :  { %6897 = vsyncpa [#allocation77], 1 }
0x10af   :  { %6898 = vsyncpa [#allocation80], 1 }
0x10b0   :  { %6899 = vsyncpa [#allocation15], 1 }
0x10b1   :  { %6900 = vsyncmov [#allocation12] }
0x10b4   :  { %s6901_s19 = vpop.sfrf %6900 }
0x10b5   :  { %p7250_p4 = scmp.ne.s32.totalorder %s6901_s19, 0 }
0x10b7   :  { %6905 = shalt.err (%p7250_p4)  }
0x10b8   :  { %6907 = vsyncmov [#allocation12 + $0x1] }
0x10bb   :  { %s6908_s6 = vpop.sfrf %6907 }
0x10bc   :  { %p7251_p5 = scmp.ne.s32.totalorder %s6908_s6, 0 }
0x10be   :  { %6912 = shalt.err (%p7251_p5)  }

</bundles_post_ra>
